<compile_context>
chip_gen: v5e
topology: v5e:2x2
jax: 0.10.0
libtpu: 0.0.40
codegen_flags: <defaults>
</compile_context>

<pallas_src>
import jax
import jax.numpy as jnp
from jax import lax
from jax.experimental import pallas as pl
from jax.experimental.pallas import tpu as pltpu

F32 = jnp.float32
BF16 = jnp.bfloat16

# ---------------- config ----------------
IMG = 16                         # pre-resized image size (real: 224)
PATCH = 4                        # patch size (real: 14)
NPATCH = (IMG // PATCH) ** 2     # 16 patches
PATCH_DIM = 3 * PATCH * PATCH    # 48
VIT_SEQ = NPATCH + 1             # 17 = CLS + patches
SEQ_PAD = 24                     # ViT sequence padded to a multiple of 8 sublanes
H_V = 32                         # vision hidden (real: 1408)
NH_V = 4
DH_V = H_V // NH_V               # 8
FF_V = 64
NL_V = 2                         # ViT depth (real: 39)

NQ = 32                          # learned query tokens (real: 32)
H = 32                           # Q-Former hidden (real: 768)
NH_Q = 4
DH_Q = H // NH_Q                 # 8
FF = 64
NL_Q = 2                         # Q-Former layers (real: 12)
CROSS_FREQ = 2                   # cross-attention every CROSS_FREQ layers (real: 2)
EMB = 256                        # vision_proj output dim -> lane-dense store
LN_EPS = 1e-12

VEC_W = 64                       # packed per-layer vector row width = max(H, FF)
R_V = 7 + 3 * NH_V               # ViT packed rows   (19)
R_Q = 10 + 6 * NH_Q              # QFormer packed rows (34)
TOTAL_STEPS = NL_V + NL_Q        # one grid step per layer

CLIP_MEAN = jnp.array([0.48145466, 0.4578275, 0.40821073], dtype=F32)
CLIP_STD = jnp.array([0.26862954, 0.26130258, 0.27577711], dtype=F32)


# ---------------- in-kernel helpers ----------------
def _ln(x, g, b, eps=LN_EPS):
    """Single-pass LayerNorm: one pass for mean and mean-of-squares (fewer XLU reductions)."""
    mu = jnp.mean(x, axis=-1, keepdims=True)
    ms = jnp.mean(x * x, axis=-1, keepdims=True)
    var = jnp.maximum(ms - mu * mu, 0.0)          # clamp: padded rows must never go NaN
    return (x - mu) * lax.rsqrt(var + eps) * g + b


def _mha(xq, xkv, wq_ref, q_off, wk_ref, k_off, wv_ref, v_off, wo_ref, vec_ref, brow,
         nh, dh, key_mask=None):
    """Multi-head attention with per-head weight layout (head = leading axis of the weight
    refs).  The head split never lane-slices activations; heads are merged by accumulating
    ctx_h @ Wo_h, so there is no stack/concatenate (only plain 2-D MXU matmuls)."""
    scale = dh ** -0.5
    out = None
    for h in range(nh):
        r = brow + 3 * h
        q = jnp.dot(xq, wq_ref[q_off + h].astype(F32),
                    preferred_element_type=F32) + vec_ref[r:r + 1, 0:dh]
        k = jnp.dot(xkv, wk_ref[k_off + h].astype(F32),
                    preferred_element_type=F32) + vec_ref[r + 1:r + 2, 0:dh]
        v = jnp.dot(xkv, wv_ref[v_off + h].astype(F32),
                    preferred_element_type=F32) + vec_ref[r + 2:r + 3, 0:dh]
        s = jnp.einsum('qd,kd->qk', q, k, preferred_element_type=F32) * scale
        if key_mask is not None:
            s = jnp.where(key_mask, s, -1e30)     # mask padded key columns
        s = s - jnp.max(s, axis=-1, keepdims=True)
        p = jnp.exp(s)
        p = p * pl.reciprocal(jnp.sum(p, axis=-1, keepdims=True), approx=True)  # EUP slot
        ctx = jnp.dot(p, v, preferred_element_type=F32)
        oh = jnp.dot(ctx, wo_ref[h].astype(F32), preferred_element_type=F32)
        out = oh if out is None else out + oh
    return out


# ---------------- the Pallas kernel (one grid step per layer) ----------------
def blip2_kernel(patches_ref, patch_w_ref, embed_ref,
                 vwqkv_ref, vwo_ref, vw1_ref, vw2_ref, vvec_ref,
                 qtok_ref,
                 swqkv_ref, swo_ref, cwq_ref, cwkv_ref, cwo_ref, qw1_ref, qw2_ref, qvec_ref,
                 projw_ref, misc_ref,
                 o_ref,
                 x_sc, img_sc, y_sc):
    step = pl.program_id(0)
    # validity mask along the (padded) ViT key axis
    key_mask = lax.broadcasted_iota(jnp.int32, (1, SEQ_PAD), 1) < VIT_SEQ

    # ---- step 0: patch embed (CLS / pos / patch bias folded into embed_ref on the host) ----
    @pl.when(step == 0)
    def _():
        x_sc[...] = jnp.dot(patches_ref[...], patch_w_ref[...].astype(F32),
                            preferred_element_type=F32) + embed_ref[...]

    # ---- ViT encoder layer (steps 0 .. NL_V-1); layer weights selected by BlockSpec ----
    @pl.when(step < NL_V)
    def _():
        x = x_sc[...]
        h = _ln(x, vvec_ref[0:1, 0:H_V], vvec_ref[1:2, 0:H_V])
        attn = _mha(h, h, vwqkv_ref, 0, vwqkv_ref, NH_V, vwqkv_ref, 2 * NH_V,
                    vwo_ref, vvec_ref, 7, NH_V, DH_V, key_mask)
        x = x + attn + vvec_ref[2:3, 0:H_V]
        h2 = _ln(x, vvec_ref[3:4, 0:H_V], vvec_ref[4:5, 0:H_V])
        # TODO(synk): real EVA-ViT / BERT use exact erf GELU; tanh approximation kept for a
        # safe Mosaic lowering (reference below uses the identical approximation).
        ff = jax.nn.gelu(jnp.dot(h2, vw1_ref[...].astype(F32), preferred_element_type=F32)
                         + vvec_ref[5:6, 0:FF_V], approximate=True)
        x = x + jnp.dot(ff, vw2_ref[...].astype(F32),
                        preferred_element_type=F32) + vvec_ref[6:7, 0:H_V]
        x_sc[...] = x

    # ---- transition (once): ln_vision + Q-Former embedding LayerNorm of the query tokens ----
    @pl.when(step == NL_V)
    def _():
        img_sc[...] = _ln(x_sc[...], misc_ref[0:1, 0:H_V], misc_ref[1:2, 0:H_V])
        y_sc[...] = _ln(qtok_ref[...], misc_ref[2:3, 0:H], misc_ref[3:4, 0:H])

    # ---- Q-Former BERT layer (steps NL_V .. NL_V+NL_Q-1) ----
    @pl.when(step >= NL_V)
    def _():
        lyr = step - NL_V
        y = y_sc[...]
        attn = _mha(y, y, swqkv_ref, 0, swqkv_ref, NH_Q, swqkv_ref, 2 * NH_Q,
                    swo_ref, qvec_ref, 10, NH_Q, DH_Q)
        y = _ln(attn + qvec_ref[2:3, 0:H] + y, qvec_ref[0:1, 0:H], qvec_ref[1:2, 0:H])
        y_sc[...] = y

        # cross-attention to the image embeddings every CROSS_FREQ layers.
        # image_atts are all ones => only padded image rows need masking.
        @pl.when(lyr % CROSS_FREQ == 0)
        def _():
            yc = y_sc[...]
            cattn = _mha(yc, img_sc[...], cwq_ref, 0, cwkv_ref, 0, cwkv_ref, NH_Q,
                         cwo_ref, qvec_ref, 10 + 3 * NH_Q, NH_Q, DH_Q, key_mask)
            y_sc[...] = _ln(cattn + qvec_ref[5:6, 0:H] + yc,
                            qvec_ref[3:4, 0:H], qvec_ref[4:5, 0:H])

        y2 = y_sc[...]
        ff = jax.nn.gelu(jnp.dot(y2, qw1_ref[...].astype(F32), preferred_element_type=F32)
                         + qvec_ref[8:9, 0:FF], approximate=True)
        y_sc[...] = _ln(jnp.dot(ff, qw2_ref[...].astype(F32), preferred_element_type=F32)
                        + qvec_ref[9:10, 0:H] + y2,
                        qvec_ref[6:7, 0:H], qvec_ref[7:8, 0:H])

    # ---- final step: vision_proj + exact L2 normalize (F.normalize(dim=-1)) ----
    @pl.when(step == TOTAL_STEPS - 1)
    def _():
        z = jnp.dot(y_sc[...], projw_ref[...].astype(F32),
                    preferred_element_type=F32) + misc_ref[4:5, :]
        sumsq = jnp.sum(z * z, axis=-1, keepdims=True)
        # exact rsqrt (EUP); eps applied to the sum of squares (== clamp of the norm at 1e-12)
        o_ref[...] = z * lax.rsqrt(jnp.maximum(sumsq, 1e-24))


# ---------------- host-side packing / specs ----------------
def _extract_patches(img):
    # (3, IMG, IMG) -> (NPATCH, 3*PATCH*PATCH), channel-major within each patch (layout glue)
    c, hh, ww = img.shape
    gh, gw = hh // PATCH, ww // PATCH
    x = img.reshape(c, gh, PATCH, gw, PATCH)
    return x.transpose(1, 3, 0, 2, 4).reshape(gh * gw, c * PATCH * PATCH)


def _row(v, width=VEC_W):
    out = jnp.zeros((width,), F32)
    return out.at[:v.shape[0]].set(v.astype(F32))


def _heads_out(w, nh, dh):
    # (L, Din, nh*dh) -> (L, nh, Din, dh): head becomes a leading axis of the weight
    L, din, _ = w.shape
    return w.reshape(L, din, nh, dh).transpose(0, 2, 1, 3)


def _heads_in(w, nh, dh):
    # (L, nh*dh, Dout) -> (L, nh, dh, Dout)
    L, _, dout = w.shape
    return w.reshape(L, nh, dh, dout)


def _const_spec(a):
    nd = a.ndim
    return pl.BlockSpec(a.shape, lambda i: (0,) * nd)


def _layer_spec(a, first_step, n_layers):
    # one layer per grid step; clamped so other phases keep their block resident (no re-DMA)
    blk = (None,) + a.shape[1:]
    nd = a.ndim

    def idx(i):
        l = jnp.clip(i - first_step, 0, n_layers - 1)
        return (l,) + (0,) * (nd - 1)

    return pl.BlockSpec(blk, idx)


def _pack_inputs(img, p):
    """Repack natural (PyTorch-like) parameters into the kernel's per-head / packed layout."""
    bf = lambda a: a.astype(BF16)

    patches = _extract_patches(img)
    patches_pad = jnp.zeros((SEQ_PAD, PATCH_DIM), F32).at[1:VIT_SEQ].set(patches)
    # fold cls / pos / patch bias into one additive table (row 0 of patches_pad is zero)
    embed_add = jnp.zeros((SEQ_PAD, H_V), F32)
    embed_add = embed_add.at[0].set(p['cls'] + p['pos'][0])
    embed_add = embed_add.at[1:VIT_SEQ].set(p['patch_b'][None, :] + p['pos'][1:])

    patch_w = bf(p['patch_w'])
    vit_wqkv = bf(jnp.concatenate([_heads_out(p['vit_wq'], NH_V, DH_V),
                                   _heads_out(p['vit_wk'], NH_V, DH_V),
                                   _heads_out(p['vit_wv'], NH_V, DH_V)], axis=1))
    vit_wo = bf(_heads_in(p['vit_wo'], NH_V, DH_V))
    vit_w1, vit_w2 = bf(p['vit_w1']), bf(p['vit_w2'])

    def vit_vec_layer(l):
        rows = [_row(p['vit_ln1_g'][l]), _row(p['vit_ln1_b'][l]), _row(p['vit_bo'][l]),
                _row(p['vit_ln2_g'][l]), _row(p['vit_ln2_b'][l]),
                _row(p['vit_b1'][l]), _row(p['vit_b2'][l])]
        for hd in range(NH_V):
            sl = slice(hd * DH_V, (hd + 1) * DH_V)
            rows += [_row(p['vit_bq'][l][sl]), _row(p['vit_bk'][l][sl]), _row(p['vit_bv'][l][sl])]
        return jnp.stack(rows, axis=0)

    vit_vec = jnp.stack([vit_vec_layer(l) for l in range(NL_V)], axis=0)
    assert vit_vec.shape == (NL_V, R_V, VEC_W)

    qtok = p['query_tokens'].astype(F32)
    qf_swqkv = bf(jnp.concatenate([_heads_out(p['qf_s_wq'], NH_Q, DH_Q),
                                   _heads_out(p['qf_s_wk'], NH_Q, DH_Q),
                                   _heads_out(p['qf_s_wv'], NH_Q, DH_Q)], axis=1))
    qf_swo = bf(_heads_in(p['qf_s_wo'], NH_Q, DH_Q))
    qf_cwq = bf(_heads_out(p['qf_c_wq'], NH_Q, DH_Q))
    qf_cwkv = bf(jnp.concatenate([_heads_out(p['qf_c_wk'], NH_Q, DH_Q),
                                  _heads_out(p['qf_c_wv'], NH_Q, DH_Q)], axis=1))
    qf_cwo = bf(_heads_in(p['qf_c_wo'], NH_Q, DH_Q))
    qf_w1, qf_w2 = bf(p['qf_w1']), bf(p['qf_w2'])

    def qf_vec_layer(l):
        rows = [_row(p['qf_ln1_g'][l]), _row(p['qf_ln1_b'][l]), _row(p['qf_s_bo'][l]),
                _row(p['qf_lnc_g'][l]), _row(p['qf_lnc_b'][l]), _row(p['qf_c_bo'][l]),
                _row(p['qf_ln2_g'][l]), _row(p['qf_ln2_b'][l]),
                _row(p['qf_b1'][l]), _row(p['qf_b2'][l])]
        for hd in range(NH_Q):
            sl = slice(hd * DH_Q, (hd + 1) * DH_Q)
            rows += [_row(p['qf_s_bq'][l][sl]), _row(p['qf_s_bk'][l][sl]), _row(p['qf_s_bv'][l][sl])]
        for hd in range(NH_Q):
            sl = slice(hd * DH_Q, (hd + 1) * DH_Q)
            rows += [_row(p['qf_c_bq'][l][sl]), _row(p['qf_c_bk'][l][sl]), _row(p['qf_c_bv'][l][sl])]
        return jnp.stack(rows, axis=0)

    qf_vec = jnp.stack([qf_vec_layer(l) for l in range(NL_Q)], axis=0)
    assert qf_vec.shape == (NL_Q, R_Q, VEC_W)

    proj_w = bf(p['proj_w'])
    misc = jnp.stack([_row(p['lnv_g'], EMB), _row(p['lnv_b'], EMB),
                      _row(p['qln_g'], EMB), _row(p['qln_b'], EMB),
                      _row(p['proj_b'], EMB)], axis=0)

    pairs = [
        (patches_pad, _const_spec(patches_pad)),
        (patch_w, _const_spec(patch_w)),
        (embed_add, _const_spec(embed_add)),
        (vit_wqkv, _layer_spec(vit_wqkv, 0, NL_V)),
        (vit_wo, _layer_spec(vit_wo, 0, NL_V)),
        (vit_w1, _layer_spec(vit_w1, 0, NL_V)),
        (vit_w2, _layer_spec(vit_w2, 0, NL_V)),
        (vit_vec, _layer_spec(vit_vec, 0, NL_V)),
        (qtok, _const_spec(qtok)),
        (qf_swqkv, _layer_spec(qf_swqkv, NL_V, NL_Q)),
        (qf_swo, _layer_spec(qf_swo, NL_V, NL_Q)),
        (qf_cwq, _layer_spec(qf_cwq, NL_V, NL_Q)),
        (qf_cwkv, _layer_spec(qf_cwkv, NL_V, NL_Q)),
        (qf_cwo, _layer_spec(qf_cwo, NL_V, NL_Q)),
        (qf_w1, _layer_spec(qf_w1, NL_V, NL_Q)),
        (qf_w2, _layer_spec(qf_w2, NL_V, NL_Q)),
        (qf_vec, _layer_spec(qf_vec, NL_V, NL_Q)),
        (proj_w, _const_spec(proj_w)),
        (misc, _const_spec(misc)),
    ]
    return [a for a, _ in pairs], [s for _, s in pairs]


def blip2_image_encoder_forward(image, params):
    # image: (3, IMG, IMG) float in [0, 1]  (single image, like the PyTorch forward)
    assert image.ndim == 3
    # TODO(synk): Blip2ImageProcessor's bicubic resize has no clean Pallas equivalent; the
    # input is assumed already (3, IMG, IMG). Normalize / patch extraction / param repacking
    # below are host-side layout glue.
    img = (image.astype(F32) - CLIP_MEAN[:, None, None]) / CLIP_STD[:, None, None]
    inputs, specs = _pack_inputs(img, params)
    out = pl.pallas_call(
        blip2_kernel,
        grid=(TOTAL_STEPS,),                       # one grid step per layer (ViT then Q-Former)
        in_specs=specs,
        out_specs=pl.BlockSpec((NQ, EMB), lambda i: (0, 0)),
        out_shape=jax.ShapeDtypeStruct((NQ, EMB), F32),
        scratch_shapes=[pltpu.VMEM((SEQ_PAD, H_V), F32),   # ViT activations (persist)
                        pltpu.VMEM((SEQ_PAD, H_V), F32),   # ln_vision image embeddings
                        pltpu.VMEM((NQ, H), F32)],         # Q-Former query activations
        # layer steps carry state sequentially; at real BLIP-2 scale also raise
        # vmem_limit_bytes (v6e) and tile the FFN weights along N/K (v7x, 64 MiB VMEM).
        compiler_params=pltpu.CompilerParams(dimension_semantics=("arbitrary",)),
    )(*inputs)
    return out[None]                                # (1, NQ, EMB)


# ---------------- parameter init (deterministic, synthetic, natural layout) ----------------
def init_params(key):
    ks = iter(jax.random.split(key, 256))

    def w(shape, scale=0.02):
        # weight matrices are stored at bf16 precision (the kernel DMAs them as bf16),
        # rounded here so the f32 reference sees the exact same values.
        v = scale * jax.random.normal(next(ks), shape, dtype=F32)
        return v.astype(BF16).astype(F32)

    def vec(shape, scale=0.02):
        return (scale * jax.random.normal(next(ks), shape, dtype=F32)).astype(F32)

    def gain(shape):
        return (1.0 + 0.02 * jax.random.normal(next(ks), shape, dtype=F32)).astype(F32)

    p = {
        'patch_w': w((PATCH_DIM, H_V)), 'patch_b': vec((H_V,)),
        'cls': vec((H_V,)), 'pos': vec((VIT_SEQ, H_V)),
        'vit_ln1_g': gain((NL_V, H_V)), 'vit_ln1_b': vec((NL_V, H_V)),
        'vit_wq': w((NL_V, H_V, H_V)), 'vit_bq': vec((NL_V, H_V)),
        'vit_wk': w((NL_V, H_V, H_V)), 'vit_bk': vec((NL_V, H_V)),
        'vit_wv': w((NL_V, H_V, H_V)), 'vit_bv': vec((NL_V, H_V)),
        'vit_wo': w((NL_V, H_V, H_V)), 'vit_bo': vec((NL_V, H_V)),
        'vit_ln2_g': gain((NL_V, H_V)), 'vit_ln2_b': vec((NL_V, H_V)),
        'vit_w1': w((NL_V, H_V, FF_V)), 'vit_b1': vec((NL_V, FF_V)),
        'vit_w2': w((NL_V, FF_V, H_V)), 'vit_b2': vec((NL_V, H_V)),
        'lnv_g': gain((H_V,)), 'lnv_b': vec((H_V,)),
        'query_tokens': vec((NQ, H)),
        'qln_g': gain((H,)), 'qln_b': vec((H,)),
        'qf_s_wq': w((NL_Q, H, H)), 'qf_s_bq': vec((NL_Q, H)),
        'qf_s_wk': w((NL_Q, H, H)), 'qf_s_bk': vec((NL_Q, H)),
        'qf_s_wv': w((NL_Q, H, H)), 'qf_s_bv': vec((NL_Q, H)),
        'qf_s_wo': w((NL_Q, H, H)), 'qf_s_bo': vec((NL_Q, H)),
        'qf_ln1_g': gain((NL_Q, H)), 'qf_ln1_b': vec((NL_Q, H)),
        'qf_c_wq': w((NL_Q, H, H)), 'qf_c_bq': vec((NL_Q, H)),
        'qf_c_wk': w((NL_Q, H_V, H)), 'qf_c_bk': vec((NL_Q, H)),
        'qf_c_wv': w((NL_Q, H_V, H)), 'qf_c_bv': vec((NL_Q, H)),
        'qf_c_wo': w((NL_Q, H, H)), 'qf_c_bo': vec((NL_Q, H)),
        'qf_lnc_g': gain((NL_Q, H)), 'qf_lnc_b': vec((NL_Q, H)),
        'qf_w1': w((NL_Q, H, FF)), 'qf_b1': vec((NL_Q, FF)),
        'qf_w2': w((NL_Q, FF, H)), 'qf_b2': vec((NL_Q, H)),
        'qf_ln2_g': gain((NL_Q, H)), 'qf_ln2_b': vec((NL_Q, H)),
        'proj_w': w((H, EMB)), 'proj_b': vec((EMB,)),
    }
    return p


# ---------------- pure-JAX reference (independent formulation, unpadded) ----------------
def _ref_ln(x, g, b, eps=LN_EPS):
    mu = jnp.mean(x, axis=-1, keepdims=True)
    var = jnp.mean((x - mu) ** 2, axis=-1, keepdims=True)
    return (x - mu) / jnp.sqrt(var + eps) * g + b


def _ref_mha(xq, xkv, wq, bq, wk, bk, wv, bv, wo, bo, nh, dh):
    sq, sk = xq.shape[0], xkv.shape[0]
    q = (xq @ wq + bq).reshape(sq, nh, dh)
    k = (xkv @ wk + bk).reshape(sk, nh, dh)
    v = (xkv @ wv + bv).reshape(sk, nh, dh)
    s = jnp.einsum('qhd,khd->hqk', q, k) / (dh ** 0.5)
    a = jax.nn.softmax(s, axis=-1)
    ctx = jnp.einsum('hqk,khd->qhd', a, v).reshape(sq, nh * dh)
    return ctx @ wo + bo


def ref_forward(image, p):
    img = (image.astype(F32) - CLIP_MEAN[:, None, None]) / CLIP_STD[:, None, None]
    patches = _extract_patches(img)
    tok = patches @ p['patch_w'] + p['patch_b'][None, :]
    x = jnp.concatenate([p['cls'][None, :], tok], axis=0) + p['pos']
    for l in range(NL_V):
        h = _ref_ln(x, p['vit_ln1_g'][l], p['vit_ln1_b'][l])
        x = x + _ref_mha(h, h, p['vit_wq'][l], p['vit_bq'][l], p['vit_wk'][l], p['vit_bk'][l],
                         p['vit_wv'][l], p['vit_bv'][l], p['vit_wo'][l], p['vit_bo'][l],
                         NH_V, DH_V)
        h = _ref_ln(x, p['vit_ln2_g'][l], p['vit_ln2_b'][l])
        x = x + jax.nn.gelu(h @ p['vit_w1'][l] + p['vit_b1'][l],
                            approximate=True) @ p['vit_w2'][l] + p['vit_b2'][l]
    img_emb = _ref_ln(x, p['lnv_g'], p['lnv_b'])

    y = _ref_ln(p['query_tokens'], p['qln_g'], p['qln_b'])
    for l in range(NL_Q):
        a = _ref_mha(y, y, p['qf_s_wq'][l], p['qf_s_bq'][l], p['qf_s_wk'][l], p['qf_s_bk'][l],
                     p['qf_s_wv'][l], p['qf_s_bv'][l], p['qf_s_wo'][l], p['qf_s_bo'][l],
                     NH_Q, DH_Q)
        y = _ref_ln(a + y, p['qf_ln1_g'][l], p['qf_ln1_b'][l])
        if l % CROSS_FREQ == 0:
            c = _ref_mha(y, img_emb, p['qf_c_wq'][l], p['qf_c_bq'][l], p['qf_c_wk'][l],
                         p['qf_c_bk'][l], p['qf_c_wv'][l], p['qf_c_bv'][l],
                         p['qf_c_wo'][l], p['qf_c_bo'][l], NH_Q, DH_Q)
            y = _ref_ln(c + y, p['qf_lnc_g'][l], p['qf_lnc_b'][l])
        ff = jax.nn.gelu(y @ p['qf_w1'][l] + p['qf_b1'][l], approximate=True)
        y = _ref_ln(ff @ p['qf_w2'][l] + p['qf_b2'][l] + y, p['qf_ln2_g'][l], p['qf_ln2_b'][l])

    z = y @ p['proj_w'] + p['proj_b']
    n = jnp.sqrt(jnp.sum(z * z, axis=-1, keepdims=True))
    return (z / jnp.maximum(n, 1e-12))[None]


# ---------------- main ----------------
if __name__ == "__main__":
    key = jax.random.PRNGKey(0)
    k_param, k_img = jax.random.split(key)
    params = init_params(k_param)
    image = jax.random.uniform(k_img, (3, IMG, IMG), dtype=F32)  # single image, like torch forward

    out = jax.block_until_ready(blip2_image_encoder_forward(image, params))
    ref = jax.block_until_ready(ref_forward(image, params))

    assert out.shape == (1, NQ, EMB)
    max_err = float(jnp.max(jnp.abs(out - ref)))
    assert jnp.allclose(out, ref, atol=2e-3, rtol=2e-3), max_err
    # F.normalize semantics: every query embedding is unit-norm (exact rsqrt now)
    assert jnp.allclose(jnp.linalg.norm(out, axis=-1), 1.0, atol=1e-3)
    print("KERNEL_OK")
</pallas_src>

<mosaic_0001>
module attributes {stable_mosaic.version = 11 : i64} {
  func.func @blip2_kernel(%arg0: i32, %arg1: memref<24x48xf32, #tpu.memory_space<vmem>>, %arg2: memref<48x32xbf16, #tpu.memory_space<vmem>>, %arg3: memref<24x32xf32, #tpu.memory_space<vmem>>, %arg4: memref<1x12x32x8xbf16, #tpu.memory_space<vmem>>, %arg5: memref<1x4x8x32xbf16, #tpu.memory_space<vmem>>, %arg6: memref<1x32x64xbf16, #tpu.memory_space<vmem>>, %arg7: memref<1x64x32xbf16, #tpu.memory_space<vmem>>, %arg8: memref<1x19x64xf32, #tpu.memory_space<vmem>>, %arg9: memref<32x32xf32, #tpu.memory_space<vmem>>, %arg10: memref<1x12x32x8xbf16, #tpu.memory_space<vmem>>, %arg11: memref<1x4x8x32xbf16, #tpu.memory_space<vmem>>, %arg12: memref<1x4x32x8xbf16, #tpu.memory_space<vmem>>, %arg13: memref<1x8x32x8xbf16, #tpu.memory_space<vmem>>, %arg14: memref<1x4x8x32xbf16, #tpu.memory_space<vmem>>, %arg15: memref<1x32x64xbf16, #tpu.memory_space<vmem>>, %arg16: memref<1x64x32xbf16, #tpu.memory_space<vmem>>, %arg17: memref<1x34x64xf32, #tpu.memory_space<vmem>>, %arg18: memref<32x256xbf16, #tpu.memory_space<vmem>>, %arg19: memref<5x256xf32, #tpu.memory_space<vmem>>, %arg20: memref<32x256xf32, #tpu.memory_space<vmem>>, %arg21: memref<24x32xf32, #tpu.memory_space<vmem>>, %arg22: memref<24x32xf32, #tpu.memory_space<vmem>>, %arg23: memref<32x32xf32, #tpu.memory_space<vmem>>) attributes {dimension_semantics = [#tpu.dimension_semantics<arbitrary>], iteration_bounds = array<i64: 4>, scalar_prefetch = 0 : i64, scratch_operands = 3 : i64, tpu.core_type = #tpu.core_type<tc>, window_params = [{pipeline_mode = #tpu.pipeline_mode<synchronous>, transform_indices = @transform_0, window_bounds = array<i64: 24, 48>}, {pipeline_mode = #tpu.pipeline_mode<synchronous>, transform_indices = @transform_1, window_bounds = array<i64: 48, 32>}, {pipeline_mode = #tpu.pipeline_mode<synchronous>, transform_indices = @transform_2, window_bounds = array<i64: 24, 32>}, {transform_indices = @transform_3, window_bounds = array<i64: 1, 12, 32, 8>}, {transform_indices = @transform_4, window_bounds = array<i64: 1, 4, 8, 32>}, {transform_indices = @transform_5, window_bounds = array<i64: 1, 32, 64>}, {transform_indices = @transform_6, window_bounds = array<i64: 1, 64, 32>}, {transform_indices = @transform_7, window_bounds = array<i64: 1, 19, 64>}, {pipeline_mode = #tpu.pipeline_mode<synchronous>, transform_indices = @transform_8, window_bounds = array<i64: 32, 32>}, {transform_indices = @transform_9, window_bounds = array<i64: 1, 12, 32, 8>}, {transform_indices = @transform_10, window_bounds = array<i64: 1, 4, 8, 32>}, {transform_indices = @transform_11, window_bounds = array<i64: 1, 4, 32, 8>}, {transform_indices = @transform_12, window_bounds = array<i64: 1, 8, 32, 8>}, {transform_indices = @transform_13, window_bounds = array<i64: 1, 4, 8, 32>}, {transform_indices = @transform_14, window_bounds = array<i64: 1, 32, 64>}, {transform_indices = @transform_15, window_bounds = array<i64: 1, 64, 32>}, {transform_indices = @transform_16, window_bounds = array<i64: 1, 34, 64>}, {pipeline_mode = #tpu.pipeline_mode<synchronous>, transform_indices = @transform_17, window_bounds = array<i64: 32, 256>}, {pipeline_mode = #tpu.pipeline_mode<synchronous>, transform_indices = @transform_18, window_bounds = array<i64: 5, 256>}, {pipeline_mode = #tpu.pipeline_mode<synchronous>, transform_indices = @transform_19, window_bounds = array<i64: 32, 256>}]} {
    %0 = tpu.iota {dimensions = array<i32: 1>} : vector<1x24xi32>
    %c17_i32 = arith.constant 17 : i32
    %1 = vector.broadcast %c17_i32 : i32 to vector<1x24xi32>
    %2 = arith.cmpi slt, %0, %1 : vector<1x24xi32>
    %c0_i32 = arith.constant 0 : i32
    %3 = arith.cmpi eq, %arg0, %c0_i32 : i32
    %4 = arith.extui %3 : i1 to i32
    %c0_i32_0 = arith.constant 0 : i32
    %5 = arith.cmpi ne, %4, %c0_i32_0 : i32
    scf.if %5 {
      %c0 = arith.constant 0 : index
      %c0_7 = arith.constant 0 : index
      %18 = vector.load %arg1[%c0, %c0_7] : memref<24x48xf32, #tpu.memory_space<vmem>>, vector<24x48xf32>
      %c0_8 = arith.constant 0 : index
      %c0_9 = arith.constant 0 : index
      %19 = vector.load %arg2[%c0_8, %c0_9] : memref<48x32xbf16, #tpu.memory_space<vmem>>, vector<48x32xbf16>
      %20 = arith.extf %19 : vector<48x32xbf16> to vector<48x32xf32>
      %cst = arith.constant dense<0.000000e+00> : vector<24x32xf32>
      %21 = tpu.matmul %18, %20, %cst {dimension_numbers = #tpu.dot_dimension_numbers<[1], [0], [0], [1], [0, 0, 1, 1], [], []>} : vector<24x48xf32>, vector<48x32xf32>, vector<24x32xf32> -> vector<24x32xf32>
      %c0_10 = arith.constant 0 : index
      %c0_11 = arith.constant 0 : index
      %22 = vector.load %arg3[%c0_10, %c0_11] : memref<24x32xf32, #tpu.memory_space<vmem>>, vector<24x32xf32>
      %23 = arith.addf %21, %22 : vector<24x32xf32>
      %c0_12 = arith.constant 0 : index
      %c0_13 = arith.constant 0 : index
      %24 = vector.load %arg21[%c0_12, %c0_13] : memref<24x32xf32, #tpu.memory_space<vmem>>, vector<24x32xf32>
      tpu.vector_store %arg21[%c0_12, %c0_13], %23 {strides = array<i32>} : memref<24x32xf32, #tpu.memory_space<vmem>>, vector<24x32xf32>,
    } else {
    }
    %c2_i32 = arith.constant 2 : i32
    %6 = arith.cmpi slt, %arg0, %c2_i32 : i32
    %7 = arith.extui %6 : i1 to i32
    %c0_i32_1 = arith.constant 0 : i32
    %8 = arith.cmpi ne, %7, %c0_i32_1 : i32
    scf.if %8 {
      %c0 = arith.constant 0 : index
      %c0_7 = arith.constant 0 : index
      %18 = vector.load %arg21[%c0, %c0_7] : memref<24x32xf32, #tpu.memory_space<vmem>>, vector<24x32xf32>
      %c0_8 = arith.constant 0 : index
      %c0_9 = arith.constant 0 : index
      %c0_10 = arith.constant 0 : index
      %19 = vector.load %arg8[%c0_8, %c0_9, %c0_10] : memref<1x19x64xf32, #tpu.memory_space<vmem>>, vector<1x1x32xf32>
      %20 = vector.shape_cast %19 : vector<1x1x32xf32> to vector<1x32xf32>
      %c0_11 = arith.constant 0 : index
      %c1 = arith.constant 1 : index
      %c0_12 = arith.constant 0 : index
      %21 = vector.load %arg8[%c0_11, %c1, %c0_12] : memref<1x19x64xf32, #tpu.memory_space<vmem>>, vector<1x1x32xf32>
      %22 = vector.shape_cast %21 : vector<1x1x32xf32> to vector<1x32xf32>
      %cst = arith.constant dense<0.000000e+00> : vector<24xf32>
      %23 = vector.multi_reduction <add>, %18, %cst [1] : vector<24x32xf32> to vector<24xf32>
      %24 = vector.shape_cast %23 : vector<24xf32> to vector<24x1xf32>
      %cst_13 = arith.constant 3.200000e+01 : f32
      %25 = vector.broadcast %cst_13 : f32 to vector<24x1xf32>
      %26 = arith.divf %24, %25 : vector<24x1xf32>
      %27 = arith.mulf %18, %18 : vector<24x32xf32>
      %cst_14 = arith.constant dense<0.000000e+00> : vector<24xf32>
      %28 = vector.multi_reduction <add>, %27, %cst_14 [1] : vector<24x32xf32> to vector<24xf32>
      %29 = vector.shape_cast %28 : vector<24xf32> to vector<24x1xf32>
      %cst_15 = arith.constant 3.200000e+01 : f32
      %30 = vector.broadcast %cst_15 : f32 to vector<24x1xf32>
      %31 = arith.divf %29, %30 : vector<24x1xf32>
      %32 = arith.mulf %26, %26 : vector<24x1xf32>
      %33 = arith.subf %31, %32 : vector<24x1xf32>
      %cst_16 = arith.constant 0.000000e+00 : f32
      %34 = vector.broadcast %cst_16 : f32 to vector<24x1xf32>
      %35 = arith.maximumf %33, %34 : vector<24x1xf32>
      %36 = vector.broadcast %26 : vector<24x1xf32> to vector<24x32xf32>
      %37 = arith.subf %18, %36 : vector<24x32xf32>
      %cst_17 = arith.constant 9.99999996E-13 : f32
      %38 = vector.broadcast %cst_17 : f32 to vector<24x1xf32>
      %39 = arith.addf %35, %38 : vector<24x1xf32>
      %40 = math.rsqrt %39 : vector<24x1xf32>
      %41 = vector.broadcast %40 : vector<24x1xf32> to vector<24x32xf32>
      %42 = arith.mulf %37, %41 : vector<24x32xf32>
      %43 = vector.broadcast %20 : vector<1x32xf32> to vector<24x32xf32>
      %44 = arith.mulf %42, %43 : vector<24x32xf32>
      %45 = vector.broadcast %22 : vector<1x32xf32> to vector<24x32xf32>
      %46 = arith.addf %44, %45 : vector<24x32xf32>
      %c0_18 = arith.constant 0 : index
      %c0_19 = arith.constant 0 : index
      %c0_20 = arith.constant 0 : index
      %c0_21 = arith.constant 0 : index
      %47 = vector.load %arg4[%c0_18, %c0_19, %c0_20, %c0_21] : memref<1x12x32x8xbf16, #tpu.memory_space<vmem>>, vector<1x1x32x8xbf16>
      %48 = vector.shape_cast %47 : vector<1x1x32x8xbf16> to vector<32x8xbf16>
      %49 = arith.extf %48 : vector<32x8xbf16> to vector<32x8xf32>
      %cst_22 = arith.constant dense<0.000000e+00> : vector<24x8xf32>
      %50 = tpu.matmul %46, %49, %cst_22 {dimension_numbers = #tpu.dot_dimension_numbers<[1], [0], [0], [1], [0, 0, 1, 1], [], []>} : vector<24x32xf32>, vector<32x8xf32>, vector<24x8xf32> -> vector<24x8xf32>
      %c0_23 = arith.constant 0 : index
      %c7 = arith.constant 7 : index
      %c0_24 = arith.constant 0 : index
      %51 = vector.load %arg8[%c0_23, %c7, %c0_24] : memref<1x19x64xf32, #tpu.memory_space<vmem>>, vector<1x1x8xf32>
      %52 = vector.shape_cast %51 : vector<1x1x8xf32> to vector<1x8xf32>
      %53 = vector.broadcast %52 : vector<1x8xf32> to vector<24x8xf32>
      %54 = arith.addf %50, %53 : vector<24x8xf32>
      %c0_25 = arith.constant 0 : index
      %c4 = arith.constant 4 : index
      %c0_26 = arith.constant 0 : index
      %c0_27 = arith.constant 0 : index
      %55 = vector.load %arg4[%c0_25, %c4, %c0_26, %c0_27] : memref<1x12x32x8xbf16, #tpu.memory_space<vmem>>, vector<1x1x32x8xbf16>
      %56 = vector.shape_cast %55 : vector<1x1x32x8xbf16> to vector<32x8xbf16>
      %57 = arith.extf %56 : vector<32x8xbf16> to vector<32x8xf32>
      %cst_28 = arith.constant dense<0.000000e+00> : vector<24x8xf32>
      %58 = tpu.matmul %46, %57, %cst_28 {dimension_numbers = #tpu.dot_dimension_numbers<[1], [0], [0], [1], [0, 0, 1, 1], [], []>} : vector<24x32xf32>, vector<32x8xf32>, vector<24x8xf32> -> vector<24x8xf32>
      %c0_29 = arith.constant 0 : index
      %c8 = arith.constant 8 : index
      %c0_30 = arith.constant 0 : index
      %59 = vector.load %arg8[%c0_29, %c8, %c0_30] : memref<1x19x64xf32, #tpu.memory_space<vmem>>, vector<1x1x8xf32>
      %60 = vector.shape_cast %59 : vector<1x1x8xf32> to vector<1x8xf32>
      %61 = vector.broadcast %60 : vector<1x8xf32> to vector<24x8xf32>
      %62 = arith.addf %58, %61 : vector<24x8xf32>
      %c0_31 = arith.constant 0 : index
      %c8_32 = arith.constant 8 : index
      %c0_33 = arith.constant 0 : index
      %c0_34 = arith.constant 0 : index
      %63 = vector.load %arg4[%c0_31, %c8_32, %c0_33, %c0_34] : memref<1x12x32x8xbf16, #tpu.memory_space<vmem>>, vector<1x1x32x8xbf16>
      %64 = vector.shape_cast %63 : vector<1x1x32x8xbf16> to vector<32x8xbf16>
      %65 = arith.extf %64 : vector<32x8xbf16> to vector<32x8xf32>
      %cst_35 = arith.constant dense<0.000000e+00> : vector<24x8xf32>
      %66 = tpu.matmul %46, %65, %cst_35 {dimension_numbers = #tpu.dot_dimension_numbers<[1], [0], [0], [1], [0, 0, 1, 1], [], []>} : vector<24x32xf32>, vector<32x8xf32>, vector<24x8xf32> -> vector<24x8xf32>
      %c0_36 = arith.constant 0 : index
      %c9 = arith.constant 9 : index
      %c0_37 = arith.constant 0 : index
      %67 = vector.load %arg8[%c0_36, %c9, %c0_37] : memref<1x19x64xf32, #tpu.memory_space<vmem>>, vector<1x1x8xf32>
      %68 = vector.shape_cast %67 : vector<1x1x8xf32> to vector<1x8xf32>
      %69 = vector.broadcast %68 : vector<1x8xf32> to vector<24x8xf32>
      %70 = arith.addf %66, %69 : vector<24x8xf32>
      "tpu.trace_start"() <{level = 10 : i32, message = "qd,kd->qk"}> : () -> ()
      %cst_38 = arith.constant dense<0.000000e+00> : vector<24x24xf32>
      %71 = tpu.matmul %54, %62, %cst_38 {dimension_numbers = #tpu.dot_dimension_numbers<[1], [1], [0], [0], [0, 0, 1, 0], [], []>} : vector<24x8xf32>, vector<24x8xf32>, vector<24x24xf32> -> vector<24x24xf32>
      "tpu.trace_stop"() : () -> ()
      %cst_39 = arith.constant 0.353553385 : f32
      %72 = vector.broadcast %cst_39 : f32 to vector<24x24xf32>
      %73 = arith.mulf %71, %72 : vector<24x24xf32>
      %cst_40 = arith.constant -1.000000e+30 : f32
      %74 = vector.shape_cast %2 : vector<1x24xi1> to vector<1x24xi1>
      %75 = vector.broadcast %74 : vector<1x24xi1> to vector<24x24xi1>
      %76 = vector.broadcast %cst_40 : f32 to vector<24x24xf32>
      %77 = arith.select %75, %73, %76 : vector<24x24xi1>, vector<24x24xf32>
      %cst_41 = arith.constant dense<0xFF800000> : vector<24xf32>
      %78 = vector.multi_reduction <maximumf>, %77, %cst_41 [1] : vector<24x24xf32> to vector<24xf32>
      %79 = vector.shape_cast %78 : vector<24xf32> to vector<24x1xf32>
      %80 = vector.broadcast %79 : vector<24x1xf32> to vector<24x24xf32>
      %81 = arith.subf %77, %80 : vector<24x24xf32>
      %82 = math.exp %81 : vector<24x24xf32>
      %cst_42 = arith.constant dense<0.000000e+00> : vector<24xf32>
      %83 = vector.multi_reduction <add>, %82, %cst_42 [1] : vector<24x24xf32> to vector<24xf32>
      %84 = vector.shape_cast %83 : vector<24xf32> to vector<24x1xf32>
      %85 = tpu.reciprocal %84 {approx = true} : vector<24x1xf32> -> vector<24x1xf32>
      %86 = vector.broadcast %85 : vector<24x1xf32> to vector<24x24xf32>
      %87 = arith.mulf %82, %86 : vector<24x24xf32>
      %cst_43 = arith.constant dense<0.000000e+00> : vector<24x8xf32>
      %88 = tpu.matmul %87, %70, %cst_43 {dimension_numbers = #tpu.dot_dimension_numbers<[1], [0], [0], [1], [0, 0, 1, 1], [], []>} : vector<24x24xf32>, vector<24x8xf32>, vector<24x8xf32> -> vector<24x8xf32>
      %c0_44 = arith.constant 0 : index
      %c0_45 = arith.constant 0 : index
      %c0_46 = arith.constant 0 : index
      %c0_47 = arith.constant 0 : index
      %89 = vector.load %arg5[%c0_44, %c0_45, %c0_46, %c0_47] : memref<1x4x8x32xbf16, #tpu.memory_space<vmem>>, vector<1x1x8x32xbf16>
      %90 = vector.shape_cast %89 : vector<1x1x8x32xbf16> to vector<8x32xbf16>
      %91 = arith.extf %90 : vector<8x32xbf16> to vector<8x32xf32>
      %cst_48 = arith.constant dense<0.000000e+00> : vector<24x32xf32>
      %92 = tpu.matmul %88, %91, %cst_48 {dimension_numbers = #tpu.dot_dimension_numbers<[1], [0], [0], [1], [0, 0, 1, 1], [], []>} : vector<24x8xf32>, vector<8x32xf32>, vector<24x32xf32> -> vector<24x32xf32>
      %c0_49 = arith.constant 0 : index
      %c1_50 = arith.constant 1 : index
      %c0_51 = arith.constant 0 : index
      %c0_52 = arith.constant 0 : index
      %93 = vector.load %arg4[%c0_49, %c1_50, %c0_51, %c0_52] : memref<1x12x32x8xbf16, #tpu.memory_space<vmem>>, vector<1x1x32x8xbf16>
      %94 = vector.shape_cast %93 : vector<1x1x32x8xbf16> to vector<32x8xbf16>
      %95 = arith.extf %94 : vector<32x8xbf16> to vector<32x8xf32>
      %cst_53 = arith.constant dense<0.000000e+00> : vector<24x8xf32>
      %96 = tpu.matmul %46, %95, %cst_53 {dimension_numbers = #tpu.dot_dimension_numbers<[1], [0], [0], [1], [0, 0, 1, 1], [], []>} : vector<24x32xf32>, vector<32x8xf32>, vector<24x8xf32> -> vector<24x8xf32>
      %c0_54 = arith.constant 0 : index
      %c10 = arith.constant 10 : index
      %c0_55 = arith.constant 0 : index
      %97 = vector.load %arg8[%c0_54, %c10, %c0_55] : memref<1x19x64xf32, #tpu.memory_space<vmem>>, vector<1x1x8xf32>
      %98 = vector.shape_cast %97 : vector<1x1x8xf32> to vector<1x8xf32>
      %99 = vector.broadcast %98 : vector<1x8xf32> to vector<24x8xf32>
      %100 = arith.addf %96, %99 : vector<24x8xf32>
      %c0_56 = arith.constant 0 : index
      %c5 = arith.constant 5 : index
      %c0_57 = arith.constant 0 : index
      %c0_58 = arith.constant 0 : index
      %101 = vector.load %arg4[%c0_56, %c5, %c0_57, %c0_58] : memref<1x12x32x8xbf16, #tpu.memory_space<vmem>>, vector<1x1x32x8xbf16>
      %102 = vector.shape_cast %101 : vector<1x1x32x8xbf16> to vector<32x8xbf16>
      %103 = arith.extf %102 : vector<32x8xbf16> to vector<32x8xf32>
      %cst_59 = arith.constant dense<0.000000e+00> : vector<24x8xf32>
      %104 = tpu.matmul %46, %103, %cst_59 {dimension_numbers = #tpu.dot_dimension_numbers<[1], [0], [0], [1], [0, 0, 1, 1], [], []>} : vector<24x32xf32>, vector<32x8xf32>, vector<24x8xf32> -> vector<24x8xf32>
      %c0_60 = arith.constant 0 : index
      %c11 = arith.constant 11 : index
      %c0_61 = arith.constant 0 : index
      %105 = vector.load %arg8[%c0_60, %c11, %c0_61] : memref<1x19x64xf32, #tpu.memory_space<vmem>>, vector<1x1x8xf32>
      %106 = vector.shape_cast %105 : vector<1x1x8xf32> to vector<1x8xf32>
      %107 = vector.broadcast %106 : vector<1x8xf32> to vector<24x8xf32>
      %108 = arith.addf %104, %107 : vector<24x8xf32>
      %c0_62 = arith.constant 0 : index
      %c9_63 = arith.constant 9 : index
      %c0_64 = arith.constant 0 : index
      %c0_65 = arith.constant 0 : index
      %109 = vector.load %arg4[%c0_62, %c9_63, %c0_64, %c0_65] : memref<1x12x32x8xbf16, #tpu.memory_space<vmem>>, vector<1x1x32x8xbf16>
      %110 = vector.shape_cast %109 : vector<1x1x32x8xbf16> to vector<32x8xbf16>
      %111 = arith.extf %110 : vector<32x8xbf16> to vector<32x8xf32>
      %cst_66 = arith.constant dense<0.000000e+00> : vector<24x8xf32>
      %112 = tpu.matmul %46, %111, %cst_66 {dimension_numbers = #tpu.dot_dimension_numbers<[1], [0], [0], [1], [0, 0, 1, 1], [], []>} : vector<24x32xf32>, vector<32x8xf32>, vector<24x8xf32> -> vector<24x8xf32>
      %c0_67 = arith.constant 0 : index
      %c12 = arith.constant 12 : index
      %c0_68 = arith.constant 0 : index
      %113 = vector.load %arg8[%c0_67, %c12, %c0_68] : memref<1x19x64xf32, #tpu.memory_space<vmem>>, vector<1x1x8xf32>
      %114 = vector.shape_cast %113 : vector<1x1x8xf32> to vector<1x8xf32>
      %115 = vector.broadcast %114 : vector<1x8xf32> to vector<24x8xf32>
      %116 = arith.addf %112, %115 : vector<24x8xf32>
      "tpu.trace_start"() <{level = 10 : i32, message = "qd,kd->qk"}> : () -> ()
      %cst_69 = arith.constant dense<0.000000e+00> : vector<24x24xf32>
      %117 = tpu.matmul %100, %108, %cst_69 {dimension_numbers = #tpu.dot_dimension_numbers<[1], [1], [0], [0], [0, 0, 1, 0], [], []>} : vector<24x8xf32>, vector<24x8xf32>, vector<24x24xf32> -> vector<24x24xf32>
      "tpu.trace_stop"() : () -> ()
      %cst_70 = arith.constant 0.353553385 : f32
      %118 = vector.broadcast %cst_70 : f32 to vector<24x24xf32>
      %119 = arith.mulf %117, %118 : vector<24x24xf32>
      %cst_71 = arith.constant -1.000000e+30 : f32
      %120 = vector.shape_cast %2 : vector<1x24xi1> to vector<1x24xi1>
      %121 = vector.broadcast %120 : vector<1x24xi1> to vector<24x24xi1>
      %122 = vector.broadcast %cst_71 : f32 to vector<24x24xf32>
      %123 = arith.select %121, %119, %122 : vector<24x24xi1>, vector<24x24xf32>
      %cst_72 = arith.constant dense<0xFF800000> : vector<24xf32>
      %124 = vector.multi_reduction <maximumf>, %123, %cst_72 [1] : vector<24x24xf32> to vector<24xf32>
      %125 = vector.shape_cast %124 : vector<24xf32> to vector<24x1xf32>
      %126 = vector.broadcast %125 : vector<24x1xf32> to vector<24x24xf32>
      %127 = arith.subf %123, %126 : vector<24x24xf32>
      %128 = math.exp %127 : vector<24x24xf32>
      %cst_73 = arith.constant dense<0.000000e+00> : vector<24xf32>
      %129 = vector.multi_reduction <add>, %128, %cst_73 [1] : vector<24x24xf32> to vector<24xf32>
      %130 = vector.shape_cast %129 : vector<24xf32> to vector<24x1xf32>
      %131 = tpu.reciprocal %130 {approx = true} : vector<24x1xf32> -> vector<24x1xf32>
      %132 = vector.broadcast %131 : vector<24x1xf32> to vector<24x24xf32>
      %133 = arith.mulf %128, %132 : vector<24x24xf32>
      %cst_74 = arith.constant dense<0.000000e+00> : vector<24x8xf32>
      %134 = tpu.matmul %133, %116, %cst_74 {dimension_numbers = #tpu.dot_dimension_numbers<[1], [0], [0], [1], [0, 0, 1, 1], [], []>} : vector<24x24xf32>, vector<24x8xf32>, vector<24x8xf32> -> vector<24x8xf32>
      %c0_75 = arith.constant 0 : index
      %c1_76 = arith.constant 1 : index
      %c0_77 = arith.constant 0 : index
      %c0_78 = arith.constant 0 : index
      %135 = vector.load %arg5[%c0_75, %c1_76, %c0_77, %c0_78] : memref<1x4x8x32xbf16, #tpu.memory_space<vmem>>, vector<1x1x8x32xbf16>
      %136 = vector.shape_cast %135 : vector<1x1x8x32xbf16> to vector<8x32xbf16>
      %137 = arith.extf %136 : vector<8x32xbf16> to vector<8x32xf32>
      %cst_79 = arith.constant dense<0.000000e+00> : vector<24x32xf32>
      %138 = tpu.matmul %134, %137, %cst_79 {dimension_numbers = #tpu.dot_dimension_numbers<[1], [0], [0], [1], [0, 0, 1, 1], [], []>} : vector<24x8xf32>, vector<8x32xf32>, vector<24x32xf32> -> vector<24x32xf32>
      %139 = arith.addf %92, %138 : vector<24x32xf32>
      %c0_80 = arith.constant 0 : index
      %c2 = arith.constant 2 : index
      %c0_81 = arith.constant 0 : index
      %c0_82 = arith.constant 0 : index
      %140 = vector.load %arg4[%c0_80, %c2, %c0_81, %c0_82] : memref<1x12x32x8xbf16, #tpu.memory_space<vmem>>, vector<1x1x32x8xbf16>
      %141 = vector.shape_cast %140 : vector<1x1x32x8xbf16> to vector<32x8xbf16>
      %142 = arith.extf %141 : vector<32x8xbf16> to vector<32x8xf32>
      %cst_83 = arith.constant dense<0.000000e+00> : vector<24x8xf32>
      %143 = tpu.matmul %46, %142, %cst_83 {dimension_numbers = #tpu.dot_dimension_numbers<[1], [0], [0], [1], [0, 0, 1, 1], [], []>} : vector<24x32xf32>, vector<32x8xf32>, vector<24x8xf32> -> vector<24x8xf32>
      %c0_84 = arith.constant 0 : index
      %c13 = arith.constant 13 : index
      %c0_85 = arith.constant 0 : index
      %144 = vector.load %arg8[%c0_84, %c13, %c0_85] : memref<1x19x64xf32, #tpu.memory_space<vmem>>, vector<1x1x8xf32>
      %145 = vector.shape_cast %144 : vector<1x1x8xf32> to vector<1x8xf32>
      %146 = vector.broadcast %145 : vector<1x8xf32> to vector<24x8xf32>
      %147 = arith.addf %143, %146 : vector<24x8xf32>
      %c0_86 = arith.constant 0 : index
      %c6 = arith.constant 6 : index
      %c0_87 = arith.constant 0 : index
      %c0_88 = arith.constant 0 : index
      %148 = vector.load %arg4[%c0_86, %c6, %c0_87, %c0_88] : memref<1x12x32x8xbf16, #tpu.memory_space<vmem>>, vector<1x1x32x8xbf16>
      %149 = vector.shape_cast %148 : vector<1x1x32x8xbf16> to vector<32x8xbf16>
      %150 = arith.extf %149 : vector<32x8xbf16> to vector<32x8xf32>
      %cst_89 = arith.constant dense<0.000000e+00> : vector<24x8xf32>
      %151 = tpu.matmul %46, %150, %cst_89 {dimension_numbers = #tpu.dot_dimension_numbers<[1], [0], [0], [1], [0, 0, 1, 1], [], []>} : vector<24x32xf32>, vector<32x8xf32>, vector<24x8xf32> -> vector<24x8xf32>
      %c0_90 = arith.constant 0 : index
      %c14 = arith.constant 14 : index
      %c0_91 = arith.constant 0 : index
      %152 = vector.load %arg8[%c0_90, %c14, %c0_91] : memref<1x19x64xf32, #tpu.memory_space<vmem>>, vector<1x1x8xf32>
      %153 = vector.shape_cast %152 : vector<1x1x8xf32> to vector<1x8xf32>
      %154 = vector.broadcast %153 : vector<1x8xf32> to vector<24x8xf32>
      %155 = arith.addf %151, %154 : vector<24x8xf32>
      %c0_92 = arith.constant 0 : index
      %c10_93 = arith.constant 10 : index
      %c0_94 = arith.constant 0 : index
      %c0_95 = arith.constant 0 : index
      %156 = vector.load %arg4[%c0_92, %c10_93, %c0_94, %c0_95] : memref<1x12x32x8xbf16, #tpu.memory_space<vmem>>, vector<1x1x32x8xbf16>
      %157 = vector.shape_cast %156 : vector<1x1x32x8xbf16> to vector<32x8xbf16>
      %158 = arith.extf %157 : vector<32x8xbf16> to vector<32x8xf32>
      %cst_96 = arith.constant dense<0.000000e+00> : vector<24x8xf32>
      %159 = tpu.matmul %46, %158, %cst_96 {dimension_numbers = #tpu.dot_dimension_numbers<[1], [0], [0], [1], [0, 0, 1, 1], [], []>} : vector<24x32xf32>, vector<32x8xf32>, vector<24x8xf32> -> vector<24x8xf32>
      %c0_97 = arith.constant 0 : index
      %c15 = arith.constant 15 : index
      %c0_98 = arith.constant 0 : index
      %160 = vector.load %arg8[%c0_97, %c15, %c0_98] : memref<1x19x64xf32, #tpu.memory_space<vmem>>, vector<1x1x8xf32>
      %161 = vector.shape_cast %160 : vector<1x1x8xf32> to vector<1x8xf32>
      %162 = vector.broadcast %161 : vector<1x8xf32> to vector<24x8xf32>
      %163 = arith.addf %159, %162 : vector<24x8xf32>
      "tpu.trace_start"() <{level = 10 : i32, message = "qd,kd->qk"}> : () -> ()
      %cst_99 = arith.constant dense<0.000000e+00> : vector<24x24xf32>
      %164 = tpu.matmul %147, %155, %cst_99 {dimension_numbers = #tpu.dot_dimension_numbers<[1], [1], [0], [0], [0, 0, 1, 0], [], []>} : vector<24x8xf32>, vector<24x8xf32>, vector<24x24xf32> -> vector<24x24xf32>
      "tpu.trace_stop"() : () -> ()
      %cst_100 = arith.constant 0.353553385 : f32
      %165 = vector.broadcast %cst_100 : f32 to vector<24x24xf32>
      %166 = arith.mulf %164, %165 : vector<24x24xf32>
      %cst_101 = arith.constant -1.000000e+30 : f32
      %167 = vector.shape_cast %2 : vector<1x24xi1> to vector<1x24xi1>
      %168 = vector.broadcast %167 : vector<1x24xi1> to vector<24x24xi1>
      %169 = vector.broadcast %cst_101 : f32 to vector<24x24xf32>
      %170 = arith.select %168, %166, %169 : vector<24x24xi1>, vector<24x24xf32>
      %cst_102 = arith.constant dense<0xFF800000> : vector<24xf32>
      %171 = vector.multi_reduction <maximumf>, %170, %cst_102 [1] : vector<24x24xf32> to vector<24xf32>
      %172 = vector.shape_cast %171 : vector<24xf32> to vector<24x1xf32>
      %173 = vector.broadcast %172 : vector<24x1xf32> to vector<24x24xf32>
      %174 = arith.subf %170, %173 : vector<24x24xf32>
      %175 = math.exp %174 : vector<24x24xf32>
      %cst_103 = arith.constant dense<0.000000e+00> : vector<24xf32>
      %176 = vector.multi_reduction <add>, %175, %cst_103 [1] : vector<24x24xf32> to vector<24xf32>
      %177 = vector.shape_cast %176 : vector<24xf32> to vector<24x1xf32>
      %178 = tpu.reciprocal %177 {approx = true} : vector<24x1xf32> -> vector<24x1xf32>
      %179 = vector.broadcast %178 : vector<24x1xf32> to vector<24x24xf32>
      %180 = arith.mulf %175, %179 : vector<24x24xf32>
      %cst_104 = arith.constant dense<0.000000e+00> : vector<24x8xf32>
      %181 = tpu.matmul %180, %163, %cst_104 {dimension_numbers = #tpu.dot_dimension_numbers<[1], [0], [0], [1], [0, 0, 1, 1], [], []>} : vector<24x24xf32>, vector<24x8xf32>, vector<24x8xf32> -> vector<24x8xf32>
      %c0_105 = arith.constant 0 : index
      %c2_106 = arith.constant 2 : index
      %c0_107 = arith.constant 0 : index
      %c0_108 = arith.constant 0 : index
      %182 = vector.load %arg5[%c0_105, %c2_106, %c0_107, %c0_108] : memref<1x4x8x32xbf16, #tpu.memory_space<vmem>>, vector<1x1x8x32xbf16>
      %183 = vector.shape_cast %182 : vector<1x1x8x32xbf16> to vector<8x32xbf16>
      %184 = arith.extf %183 : vector<8x32xbf16> to vector<8x32xf32>
      %cst_109 = arith.constant dense<0.000000e+00> : vector<24x32xf32>
      %185 = tpu.matmul %181, %184, %cst_109 {dimension_numbers = #tpu.dot_dimension_numbers<[1], [0], [0], [1], [0, 0, 1, 1], [], []>} : vector<24x8xf32>, vector<8x32xf32>, vector<24x32xf32> -> vector<24x32xf32>
      %186 = arith.addf %139, %185 : vector<24x32xf32>
      %c0_110 = arith.constant 0 : index
      %c3 = arith.constant 3 : index
      %c0_111 = arith.constant 0 : index
      %c0_112 = arith.constant 0 : index
      %187 = vector.load %arg4[%c0_110, %c3, %c0_111, %c0_112] : memref<1x12x32x8xbf16, #tpu.memory_space<vmem>>, vector<1x1x32x8xbf16>
      %188 = vector.shape_cast %187 : vector<1x1x32x8xbf16> to vector<32x8xbf16>
      %189 = arith.extf %188 : vector<32x8xbf16> to vector<32x8xf32>
      %cst_113 = arith.constant dense<0.000000e+00> : vector<24x8xf32>
      %190 = tpu.matmul %46, %189, %cst_113 {dimension_numbers = #tpu.dot_dimension_numbers<[1], [0], [0], [1], [0, 0, 1, 1], [], []>} : vector<24x32xf32>, vector<32x8xf32>, vector<24x8xf32> -> vector<24x8xf32>
      %c0_114 = arith.constant 0 : index
      %c16 = arith.constant 16 : index
      %c0_115 = arith.constant 0 : index
      %191 = vector.load %arg8[%c0_114, %c16, %c0_115] : memref<1x19x64xf32, #tpu.memory_space<vmem>>, vector<1x1x8xf32>
      %192 = vector.shape_cast %191 : vector<1x1x8xf32> to vector<1x8xf32>
      %193 = vector.broadcast %192 : vector<1x8xf32> to vector<24x8xf32>
      %194 = arith.addf %190, %193 : vector<24x8xf32>
      %c0_116 = arith.constant 0 : index
      %c7_117 = arith.constant 7 : index
      %c0_118 = arith.constant 0 : index
      %c0_119 = arith.constant 0 : index
      %195 = vector.load %arg4[%c0_116, %c7_117, %c0_118, %c0_119] : memref<1x12x32x8xbf16, #tpu.memory_space<vmem>>, vector<1x1x32x8xbf16>
      %196 = vector.shape_cast %195 : vector<1x1x32x8xbf16> to vector<32x8xbf16>
      %197 = arith.extf %196 : vector<32x8xbf16> to vector<32x8xf32>
      %cst_120 = arith.constant dense<0.000000e+00> : vector<24x8xf32>
      %198 = tpu.matmul %46, %197, %cst_120 {dimension_numbers = #tpu.dot_dimension_numbers<[1], [0], [0], [1], [0, 0, 1, 1], [], []>} : vector<24x32xf32>, vector<32x8xf32>, vector<24x8xf32> -> vector<24x8xf32>
      %c0_121 = arith.constant 0 : index
      %c17 = arith.constant 17 : index
      %c0_122 = arith.constant 0 : index
      %199 = vector.load %arg8[%c0_121, %c17, %c0_122] : memref<1x19x64xf32, #tpu.memory_space<vmem>>, vector<1x1x8xf32>
      %200 = vector.shape_cast %199 : vector<1x1x8xf32> to vector<1x8xf32>
      %201 = vector.broadcast %200 : vector<1x8xf32> to vector<24x8xf32>
      %202 = arith.addf %198, %201 : vector<24x8xf32>
      %c0_123 = arith.constant 0 : index
      %c11_124 = arith.constant 11 : index
      %c0_125 = arith.constant 0 : index
      %c0_126 = arith.constant 0 : index
      %203 = vector.load %arg4[%c0_123, %c11_124, %c0_125, %c0_126] : memref<1x12x32x8xbf16, #tpu.memory_space<vmem>>, vector<1x1x32x8xbf16>
      %204 = vector.shape_cast %203 : vector<1x1x32x8xbf16> to vector<32x8xbf16>
      %205 = arith.extf %204 : vector<32x8xbf16> to vector<32x8xf32>
      %cst_127 = arith.constant dense<0.000000e+00> : vector<24x8xf32>
      %206 = tpu.matmul %46, %205, %cst_127 {dimension_numbers = #tpu.dot_dimension_numbers<[1], [0], [0], [1], [0, 0, 1, 1], [], []>} : vector<24x32xf32>, vector<32x8xf32>, vector<24x8xf32> -> vector<24x8xf32>
      %c0_128 = arith.constant 0 : index
      %c18 = arith.constant 18 : index
      %c0_129 = arith.constant 0 : index
      %207 = vector.load %arg8[%c0_128, %c18, %c0_129] : memref<1x19x64xf32, #tpu.memory_space<vmem>>, vector<1x1x8xf32>
      %208 = vector.shape_cast %207 : vector<1x1x8xf32> to vector<1x8xf32>
      %209 = vector.broadcast %208 : vector<1x8xf32> to vector<24x8xf32>
      %210 = arith.addf %206, %209 : vector<24x8xf32>
      "tpu.trace_start"() <{level = 10 : i32, message = "qd,kd->qk"}> : () -> ()
      %cst_130 = arith.constant dense<0.000000e+00> : vector<24x24xf32>
      %211 = tpu.matmul %194, %202, %cst_130 {dimension_numbers = #tpu.dot_dimension_numbers<[1], [1], [0], [0], [0, 0, 1, 0], [], []>} : vector<24x8xf32>, vector<24x8xf32>, vector<24x24xf32> -> vector<24x24xf32>
      "tpu.trace_stop"() : () -> ()
      %cst_131 = arith.constant 0.353553385 : f32
      %212 = vector.broadcast %cst_131 : f32 to vector<24x24xf32>
      %213 = arith.mulf %211, %212 : vector<24x24xf32>
      %cst_132 = arith.constant -1.000000e+30 : f32
      %214 = vector.shape_cast %2 : vector<1x24xi1> to vector<1x24xi1>
      %215 = vector.broadcast %214 : vector<1x24xi1> to vector<24x24xi1>
      %216 = vector.broadcast %cst_132 : f32 to vector<24x24xf32>
      %217 = arith.select %215, %213, %216 : vector<24x24xi1>, vector<24x24xf32>
      %cst_133 = arith.constant dense<0xFF800000> : vector<24xf32>
      %218 = vector.multi_reduction <maximumf>, %217, %cst_133 [1] : vector<24x24xf32> to vector<24xf32>
      %219 = vector.shape_cast %218 : vector<24xf32> to vector<24x1xf32>
      %220 = vector.broadcast %219 : vector<24x1xf32> to vector<24x24xf32>
      %221 = arith.subf %217, %220 : vector<24x24xf32>
      %222 = math.exp %221 : vector<24x24xf32>
      %cst_134 = arith.constant dense<0.000000e+00> : vector<24xf32>
      %223 = vector.multi_reduction <add>, %222, %cst_134 [1] : vector<24x24xf32> to vector<24xf32>
      %224 = vector.shape_cast %223 : vector<24xf32> to vector<24x1xf32>
      %225 = tpu.reciprocal %224 {approx = true} : vector<24x1xf32> -> vector<24x1xf32>
      %226 = vector.broadcast %225 : vector<24x1xf32> to vector<24x24xf32>
      %227 = arith.mulf %222, %226 : vector<24x24xf32>
      %cst_135 = arith.constant dense<0.000000e+00> : vector<24x8xf32>
      %228 = tpu.matmul %227, %210, %cst_135 {dimension_numbers = #tpu.dot_dimension_numbers<[1], [0], [0], [1], [0, 0, 1, 1], [], []>} : vector<24x24xf32>, vector<24x8xf32>, vector<24x8xf32> -> vector<24x8xf32>
      %c0_136 = arith.constant 0 : index
      %c3_137 = arith.constant 3 : index
      %c0_138 = arith.constant 0 : index
      %c0_139 = arith.constant 0 : index
      %229 = vector.load %arg5[%c0_136, %c3_137, %c0_138, %c0_139] : memref<1x4x8x32xbf16, #tpu.memory_space<vmem>>, vector<1x1x8x32xbf16>
      %230 = vector.shape_cast %229 : vector<1x1x8x32xbf16> to vector<8x32xbf16>
      %231 = arith.extf %230 : vector<8x32xbf16> to vector<8x32xf32>
      %cst_140 = arith.constant dense<0.000000e+00> : vector<24x32xf32>
      %232 = tpu.matmul %228, %231, %cst_140 {dimension_numbers = #tpu.dot_dimension_numbers<[1], [0], [0], [1], [0, 0, 1, 1], [], []>} : vector<24x8xf32>, vector<8x32xf32>, vector<24x32xf32> -> vector<24x32xf32>
      %233 = arith.addf %186, %232 : vector<24x32xf32>
      %234 = arith.addf %18, %233 : vector<24x32xf32>
      %c0_141 = arith.constant 0 : index
      %c2_142 = arith.constant 2 : index
      %c0_143 = arith.constant 0 : index
      %235 = vector.load %arg8[%c0_141, %c2_142, %c0_143] : memref<1x19x64xf32, #tpu.memory_space<vmem>>, vector<1x1x32xf32>
      %236 = vector.shape_cast %235 : vector<1x1x32xf32> to vector<1x32xf32>
      %237 = vector.broadcast %236 : vector<1x32xf32> to vector<24x32xf32>
      %238 = arith.addf %234, %237 : vector<24x32xf32>
      %c0_144 = arith.constant 0 : index
      %c3_145 = arith.constant 3 : index
      %c0_146 = arith.constant 0 : index
      %239 = vector.load %arg8[%c0_144, %c3_145, %c0_146] : memref<1x19x64xf32, #tpu.memory_space<vmem>>, vector<1x1x32xf32>
      %240 = vector.shape_cast %239 : vector<1x1x32xf32> to vector<1x32xf32>
      %c0_147 = arith.constant 0 : index
      %c4_148 = arith.constant 4 : index
      %c0_149 = arith.constant 0 : index
      %241 = vector.load %arg8[%c0_147, %c4_148, %c0_149] : memref<1x19x64xf32, #tpu.memory_space<vmem>>, vector<1x1x32xf32>
      %242 = vector.shape_cast %241 : vector<1x1x32xf32> to vector<1x32xf32>
      %cst_150 = arith.constant dense<0.000000e+00> : vector<24xf32>
      %243 = vector.multi_reduction <add>, %238, %cst_150 [1] : vector<24x32xf32> to vector<24xf32>
      %244 = vector.shape_cast %243 : vector<24xf32> to vector<24x1xf32>
      %cst_151 = arith.constant 3.200000e+01 : f32
      %245 = vector.broadcast %cst_151 : f32 to vector<24x1xf32>
      %246 = arith.divf %244, %245 : vector<24x1xf32>
      %247 = arith.mulf %238, %238 : vector<24x32xf32>
      %cst_152 = arith.constant dense<0.000000e+00> : vector<24xf32>
      %248 = vector.multi_reduction <add>, %247, %cst_152 [1] : vector<24x32xf32> to vector<24xf32>
      %249 = vector.shape_cast %248 : vector<24xf32> to vector<24x1xf32>
      %cst_153 = arith.constant 3.200000e+01 : f32
      %250 = vector.broadcast %cst_153 : f32 to vector<24x1xf32>
      %251 = arith.divf %249, %250 : vector<24x1xf32>
      %252 = arith.mulf %246, %246 : vector<24x1xf32>
      %253 = arith.subf %251, %252 : vector<24x1xf32>
      %cst_154 = arith.constant 0.000000e+00 : f32
      %254 = vector.broadcast %cst_154 : f32 to vector<24x1xf32>
      %255 = arith.maximumf %253, %254 : vector<24x1xf32>
      %256 = vector.broadcast %246 : vector<24x1xf32> to vector<24x32xf32>
      %257 = arith.subf %238, %256 : vector<24x32xf32>
      %cst_155 = arith.constant 9.99999996E-13 : f32
      %258 = vector.broadcast %cst_155 : f32 to vector<24x1xf32>
      %259 = arith.addf %255, %258 : vector<24x1xf32>
      %260 = math.rsqrt %259 : vector<24x1xf32>
      %261 = vector.broadcast %260 : vector<24x1xf32> to vector<24x32xf32>
      %262 = arith.mulf %257, %261 : vector<24x32xf32>
      %263 = vector.broadcast %240 : vector<1x32xf32> to vector<24x32xf32>
      %264 = arith.mulf %262, %263 : vector<24x32xf32>
      %265 = vector.broadcast %242 : vector<1x32xf32> to vector<24x32xf32>
      %266 = arith.addf %264, %265 : vector<24x32xf32>
      %c0_156 = arith.constant 0 : index
      %c0_157 = arith.constant 0 : index
      %c0_158 = arith.constant 0 : index
      %267 = vector.load %arg6[%c0_156, %c0_157, %c0_158] : memref<1x32x64xbf16, #tpu.memory_space<vmem>>, vector<1x32x64xbf16>
      %268 = vector.shape_cast %267 : vector<1x32x64xbf16> to vector<32x64xbf16>
      %269 = arith.extf %268 : vector<32x64xbf16> to vector<32x64xf32>
      %cst_159 = arith.constant dense<0.000000e+00> : vector<24x64xf32>
      %270 = tpu.matmul %266, %269, %cst_159 {dimension_numbers = #tpu.dot_dimension_numbers<[1], [0], [0], [1], [0, 0, 1, 1], [], []>} : vector<24x32xf32>, vector<32x64xf32>, vector<24x64xf32> -> vector<24x64xf32>
      %c0_160 = arith.constant 0 : index
      %c5_161 = arith.constant 5 : index
      %c0_162 = arith.constant 0 : index
      %271 = vector.load %arg8[%c0_160, %c5_161, %c0_162] : memref<1x19x64xf32, #tpu.memory_space<vmem>>, vector<1x1x64xf32>
      %272 = vector.shape_cast %271 : vector<1x1x64xf32> to vector<1x64xf32>
      %273 = vector.broadcast %272 : vector<1x64xf32> to vector<24x64xf32>
      %274 = arith.addf %270, %273 : vector<24x64xf32>
      %275 = arith.mulf %274, %274 : vector<24x64xf32>
      %276 = arith.mulf %274, %275 : vector<24x64xf32>
      %cst_163 = arith.constant 4.471500e-02 : f32
      %277 = vector.broadcast %cst_163 : f32 to vector<24x64xf32>
      %278 = arith.mulf %277, %276 : vector<24x64xf32>
      %279 = arith.addf %274, %278 : vector<24x64xf32>
      %cst_164 = arith.constant 0.797884583 : f32
      %280 = vector.broadcast %cst_164 : f32 to vector<24x64xf32>
      %281 = arith.mulf %280, %279 : vector<24x64xf32>
      %282 = math.tanh %281 : vector<24x64xf32>
      %cst_165 = arith.constant 1.000000e+00 : f32
      %283 = vector.broadcast %cst_165 : f32 to vector<24x64xf32>
      %284 = arith.addf %283, %282 : vector<24x64xf32>
      %cst_166 = arith.constant 5.000000e-01 : f32
      %285 = vector.broadcast %cst_166 : f32 to vector<24x64xf32>
      %286 = arith.mulf %285, %284 : vector<24x64xf32>
      %287 = arith.mulf %274, %286 : vector<24x64xf32>
      %c0_167 = arith.constant 0 : index
      %c0_168 = arith.constant 0 : index
      %c0_169 = arith.constant 0 : index
      %288 = vector.load %arg7[%c0_167, %c0_168, %c0_169] : memref<1x64x32xbf16, #tpu.memory_space<vmem>>, vector<1x64x32xbf16>
      %289 = vector.shape_cast %288 : vector<1x64x32xbf16> to vector<64x32xbf16>
      %290 = arith.extf %289 : vector<64x32xbf16> to vector<64x32xf32>
      %cst_170 = arith.constant dense<0.000000e+00> : vector<24x32xf32>
      %291 = tpu.matmul %287, %290, %cst_170 {dimension_numbers = #tpu.dot_dimension_numbers<[1], [0], [0], [1], [0, 0, 1, 1], [], []>} : vector<24x64xf32>, vector<64x32xf32>, vector<24x32xf32> -> vector<24x32xf32>
      %292 = arith.addf %238, %291 : vector<24x32xf32>
      %c0_171 = arith.constant 0 : index
      %c6_172 = arith.constant 6 : index
      %c0_173 = arith.constant 0 : index
      %293 = vector.load %arg8[%c0_171, %c6_172, %c0_173] : memref<1x19x64xf32, #tpu.memory_space<vmem>>, vector<1x1x32xf32>
      %294 = vector.shape_cast %293 : vector<1x1x32xf32> to vector<1x32xf32>
      %295 = vector.broadcast %294 : vector<1x32xf32> to vector<24x32xf32>
      %296 = arith.addf %292, %295 : vector<24x32xf32>
      %c0_174 = arith.constant 0 : index
      %c0_175 = arith.constant 0 : index
      %297 = vector.load %arg21[%c0_174, %c0_175] : memref<24x32xf32, #tpu.memory_space<vmem>>, vector<24x32xf32>
      tpu.vector_store %arg21[%c0_174, %c0_175], %296 {strides = array<i32>} : memref<24x32xf32, #tpu.memory_space<vmem>>, vector<24x32xf32>,
    } else {
    }
    %c2_i32_2 = arith.constant 2 : i32
    %9 = arith.cmpi eq, %arg0, %c2_i32_2 : i32
    %10 = arith.extui %9 : i1 to i32
    %c0_i32_3 = arith.constant 0 : i32
    %11 = arith.cmpi ne, %10, %c0_i32_3 : i32
    scf.if %11 {
      %c0 = arith.constant 0 : index
      %c0_7 = arith.constant 0 : index
      %18 = vector.load %arg21[%c0, %c0_7] : memref<24x32xf32, #tpu.memory_space<vmem>>, vector<24x32xf32>
      %c0_8 = arith.constant 0 : index
      %c0_9 = arith.constant 0 : index
      %19 = vector.load %arg19[%c0_8, %c0_9] : memref<5x256xf32, #tpu.memory_space<vmem>>, vector<1x32xf32>
      %c1 = arith.constant 1 : index
      %c0_10 = arith.constant 0 : index
      %20 = vector.load %arg19[%c1, %c0_10] : memref<5x256xf32, #tpu.memory_space<vmem>>, vector<1x32xf32>
      %cst = arith.constant dense<0.000000e+00> : vector<24xf32>
      %21 = vector.multi_reduction <add>, %18, %cst [1] : vector<24x32xf32> to vector<24xf32>
      %22 = vector.shape_cast %21 : vector<24xf32> to vector<24x1xf32>
      %cst_11 = arith.constant 3.200000e+01 : f32
      %23 = vector.broadcast %cst_11 : f32 to vector<24x1xf32>
      %24 = arith.divf %22, %23 : vector<24x1xf32>
      %25 = arith.mulf %18, %18 : vector<24x32xf32>
      %cst_12 = arith.constant dense<0.000000e+00> : vector<24xf32>
      %26 = vector.multi_reduction <add>, %25, %cst_12 [1] : vector<24x32xf32> to vector<24xf32>
      %27 = vector.shape_cast %26 : vector<24xf32> to vector<24x1xf32>
      %cst_13 = arith.constant 3.200000e+01 : f32
      %28 = vector.broadcast %cst_13 : f32 to vector<24x1xf32>
      %29 = arith.divf %27, %28 : vector<24x1xf32>
      %30 = arith.mulf %24, %24 : vector<24x1xf32>
      %31 = arith.subf %29, %30 : vector<24x1xf32>
      %cst_14 = arith.constant 0.000000e+00 : f32
      %32 = vector.broadcast %cst_14 : f32 to vector<24x1xf32>
      %33 = arith.maximumf %31, %32 : vector<24x1xf32>
      %34 = vector.broadcast %24 : vector<24x1xf32> to vector<24x32xf32>
      %35 = arith.subf %18, %34 : vector<24x32xf32>
      %cst_15 = arith.constant 9.99999996E-13 : f32
      %36 = vector.broadcast %cst_15 : f32 to vector<24x1xf32>
      %37 = arith.addf %33, %36 : vector<24x1xf32>
      %38 = math.rsqrt %37 : vector<24x1xf32>
      %39 = vector.broadcast %38 : vector<24x1xf32> to vector<24x32xf32>
      %40 = arith.mulf %35, %39 : vector<24x32xf32>
      %41 = vector.broadcast %19 : vector<1x32xf32> to vector<24x32xf32>
      %42 = arith.mulf %40, %41 : vector<24x32xf32>
      %43 = vector.broadcast %20 : vector<1x32xf32> to vector<24x32xf32>
      %44 = arith.addf %42, %43 : vector<24x32xf32>
      %c0_16 = arith.constant 0 : index
      %c0_17 = arith.constant 0 : index
      %45 = vector.load %arg22[%c0_16, %c0_17] : memref<24x32xf32, #tpu.memory_space<vmem>>, vector<24x32xf32>
      tpu.vector_store %arg22[%c0_16, %c0_17], %44 {strides = array<i32>} : memref<24x32xf32, #tpu.memory_space<vmem>>, vector<24x32xf32>,
      %c0_18 = arith.constant 0 : index
      %c0_19 = arith.constant 0 : index
      %46 = vector.load %arg9[%c0_18, %c0_19] : memref<32x32xf32, #tpu.memory_space<vmem>>, vector<32x32xf32>
      %c2 = arith.constant 2 : index
      %c0_20 = arith.constant 0 : index
      %47 = vector.load %arg19[%c2, %c0_20] : memref<5x256xf32, #tpu.memory_space<vmem>>, vector<1x32xf32>
      %c3 = arith.constant 3 : index
      %c0_21 = arith.constant 0 : index
      %48 = vector.load %arg19[%c3, %c0_21] : memref<5x256xf32, #tpu.memory_space<vmem>>, vector<1x32xf32>
      %cst_22 = arith.constant dense<0.000000e+00> : vector<32xf32>
      %49 = vector.multi_reduction <add>, %46, %cst_22 [1] : vector<32x32xf32> to vector<32xf32>
      %50 = vector.shape_cast %49 : vector<32xf32> to vector<32x1xf32>
      %cst_23 = arith.constant 3.200000e+01 : f32
      %51 = vector.broadcast %cst_23 : f32 to vector<32x1xf32>
      %52 = arith.divf %50, %51 : vector<32x1xf32>
      %53 = arith.mulf %46, %46 : vector<32x32xf32>
      %cst_24 = arith.constant dense<0.000000e+00> : vector<32xf32>
      %54 = vector.multi_reduction <add>, %53, %cst_24 [1] : vector<32x32xf32> to vector<32xf32>
      %55 = vector.shape_cast %54 : vector<32xf32> to vector<32x1xf32>
      %cst_25 = arith.constant 3.200000e+01 : f32
      %56 = vector.broadcast %cst_25 : f32 to vector<32x1xf32>
      %57 = arith.divf %55, %56 : vector<32x1xf32>
      %58 = arith.mulf %52, %52 : vector<32x1xf32>
      %59 = arith.subf %57, %58 : vector<32x1xf32>
      %cst_26 = arith.constant 0.000000e+00 : f32
      %60 = vector.broadcast %cst_26 : f32 to vector<32x1xf32>
      %61 = arith.maximumf %59, %60 : vector<32x1xf32>
      %62 = vector.broadcast %52 : vector<32x1xf32> to vector<32x32xf32>
      %63 = arith.subf %46, %62 : vector<32x32xf32>
      %cst_27 = arith.constant 9.99999996E-13 : f32
      %64 = vector.broadcast %cst_27 : f32 to vector<32x1xf32>
      %65 = arith.addf %61, %64 : vector<32x1xf32>
      %66 = math.rsqrt %65 : vector<32x1xf32>
      %67 = vector.broadcast %66 : vector<32x1xf32> to vector<32x32xf32>
      %68 = arith.mulf %63, %67 : vector<32x32xf32>
      %69 = vector.broadcast %47 : vector<1x32xf32> to vector<32x32xf32>
      %70 = arith.mulf %68, %69 : vector<32x32xf32>
      %71 = vector.broadcast %48 : vector<1x32xf32> to vector<32x32xf32>
      %72 = arith.addf %70, %71 : vector<32x32xf32>
      %c0_28 = arith.constant 0 : index
      %c0_29 = arith.constant 0 : index
      %73 = vector.load %arg23[%c0_28, %c0_29] : memref<32x32xf32, #tpu.memory_space<vmem>>, vector<32x32xf32>
      tpu.vector_store %arg23[%c0_28, %c0_29], %72 {strides = array<i32>} : memref<32x32xf32, #tpu.memory_space<vmem>>, vector<32x32xf32>,
    } else {
    }
    %c2_i32_4 = arith.constant 2 : i32
    %12 = arith.cmpi sge, %arg0, %c2_i32_4 : i32
    %13 = arith.extui %12 : i1 to i32
    %c0_i32_5 = arith.constant 0 : i32
    %14 = arith.cmpi ne, %13, %c0_i32_5 : i32
    scf.if %14 {
      %c2_i32_7 = arith.constant 2 : i32
      %18 = arith.subi %arg0, %c2_i32_7 : i32
      %c0 = arith.constant 0 : index
      %c0_8 = arith.constant 0 : index
      %19 = vector.load %arg23[%c0, %c0_8] : memref<32x32xf32, #tpu.memory_space<vmem>>, vector<32x32xf32>
      %c0_9 = arith.constant 0 : index
      %c0_10 = arith.constant 0 : index
      %c0_11 = arith.constant 0 : index
      %c0_12 = arith.constant 0 : index
      %20 = vector.load %arg10[%c0_9, %c0_10, %c0_11, %c0_12] : memref<1x12x32x8xbf16, #tpu.memory_space<vmem>>, vector<1x1x32x8xbf16>
      %21 = vector.shape_cast %20 : vector<1x1x32x8xbf16> to vector<32x8xbf16>
      %22 = arith.extf %21 : vector<32x8xbf16> to vector<32x8xf32>
      %cst = arith.constant dense<0.000000e+00> : vector<32x8xf32>
      %23 = tpu.matmul %19, %22, %cst {dimension_numbers = #tpu.dot_dimension_numbers<[1], [0], [0], [1], [0, 0, 1, 1], [], []>} : vector<32x32xf32>, vector<32x8xf32>, vector<32x8xf32> -> vector<32x8xf32>
      %c0_13 = arith.constant 0 : index
      %c10 = arith.constant 10 : index
      %c0_14 = arith.constant 0 : index
      %24 = vector.load %arg17[%c0_13, %c10, %c0_14] : memref<1x34x64xf32, #tpu.memory_space<vmem>>, vector<1x1x8xf32>
      %25 = vector.shape_cast %24 : vector<1x1x8xf32> to vector<1x8xf32>
      %26 = vector.broadcast %25 : vector<1x8xf32> to vector<32x8xf32>
      %27 = arith.addf %23, %26 : vector<32x8xf32>
      %c0_15 = arith.constant 0 : index
      %c4 = arith.constant 4 : index
      %c0_16 = arith.constant 0 : index
      %c0_17 = arith.constant 0 : index
      %28 = vector.load %arg10[%c0_15, %c4, %c0_16, %c0_17] : memref<1x12x32x8xbf16, #tpu.memory_space<vmem>>, vector<1x1x32x8xbf16>
      %29 = vector.shape_cast %28 : vector<1x1x32x8xbf16> to vector<32x8xbf16>
      %30 = arith.extf %29 : vector<32x8xbf16> to vector<32x8xf32>
      %cst_18 = arith.constant dense<0.000000e+00> : vector<32x8xf32>
      %31 = tpu.matmul %19, %30, %cst_18 {dimension_numbers = #tpu.dot_dimension_numbers<[1], [0], [0], [1], [0, 0, 1, 1], [], []>} : vector<32x32xf32>, vector<32x8xf32>, vector<32x8xf32> -> vector<32x8xf32>
      %c0_19 = arith.constant 0 : index
      %c11 = arith.constant 11 : index
      %c0_20 = arith.constant 0 : index
      %32 = vector.load %arg17[%c0_19, %c11, %c0_20] : memref<1x34x64xf32, #tpu.memory_space<vmem>>, vector<1x1x8xf32>
      %33 = vector.shape_cast %32 : vector<1x1x8xf32> to vector<1x8xf32>
      %34 = vector.broadcast %33 : vector<1x8xf32> to vector<32x8xf32>
      %35 = arith.addf %31, %34 : vector<32x8xf32>
      %c0_21 = arith.constant 0 : index
      %c8 = arith.constant 8 : index
      %c0_22 = arith.constant 0 : index
      %c0_23 = arith.constant 0 : index
      %36 = vector.load %arg10[%c0_21, %c8, %c0_22, %c0_23] : memref<1x12x32x8xbf16, #tpu.memory_space<vmem>>, vector<1x1x32x8xbf16>
      %37 = vector.shape_cast %36 : vector<1x1x32x8xbf16> to vector<32x8xbf16>
      %38 = arith.extf %37 : vector<32x8xbf16> to vector<32x8xf32>
      %cst_24 = arith.constant dense<0.000000e+00> : vector<32x8xf32>
      %39 = tpu.matmul %19, %38, %cst_24 {dimension_numbers = #tpu.dot_dimension_numbers<[1], [0], [0], [1], [0, 0, 1, 1], [], []>} : vector<32x32xf32>, vector<32x8xf32>, vector<32x8xf32> -> vector<32x8xf32>
      %c0_25 = arith.constant 0 : index
      %c12 = arith.constant 12 : index
      %c0_26 = arith.constant 0 : index
      %40 = vector.load %arg17[%c0_25, %c12, %c0_26] : memref<1x34x64xf32, #tpu.memory_space<vmem>>, vector<1x1x8xf32>
      %41 = vector.shape_cast %40 : vector<1x1x8xf32> to vector<1x8xf32>
      %42 = vector.broadcast %41 : vector<1x8xf32> to vector<32x8xf32>
      %43 = arith.addf %39, %42 : vector<32x8xf32>
      "tpu.trace_start"() <{level = 10 : i32, message = "qd,kd->qk"}> : () -> ()
      %cst_27 = arith.constant dense<0.000000e+00> : vector<32x32xf32>
      %44 = tpu.matmul %27, %35, %cst_27 {dimension_numbers = #tpu.dot_dimension_numbers<[1], [1], [0], [0], [0, 0, 1, 0], [], []>} : vector<32x8xf32>, vector<32x8xf32>, vector<32x32xf32> -> vector<32x32xf32>
      "tpu.trace_stop"() : () -> ()
      %cst_28 = arith.constant 0.353553385 : f32
      %45 = vector.broadcast %cst_28 : f32 to vector<32x32xf32>
      %46 = arith.mulf %44, %45 : vector<32x32xf32>
      %cst_29 = arith.constant dense<0xFF800000> : vector<32xf32>
      %47 = vector.multi_reduction <maximumf>, %46, %cst_29 [1] : vector<32x32xf32> to vector<32xf32>
      %48 = vector.shape_cast %47 : vector<32xf32> to vector<32x1xf32>
      %49 = vector.broadcast %48 : vector<32x1xf32> to vector<32x32xf32>
      %50 = arith.subf %46, %49 : vector<32x32xf32>
      %51 = math.exp %50 : vector<32x32xf32>
      %cst_30 = arith.constant dense<0.000000e+00> : vector<32xf32>
      %52 = vector.multi_reduction <add>, %51, %cst_30 [1] : vector<32x32xf32> to vector<32xf32>
      %53 = vector.shape_cast %52 : vector<32xf32> to vector<32x1xf32>
      %54 = tpu.reciprocal %53 {approx = true} : vector<32x1xf32> -> vector<32x1xf32>
      %55 = vector.broadcast %54 : vector<32x1xf32> to vector<32x32xf32>
      %56 = arith.mulf %51, %55 : vector<32x32xf32>
      %cst_31 = arith.constant dense<0.000000e+00> : vector<32x8xf32>
      %57 = tpu.matmul %56, %43, %cst_31 {dimension_numbers = #tpu.dot_dimension_numbers<[1], [0], [0], [1], [0, 0, 1, 1], [], []>} : vector<32x32xf32>, vector<32x8xf32>, vector<32x8xf32> -> vector<32x8xf32>
      %c0_32 = arith.constant 0 : index
      %c0_33 = arith.constant 0 : index
      %c0_34 = arith.constant 0 : index
      %c0_35 = arith.constant 0 : index
      %58 = vector.load %arg11[%c0_32, %c0_33, %c0_34, %c0_35] : memref<1x4x8x32xbf16, #tpu.memory_space<vmem>>, vector<1x1x8x32xbf16>
      %59 = vector.shape_cast %58 : vector<1x1x8x32xbf16> to vector<8x32xbf16>
      %60 = arith.extf %59 : vector<8x32xbf16> to vector<8x32xf32>
      %cst_36 = arith.constant dense<0.000000e+00> : vector<32x32xf32>
      %61 = tpu.matmul %57, %60, %cst_36 {dimension_numbers = #tpu.dot_dimension_numbers<[1], [0], [0], [1], [0, 0, 1, 1], [], []>} : vector<32x8xf32>, vector<8x32xf32>, vector<32x32xf32> -> vector<32x32xf32>
      %c0_37 = arith.constant 0 : index
      %c1 = arith.constant 1 : index
      %c0_38 = arith.constant 0 : index
      %c0_39 = arith.constant 0 : index
      %62 = vector.load %arg10[%c0_37, %c1, %c0_38, %c0_39] : memref<1x12x32x8xbf16, #tpu.memory_space<vmem>>, vector<1x1x32x8xbf16>
      %63 = vector.shape_cast %62 : vector<1x1x32x8xbf16> to vector<32x8xbf16>
      %64 = arith.extf %63 : vector<32x8xbf16> to vector<32x8xf32>
      %cst_40 = arith.constant dense<0.000000e+00> : vector<32x8xf32>
      %65 = tpu.matmul %19, %64, %cst_40 {dimension_numbers = #tpu.dot_dimension_numbers<[1], [0], [0], [1], [0, 0, 1, 1], [], []>} : vector<32x32xf32>, vector<32x8xf32>, vector<32x8xf32> -> vector<32x8xf32>
      %c0_41 = arith.constant 0 : index
      %c13 = arith.constant 13 : index
      %c0_42 = arith.constant 0 : index
      %66 = vector.load %arg17[%c0_41, %c13, %c0_42] : memref<1x34x64xf32, #tpu.memory_space<vmem>>, vector<1x1x8xf32>
      %67 = vector.shape_cast %66 : vector<1x1x8xf32> to vector<1x8xf32>
      %68 = vector.broadcast %67 : vector<1x8xf32> to vector<32x8xf32>
      %69 = arith.addf %65, %68 : vector<32x8xf32>
      %c0_43 = arith.constant 0 : index
      %c5 = arith.constant 5 : index
      %c0_44 = arith.constant 0 : index
      %c0_45 = arith.constant 0 : index
      %70 = vector.load %arg10[%c0_43, %c5, %c0_44, %c0_45] : memref<1x12x32x8xbf16, #tpu.memory_space<vmem>>, vector<1x1x32x8xbf16>
      %71 = vector.shape_cast %70 : vector<1x1x32x8xbf16> to vector<32x8xbf16>
      %72 = arith.extf %71 : vector<32x8xbf16> to vector<32x8xf32>
      %cst_46 = arith.constant dense<0.000000e+00> : vector<32x8xf32>
      %73 = tpu.matmul %19, %72, %cst_46 {dimension_numbers = #tpu.dot_dimension_numbers<[1], [0], [0], [1], [0, 0, 1, 1], [], []>} : vector<32x32xf32>, vector<32x8xf32>, vector<32x8xf32> -> vector<32x8xf32>
      %c0_47 = arith.constant 0 : index
      %c14 = arith.constant 14 : index
      %c0_48 = arith.constant 0 : index
      %74 = vector.load %arg17[%c0_47, %c14, %c0_48] : memref<1x34x64xf32, #tpu.memory_space<vmem>>, vector<1x1x8xf32>
      %75 = vector.shape_cast %74 : vector<1x1x8xf32> to vector<1x8xf32>
      %76 = vector.broadcast %75 : vector<1x8xf32> to vector<32x8xf32>
      %77 = arith.addf %73, %76 : vector<32x8xf32>
      %c0_49 = arith.constant 0 : index
      %c9 = arith.constant 9 : index
      %c0_50 = arith.constant 0 : index
      %c0_51 = arith.constant 0 : index
      %78 = vector.load %arg10[%c0_49, %c9, %c0_50, %c0_51] : memref<1x12x32x8xbf16, #tpu.memory_space<vmem>>, vector<1x1x32x8xbf16>
      %79 = vector.shape_cast %78 : vector<1x1x32x8xbf16> to vector<32x8xbf16>
      %80 = arith.extf %79 : vector<32x8xbf16> to vector<32x8xf32>
      %cst_52 = arith.constant dense<0.000000e+00> : vector<32x8xf32>
      %81 = tpu.matmul %19, %80, %cst_52 {dimension_numbers = #tpu.dot_dimension_numbers<[1], [0], [0], [1], [0, 0, 1, 1], [], []>} : vector<32x32xf32>, vector<32x8xf32>, vector<32x8xf32> -> vector<32x8xf32>
      %c0_53 = arith.constant 0 : index
      %c15 = arith.constant 15 : index
      %c0_54 = arith.constant 0 : index
      %82 = vector.load %arg17[%c0_53, %c15, %c0_54] : memref<1x34x64xf32, #tpu.memory_space<vmem>>, vector<1x1x8xf32>
      %83 = vector.shape_cast %82 : vector<1x1x8xf32> to vector<1x8xf32>
      %84 = vector.broadcast %83 : vector<1x8xf32> to vector<32x8xf32>
      %85 = arith.addf %81, %84 : vector<32x8xf32>
      "tpu.trace_start"() <{level = 10 : i32, message = "qd,kd->qk"}> : () -> ()
      %cst_55 = arith.constant dense<0.000000e+00> : vector<32x32xf32>
      %86 = tpu.matmul %69, %77, %cst_55 {dimension_numbers = #tpu.dot_dimension_numbers<[1], [1], [0], [0], [0, 0, 1, 0], [], []>} : vector<32x8xf32>, vector<32x8xf32>, vector<32x32xf32> -> vector<32x32xf32>
      "tpu.trace_stop"() : () -> ()
      %cst_56 = arith.constant 0.353553385 : f32
      %87 = vector.broadcast %cst_56 : f32 to vector<32x32xf32>
      %88 = arith.mulf %86, %87 : vector<32x32xf32>
      %cst_57 = arith.constant dense<0xFF800000> : vector<32xf32>
      %89 = vector.multi_reduction <maximumf>, %88, %cst_57 [1] : vector<32x32xf32> to vector<32xf32>
      %90 = vector.shape_cast %89 : vector<32xf32> to vector<32x1xf32>
      %91 = vector.broadcast %90 : vector<32x1xf32> to vector<32x32xf32>
      %92 = arith.subf %88, %91 : vector<32x32xf32>
      %93 = math.exp %92 : vector<32x32xf32>
      %cst_58 = arith.constant dense<0.000000e+00> : vector<32xf32>
      %94 = vector.multi_reduction <add>, %93, %cst_58 [1] : vector<32x32xf32> to vector<32xf32>
      %95 = vector.shape_cast %94 : vector<32xf32> to vector<32x1xf32>
      %96 = tpu.reciprocal %95 {approx = true} : vector<32x1xf32> -> vector<32x1xf32>
      %97 = vector.broadcast %96 : vector<32x1xf32> to vector<32x32xf32>
      %98 = arith.mulf %93, %97 : vector<32x32xf32>
      %cst_59 = arith.constant dense<0.000000e+00> : vector<32x8xf32>
      %99 = tpu.matmul %98, %85, %cst_59 {dimension_numbers = #tpu.dot_dimension_numbers<[1], [0], [0], [1], [0, 0, 1, 1], [], []>} : vector<32x32xf32>, vector<32x8xf32>, vector<32x8xf32> -> vector<32x8xf32>
      %c0_60 = arith.constant 0 : index
      %c1_61 = arith.constant 1 : index
      %c0_62 = arith.constant 0 : index
      %c0_63 = arith.constant 0 : index
      %100 = vector.load %arg11[%c0_60, %c1_61, %c0_62, %c0_63] : memref<1x4x8x32xbf16, #tpu.memory_space<vmem>>, vector<1x1x8x32xbf16>
      %101 = vector.shape_cast %100 : vector<1x1x8x32xbf16> to vector<8x32xbf16>
      %102 = arith.extf %101 : vector<8x32xbf16> to vector<8x32xf32>
      %cst_64 = arith.constant dense<0.000000e+00> : vector<32x32xf32>
      %103 = tpu.matmul %99, %102, %cst_64 {dimension_numbers = #tpu.dot_dimension_numbers<[1], [0], [0], [1], [0, 0, 1, 1], [], []>} : vector<32x8xf32>, vector<8x32xf32>, vector<32x32xf32> -> vector<32x32xf32>
      %104 = arith.addf %61, %103 : vector<32x32xf32>
      %c0_65 = arith.constant 0 : index
      %c2 = arith.constant 2 : index
      %c0_66 = arith.constant 0 : index
      %c0_67 = arith.constant 0 : index
      %105 = vector.load %arg10[%c0_65, %c2, %c0_66, %c0_67] : memref<1x12x32x8xbf16, #tpu.memory_space<vmem>>, vector<1x1x32x8xbf16>
      %106 = vector.shape_cast %105 : vector<1x1x32x8xbf16> to vector<32x8xbf16>
      %107 = arith.extf %106 : vector<32x8xbf16> to vector<32x8xf32>
      %cst_68 = arith.constant dense<0.000000e+00> : vector<32x8xf32>
      %108 = tpu.matmul %19, %107, %cst_68 {dimension_numbers = #tpu.dot_dimension_numbers<[1], [0], [0], [1], [0, 0, 1, 1], [], []>} : vector<32x32xf32>, vector<32x8xf32>, vector<32x8xf32> -> vector<32x8xf32>
      %c0_69 = arith.constant 0 : index
      %c16 = arith.constant 16 : index
      %c0_70 = arith.constant 0 : index
      %109 = vector.load %arg17[%c0_69, %c16, %c0_70] : memref<1x34x64xf32, #tpu.memory_space<vmem>>, vector<1x1x8xf32>
      %110 = vector.shape_cast %109 : vector<1x1x8xf32> to vector<1x8xf32>
      %111 = vector.broadcast %110 : vector<1x8xf32> to vector<32x8xf32>
      %112 = arith.addf %108, %111 : vector<32x8xf32>
      %c0_71 = arith.constant 0 : index
      %c6 = arith.constant 6 : index
      %c0_72 = arith.constant 0 : index
      %c0_73 = arith.constant 0 : index
      %113 = vector.load %arg10[%c0_71, %c6, %c0_72, %c0_73] : memref<1x12x32x8xbf16, #tpu.memory_space<vmem>>, vector<1x1x32x8xbf16>
      %114 = vector.shape_cast %113 : vector<1x1x32x8xbf16> to vector<32x8xbf16>
      %115 = arith.extf %114 : vector<32x8xbf16> to vector<32x8xf32>
      %cst_74 = arith.constant dense<0.000000e+00> : vector<32x8xf32>
      %116 = tpu.matmul %19, %115, %cst_74 {dimension_numbers = #tpu.dot_dimension_numbers<[1], [0], [0], [1], [0, 0, 1, 1], [], []>} : vector<32x32xf32>, vector<32x8xf32>, vector<32x8xf32> -> vector<32x8xf32>
      %c0_75 = arith.constant 0 : index
      %c17 = arith.constant 17 : index
      %c0_76 = arith.constant 0 : index
      %117 = vector.load %arg17[%c0_75, %c17, %c0_76] : memref<1x34x64xf32, #tpu.memory_space<vmem>>, vector<1x1x8xf32>
      %118 = vector.shape_cast %117 : vector<1x1x8xf32> to vector<1x8xf32>
      %119 = vector.broadcast %118 : vector<1x8xf32> to vector<32x8xf32>
      %120 = arith.addf %116, %119 : vector<32x8xf32>
      %c0_77 = arith.constant 0 : index
      %c10_78 = arith.constant 10 : index
      %c0_79 = arith.constant 0 : index
      %c0_80 = arith.constant 0 : index
      %121 = vector.load %arg10[%c0_77, %c10_78, %c0_79, %c0_80] : memref<1x12x32x8xbf16, #tpu.memory_space<vmem>>, vector<1x1x32x8xbf16>
      %122 = vector.shape_cast %121 : vector<1x1x32x8xbf16> to vector<32x8xbf16>
      %123 = arith.extf %122 : vector<32x8xbf16> to vector<32x8xf32>
      %cst_81 = arith.constant dense<0.000000e+00> : vector<32x8xf32>
      %124 = tpu.matmul %19, %123, %cst_81 {dimension_numbers = #tpu.dot_dimension_numbers<[1], [0], [0], [1], [0, 0, 1, 1], [], []>} : vector<32x32xf32>, vector<32x8xf32>, vector<32x8xf32> -> vector<32x8xf32>
      %c0_82 = arith.constant 0 : index
      %c18 = arith.constant 18 : index
      %c0_83 = arith.constant 0 : index
      %125 = vector.load %arg17[%c0_82, %c18, %c0_83] : memref<1x34x64xf32, #tpu.memory_space<vmem>>, vector<1x1x8xf32>
      %126 = vector.shape_cast %125 : vector<1x1x8xf32> to vector<1x8xf32>
      %127 = vector.broadcast %126 : vector<1x8xf32> to vector<32x8xf32>
      %128 = arith.addf %124, %127 : vector<32x8xf32>
      "tpu.trace_start"() <{level = 10 : i32, message = "qd,kd->qk"}> : () -> ()
      %cst_84 = arith.constant dense<0.000000e+00> : vector<32x32xf32>
      %129 = tpu.matmul %112, %120, %cst_84 {dimension_numbers = #tpu.dot_dimension_numbers<[1], [1], [0], [0], [0, 0, 1, 0], [], []>} : vector<32x8xf32>, vector<32x8xf32>, vector<32x32xf32> -> vector<32x32xf32>
      "tpu.trace_stop"() : () -> ()
      %cst_85 = arith.constant 0.353553385 : f32
      %130 = vector.broadcast %cst_85 : f32 to vector<32x32xf32>
      %131 = arith.mulf %129, %130 : vector<32x32xf32>
      %cst_86 = arith.constant dense<0xFF800000> : vector<32xf32>
      %132 = vector.multi_reduction <maximumf>, %131, %cst_86 [1] : vector<32x32xf32> to vector<32xf32>
      %133 = vector.shape_cast %132 : vector<32xf32> to vector<32x1xf32>
      %134 = vector.broadcast %133 : vector<32x1xf32> to vector<32x32xf32>
      %135 = arith.subf %131, %134 : vector<32x32xf32>
      %136 = math.exp %135 : vector<32x32xf32>
      %cst_87 = arith.constant dense<0.000000e+00> : vector<32xf32>
      %137 = vector.multi_reduction <add>, %136, %cst_87 [1] : vector<32x32xf32> to vector<32xf32>
      %138 = vector.shape_cast %137 : vector<32xf32> to vector<32x1xf32>
      %139 = tpu.reciprocal %138 {approx = true} : vector<32x1xf32> -> vector<32x1xf32>
      %140 = vector.broadcast %139 : vector<32x1xf32> to vector<32x32xf32>
      %141 = arith.mulf %136, %140 : vector<32x32xf32>
      %cst_88 = arith.constant dense<0.000000e+00> : vector<32x8xf32>
      %142 = tpu.matmul %141, %128, %cst_88 {dimension_numbers = #tpu.dot_dimension_numbers<[1], [0], [0], [1], [0, 0, 1, 1], [], []>} : vector<32x32xf32>, vector<32x8xf32>, vector<32x8xf32> -> vector<32x8xf32>
      %c0_89 = arith.constant 0 : index
      %c2_90 = arith.constant 2 : index
      %c0_91 = arith.constant 0 : index
      %c0_92 = arith.constant 0 : index
      %143 = vector.load %arg11[%c0_89, %c2_90, %c0_91, %c0_92] : memref<1x4x8x32xbf16, #tpu.memory_space<vmem>>, vector<1x1x8x32xbf16>
      %144 = vector.shape_cast %143 : vector<1x1x8x32xbf16> to vector<8x32xbf16>
      %145 = arith.extf %144 : vector<8x32xbf16> to vector<8x32xf32>
      %cst_93 = arith.constant dense<0.000000e+00> : vector<32x32xf32>
      %146 = tpu.matmul %142, %145, %cst_93 {dimension_numbers = #tpu.dot_dimension_numbers<[1], [0], [0], [1], [0, 0, 1, 1], [], []>} : vector<32x8xf32>, vector<8x32xf32>, vector<32x32xf32> -> vector<32x32xf32>
      %147 = arith.addf %104, %146 : vector<32x32xf32>
      %c0_94 = arith.constant 0 : index
      %c3 = arith.constant 3 : index
      %c0_95 = arith.constant 0 : index
      %c0_96 = arith.constant 0 : index
      %148 = vector.load %arg10[%c0_94, %c3, %c0_95, %c0_96] : memref<1x12x32x8xbf16, #tpu.memory_space<vmem>>, vector<1x1x32x8xbf16>
      %149 = vector.shape_cast %148 : vector<1x1x32x8xbf16> to vector<32x8xbf16>
      %150 = arith.extf %149 : vector<32x8xbf16> to vector<32x8xf32>
      %cst_97 = arith.constant dense<0.000000e+00> : vector<32x8xf32>
      %151 = tpu.matmul %19, %150, %cst_97 {dimension_numbers = #tpu.dot_dimension_numbers<[1], [0], [0], [1], [0, 0, 1, 1], [], []>} : vector<32x32xf32>, vector<32x8xf32>, vector<32x8xf32> -> vector<32x8xf32>
      %c0_98 = arith.constant 0 : index
      %c19 = arith.constant 19 : index
      %c0_99 = arith.constant 0 : index
      %152 = vector.load %arg17[%c0_98, %c19, %c0_99] : memref<1x34x64xf32, #tpu.memory_space<vmem>>, vector<1x1x8xf32>
      %153 = vector.shape_cast %152 : vector<1x1x8xf32> to vector<1x8xf32>
      %154 = vector.broadcast %153 : vector<1x8xf32> to vector<32x8xf32>
      %155 = arith.addf %151, %154 : vector<32x8xf32>
      %c0_100 = arith.constant 0 : index
      %c7 = arith.constant 7 : index
      %c0_101 = arith.constant 0 : index
      %c0_102 = arith.constant 0 : index
      %156 = vector.load %arg10[%c0_100, %c7, %c0_101, %c0_102] : memref<1x12x32x8xbf16, #tpu.memory_space<vmem>>, vector<1x1x32x8xbf16>
      %157 = vector.shape_cast %156 : vector<1x1x32x8xbf16> to vector<32x8xbf16>
      %158 = arith.extf %157 : vector<32x8xbf16> to vector<32x8xf32>
      %cst_103 = arith.constant dense<0.000000e+00> : vector<32x8xf32>
      %159 = tpu.matmul %19, %158, %cst_103 {dimension_numbers = #tpu.dot_dimension_numbers<[1], [0], [0], [1], [0, 0, 1, 1], [], []>} : vector<32x32xf32>, vector<32x8xf32>, vector<32x8xf32> -> vector<32x8xf32>
      %c0_104 = arith.constant 0 : index
      %c20 = arith.constant 20 : index
      %c0_105 = arith.constant 0 : index
      %160 = vector.load %arg17[%c0_104, %c20, %c0_105] : memref<1x34x64xf32, #tpu.memory_space<vmem>>, vector<1x1x8xf32>
      %161 = vector.shape_cast %160 : vector<1x1x8xf32> to vector<1x8xf32>
      %162 = vector.broadcast %161 : vector<1x8xf32> to vector<32x8xf32>
      %163 = arith.addf %159, %162 : vector<32x8xf32>
      %c0_106 = arith.constant 0 : index
      %c11_107 = arith.constant 11 : index
      %c0_108 = arith.constant 0 : index
      %c0_109 = arith.constant 0 : index
      %164 = vector.load %arg10[%c0_106, %c11_107, %c0_108, %c0_109] : memref<1x12x32x8xbf16, #tpu.memory_space<vmem>>, vector<1x1x32x8xbf16>
      %165 = vector.shape_cast %164 : vector<1x1x32x8xbf16> to vector<32x8xbf16>
      %166 = arith.extf %165 : vector<32x8xbf16> to vector<32x8xf32>
      %cst_110 = arith.constant dense<0.000000e+00> : vector<32x8xf32>
      %167 = tpu.matmul %19, %166, %cst_110 {dimension_numbers = #tpu.dot_dimension_numbers<[1], [0], [0], [1], [0, 0, 1, 1], [], []>} : vector<32x32xf32>, vector<32x8xf32>, vector<32x8xf32> -> vector<32x8xf32>
      %c0_111 = arith.constant 0 : index
      %c21 = arith.constant 21 : index
      %c0_112 = arith.constant 0 : index
      %168 = vector.load %arg17[%c0_111, %c21, %c0_112] : memref<1x34x64xf32, #tpu.memory_space<vmem>>, vector<1x1x8xf32>
      %169 = vector.shape_cast %168 : vector<1x1x8xf32> to vector<1x8xf32>
      %170 = vector.broadcast %169 : vector<1x8xf32> to vector<32x8xf32>
      %171 = arith.addf %167, %170 : vector<32x8xf32>
      "tpu.trace_start"() <{level = 10 : i32, message = "qd,kd->qk"}> : () -> ()
      %cst_113 = arith.constant dense<0.000000e+00> : vector<32x32xf32>
      %172 = tpu.matmul %155, %163, %cst_113 {dimension_numbers = #tpu.dot_dimension_numbers<[1], [1], [0], [0], [0, 0, 1, 0], [], []>} : vector<32x8xf32>, vector<32x8xf32>, vector<32x32xf32> -> vector<32x32xf32>
      "tpu.trace_stop"() : () -> ()
      %cst_114 = arith.constant 0.353553385 : f32
      %173 = vector.broadcast %cst_114 : f32 to vector<32x32xf32>
      %174 = arith.mulf %172, %173 : vector<32x32xf32>
      %cst_115 = arith.constant dense<0xFF800000> : vector<32xf32>
      %175 = vector.multi_reduction <maximumf>, %174, %cst_115 [1] : vector<32x32xf32> to vector<32xf32>
      %176 = vector.shape_cast %175 : vector<32xf32> to vector<32x1xf32>
      %177 = vector.broadcast %176 : vector<32x1xf32> to vector<32x32xf32>
      %178 = arith.subf %174, %177 : vector<32x32xf32>
      %179 = math.exp %178 : vector<32x32xf32>
      %cst_116 = arith.constant dense<0.000000e+00> : vector<32xf32>
      %180 = vector.multi_reduction <add>, %179, %cst_116 [1] : vector<32x32xf32> to vector<32xf32>
      %181 = vector.shape_cast %180 : vector<32xf32> to vector<32x1xf32>
      %182 = tpu.reciprocal %181 {approx = true} : vector<32x1xf32> -> vector<32x1xf32>
      %183 = vector.broadcast %182 : vector<32x1xf32> to vector<32x32xf32>
      %184 = arith.mulf %179, %183 : vector<32x32xf32>
      %cst_117 = arith.constant dense<0.000000e+00> : vector<32x8xf32>
      %185 = tpu.matmul %184, %171, %cst_117 {dimension_numbers = #tpu.dot_dimension_numbers<[1], [0], [0], [1], [0, 0, 1, 1], [], []>} : vector<32x32xf32>, vector<32x8xf32>, vector<32x8xf32> -> vector<32x8xf32>
      %c0_118 = arith.constant 0 : index
      %c3_119 = arith.constant 3 : index
      %c0_120 = arith.constant 0 : index
      %c0_121 = arith.constant 0 : index
      %186 = vector.load %arg11[%c0_118, %c3_119, %c0_120, %c0_121] : memref<1x4x8x32xbf16, #tpu.memory_space<vmem>>, vector<1x1x8x32xbf16>
      %187 = vector.shape_cast %186 : vector<1x1x8x32xbf16> to vector<8x32xbf16>
      %188 = arith.extf %187 : vector<8x32xbf16> to vector<8x32xf32>
      %cst_122 = arith.constant dense<0.000000e+00> : vector<32x32xf32>
      %189 = tpu.matmul %185, %188, %cst_122 {dimension_numbers = #tpu.dot_dimension_numbers<[1], [0], [0], [1], [0, 0, 1, 1], [], []>} : vector<32x8xf32>, vector<8x32xf32>, vector<32x32xf32> -> vector<32x32xf32>
      %190 = arith.addf %147, %189 : vector<32x32xf32>
      %c0_123 = arith.constant 0 : index
      %c2_124 = arith.constant 2 : index
      %c0_125 = arith.constant 0 : index
      %191 = vector.load %arg17[%c0_123, %c2_124, %c0_125] : memref<1x34x64xf32, #tpu.memory_space<vmem>>, vector<1x1x32xf32>
      %192 = vector.shape_cast %191 : vector<1x1x32xf32> to vector<1x32xf32>
      %193 = vector.broadcast %192 : vector<1x32xf32> to vector<32x32xf32>
      %194 = arith.addf %190, %193 : vector<32x32xf32>
      %195 = arith.addf %194, %19 : vector<32x32xf32>
      %c0_126 = arith.constant 0 : index
      %c0_127 = arith.constant 0 : index
      %c0_128 = arith.constant 0 : index
      %196 = vector.load %arg17[%c0_126, %c0_127, %c0_128] : memref<1x34x64xf32, #tpu.memory_space<vmem>>, vector<1x1x32xf32>
      %197 = vector.shape_cast %196 : vector<1x1x32xf32> to vector<1x32xf32>
      %c0_129 = arith.constant 0 : index
      %c1_130 = arith.constant 1 : index
      %c0_131 = arith.constant 0 : index
      %198 = vector.load %arg17[%c0_129, %c1_130, %c0_131] : memref<1x34x64xf32, #tpu.memory_space<vmem>>, vector<1x1x32xf32>
      %199 = vector.shape_cast %198 : vector<1x1x32xf32> to vector<1x32xf32>
      %cst_132 = arith.constant dense<0.000000e+00> : vector<32xf32>
      %200 = vector.multi_reduction <add>, %195, %cst_132 [1] : vector<32x32xf32> to vector<32xf32>
      %201 = vector.shape_cast %200 : vector<32xf32> to vector<32x1xf32>
      %cst_133 = arith.constant 3.200000e+01 : f32
      %202 = vector.broadcast %cst_133 : f32 to vector<32x1xf32>
      %203 = arith.divf %201, %202 : vector<32x1xf32>
      %204 = arith.mulf %195, %195 : vector<32x32xf32>
      %cst_134 = arith.constant dense<0.000000e+00> : vector<32xf32>
      %205 = vector.multi_reduction <add>, %204, %cst_134 [1] : vector<32x32xf32> to vector<32xf32>
      %206 = vector.shape_cast %205 : vector<32xf32> to vector<32x1xf32>
      %cst_135 = arith.constant 3.200000e+01 : f32
      %207 = vector.broadcast %cst_135 : f32 to vector<32x1xf32>
      %208 = arith.divf %206, %207 : vector<32x1xf32>
      %209 = arith.mulf %203, %203 : vector<32x1xf32>
      %210 = arith.subf %208, %209 : vector<32x1xf32>
      %cst_136 = arith.constant 0.000000e+00 : f32
      %211 = vector.broadcast %cst_136 : f32 to vector<32x1xf32>
      %212 = arith.maximumf %210, %211 : vector<32x1xf32>
      %213 = vector.broadcast %203 : vector<32x1xf32> to vector<32x32xf32>
      %214 = arith.subf %195, %213 : vector<32x32xf32>
      %cst_137 = arith.constant 9.99999996E-13 : f32
      %215 = vector.broadcast %cst_137 : f32 to vector<32x1xf32>
      %216 = arith.addf %212, %215 : vector<32x1xf32>
      %217 = math.rsqrt %216 : vector<32x1xf32>
      %218 = vector.broadcast %217 : vector<32x1xf32> to vector<32x32xf32>
      %219 = arith.mulf %214, %218 : vector<32x32xf32>
      %220 = vector.broadcast %197 : vector<1x32xf32> to vector<32x32xf32>
      %221 = arith.mulf %219, %220 : vector<32x32xf32>
      %222 = vector.broadcast %199 : vector<1x32xf32> to vector<32x32xf32>
      %223 = arith.addf %221, %222 : vector<32x32xf32>
      %c0_138 = arith.constant 0 : index
      %c0_139 = arith.constant 0 : index
      %224 = vector.load %arg23[%c0_138, %c0_139] : memref<32x32xf32, #tpu.memory_space<vmem>>, vector<32x32xf32>
      tpu.vector_store %arg23[%c0_138, %c0_139], %223 {strides = array<i32>} : memref<32x32xf32, #tpu.memory_space<vmem>>, vector<32x32xf32>,
      %c2_i32_140 = arith.constant 2 : i32
      %c0_i32_141 = arith.constant 0 : i32
      %225 = arith.cmpi eq, %c2_i32_140, %c0_i32_141 : i32
      %c1_i32 = arith.constant 1 : i32
      %226 = arith.select %225, %c1_i32, %c2_i32_140 : i32
      %227 = arith.remsi %18, %226 : i32
      %c0_i32_142 = arith.constant 0 : i32
      %228 = arith.cmpi ne, %227, %c0_i32_142 : i32
      %c0_i32_143 = arith.constant 0 : i32
      %229 = arith.cmpi slt, %227, %c0_i32_143 : i32
      %c0_i32_144 = arith.constant 0 : i32
      %230 = arith.cmpi slt, %226, %c0_i32_144 : i32
      %231 = arith.xori %229, %230 : i1
      %232 = arith.andi %231, %228 : i1
      %233 = arith.addi %227, %226 : i32
      %234 = arith.select %232, %233, %227 : i32
      %c0_i32_145 = arith.constant 0 : i32
      %235 = arith.cmpi eq, %234, %c0_i32_145 : i32
      %236 = arith.extui %235 : i1 to i32
      %c0_i32_146 = arith.constant 0 : i32
      %237 = arith.cmpi ne, %236, %c0_i32_146 : i32
      scf.if %237 {
        %c0_181 = arith.constant 0 : index
        %c0_182 = arith.constant 0 : index
        %298 = vector.load %arg23[%c0_181, %c0_182] : memref<32x32xf32, #tpu.memory_space<vmem>>, vector<32x32xf32>
        %c0_183 = arith.constant 0 : index
        %c0_184 = arith.constant 0 : index
        %299 = vector.load %arg22[%c0_183, %c0_184] : memref<24x32xf32, #tpu.memory_space<vmem>>, vector<24x32xf32>
        %c0_185 = arith.constant 0 : index
        %c0_186 = arith.constant 0 : index
        %c0_187 = arith.constant 0 : index
        %c0_188 = arith.constant 0 : index
        %300 = vector.load %arg12[%c0_185, %c0_186, %c0_187, %c0_188] : memref<1x4x32x8xbf16, #tpu.memory_space<vmem>>, vector<1x1x32x8xbf16>
        %301 = vector.shape_cast %300 : vector<1x1x32x8xbf16> to vector<32x8xbf16>
        %302 = arith.extf %301 : vector<32x8xbf16> to vector<32x8xf32>
        %cst_189 = arith.constant dense<0.000000e+00> : vector<32x8xf32>
        %303 = tpu.matmul %298, %302, %cst_189 {dimension_numbers = #tpu.dot_dimension_numbers<[1], [0], [0], [1], [0, 0, 1, 1], [], []>} : vector<32x32xf32>, vector<32x8xf32>, vector<32x8xf32> -> vector<32x8xf32>
        %c0_190 = arith.constant 0 : index
        %c22 = arith.constant 22 : index
        %c0_191 = arith.constant 0 : index
        %304 = vector.load %arg17[%c0_190, %c22, %c0_191] : memref<1x34x64xf32, #tpu.memory_space<vmem>>, vector<1x1x8xf32>
        %305 = vector.shape_cast %304 : vector<1x1x8xf32> to vector<1x8xf32>
        %306 = vector.broadcast %305 : vector<1x8xf32> to vector<32x8xf32>
        %307 = arith.addf %303, %306 : vector<32x8xf32>
        %c0_192 = arith.constant 0 : index
        %c0_193 = arith.constant 0 : index
        %c0_194 = arith.constant 0 : index
        %c0_195 = arith.constant 0 : index
        %308 = vector.load %arg13[%c0_192, %c0_193, %c0_194, %c0_195] : memref<1x8x32x8xbf16, #tpu.memory_space<vmem>>, vector<1x1x32x8xbf16>
        %309 = vector.shape_cast %308 : vector<1x1x32x8xbf16> to vector<32x8xbf16>
        %310 = arith.extf %309 : vector<32x8xbf16> to vector<32x8xf32>
        %cst_196 = arith.constant dense<0.000000e+00> : vector<24x8xf32>
        %311 = tpu.matmul %299, %310, %cst_196 {dimension_numbers = #tpu.dot_dimension_numbers<[1], [0], [0], [1], [0, 0, 1, 1], [], []>} : vector<24x32xf32>, vector<32x8xf32>, vector<24x8xf32> -> vector<24x8xf32>
        %c0_197 = arith.constant 0 : index
        %c23 = arith.constant 23 : index
        %c0_198 = arith.constant 0 : index
        %312 = vector.load %arg17[%c0_197, %c23, %c0_198] : memref<1x34x64xf32, #tpu.memory_space<vmem>>, vector<1x1x8xf32>
        %313 = vector.shape_cast %312 : vector<1x1x8xf32> to vector<1x8xf32>
        %314 = vector.broadcast %313 : vector<1x8xf32> to vector<24x8xf32>
        %315 = arith.addf %311, %314 : vector<24x8xf32>
        %c0_199 = arith.constant 0 : index
        %c4_200 = arith.constant 4 : index
        %c0_201 = arith.constant 0 : index
        %c0_202 = arith.constant 0 : index
        %316 = vector.load %arg13[%c0_199, %c4_200, %c0_201, %c0_202] : memref<1x8x32x8xbf16, #tpu.memory_space<vmem>>, vector<1x1x32x8xbf16>
        %317 = vector.shape_cast %316 : vector<1x1x32x8xbf16> to vector<32x8xbf16>
        %318 = arith.extf %317 : vector<32x8xbf16> to vector<32x8xf32>
        %cst_203 = arith.constant dense<0.000000e+00> : vector<24x8xf32>
        %319 = tpu.matmul %299, %318, %cst_203 {dimension_numbers = #tpu.dot_dimension_numbers<[1], [0], [0], [1], [0, 0, 1, 1], [], []>} : vector<24x32xf32>, vector<32x8xf32>, vector<24x8xf32> -> vector<24x8xf32>
        %c0_204 = arith.constant 0 : index
        %c24 = arith.constant 24 : index
        %c0_205 = arith.constant 0 : index
        %320 = vector.load %arg17[%c0_204, %c24, %c0_205] : memref<1x34x64xf32, #tpu.memory_space<vmem>>, vector<1x1x8xf32>
        %321 = vector.shape_cast %320 : vector<1x1x8xf32> to vector<1x8xf32>
        %322 = vector.broadcast %321 : vector<1x8xf32> to vector<24x8xf32>
        %323 = arith.addf %319, %322 : vector<24x8xf32>
        "tpu.trace_start"() <{level = 10 : i32, message = "qd,kd->qk"}> : () -> ()
        %cst_206 = arith.constant dense<0.000000e+00> : vector<32x24xf32>
        %324 = tpu.matmul %307, %315, %cst_206 {dimension_numbers = #tpu.dot_dimension_numbers<[1], [1], [0], [0], [0, 0, 1, 0], [], []>} : vector<32x8xf32>, vector<24x8xf32>, vector<32x24xf32> -> vector<32x24xf32>
        "tpu.trace_stop"() : () -> ()
        %cst_207 = arith.constant 0.353553385 : f32
        %325 = vector.broadcast %cst_207 : f32 to vector<32x24xf32>
        %326 = arith.mulf %324, %325 : vector<32x24xf32>
        %cst_208 = arith.constant -1.000000e+30 : f32
        %327 = vector.shape_cast %2 : vector<1x24xi1> to vector<1x24xi1>
        %328 = vector.broadcast %327 : vector<1x24xi1> to vector<32x24xi1>
        %329 = vector.broadcast %cst_208 : f32 to vector<32x24xf32>
        %330 = arith.select %328, %326, %329 : vector<32x24xi1>, vector<32x24xf32>
        %cst_209 = arith.constant dense<0xFF800000> : vector<32xf32>
        %331 = vector.multi_reduction <maximumf>, %330, %cst_209 [1] : vector<32x24xf32> to vector<32xf32>
        %332 = vector.shape_cast %331 : vector<32xf32> to vector<32x1xf32>
        %333 = vector.broadcast %332 : vector<32x1xf32> to vector<32x24xf32>
        %334 = arith.subf %330, %333 : vector<32x24xf32>
        %335 = math.exp %334 : vector<32x24xf32>
        %cst_210 = arith.constant dense<0.000000e+00> : vector<32xf32>
        %336 = vector.multi_reduction <add>, %335, %cst_210 [1] : vector<32x24xf32> to vector<32xf32>
        %337 = vector.shape_cast %336 : vector<32xf32> to vector<32x1xf32>
        %338 = tpu.reciprocal %337 {approx = true} : vector<32x1xf32> -> vector<32x1xf32>
        %339 = vector.broadcast %338 : vector<32x1xf32> to vector<32x24xf32>
        %340 = arith.mulf %335, %339 : vector<32x24xf32>
        %cst_211 = arith.constant dense<0.000000e+00> : vector<32x8xf32>
        %341 = tpu.matmul %340, %323, %cst_211 {dimension_numbers = #tpu.dot_dimension_numbers<[1], [0], [0], [1], [0, 0, 1, 1], [], []>} : vector<32x24xf32>, vector<24x8xf32>, vector<32x8xf32> -> vector<32x8xf32>
        %c0_212 = arith.constant 0 : index
        %c0_213 = arith.constant 0 : index
        %c0_214 = arith.constant 0 : index
        %c0_215 = arith.constant 0 : index
        %342 = vector.load %arg14[%c0_212, %c0_213, %c0_214, %c0_215] : memref<1x4x8x32xbf16, #tpu.memory_space<vmem>>, vector<1x1x8x32xbf16>
        %343 = vector.shape_cast %342 : vector<1x1x8x32xbf16> to vector<8x32xbf16>
        %344 = arith.extf %343 : vector<8x32xbf16> to vector<8x32xf32>
        %cst_216 = arith.constant dense<0.000000e+00> : vector<32x32xf32>
        %345 = tpu.matmul %341, %344, %cst_216 {dimension_numbers = #tpu.dot_dimension_numbers<[1], [0], [0], [1], [0, 0, 1, 1], [], []>} : vector<32x8xf32>, vector<8x32xf32>, vector<32x32xf32> -> vector<32x32xf32>
        %c0_217 = arith.constant 0 : index
        %c1_218 = arith.constant 1 : index
        %c0_219 = arith.constant 0 : index
        %c0_220 = arith.constant 0 : index
        %346 = vector.load %arg12[%c0_217, %c1_218, %c0_219, %c0_220] : memref<1x4x32x8xbf16, #tpu.memory_space<vmem>>, vector<1x1x32x8xbf16>
        %347 = vector.shape_cast %346 : vector<1x1x32x8xbf16> to vector<32x8xbf16>
        %348 = arith.extf %347 : vector<32x8xbf16> to vector<32x8xf32>
        %cst_221 = arith.constant dense<0.000000e+00> : vector<32x8xf32>
        %349 = tpu.matmul %298, %348, %cst_221 {dimension_numbers = #tpu.dot_dimension_numbers<[1], [0], [0], [1], [0, 0, 1, 1], [], []>} : vector<32x32xf32>, vector<32x8xf32>, vector<32x8xf32> -> vector<32x8xf32>
        %c0_222 = arith.constant 0 : index
        %c25 = arith.constant 25 : index
        %c0_223 = arith.constant 0 : index
        %350 = vector.load %arg17[%c0_222, %c25, %c0_223] : memref<1x34x64xf32, #tpu.memory_space<vmem>>, vector<1x1x8xf32>
        %351 = vector.shape_cast %350 : vector<1x1x8xf32> to vector<1x8xf32>
        %352 = vector.broadcast %351 : vector<1x8xf32> to vector<32x8xf32>
        %353 = arith.addf %349, %352 : vector<32x8xf32>
        %c0_224 = arith.constant 0 : index
        %c1_225 = arith.constant 1 : index
        %c0_226 = arith.constant 0 : index
        %c0_227 = arith.constant 0 : index
        %354 = vector.load %arg13[%c0_224, %c1_225, %c0_226, %c0_227] : memref<1x8x32x8xbf16, #tpu.memory_space<vmem>>, vector<1x1x32x8xbf16>
        %355 = vector.shape_cast %354 : vector<1x1x32x8xbf16> to vector<32x8xbf16>
        %356 = arith.extf %355 : vector<32x8xbf16> to vector<32x8xf32>
        %cst_228 = arith.constant dense<0.000000e+00> : vector<24x8xf32>
        %357 = tpu.matmul %299, %356, %cst_228 {dimension_numbers = #tpu.dot_dimension_numbers<[1], [0], [0], [1], [0, 0, 1, 1], [], []>} : vector<24x32xf32>, vector<32x8xf32>, vector<24x8xf32> -> vector<24x8xf32>
        %c0_229 = arith.constant 0 : index
        %c26 = arith.constant 26 : index
        %c0_230 = arith.constant 0 : index
        %358 = vector.load %arg17[%c0_229, %c26, %c0_230] : memref<1x34x64xf32, #tpu.memory_space<vmem>>, vector<1x1x8xf32>
        %359 = vector.shape_cast %358 : vector<1x1x8xf32> to vector<1x8xf32>
        %360 = vector.broadcast %359 : vector<1x8xf32> to vector<24x8xf32>
        %361 = arith.addf %357, %360 : vector<24x8xf32>
        %c0_231 = arith.constant 0 : index
        %c5_232 = arith.constant 5 : index
        %c0_233 = arith.constant 0 : index
        %c0_234 = arith.constant 0 : index
        %362 = vector.load %arg13[%c0_231, %c5_232, %c0_233, %c0_234] : memref<1x8x32x8xbf16, #tpu.memory_space<vmem>>, vector<1x1x32x8xbf16>
        %363 = vector.shape_cast %362 : vector<1x1x32x8xbf16> to vector<32x8xbf16>
        %364 = arith.extf %363 : vector<32x8xbf16> to vector<32x8xf32>
        %cst_235 = arith.constant dense<0.000000e+00> : vector<24x8xf32>
        %365 = tpu.matmul %299, %364, %cst_235 {dimension_numbers = #tpu.dot_dimension_numbers<[1], [0], [0], [1], [0, 0, 1, 1], [], []>} : vector<24x32xf32>, vector<32x8xf32>, vector<24x8xf32> -> vector<24x8xf32>
        %c0_236 = arith.constant 0 : index
        %c27 = arith.constant 27 : index
        %c0_237 = arith.constant 0 : index
        %366 = vector.load %arg17[%c0_236, %c27, %c0_237] : memref<1x34x64xf32, #tpu.memory_space<vmem>>, vector<1x1x8xf32>
        %367 = vector.shape_cast %366 : vector<1x1x8xf32> to vector<1x8xf32>
        %368 = vector.broadcast %367 : vector<1x8xf32> to vector<24x8xf32>
        %369 = arith.addf %365, %368 : vector<24x8xf32>
        "tpu.trace_start"() <{level = 10 : i32, message = "qd,kd->qk"}> : () -> ()
        %cst_238 = arith.constant dense<0.000000e+00> : vector<32x24xf32>
        %370 = tpu.matmul %353, %361, %cst_238 {dimension_numbers = #tpu.dot_dimension_numbers<[1], [1], [0], [0], [0, 0, 1, 0], [], []>} : vector<32x8xf32>, vector<24x8xf32>, vector<32x24xf32> -> vector<32x24xf32>
        "tpu.trace_stop"() : () -> ()
        %cst_239 = arith.constant 0.353553385 : f32
        %371 = vector.broadcast %cst_239 : f32 to vector<32x24xf32>
        %372 = arith.mulf %370, %371 : vector<32x24xf32>
        %cst_240 = arith.constant -1.000000e+30 : f32
        %373 = vector.shape_cast %2 : vector<1x24xi1> to vector<1x24xi1>
        %374 = vector.broadcast %373 : vector<1x24xi1> to vector<32x24xi1>
        %375 = vector.broadcast %cst_240 : f32 to vector<32x24xf32>
        %376 = arith.select %374, %372, %375 : vector<32x24xi1>, vector<32x24xf32>
        %cst_241 = arith.constant dense<0xFF800000> : vector<32xf32>
        %377 = vector.multi_reduction <maximumf>, %376, %cst_241 [1] : vector<32x24xf32> to vector<32xf32>
        %378 = vector.shape_cast %377 : vector<32xf32> to vector<32x1xf32>
        %379 = vector.broadcast %378 : vector<32x1xf32> to vector<32x24xf32>
        %380 = arith.subf %376, %379 : vector<32x24xf32>
        %381 = math.exp %380 : vector<32x24xf32>
        %cst_242 = arith.constant dense<0.000000e+00> : vector<32xf32>
        %382 = vector.multi_reduction <add>, %381, %cst_242 [1] : vector<32x24xf32> to vector<32xf32>
        %383 = vector.shape_cast %382 : vector<32xf32> to vector<32x1xf32>
        %384 = tpu.reciprocal %383 {approx = true} : vector<32x1xf32> -> vector<32x1xf32>
        %385 = vector.broadcast %384 : vector<32x1xf32> to vector<32x24xf32>
        %386 = arith.mulf %381, %385 : vector<32x24xf32>
        %cst_243 = arith.constant dense<0.000000e+00> : vector<32x8xf32>
        %387 = tpu.matmul %386, %369, %cst_243 {dimension_numbers = #tpu.dot_dimension_numbers<[1], [0], [0], [1], [0, 0, 1, 1], [], []>} : vector<32x24xf32>, vector<24x8xf32>, vector<32x8xf32> -> vector<32x8xf32>
        %c0_244 = arith.constant 0 : index
        %c1_245 = arith.constant 1 : index
        %c0_246 = arith.constant 0 : index
        %c0_247 = arith.constant 0 : index
        %388 = vector.load %arg14[%c0_244, %c1_245, %c0_246, %c0_247] : memref<1x4x8x32xbf16, #tpu.memory_space<vmem>>, vector<1x1x8x32xbf16>
        %389 = vector.shape_cast %388 : vector<1x1x8x32xbf16> to vector<8x32xbf16>
        %390 = arith.extf %389 : vector<8x32xbf16> to vector<8x32xf32>
        %cst_248 = arith.constant dense<0.000000e+00> : vector<32x32xf32>
        %391 = tpu.matmul %387, %390, %cst_248 {dimension_numbers = #tpu.dot_dimension_numbers<[1], [0], [0], [1], [0, 0, 1, 1], [], []>} : vector<32x8xf32>, vector<8x32xf32>, vector<32x32xf32> -> vector<32x32xf32>
        %392 = arith.addf %345, %391 : vector<32x32xf32>
        %c0_249 = arith.constant 0 : index
        %c2_250 = arith.constant 2 : index
        %c0_251 = arith.constant 0 : index
        %c0_252 = arith.constant 0 : index
        %393 = vector.load %arg12[%c0_249, %c2_250, %c0_251, %c0_252] : memref<1x4x32x8xbf16, #tpu.memory_space<vmem>>, vector<1x1x32x8xbf16>
        %394 = vector.shape_cast %393 : vector<1x1x32x8xbf16> to vector<32x8xbf16>
        %395 = arith.extf %394 : vector<32x8xbf16> to vector<32x8xf32>
        %cst_253 = arith.constant dense<0.000000e+00> : vector<32x8xf32>
        %396 = tpu.matmul %298, %395, %cst_253 {dimension_numbers = #tpu.dot_dimension_numbers<[1], [0], [0], [1], [0, 0, 1, 1], [], []>} : vector<32x32xf32>, vector<32x8xf32>, vector<32x8xf32> -> vector<32x8xf32>
        %c0_254 = arith.constant 0 : index
        %c28 = arith.constant 28 : index
        %c0_255 = arith.constant 0 : index
        %397 = vector.load %arg17[%c0_254, %c28, %c0_255] : memref<1x34x64xf32, #tpu.memory_space<vmem>>, vector<1x1x8xf32>
        %398 = vector.shape_cast %397 : vector<1x1x8xf32> to vector<1x8xf32>
        %399 = vector.broadcast %398 : vector<1x8xf32> to vector<32x8xf32>
        %400 = arith.addf %396, %399 : vector<32x8xf32>
        %c0_256 = arith.constant 0 : index
        %c2_257 = arith.constant 2 : index
        %c0_258 = arith.constant 0 : index
        %c0_259 = arith.constant 0 : index
        %401 = vector.load %arg13[%c0_256, %c2_257, %c0_258, %c0_259] : memref<1x8x32x8xbf16, #tpu.memory_space<vmem>>, vector<1x1x32x8xbf16>
        %402 = vector.shape_cast %401 : vector<1x1x32x8xbf16> to vector<32x8xbf16>
        %403 = arith.extf %402 : vector<32x8xbf16> to vector<32x8xf32>
        %cst_260 = arith.constant dense<0.000000e+00> : vector<24x8xf32>
        %404 = tpu.matmul %299, %403, %cst_260 {dimension_numbers = #tpu.dot_dimension_numbers<[1], [0], [0], [1], [0, 0, 1, 1], [], []>} : vector<24x32xf32>, vector<32x8xf32>, vector<24x8xf32> -> vector<24x8xf32>
        %c0_261 = arith.constant 0 : index
        %c29 = arith.constant 29 : index
        %c0_262 = arith.constant 0 : index
        %405 = vector.load %arg17[%c0_261, %c29, %c0_262] : memref<1x34x64xf32, #tpu.memory_space<vmem>>, vector<1x1x8xf32>
        %406 = vector.shape_cast %405 : vector<1x1x8xf32> to vector<1x8xf32>
        %407 = vector.broadcast %406 : vector<1x8xf32> to vector<24x8xf32>
        %408 = arith.addf %404, %407 : vector<24x8xf32>
        %c0_263 = arith.constant 0 : index
        %c6_264 = arith.constant 6 : index
        %c0_265 = arith.constant 0 : index
        %c0_266 = arith.constant 0 : index
        %409 = vector.load %arg13[%c0_263, %c6_264, %c0_265, %c0_266] : memref<1x8x32x8xbf16, #tpu.memory_space<vmem>>, vector<1x1x32x8xbf16>
        %410 = vector.shape_cast %409 : vector<1x1x32x8xbf16> to vector<32x8xbf16>
        %411 = arith.extf %410 : vector<32x8xbf16> to vector<32x8xf32>
        %cst_267 = arith.constant dense<0.000000e+00> : vector<24x8xf32>
        %412 = tpu.matmul %299, %411, %cst_267 {dimension_numbers = #tpu.dot_dimension_numbers<[1], [0], [0], [1], [0, 0, 1, 1], [], []>} : vector<24x32xf32>, vector<32x8xf32>, vector<24x8xf32> -> vector<24x8xf32>
        %c0_268 = arith.constant 0 : index
        %c30 = arith.constant 30 : index
        %c0_269 = arith.constant 0 : index
        %413 = vector.load %arg17[%c0_268, %c30, %c0_269] : memref<1x34x64xf32, #tpu.memory_space<vmem>>, vector<1x1x8xf32>
        %414 = vector.shape_cast %413 : vector<1x1x8xf32> to vector<1x8xf32>
        %415 = vector.broadcast %414 : vector<1x8xf32> to vector<24x8xf32>
        %416 = arith.addf %412, %415 : vector<24x8xf32>
        "tpu.trace_start"() <{level = 10 : i32, message = "qd,kd->qk"}> : () -> ()
        %cst_270 = arith.constant dense<0.000000e+00> : vector<32x24xf32>
        %417 = tpu.matmul %400, %408, %cst_270 {dimension_numbers = #tpu.dot_dimension_numbers<[1], [1], [0], [0], [0, 0, 1, 0], [], []>} : vector<32x8xf32>, vector<24x8xf32>, vector<32x24xf32> -> vector<32x24xf32>
        "tpu.trace_stop"() : () -> ()
        %cst_271 = arith.constant 0.353553385 : f32
        %418 = vector.broadcast %cst_271 : f32 to vector<32x24xf32>
        %419 = arith.mulf %417, %418 : vector<32x24xf32>
        %cst_272 = arith.constant -1.000000e+30 : f32
        %420 = vector.shape_cast %2 : vector<1x24xi1> to vector<1x24xi1>
        %421 = vector.broadcast %420 : vector<1x24xi1> to vector<32x24xi1>
        %422 = vector.broadcast %cst_272 : f32 to vector<32x24xf32>
        %423 = arith.select %421, %419, %422 : vector<32x24xi1>, vector<32x24xf32>
        %cst_273 = arith.constant dense<0xFF800000> : vector<32xf32>
        %424 = vector.multi_reduction <maximumf>, %423, %cst_273 [1] : vector<32x24xf32> to vector<32xf32>
        %425 = vector.shape_cast %424 : vector<32xf32> to vector<32x1xf32>
        %426 = vector.broadcast %425 : vector<32x1xf32> to vector<32x24xf32>
        %427 = arith.subf %423, %426 : vector<32x24xf32>
        %428 = math.exp %427 : vector<32x24xf32>
        %cst_274 = arith.constant dense<0.000000e+00> : vector<32xf32>
        %429 = vector.multi_reduction <add>, %428, %cst_274 [1] : vector<32x24xf32> to vector<32xf32>
        %430 = vector.shape_cast %429 : vector<32xf32> to vector<32x1xf32>
        %431 = tpu.reciprocal %430 {approx = true} : vector<32x1xf32> -> vector<32x1xf32>
        %432 = vector.broadcast %431 : vector<32x1xf32> to vector<32x24xf32>
        %433 = arith.mulf %428, %432 : vector<32x24xf32>
        %cst_275 = arith.constant dense<0.000000e+00> : vector<32x8xf32>
        %434 = tpu.matmul %433, %416, %cst_275 {dimension_numbers = #tpu.dot_dimension_numbers<[1], [0], [0], [1], [0, 0, 1, 1], [], []>} : vector<32x24xf32>, vector<24x8xf32>, vector<32x8xf32> -> vector<32x8xf32>
        %c0_276 = arith.constant 0 : index
        %c2_277 = arith.constant 2 : index
        %c0_278 = arith.constant 0 : index
        %c0_279 = arith.constant 0 : index
        %435 = vector.load %arg14[%c0_276, %c2_277, %c0_278, %c0_279] : memref<1x4x8x32xbf16, #tpu.memory_space<vmem>>, vector<1x1x8x32xbf16>
        %436 = vector.shape_cast %435 : vector<1x1x8x32xbf16> to vector<8x32xbf16>
        %437 = arith.extf %436 : vector<8x32xbf16> to vector<8x32xf32>
        %cst_280 = arith.constant dense<0.000000e+00> : vector<32x32xf32>
        %438 = tpu.matmul %434, %437, %cst_280 {dimension_numbers = #tpu.dot_dimension_numbers<[1], [0], [0], [1], [0, 0, 1, 1], [], []>} : vector<32x8xf32>, vector<8x32xf32>, vector<32x32xf32> -> vector<32x32xf32>
        %439 = arith.addf %392, %438 : vector<32x32xf32>
        %c0_281 = arith.constant 0 : index
        %c3_282 = arith.constant 3 : index
        %c0_283 = arith.constant 0 : index
        %c0_284 = arith.constant 0 : index
        %440 = vector.load %arg12[%c0_281, %c3_282, %c0_283, %c0_284] : memref<1x4x32x8xbf16, #tpu.memory_space<vmem>>, vector<1x1x32x8xbf16>
        %441 = vector.shape_cast %440 : vector<1x1x32x8xbf16> to vector<32x8xbf16>
        %442 = arith.extf %441 : vector<32x8xbf16> to vector<32x8xf32>
        %cst_285 = arith.constant dense<0.000000e+00> : vector<32x8xf32>
        %443 = tpu.matmul %298, %442, %cst_285 {dimension_numbers = #tpu.dot_dimension_numbers<[1], [0], [0], [1], [0, 0, 1, 1], [], []>} : vector<32x32xf32>, vector<32x8xf32>, vector<32x8xf32> -> vector<32x8xf32>
        %c0_286 = arith.constant 0 : index
        %c31 = arith.constant 31 : index
        %c0_287 = arith.constant 0 : index
        %444 = vector.load %arg17[%c0_286, %c31, %c0_287] : memref<1x34x64xf32, #tpu.memory_space<vmem>>, vector<1x1x8xf32>
        %445 = vector.shape_cast %444 : vector<1x1x8xf32> to vector<1x8xf32>
        %446 = vector.broadcast %445 : vector<1x8xf32> to vector<32x8xf32>
        %447 = arith.addf %443, %446 : vector<32x8xf32>
        %c0_288 = arith.constant 0 : index
        %c3_289 = arith.constant 3 : index
        %c0_290 = arith.constant 0 : index
        %c0_291 = arith.constant 0 : index
        %448 = vector.load %arg13[%c0_288, %c3_289, %c0_290, %c0_291] : memref<1x8x32x8xbf16, #tpu.memory_space<vmem>>, vector<1x1x32x8xbf16>
        %449 = vector.shape_cast %448 : vector<1x1x32x8xbf16> to vector<32x8xbf16>
        %450 = arith.extf %449 : vector<32x8xbf16> to vector<32x8xf32>
        %cst_292 = arith.constant dense<0.000000e+00> : vector<24x8xf32>
        %451 = tpu.matmul %299, %450, %cst_292 {dimension_numbers = #tpu.dot_dimension_numbers<[1], [0], [0], [1], [0, 0, 1, 1], [], []>} : vector<24x32xf32>, vector<32x8xf32>, vector<24x8xf32> -> vector<24x8xf32>
        %c0_293 = arith.constant 0 : index
        %c32 = arith.constant 32 : index
        %c0_294 = arith.constant 0 : index
        %452 = vector.load %arg17[%c0_293, %c32, %c0_294] : memref<1x34x64xf32, #tpu.memory_space<vmem>>, vector<1x1x8xf32>
        %453 = vector.shape_cast %452 : vector<1x1x8xf32> to vector<1x8xf32>
        %454 = vector.broadcast %453 : vector<1x8xf32> to vector<24x8xf32>
        %455 = arith.addf %451, %454 : vector<24x8xf32>
        %c0_295 = arith.constant 0 : index
        %c7_296 = arith.constant 7 : index
        %c0_297 = arith.constant 0 : index
        %c0_298 = arith.constant 0 : index
        %456 = vector.load %arg13[%c0_295, %c7_296, %c0_297, %c0_298] : memref<1x8x32x8xbf16, #tpu.memory_space<vmem>>, vector<1x1x32x8xbf16>
        %457 = vector.shape_cast %456 : vector<1x1x32x8xbf16> to vector<32x8xbf16>
        %458 = arith.extf %457 : vector<32x8xbf16> to vector<32x8xf32>
        %cst_299 = arith.constant dense<0.000000e+00> : vector<24x8xf32>
        %459 = tpu.matmul %299, %458, %cst_299 {dimension_numbers = #tpu.dot_dimension_numbers<[1], [0], [0], [1], [0, 0, 1, 1], [], []>} : vector<24x32xf32>, vector<32x8xf32>, vector<24x8xf32> -> vector<24x8xf32>
        %c0_300 = arith.constant 0 : index
        %c33 = arith.constant 33 : index
        %c0_301 = arith.constant 0 : index
        %460 = vector.load %arg17[%c0_300, %c33, %c0_301] : memref<1x34x64xf32, #tpu.memory_space<vmem>>, vector<1x1x8xf32>
        %461 = vector.shape_cast %460 : vector<1x1x8xf32> to vector<1x8xf32>
        %462 = vector.broadcast %461 : vector<1x8xf32> to vector<24x8xf32>
        %463 = arith.addf %459, %462 : vector<24x8xf32>
        "tpu.trace_start"() <{level = 10 : i32, message = "qd,kd->qk"}> : () -> ()
        %cst_302 = arith.constant dense<0.000000e+00> : vector<32x24xf32>
        %464 = tpu.matmul %447, %455, %cst_302 {dimension_numbers = #tpu.dot_dimension_numbers<[1], [1], [0], [0], [0, 0, 1, 0], [], []>} : vector<32x8xf32>, vector<24x8xf32>, vector<32x24xf32> -> vector<32x24xf32>
        "tpu.trace_stop"() : () -> ()
        %cst_303 = arith.constant 0.353553385 : f32
        %465 = vector.broadcast %cst_303 : f32 to vector<32x24xf32>
        %466 = arith.mulf %464, %465 : vector<32x24xf32>
        %cst_304 = arith.constant -1.000000e+30 : f32
        %467 = vector.shape_cast %2 : vector<1x24xi1> to vector<1x24xi1>
        %468 = vector.broadcast %467 : vector<1x24xi1> to vector<32x24xi1>
        %469 = vector.broadcast %cst_304 : f32 to vector<32x24xf32>
        %470 = arith.select %468, %466, %469 : vector<32x24xi1>, vector<32x24xf32>
        %cst_305 = arith.constant dense<0xFF800000> : vector<32xf32>
        %471 = vector.multi_reduction <maximumf>, %470, %cst_305 [1] : vector<32x24xf32> to vector<32xf32>
        %472 = vector.shape_cast %471 : vector<32xf32> to vector<32x1xf32>
        %473 = vector.broadcast %472 : vector<32x1xf32> to vector<32x24xf32>
        %474 = arith.subf %470, %473 : vector<32x24xf32>
        %475 = math.exp %474 : vector<32x24xf32>
        %cst_306 = arith.constant dense<0.000000e+00> : vector<32xf32>
        %476 = vector.multi_reduction <add>, %475, %cst_306 [1] : vector<32x24xf32> to vector<32xf32>
        %477 = vector.shape_cast %476 : vector<32xf32> to vector<32x1xf32>
        %478 = tpu.reciprocal %477 {approx = true} : vector<32x1xf32> -> vector<32x1xf32>
        %479 = vector.broadcast %478 : vector<32x1xf32> to vector<32x24xf32>
        %480 = arith.mulf %475, %479 : vector<32x24xf32>
        %cst_307 = arith.constant dense<0.000000e+00> : vector<32x8xf32>
        %481 = tpu.matmul %480, %463, %cst_307 {dimension_numbers = #tpu.dot_dimension_numbers<[1], [0], [0], [1], [0, 0, 1, 1], [], []>} : vector<32x24xf32>, vector<24x8xf32>, vector<32x8xf32> -> vector<32x8xf32>
        %c0_308 = arith.constant 0 : index
        %c3_309 = arith.constant 3 : index
        %c0_310 = arith.constant 0 : index
        %c0_311 = arith.constant 0 : index
        %482 = vector.load %arg14[%c0_308, %c3_309, %c0_310, %c0_311] : memref<1x4x8x32xbf16, #tpu.memory_space<vmem>>, vector<1x1x8x32xbf16>
        %483 = vector.shape_cast %482 : vector<1x1x8x32xbf16> to vector<8x32xbf16>
        %484 = arith.extf %483 : vector<8x32xbf16> to vector<8x32xf32>
        %cst_312 = arith.constant dense<0.000000e+00> : vector<32x32xf32>
        %485 = tpu.matmul %481, %484, %cst_312 {dimension_numbers = #tpu.dot_dimension_numbers<[1], [0], [0], [1], [0, 0, 1, 1], [], []>} : vector<32x8xf32>, vector<8x32xf32>, vector<32x32xf32> -> vector<32x32xf32>
        %486 = arith.addf %439, %485 : vector<32x32xf32>
        %c0_313 = arith.constant 0 : index
        %c5_314 = arith.constant 5 : index
        %c0_315 = arith.constant 0 : index
        %487 = vector.load %arg17[%c0_313, %c5_314, %c0_315] : memref<1x34x64xf32, #tpu.memory_space<vmem>>, vector<1x1x32xf32>
        %488 = vector.shape_cast %487 : vector<1x1x32xf32> to vector<1x32xf32>
        %489 = vector.broadcast %488 : vector<1x32xf32> to vector<32x32xf32>
        %490 = arith.addf %486, %489 : vector<32x32xf32>
        %491 = arith.addf %490, %298 : vector<32x32xf32>
        %c0_316 = arith.constant 0 : index
        %c3_317 = arith.constant 3 : index
        %c0_318 = arith.constant 0 : index
        %492 = vector.load %arg17[%c0_316, %c3_317, %c0_318] : memref<1x34x64xf32, #tpu.memory_space<vmem>>, vector<1x1x32xf32>
        %493 = vector.shape_cast %492 : vector<1x1x32xf32> to vector<1x32xf32>
        %c0_319 = arith.constant 0 : index
        %c4_320 = arith.constant 4 : index
        %c0_321 = arith.constant 0 : index
        %494 = vector.load %arg17[%c0_319, %c4_320, %c0_321] : memref<1x34x64xf32, #tpu.memory_space<vmem>>, vector<1x1x32xf32>
        %495 = vector.shape_cast %494 : vector<1x1x32xf32> to vector<1x32xf32>
        %cst_322 = arith.constant dense<0.000000e+00> : vector<32xf32>
        %496 = vector.multi_reduction <add>, %491, %cst_322 [1] : vector<32x32xf32> to vector<32xf32>
        %497 = vector.shape_cast %496 : vector<32xf32> to vector<32x1xf32>
        %cst_323 = arith.constant 3.200000e+01 : f32
        %498 = vector.broadcast %cst_323 : f32 to vector<32x1xf32>
        %499 = arith.divf %497, %498 : vector<32x1xf32>
        %500 = arith.mulf %491, %491 : vector<32x32xf32>
        %cst_324 = arith.constant dense<0.000000e+00> : vector<32xf32>
        %501 = vector.multi_reduction <add>, %500, %cst_324 [1] : vector<32x32xf32> to vector<32xf32>
        %502 = vector.shape_cast %501 : vector<32xf32> to vector<32x1xf32>
        %cst_325 = arith.constant 3.200000e+01 : f32
        %503 = vector.broadcast %cst_325 : f32 to vector<32x1xf32>
        %504 = arith.divf %502, %503 : vector<32x1xf32>
        %505 = arith.mulf %499, %499 : vector<32x1xf32>
        %506 = arith.subf %504, %505 : vector<32x1xf32>
        %cst_326 = arith.constant 0.000000e+00 : f32
        %507 = vector.broadcast %cst_326 : f32 to vector<32x1xf32>
        %508 = arith.maximumf %506, %507 : vector<32x1xf32>
        %509 = vector.broadcast %499 : vector<32x1xf32> to vector<32x32xf32>
        %510 = arith.subf %491, %509 : vector<32x32xf32>
        %cst_327 = arith.constant 9.99999996E-13 : f32
        %511 = vector.broadcast %cst_327 : f32 to vector<32x1xf32>
        %512 = arith.addf %508, %511 : vector<32x1xf32>
        %513 = math.rsqrt %512 : vector<32x1xf32>
        %514 = vector.broadcast %513 : vector<32x1xf32> to vector<32x32xf32>
        %515 = arith.mulf %510, %514 : vector<32x32xf32>
        %516 = vector.broadcast %493 : vector<1x32xf32> to vector<32x32xf32>
        %517 = arith.mulf %515, %516 : vector<32x32xf32>
        %518 = vector.broadcast %495 : vector<1x32xf32> to vector<32x32xf32>
        %519 = arith.addf %517, %518 : vector<32x32xf32>
        %c0_328 = arith.constant 0 : index
        %c0_329 = arith.constant 0 : index
        %520 = vector.load %arg23[%c0_328, %c0_329] : memref<32x32xf32, #tpu.memory_space<vmem>>, vector<32x32xf32>
        tpu.vector_store %arg23[%c0_328, %c0_329], %519 {strides = array<i32>} : memref<32x32xf32, #tpu.memory_space<vmem>>, vector<32x32xf32>,
      } else {
      }
      %c0_147 = arith.constant 0 : index
      %c0_148 = arith.constant 0 : index
      %238 = vector.load %arg23[%c0_147, %c0_148] : memref<32x32xf32, #tpu.memory_space<vmem>>, vector<32x32xf32>
      %c0_149 = arith.constant 0 : index
      %c0_150 = arith.constant 0 : index
      %c0_151 = arith.constant 0 : index
      %239 = vector.load %arg15[%c0_149, %c0_150, %c0_151] : memref<1x32x64xbf16, #tpu.memory_space<vmem>>, vector<1x32x64xbf16>
      %240 = vector.shape_cast %239 : vector<1x32x64xbf16> to vector<32x64xbf16>
      %241 = arith.extf %240 : vector<32x64xbf16> to vector<32x64xf32>
      %cst_152 = arith.constant dense<0.000000e+00> : vector<32x64xf32>
      %242 = tpu.matmul %238, %241, %cst_152 {dimension_numbers = #tpu.dot_dimension_numbers<[1], [0], [0], [1], [0, 0, 1, 1], [], []>} : vector<32x32xf32>, vector<32x64xf32>, vector<32x64xf32> -> vector<32x64xf32>
      %c0_153 = arith.constant 0 : index
      %c8_154 = arith.constant 8 : index
      %c0_155 = arith.constant 0 : index
      %243 = vector.load %arg17[%c0_153, %c8_154, %c0_155] : memref<1x34x64xf32, #tpu.memory_space<vmem>>, vector<1x1x64xf32>
      %244 = vector.shape_cast %243 : vector<1x1x64xf32> to vector<1x64xf32>
      %245 = vector.broadcast %244 : vector<1x64xf32> to vector<32x64xf32>
      %246 = arith.addf %242, %245 : vector<32x64xf32>
      %247 = arith.mulf %246, %246 : vector<32x64xf32>
      %248 = arith.mulf %246, %247 : vector<32x64xf32>
      %cst_156 = arith.constant 4.471500e-02 : f32
      %249 = vector.broadcast %cst_156 : f32 to vector<32x64xf32>
      %250 = arith.mulf %249, %248 : vector<32x64xf32>
      %251 = arith.addf %246, %250 : vector<32x64xf32>
      %cst_157 = arith.constant 0.797884583 : f32
      %252 = vector.broadcast %cst_157 : f32 to vector<32x64xf32>
      %253 = arith.mulf %252, %251 : vector<32x64xf32>
      %254 = math.tanh %253 : vector<32x64xf32>
      %cst_158 = arith.constant 1.000000e+00 : f32
      %255 = vector.broadcast %cst_158 : f32 to vector<32x64xf32>
      %256 = arith.addf %255, %254 : vector<32x64xf32>
      %cst_159 = arith.constant 5.000000e-01 : f32
      %257 = vector.broadcast %cst_159 : f32 to vector<32x64xf32>
      %258 = arith.mulf %257, %256 : vector<32x64xf32>
      %259 = arith.mulf %246, %258 : vector<32x64xf32>
      %c0_160 = arith.constant 0 : index
      %c0_161 = arith.constant 0 : index
      %c0_162 = arith.constant 0 : index
      %260 = vector.load %arg16[%c0_160, %c0_161, %c0_162] : memref<1x64x32xbf16, #tpu.memory_space<vmem>>, vector<1x64x32xbf16>
      %261 = vector.shape_cast %260 : vector<1x64x32xbf16> to vector<64x32xbf16>
      %262 = arith.extf %261 : vector<64x32xbf16> to vector<64x32xf32>
      %cst_163 = arith.constant dense<0.000000e+00> : vector<32x32xf32>
      %263 = tpu.matmul %259, %262, %cst_163 {dimension_numbers = #tpu.dot_dimension_numbers<[1], [0], [0], [1], [0, 0, 1, 1], [], []>} : vector<32x64xf32>, vector<64x32xf32>, vector<32x32xf32> -> vector<32x32xf32>
      %c0_164 = arith.constant 0 : index
      %c9_165 = arith.constant 9 : index
      %c0_166 = arith.constant 0 : index
      %264 = vector.load %arg17[%c0_164, %c9_165, %c0_166] : memref<1x34x64xf32, #tpu.memory_space<vmem>>, vector<1x1x32xf32>
      %265 = vector.shape_cast %264 : vector<1x1x32xf32> to vector<1x32xf32>
      %266 = vector.broadcast %265 : vector<1x32xf32> to vector<32x32xf32>
      %267 = arith.addf %263, %266 : vector<32x32xf32>
      %268 = arith.addf %267, %238 : vector<32x32xf32>
      %c0_167 = arith.constant 0 : index
      %c6_168 = arith.constant 6 : index
      %c0_169 = arith.constant 0 : index
      %269 = vector.load %arg17[%c0_167, %c6_168, %c0_169] : memref<1x34x64xf32, #tpu.memory_space<vmem>>, vector<1x1x32xf32>
      %270 = vector.shape_cast %269 : vector<1x1x32xf32> to vector<1x32xf32>
      %c0_170 = arith.constant 0 : index
      %c7_171 = arith.constant 7 : index
      %c0_172 = arith.constant 0 : index
      %271 = vector.load %arg17[%c0_170, %c7_171, %c0_172] : memref<1x34x64xf32, #tpu.memory_space<vmem>>, vector<1x1x32xf32>
      %272 = vector.shape_cast %271 : vector<1x1x32xf32> to vector<1x32xf32>
      %cst_173 = arith.constant dense<0.000000e+00> : vector<32xf32>
      %273 = vector.multi_reduction <add>, %268, %cst_173 [1] : vector<32x32xf32> to vector<32xf32>
      %274 = vector.shape_cast %273 : vector<32xf32> to vector<32x1xf32>
      %cst_174 = arith.constant 3.200000e+01 : f32
      %275 = vector.broadcast %cst_174 : f32 to vector<32x1xf32>
      %276 = arith.divf %274, %275 : vector<32x1xf32>
      %277 = arith.mulf %268, %268 : vector<32x32xf32>
      %cst_175 = arith.constant dense<0.000000e+00> : vector<32xf32>
      %278 = vector.multi_reduction <add>, %277, %cst_175 [1] : vector<32x32xf32> to vector<32xf32>
      %279 = vector.shape_cast %278 : vector<32xf32> to vector<32x1xf32>
      %cst_176 = arith.constant 3.200000e+01 : f32
      %280 = vector.broadcast %cst_176 : f32 to vector<32x1xf32>
      %281 = arith.divf %279, %280 : vector<32x1xf32>
      %282 = arith.mulf %276, %276 : vector<32x1xf32>
      %283 = arith.subf %281, %282 : vector<32x1xf32>
      %cst_177 = arith.constant 0.000000e+00 : f32
      %284 = vector.broadcast %cst_177 : f32 to vector<32x1xf32>
      %285 = arith.maximumf %283, %284 : vector<32x1xf32>
      %286 = vector.broadcast %276 : vector<32x1xf32> to vector<32x32xf32>
      %287 = arith.subf %268, %286 : vector<32x32xf32>
      %cst_178 = arith.constant 9.99999996E-13 : f32
      %288 = vector.broadcast %cst_178 : f32 to vector<32x1xf32>
      %289 = arith.addf %285, %288 : vector<32x1xf32>
      %290 = math.rsqrt %289 : vector<32x1xf32>
      %291 = vector.broadcast %290 : vector<32x1xf32> to vector<32x32xf32>
      %292 = arith.mulf %287, %291 : vector<32x32xf32>
      %293 = vector.broadcast %270 : vector<1x32xf32> to vector<32x32xf32>
      %294 = arith.mulf %292, %293 : vector<32x32xf32>
      %295 = vector.broadcast %272 : vector<1x32xf32> to vector<32x32xf32>
      %296 = arith.addf %294, %295 : vector<32x32xf32>
      %c0_179 = arith.constant 0 : index
      %c0_180 = arith.constant 0 : index
      %297 = vector.load %arg23[%c0_179, %c0_180] : memref<32x32xf32, #tpu.memory_space<vmem>>, vector<32x32xf32>
      tpu.vector_store %arg23[%c0_179, %c0_180], %296 {strides = array<i32>} : memref<32x32xf32, #tpu.memory_space<vmem>>, vector<32x32xf32>,
    } else {
    }
    %c3_i32 = arith.constant 3 : i32
    %15 = arith.cmpi eq, %arg0, %c3_i32 : i32
    %16 = arith.extui %15 : i1 to i32
    %c0_i32_6 = arith.constant 0 : i32
    %17 = arith.cmpi ne, %16, %c0_i32_6 : i32
    scf.if %17 {
      %c0 = arith.constant 0 : index
      %c0_7 = arith.constant 0 : index
      %18 = vector.load %arg23[%c0, %c0_7] : memref<32x32xf32, #tpu.memory_space<vmem>>, vector<32x32xf32>
      %c0_8 = arith.constant 0 : index
      %c0_9 = arith.constant 0 : index
      %19 = vector.load %arg18[%c0_8, %c0_9] : memref<32x256xbf16, #tpu.memory_space<vmem>>, vector<32x256xbf16>
      %20 = arith.extf %19 : vector<32x256xbf16> to vector<32x256xf32>
      %cst = arith.constant dense<0.000000e+00> : vector<32x256xf32>
      %21 = tpu.matmul %18, %20, %cst {dimension_numbers = #tpu.dot_dimension_numbers<[1], [0], [0], [1], [0, 0, 1, 1], [], []>} : vector<32x32xf32>, vector<32x256xf32>, vector<32x256xf32> -> vector<32x256xf32>
      %c4 = arith.constant 4 : index
      %c0_10 = arith.constant 0 : index
      %22 = vector.load %arg19[%c4, %c0_10] : memref<5x256xf32, #tpu.memory_space<vmem>>, vector<1x256xf32>
      %23 = vector.broadcast %22 : vector<1x256xf32> to vector<32x256xf32>
      %24 = arith.addf %21, %23 : vector<32x256xf32>
      %25 = arith.mulf %24, %24 : vector<32x256xf32>
      %cst_11 = arith.constant dense<0.000000e+00> : vector<32xf32>
      %26 = vector.multi_reduction <add>, %25, %cst_11 [1] : vector<32x256xf32> to vector<32xf32>
      %27 = vector.shape_cast %26 : vector<32xf32> to vector<32x1xf32>
      %cst_12 = arith.constant 1.000000e-24 : f32
      %28 = vector.broadcast %cst_12 : f32 to vector<32x1xf32>
      %29 = arith.maximumf %27, %28 : vector<32x1xf32>
      %30 = math.rsqrt %29 : vector<32x1xf32>
      %31 = vector.broadcast %30 : vector<32x1xf32> to vector<32x256xf32>
      %32 = arith.mulf %24, %31 : vector<32x256xf32>
      %c0_13 = arith.constant 0 : index
      %c0_14 = arith.constant 0 : index
      %33 = vector.load %arg20[%c0_13, %c0_14] : memref<32x256xf32, #tpu.memory_space<vmem>>, vector<32x256xf32>
      tpu.vector_store %arg20[%c0_13, %c0_14], %32 {strides = array<i32>} : memref<32x256xf32, #tpu.memory_space<vmem>>, vector<32x256xf32>,
    } else {
    }
    return
  }
  func.func @transform_0(%arg0: i32) -> (i32, i32) {
    %c0_i32 = arith.constant 0 : i32
    %c0_i32_0 = arith.constant 0 : i32
    %c0_i32_1 = arith.constant 0 : i32
    return %c0_i32, %c0_i32_0 : i32, i32
  }
  func.func @transform_1(%arg0: i32) -> (i32, i32) {
    %c0_i32 = arith.constant 0 : i32
    %c0_i32_0 = arith.constant 0 : i32
    %c0_i32_1 = arith.constant 0 : i32
    return %c0_i32, %c0_i32_0 : i32, i32
  }
  func.func @transform_2(%arg0: i32) -> (i32, i32) {
    %c0_i32 = arith.constant 0 : i32
    %c0_i32_0 = arith.constant 0 : i32
    %c0_i32_1 = arith.constant 0 : i32
    return %c0_i32, %c0_i32_0 : i32, i32
  }
  func.func @transform_3(%arg0: i32) -> (i32, i32, i32, i32) {
    %c0_i32 = arith.constant 0 : i32
    %0 = arith.subi %arg0, %c0_i32 : i32
    %c0_i32_0 = arith.constant 0 : i32
    %c1_i32 = arith.constant 1 : i32
    %1 = arith.maxsi %c0_i32_0, %0 : i32
    %2 = arith.minsi %c1_i32, %1 : i32
    %c0_i32_1 = arith.constant 0 : i32
    %c0_i32_2 = arith.constant 0 : i32
    %c0_i32_3 = arith.constant 0 : i32
    %c0_i32_4 = arith.constant 0 : i32
    return %2, %c0_i32_1, %c0_i32_2, %c0_i32_3 : i32, i32, i32, i32
  }
  func.func @transform_4(%arg0: i32) -> (i32, i32, i32, i32) {
    %c0_i32 = arith.constant 0 : i32
    %0 = arith.subi %arg0, %c0_i32 : i32
    %c0_i32_0 = arith.constant 0 : i32
    %c1_i32 = arith.constant 1 : i32
    %1 = arith.maxsi %c0_i32_0, %0 : i32
    %2 = arith.minsi %c1_i32, %1 : i32
    %c0_i32_1 = arith.constant 0 : i32
    %c0_i32_2 = arith.constant 0 : i32
    %c0_i32_3 = arith.constant 0 : i32
    %c0_i32_4 = arith.constant 0 : i32
    return %2, %c0_i32_1, %c0_i32_2, %c0_i32_3 : i32, i32, i32, i32
  }
  func.func @transform_5(%arg0: i32) -> (i32, i32, i32) {
    %c0_i32 = arith.constant 0 : i32
    %0 = arith.subi %arg0, %c0_i32 : i32
    %c0_i32_0 = arith.constant 0 : i32
    %c1_i32 = arith.constant 1 : i32
    %1 = arith.maxsi %c0_i32_0, %0 : i32
    %2 = arith.minsi %c1_i32, %1 : i32
    %c0_i32_1 = arith.constant 0 : i32
    %c0_i32_2 = arith.constant 0 : i32
    %c0_i32_3 = arith.constant 0 : i32
    return %2, %c0_i32_1, %c0_i32_2 : i32, i32, i32
  }
  func.func @transform_6(%arg0: i32) -> (i32, i32, i32) {
    %c0_i32 = arith.constant 0 : i32
    %0 = arith.subi %arg0, %c0_i32 : i32
    %c0_i32_0 = arith.constant 0 : i32
    %c1_i32 = arith.constant 1 : i32
    %1 = arith.maxsi %c0_i32_0, %0 : i32
    %2 = arith.minsi %c1_i32, %1 : i32
    %c0_i32_1 = arith.constant 0 : i32
    %c0_i32_2 = arith.constant 0 : i32
    %c0_i32_3 = arith.constant 0 : i32
    return %2, %c0_i32_1, %c0_i32_2 : i32, i32, i32
  }
  func.func @transform_7(%arg0: i32) -> (i32, i32, i32) {
    %c0_i32 = arith.constant 0 : i32
    %0 = arith.subi %arg0, %c0_i32 : i32
    %c0_i32_0 = arith.constant 0 : i32
    %c1_i32 = arith.constant 1 : i32
    %1 = arith.maxsi %c0_i32_0, %0 : i32
    %2 = arith.minsi %c1_i32, %1 : i32
    %c0_i32_1 = arith.constant 0 : i32
    %c0_i32_2 = arith.constant 0 : i32
    %c0_i32_3 = arith.constant 0 : i32
    return %2, %c0_i32_1, %c0_i32_2 : i32, i32, i32
  }
  func.func @transform_8(%arg0: i32) -> (i32, i32) {
    %c0_i32 = arith.constant 0 : i32
    %c0_i32_0 = arith.constant 0 : i32
    %c0_i32_1 = arith.constant 0 : i32
    return %c0_i32, %c0_i32_0 : i32, i32
  }
  func.func @transform_9(%arg0: i32) -> (i32, i32, i32, i32) {
    %c2_i32 = arith.constant 2 : i32
    %0 = arith.subi %arg0, %c2_i32 : i32
    %c0_i32 = arith.constant 0 : i32
    %c1_i32 = arith.constant 1 : i32
    %1 = arith.maxsi %c0_i32, %0 : i32
    %2 = arith.minsi %c1_i32, %1 : i32
    %c0_i32_0 = arith.constant 0 : i32
    %c0_i32_1 = arith.constant 0 : i32
    %c0_i32_2 = arith.constant 0 : i32
    %c0_i32_3 = arith.constant 0 : i32
    return %2, %c0_i32_0, %c0_i32_1, %c0_i32_2 : i32, i32, i32, i32
  }
  func.func @transform_10(%arg0: i32) -> (i32, i32, i32, i32) {
    %c2_i32 = arith.constant 2 : i32
    %0 = arith.subi %arg0, %c2_i32 : i32
    %c0_i32 = arith.constant 0 : i32
    %c1_i32 = arith.constant 1 : i32
    %1 = arith.maxsi %c0_i32, %0 : i32
    %2 = arith.minsi %c1_i32, %1 : i32
    %c0_i32_0 = arith.constant 0 : i32
    %c0_i32_1 = arith.constant 0 : i32
    %c0_i32_2 = arith.constant 0 : i32
    %c0_i32_3 = arith.constant 0 : i32
    return %2, %c0_i32_0, %c0_i32_1, %c0_i32_2 : i32, i32, i32, i32
  }
  func.func @transform_11(%arg0: i32) -> (i32, i32, i32, i32) {
    %c2_i32 = arith.constant 2 : i32
    %0 = arith.subi %arg0, %c2_i32 : i32
    %c0_i32 = arith.constant 0 : i32
    %c1_i32 = arith.constant 1 : i32
    %1 = arith.maxsi %c0_i32, %0 : i32
    %2 = arith.minsi %c1_i32, %1 : i32
    %c0_i32_0 = arith.constant 0 : i32
    %c0_i32_1 = arith.constant 0 : i32
    %c0_i32_2 = arith.constant 0 : i32
    %c0_i32_3 = arith.constant 0 : i32
    return %2, %c0_i32_0, %c0_i32_1, %c0_i32_2 : i32, i32, i32, i32
  }
  func.func @transform_12(%arg0: i32) -> (i32, i32, i32, i32) {
    %c2_i32 = arith.constant 2 : i32
    %0 = arith.subi %arg0, %c2_i32 : i32
    %c0_i32 = arith.constant 0 : i32
    %c1_i32 = arith.constant 1 : i32
    %1 = arith.maxsi %c0_i32, %0 : i32
    %2 = arith.minsi %c1_i32, %1 : i32
    %c0_i32_0 = arith.constant 0 : i32
    %c0_i32_1 = arith.constant 0 : i32
    %c0_i32_2 = arith.constant 0 : i32
    %c0_i32_3 = arith.constant 0 : i32
    return %2, %c0_i32_0, %c0_i32_1, %c0_i32_2 : i32, i32, i32, i32
  }
  func.func @transform_13(%arg0: i32) -> (i32, i32, i32, i32) {
    %c2_i32 = arith.constant 2 : i32
    %0 = arith.subi %arg0, %c2_i32 : i32
    %c0_i32 = arith.constant 0 : i32
    %c1_i32 = arith.constant 1 : i32
    %1 = arith.maxsi %c0_i32, %0 : i32
    %2 = arith.minsi %c1_i32, %1 : i32
    %c0_i32_0 = arith.constant 0 : i32
    %c0_i32_1 = arith.constant 0 : i32
    %c0_i32_2 = arith.constant 0 : i32
    %c0_i32_3 = arith.constant 0 : i32
    return %2, %c0_i32_0, %c0_i32_1, %c0_i32_2 : i32, i32, i32, i32
  }
  func.func @transform_14(%arg0: i32) -> (i32, i32, i32) {
    %c2_i32 = arith.constant 2 : i32
    %0 = arith.subi %arg0, %c2_i32 : i32
    %c0_i32 = arith.constant 0 : i32
    %c1_i32 = arith.constant 1 : i32
    %1 = arith.maxsi %c0_i32, %0 : i32
    %2 = arith.minsi %c1_i32, %1 : i32
    %c0_i32_0 = arith.constant 0 : i32
    %c0_i32_1 = arith.constant 0 : i32
    %c0_i32_2 = arith.constant 0 : i32
    return %2, %c0_i32_0, %c0_i32_1 : i32, i32, i32
  }
  func.func @transform_15(%arg0: i32) -> (i32, i32, i32) {
    %c2_i32 = arith.constant 2 : i32
    %0 = arith.subi %arg0, %c2_i32 : i32
    %c0_i32 = arith.constant 0 : i32
    %c1_i32 = arith.constant 1 : i32
    %1 = arith.maxsi %c0_i32, %0 : i32
    %2 = arith.minsi %c1_i32, %1 : i32
    %c0_i32_0 = arith.constant 0 : i32
    %c0_i32_1 = arith.constant 0 : i32
    %c0_i32_2 = arith.constant 0 : i32
    return %2, %c0_i32_0, %c0_i32_1 : i32, i32, i32
  }
  func.func @transform_16(%arg0: i32) -> (i32, i32, i32) {
    %c2_i32 = arith.constant 2 : i32
    %0 = arith.subi %arg0, %c2_i32 : i32
    %c0_i32 = arith.constant 0 : i32
    %c1_i32 = arith.constant 1 : i32
    %1 = arith.maxsi %c0_i32, %0 : i32
    %2 = arith.minsi %c1_i32, %1 : i32
    %c0_i32_0 = arith.constant 0 : i32
    %c0_i32_1 = arith.constant 0 : i32
    %c0_i32_2 = arith.constant 0 : i32
    return %2, %c0_i32_0, %c0_i32_1 : i32, i32, i32
  }
  func.func @transform_17(%arg0: i32) -> (i32, i32) {
    %c0_i32 = arith.constant 0 : i32
    %c0_i32_0 = arith.constant 0 : i32
    %c0_i32_1 = arith.constant 0 : i32
    return %c0_i32, %c0_i32_0 : i32, i32
  }
  func.func @transform_18(%arg0: i32) -> (i32, i32) {
    %c0_i32 = arith.constant 0 : i32
    %c0_i32_0 = arith.constant 0 : i32
    %c0_i32_1 = arith.constant 0 : i32
    return %c0_i32, %c0_i32_0 : i32, i32
  }
  func.func @transform_19(%arg0: i32) -> (i32, i32) {
    %c0_i32 = arith.constant 0 : i32
    %c0_i32_0 = arith.constant 0 : i32
    %c0_i32_1 = arith.constant 0 : i32
    return %c0_i32, %c0_i32_0 : i32, i32
  }
}

</mosaic_0001>

<bundles_post_ra>
// kernel: tpu_custom_call.1
= control target key start
LH: loop header
LB: loop body
LE: loop exit
PB: predicated region body
PF: predicated region fallthrough
CT: control target
= control target key end

     0   :  { %s9604_s0 = inlined_call_operand.vmem [shape: f32[24,48], index: 0, kind: input, shape index: {}]   ;;  %s9605_s1 = inlined_call_operand.vmem [shape: bf16[48,32], index: 1, kind: input, shape index: {}]   ;;  %s9606_s2 = inlined_call_operand.vmem [shape: f32[24,32], index: 2, kind: input, shape index: {}]   ;;  %s9607_s3 = inlined_call_operand.vmem [shape: bf16[2,12,32,8], index: 3, kind: input, shape index: {}]   ;;  %s9608_s4 = inlined_call_operand.vmem [shape: bf16[2,4,8,32], index: 4, kind: input, shape index: {}]   ;;  %s9609_s5 = inlined_call_operand.vmem [shape: bf16[2,32,64], index: 5, kind: input, shape index: {}]   ;;  %s9610_s6 = inlined_call_operand.vmem [shape: bf16[2,64,32], index: 6, kind: input, shape index: {}]   ;;  %s9611_s7 = inlined_call_operand.vmem [shape: f32[2,19,64], index: 7, kind: input, shape index: {}]   ;;  %s9612_s8 = inlined_call_operand.vmem [shape: f32[32,32], index: 8, kind: input, shape index: {}]   ;;  %s9613_s9 = inlined_call_operand.vmem [shape: bf16[2,12,32,8], index: 9, kind: input, shape index: {}]   ;;  %s9614_s10 = inlined_call_operand.vmem [shape: bf16[2,4,8,32], index: 10, kind: input, shape index: {}]   ;;  %s9615_s11 = inlined_call_operand.vmem [shape: bf16[2,4,32,8], index: 11, kind: input, shape index: {}]   ;;  %s9616_s12 = inlined_call_operand.vmem [shape: bf16[2,8,32,8], index: 12, kind: input, shape index: {}]   ;;  %s9617_s13 = inlined_call_operand.vmem [shape: bf16[2,4,8,32], index: 13, kind: input, shape index: {}]   ;;  %s9618_s14 = inlined_call_operand.vmem [shape: bf16[2,32,64], index: 14, kind: input, shape index: {}]   ;;  %s9619_s15 = inlined_call_operand.vmem [shape: bf16[2,64,32], index: 15, kind: input, shape index: {}]   ;;  %s9620_s16 = inlined_call_operand.vmem [shape: f32[2,34,64], index: 16, kind: input, shape index: {}]   ;;  %s9621_s17 = inlined_call_operand.vmem [shape: bf16[32,256], index: 17, kind: input, shape index: {}]   ;;  %s9622_s18 = inlined_call_operand.vmem [shape: f32[5,256], index: 18, kind: input, shape index: {}]   ;;  %s9623_s19 = inlined_call_operand.hbm [shape: f32[32,256], index: 19, kind: output, shape index: {}]  }
   0x1   :  { %9634 = sst [smem:[#allocation11_spill]] %s9604_s0 }
   0x2   :  { %9635 = sst [smem:[#allocation12_spill]] %s9605_s1 }
   0x3   :  { %9636 = sst [smem:[#allocation13_spill]] %s9606_s2 }
   0x4   :  { %9637 = sst [smem:[#allocation14_spill]] %s9607_s3 }
   0x5   :  { %9638 = sst [smem:[#allocation15_spill]] %s9608_s4 }
   0x6   :  { %9639 = sst [smem:[#allocation16_spill]] %s9609_s5 }
   0x7   :  { %9640 = sst [smem:[#allocation17_spill]] %s9610_s6 }
   0x8   :  { %9641 = sst [smem:[#allocation18_spill]] %s9611_s7 }
   0x9   :  { %9642 = sst [smem:[#allocation19_spill]] %s9612_s8 }
   0xa   :  { %9643 = sst [smem:[#allocation20_spill]] %s9613_s9 }
   0xb   :  { %9644 = sst [smem:[#allocation21_spill]] %s9614_s10 }
   0xc   :  { %9645 = sst [smem:[#allocation22_spill]] %s9615_s11 }
   0xd   :  { %9646 = sst [smem:[#allocation23_spill]] %s9621_s17 }
   0xe   :  { %9647 = sst [smem:[#allocation24_spill]] %s9622_s18 }
   0xf   :  { %9648 = sst [smem:[#allocation25_spill]] %s9623_s19 }
  0x10   :  { %24 = vsyncpa [#allocation6], 0  ;;  %s8123_s0 = smov 0  }
  0x11 LB: > { %9649 = sst [smem:[#allocation8_spill]] %s8015_s0  ;;  %s8129_s30 = sadd.s32 4294967295, %s8015_s0   ;;  %s8015_s0 = sphi %s8123_s0, %s30_s0  }
  0x12   : > { %9650 = sst [smem:[#allocation9_spill]] %s8129_s30  ;;  %p6506_p0 = scmp.ge.s32.totalorder %s8015_s0, 1 }
  0x13   : > { %p893_p1 = scmp.lt.s32.totalorder %s8015_s0, 5 }
  0x15   : > { %p894_p2 = pnand %p6506_p0, %p893_p1 }
  0x17   : > { %897 = sbr.rel (%p894_p2) target bundleno = 9396 (0x24b4), region = 96 }
  0x1c   : > { %p1064_p3 = scmp.gt.s32.totalorder %s8129_s30, 0  ;;  %p6507_p4 = scmp.lt.s32.totalorder %s8129_s30, 1  ;;  %v1249_v0 = vlaneseq }
  0x1d   : > { %s8136_s20 = sadd.s32 4294967294, %s8129_s30  ;;  %s9652_s4 = sld [smem:[#allocation15_spill]] }
  0x1e   : > { %9651 = sst [smem:[#allocation10_spill]] %s8136_s20  ;;  %v8139_v1 = vand.u32 127, %v1249_v0  ;;  %p1130_p5 = scmp.gt.s32.totalorder %s8136_s20, 0 }
  0x1f   : > { %s1065_s21 = scalar_select %p1064_p3, %s8129_s30, 0 }
  0x20   : > { %p6541_p6 = scmp.lt.s32.totalorder %s8136_s20, 1  ;;  %vm1251_vm0 = vcmp.lt.s32.totalorder %v8139_v1, 17  ;;  %s9653_s5 = sld [smem:[#allocation16_spill]] }
  0x21   : > { %s9677_s21 = smov (!%p6507_p4, %s1065_s21), 1  ;;  %s9654_s0 = sld [smem:[#allocation14_spill]] }
  0x22   : > { %s1131_s1 = scalar_select %p1130_p5, %s8136_s20, 0 }
  0x23   : > { %p1068_p7 = scmp.lt.s32.totalorder %s9677_s21, 1  ;;  %s9655_s6 = sld [smem:[#allocation17_spill]] }
  0x24   : > { %s9679_s1 = smov (!%p6541_p6, %s1131_s1), 1  ;;  %s9656_s7 = sld [smem:[#allocation18_spill]] }
  0x25   : > { %s9681_s21 = smov (!%p1068_p7, %s9677_s21), 1  ;;  %p1134_p8 = scmp.lt.s32.totalorder %s9679_s1, 1 }
  0x26   : > { %s7632_s22 = smul.u32 192, %s9681_s21  ;;  %s7131_s2 = sshll.u32 %s9681_s21, 4 }
  0x27   : > { %s8148_s25 = scalar_lea.vmem %s9652_s4, %s7131_s2  ;;  %s8153_s27 = scalar_lea.vmem %s9653_s5, %s7131_s2 }
  0x28   : > { %s8158_s19 = scalar_lea.vmem %s9654_s0, %s7632_s22  ;;  %s7137_s17 = sshll.u32 %s9681_s21, 5 }
  0x29   : > { %s8163_s8 = scalar_lea.vmem %s9655_s6, %s7137_s17  ;;  %s7633_s30 = smul.u32 24, %s9681_s21 }
  0x2a   : > { %s9683_s1 = smov (!%p1134_p8, %s9679_s1), 1  ;;  %s9657_s10 = sld [smem:[#allocation21_spill]] }
  0x2b   : > { %s8168_s4 = scalar_lea.vmem %s9656_s7, %s7633_s30  ;;  %s7634_s2 = smul.u32 192, %s9683_s1 }
  0x2c   : > { %s7144_s3 = sshll.u32 %s9683_s1, 4  ;;  %s7147_s22 = sshll.u32 %s9683_s1, 6 }
  0x2d   : > { %s9658_s9 = sld [smem:[#allocation20_spill]]  ;;  %s7150_s30 = sshll.u32 %s9683_s1, 7 }
  0x2e   : > { %s9659_s11 = sld [smem:[#allocation22_spill]]  ;;  %s8188_s6 = scalar_lea.vmem %s9617_s13, %s7144_s3 }
  0x2f   : > { %s8193_s7 = scalar_lea.vmem %s9616_s12, %s7150_s30  ;;  %s7159_s29 = sshll.u32 %s9683_s1, 5 }
  0x30   : > { %s8173_s0 = scalar_lea.vmem %s9657_s10, %s7144_s3  ;;  %s7635_s18 = smul.u32 40, %s9683_s1 }
  0x31   : > { %s9660_s5 = sld [smem:[#allocation9_spill]] }
  0x33   : > { %s8178_s17 = scalar_lea.vmem %s9658_s9, %s7634_s2  ;;  %s8198_s2 = scalar_lea.vmem %s9618_s14, %s7144_s3 }
  0x34   : > { %s8183_s21 = scalar_lea.vmem %s9659_s11, %s7147_s22  ;;  %s8203_s9 = scalar_lea.vmem %s9619_s15, %s7159_s29 }
  0x35   : > { %s8208_s11 = scalar_lea.vmem %s9620_s16, %s7635_s18 }
  0x37   : > { %p6602_p9 = scmp.ne.s32.totalorder %s9660_s5, 0 }
  0x38   : > { %s9661_s10 = sld [smem:[#allocation12_spill]] (!%p6602_p9) }
  0x39   : > { %1255 = sbr.rel (%p6602_p9) target bundleno = 211 (0xd3), region = 100  ;;  %s9662_s20 = sld [smem:[#allocation11_spill]] (!%p6602_p9) }
  0x3a   : > { %s9663_s28 = sld [smem:[#allocation13_spill]] (!%p6602_p9) }
  0x3e   : > { %v7511_v2 = vld [vmem:[%s9661_s10 + $0x10] sm:$0xff]   ;;  %v7510_v3 = vld [vmem:[%s9661_s10 + $0x8] sm:$0xff]   ;;  %v7163_v7 = vld [vmem:[%s9661_s10] sm:$0xff]   ;;  %vm1274_vm1 = vcmask 392192   ;;  %vm1310_vm2 = vcmask 261120  }
  0x3f   : > { %v7173_v4 = vunpack.c.h.bf16 %v7511_v2  ;;  %v7172_v5 = vunpack.c.l.bf16 %v7511_v2  ;;  %v7169_v6 = vunpack.c.h.bf16 %v7510_v3  ;;  %v7168_v8 = vunpack.c.l.bf16 %v7510_v3  ;;  %v1258_v11 = vld [vmem:[%s9662_s20 + $0x10] sm:$0xff]  ;;  %v1256_v12 = vld [vmem:[%s9662_s20] sm:$0xff]  ;;  %v1257_v13 = vld [vmem:[%s9662_s20 + $0x8] sm:$0xff] }
  0x40   : > { %v7165_v9 = vunpack.c.h.bf16 %v7163_v7  ;;  %v7164_v10 = vunpack.c.l.bf16 %v7163_v7  ;;  %v1271_v14 = vld [vmem:[%s9663_s28] sm:$0xff]  ;;  %v1272_v15 = vld [vmem:[%s9663_s28 + $0x8] sm:$0xff]  ;;  %v1273_v20 = vld [vmem:[%s9663_s28 + $0x10] sm:$0xff] }
  0x41   : > { %7589 = vmatpush.msra.mxu2 %v7173_v4  ;;  %1294 = vmatpush.msra.mxu0 %v7173_v4 }
  0x42   : > { %7588 = vmatpush.msra.mxu1 %v7173_v4 }
  0x43   : > { %7591 = vmatpush.msra.mxu2 %v7172_v5  ;;  %1295 = vmatpush.msra.mxu0 %v7172_v5 }
  0x44   : > { %7590 = vmatpush.msra.mxu1 %v7172_v5 }
  0x45   : > { %7593 = vmatpush.msra.mxu2 %v7169_v6  ;;  %1296 = vmatpush.msra.mxu0 %v7169_v6 }
  0x46   : > { %7592 = vmatpush.msra.mxu1 %v7169_v6 }
  0x47   : > { %7595 = vmatpush.msra.mxu2 %v7168_v8  ;;  %1297 = vmatpush.msra.mxu0 %v7168_v8 }
  0x48   : > { %7594 = vmatpush.msra.mxu1 %v7168_v8 }
  0x49   : > { %7597 = vmatpush.msra.mxu2 %v7165_v9  ;;  %1298 = vmatpush.msra.mxu0 %v7165_v9 }
  0x4a   : > { %7596 = vmatpush.msra.mxu1 %v7165_v9 }
  0x4b   : > { %7599 = vmatpush.msra.mxu2 %v7164_v10  ;;  %1299 = vmatpush.msra.mxu0 %v7164_v10 }
  0x4c   : > { %6605 = vmatmul.msk.f32.vlgmr.msra.gmra.mxu2 %vm1274_vm1, %v1258_v11  ;;  %7598 = vmatpush.msra.mxu1 %v7164_v10 }
  0x4d   : > { %6603 = vmatmul.msk.f32.vlgmr.msra.gmra.mxu0 %vm1274_vm1, %v1256_v12  ;;  %6604 = vmatmul.msk.f32.vlgmr.msra.gmra.mxu1 %vm1274_vm1, %v1257_v13 }
  0xca   : > { %v1301_v16 = vpop.f32.mrf.mxu0  ;;  %v1304_v17 = vpop.f32.mrf.mxu1 }
  0xcb   : > { %v1302_v18 = vadd.f32 %v1301_v16, %v1271_v14  ;;  %v1305_v19 = vadd.f32 %v1304_v17, %v1272_v15 }
  0xcd   : > { %1311 = vst.msk [vmem:[#allocation2] sm:$0xff] %vm1310_vm2, %v1302_v18 }
  0xce   : > { %1312 = vst.msk [vmem:[#allocation2 + $0x8] sm:$0xff] %vm1310_vm2, %v1305_v19 }
  0xcf   : > { %v1307_v21 = vpop.f32.mrf.mxu2 }
  0xd0   : > { %v1308_v22 = vadd.f32 %v1307_v21, %v1273_v20 }
  0xd2   : > { %1313 = vst.msk [vmem:[#allocation2 + $0x10] sm:$0xff] %vm1310_vm2, %v1308_v22 }
  0xd3 PF: > { %s9664_s23 = sld [smem:[#allocation9_spill]] }
  0xd9   : > { %p6606_p10 = scmp.ge.s32.totalorder %s9664_s23, 2 }
  0xdb   : > { %1317 = sbr.rel (%p6606_p10) target bundleno = 3152 (0xc50), region = 104 }
  0xe0   : > { %v8239_v23 = vld [vmem:[#allocation2 + $0x10] sm:$0xff]  ;;  %vm1323_vm3 = vcmask 261120   ;;  %v8241_v24 = vld [vmem:[#allocation2 + $0x8] sm:$0xff]  ;;  %v8243_v25 = vld [vmem:[#allocation2] sm:$0xff]  ;;  %v8017_v35 = vmov 32.0   ;;  %vm1533_vm14 = vcmask 64512  }
  0xe1   : > { %v1330_v26 = vsel %vm1323_vm3, %v8239_v23, 0.0  ;;  %v1327_v27 = vsel %vm1323_vm3, %v8241_v24, 0.0  ;;  %v1324_v28 = vsel %vm1323_vm3, %v8243_v25, 0.0  ;;  %v1345_v29 = vmul.f32 %v8239_v23, %v8239_v23  ;;  %v7512_v44 = vld [vmem:[%s8158_s19 + $0x8] sm:$0xff]   ;;  %v7175_v54 = vld [vmem:[%s8158_s19] sm:$0xff]   ;;  %v7518_v5 = vld [vmem:[%s8158_s19 + $0x18] sm:$0xff]  }
  0xe2   : > { %1331 = vadd.xlane.f32.xlu1 %v1330_v26  ;;  %1328 = vadd.xlane.f32.xlu0 %v1327_v27  ;;  %v1344_v30 = vmul.f32 %v8241_v24, %v8241_v24  ;;  %v1343_v33 = vmul.f32 %v8243_v25, %v8243_v25  ;;  %7675 = vrcp.f32 %v8017_v35  ;;  %v7514_v45 = vld [vmem:[%s8158_s19 + $0x48] sm:$0xff]   ;;  %v7181_v47 = vunpack.c.h.bf16 %v7512_v44  ;;  %v7513_v55 = vld [vmem:[%s8158_s19 + $0x40] sm:$0xff]   ;;  %v7517_v11 = vld [vmem:[%s8158_s19 + $0x10] sm:$0xff]  }
  0xe3   : > { %1325 = vadd.xlane.f32.xlu2 %v1324_v28  ;;  %v1352_v31 = vsel %vm1323_vm3, %v1345_v29, 0.0  ;;  %v7189_v48 = vunpack.c.h.bf16 %v7514_v45  ;;  %v7180_v51 = vunpack.c.l.bf16 %v7512_v44  ;;  %v7188_v52 = vunpack.c.l.bf16 %v7514_v45  ;;  %v7516_v21 = vld [vmem:[%s8158_s19 + $0x88] sm:$0xff]   ;;  %v7515_v27 = vld [vmem:[%s8158_s19 + $0x80] sm:$0xff]  }
  0xe4   : > { %v1349_v32 = vsel %vm1323_vm3, %v1344_v30, 0.0  ;;  %v1346_v34 = vsel %vm1323_vm3, %v1343_v33, 0.0  ;;  %1445 = vmatpush.msra.mxu0 %v7181_v47  ;;  %7600 = vmatpush.msra.mxu2 %v7181_v47  ;;  %v7177_v56 = vunpack.c.h.bf16 %v7175_v54  ;;  %v7185_v57 = vunpack.c.h.bf16 %v7513_v55 }
  0xe5   : > { %1482 = vmatpush.msra.mxu1 %v7189_v48  ;;  %7604 = vmatpush.msra.mxu3 %v7189_v48  ;;  %v7176_v62 = vunpack.c.l.bf16 %v7175_v54  ;;  %v7184_v63 = vunpack.c.l.bf16 %v7513_v55  ;;  %v7205_v7 = vunpack.c.h.bf16 %v7518_v5  ;;  %v7204_v10 = vunpack.c.l.bf16 %v7518_v5 }
  0xe6   : > { %1446 = vmatpush.msra.mxu0 %v7180_v51  ;;  %7601 = vmatpush.msra.mxu2 %v7180_v51  ;;  %v7201_v13 = vunpack.c.h.bf16 %v7517_v11  ;;  %v7200_v17 = vunpack.c.l.bf16 %v7517_v11  ;;  %v7197_v22 = vunpack.c.h.bf16 %v7516_v21  ;;  %v7196_v26 = vunpack.c.l.bf16 %v7516_v21  ;;  %v7656_v51 = vld [vmem:[%s8168_s4] ss:$0 sm:$0xff] }
  0xe7   : > { %1483 = vmatpush.msra.mxu1 %v7188_v52  ;;  %7605 = vmatpush.msra.mxu3 %v7188_v52  ;;  %v7193_v28 = vunpack.c.h.bf16 %v7515_v27  ;;  %v7192_v29 = vunpack.c.l.bf16 %v7515_v27  ;;  %vm1586_vm15 = vcmask 195584  }
  0xe8   : > { %v7676_v36 = vpop.eup %7675  ;;  %1447 = vmatpush.msra.mxu0 %v7177_v56  ;;  %7602 = vmatpush.msra.mxu2 %v7177_v56  ;;  %v7657_v56 = vld [vmem:[%s8168_s4 + $0x1] ss:$0 sm:$0xff] }
  0xe9   : > { %v1334_v37 = vmul.f32 32.0, %v7676_v36  ;;  %vm1338_vm4 = vweird.f32 %v7676_v36  ;;  %1484 = vmatpush.msra.mxu1 %v7185_v57  ;;  %7606 = vmatpush.msra.mxu3 %v7185_v57 }
  0xea   : > { %1353 = vadd.xlane.f32.xlu1 %v1352_v31  ;;  %1350 = vadd.xlane.f32.xlu0 %v1349_v32 }
  0xeb   : > { %1347 = vadd.xlane.f32.xlu2 %v1346_v34  ;;  %v1335_v38 = vsub.f32 1.0, %v1334_v37  ;;  %1448 = vmatpush.msra.mxu0 %v7176_v62 }
  0xec   : > { %7603 = vmatpush.msra.mxu2 %v7176_v62  ;;  %1485 = vmatpush.msra.mxu1 %v7184_v63 }
  0xed   : > { %v1336_v39 = vmul.f32 %v7676_v36, %v1335_v38  ;;  %7607 = vmatpush.msra.mxu3 %v7184_v63 }
  0xee   : > { %1680 = vmatpush.msrb.mxu1 %v7205_v7  ;;  %1519 = vmatpush.msrb.mxu2 %v7197_v22 }
  0xef   : > { %v1337_v40 = vadd.f32 %v7676_v36, %v1336_v39 }
  0xf0   : > { %1681 = vmatpush.msrb.mxu1 %v7204_v10  ;;  %1520 = vmatpush.msrb.mxu2 %v7196_v26 }
  0xf1   : > { %v8262_v46 = vsel %vm1338_vm4, %v7676_v36, %v1337_v40 }
  0xf2   : > { %1682 = vmatpush.msrb.mxu1 %v7201_v13  ;;  %1521 = vmatpush.msrb.mxu2 %v7193_v28  ;;  %v7522_v13 = vld [vmem:[%s8158_s19 + $0x98] sm:$0xff]  }
  0xf3   : > { %v7220_v21 = vunpack.c.l.bf16 %v7522_v13 }
  0xf4   : > { %1683 = vmatpush.msrb.mxu1 %v7200_v17  ;;  %1522 = vmatpush.msrb.mxu2 %v7192_v29  ;;  %v7221_v17 = vunpack.c.h.bf16 %v7522_v13 }
 0x155   : > { %v1332_v41 = vpop.xlane.xlu1 %1331  ;;  %v1329_v42 = vpop.xlane.xlu0 %1328 }
 0x156   : > { %v1326_v43 = vpop.xlane.xlu2 %1325  ;;  %v8265_v49 = vmul.f32 %v8262_v46, %v1332_v41  ;;  %v8271_v53 = vmul.f32 %v8262_v46, %v1329_v42 }
 0x157   : > { %v8268_v50 = vmul.f32 %v8262_v46, %v1326_v43 }
 0x158   : > { %v1360_v58 = vmul.f32 %v8265_v49, %v8265_v49  ;;  %v1359_v0 = vmul.f32 %v8271_v53, %v8271_v53  ;;  %v1368_v48 = vsub.f32 %v8241_v24, %v8271_v53 }
 0x159   : > { %v1358_v59 = vmul.f32 %v8268_v50, %v8268_v50  ;;  %v1367_v54 = vsub.f32 %v8243_v25, %v8268_v50  ;;  %v7520_v25 = vld [vmem:[%s8158_s19 + $0x58] sm:$0xff]  }
 0x15a   : > { %v7213_v50 = vunpack.c.h.bf16 %v7520_v25 }
 0x15d   : > { %v1354_v60 = vpop.xlane.xlu1 %1353  ;;  %v1351_v61 = vpop.xlane.xlu0 %1350 }
 0x15e   : > { %v1357_v2 = vmul.f32 %v1354_v60, %v8262_v46  ;;  %v1356_v3 = vmul.f32 %v1351_v61, %v8262_v46  ;;  %v1348_v4 = vpop.xlane.xlu2 %1347  ;;  %v1369_v61 = vsub.f32 %v8239_v23, %v8265_v49 }
 0x15f   : > { %v1355_v6 = vmul.f32 %v1348_v4, %v8262_v46 }
 0x160   : > { %v1363_v8 = vsub.f32 %v1357_v2, %v1360_v58  ;;  %v1362_v9 = vsub.f32 %v1356_v3, %v1359_v0  ;;  %v7212_v2 = vunpack.c.l.bf16 %v7520_v25  ;;  %v7519_v3 = vld [vmem:[%s8158_s19 + $0x50] sm:$0xff]  }
 0x161   : > { %v1361_v12 = vsub.f32 %v1355_v6, %v1358_v59  ;;  %v7209_v49 = vunpack.c.h.bf16 %v7519_v3  ;;  %v7208_v4 = vunpack.c.l.bf16 %v7519_v3 }
 0x162   : > { %v1366_v14 = vmax.f32 %v1363_v8, 0.0  ;;  %v1365_v15 = vmax.f32 %v1362_v9, 0.0  ;;  %v7659_v8 = vld [vmem:[%s8168_s4 + $0x8] ss:$0 sm:$0xff] }
 0x163   : > { %v1364_v16 = vmax.f32 %v1361_v12, 0.0 }
 0x164   : > { %v1372_v18 = vadd.f32 1e-12, %v1366_v14  ;;  %v1371_v19 = vadd.f32 1e-12, %v1365_v15  ;;  %v7658_v15 = vld [vmem:[%s8168_s4 + $0x7] ss:$0 sm:$0xff] }
 0x165   : > { %v1370_v20 = vadd.f32 1e-12, %v1364_v16 }
 0x166   : > { %7677 = vrsqrt.f32 %v1372_v18  ;;  %vm1389_vm9 = vweird.f32 %v1371_v19  ;;  %vm1399_vm12 = vweird.f32 %v1372_v18 }
 0x167   : > { %7679 = vrsqrt.f32 %v1371_v19  ;;  %vm1379_vm5 = vweird.f32 %v1370_v20 }
 0x168   : > { %7681 = vrsqrt.f32 %v1370_v20 }
 0x16c   : > { %v7678_v30 = vpop.eup %7677 }
 0x16d   : > { %v7680_v31 = vpop.eup %7679  ;;  %v1394_v32 = vmul.f32 %v7678_v30, %v1372_v18  ;;  %vm1400_vm8 = vweird.f32 %v7678_v30 }
 0x16e   : > { %v7682_v33 = vpop.eup %7681  ;;  %v1384_v34 = vmul.f32 %v7680_v31, %v1371_v19  ;;  %vm1390_vm7 = vweird.f32 %v7680_v31  ;;  %vm1401_vm13 = vmor %vm1399_vm12, %vm1400_vm8 }
 0x16f   : > { %v1395_v35 = vmul.f32 %v7678_v30, %v1394_v32  ;;  %v1374_v36 = vmul.f32 %v7682_v33, %v1370_v20  ;;  %vm1380_vm6 = vweird.f32 %v7682_v33  ;;  %vm1391_vm11 = vmor %vm1389_vm9, %vm1390_vm7  ;;  %v7521_v20 = vld [vmem:[%s8158_s19 + $0x90] sm:$0xff]  }
 0x170   : > { %v1385_v37 = vmul.f32 %v7680_v31, %v1384_v34  ;;  %vm1381_vm10 = vmor %vm1379_vm5, %vm1380_vm6  ;;  %v7217_v26 = vunpack.c.h.bf16 %v7521_v20  ;;  %v7216_v27 = vunpack.c.l.bf16 %v7521_v20 }
 0x171   : > { %v1396_v38 = vmul.f32 0.5, %v1395_v35  ;;  %v1375_v39 = vmul.f32 %v7682_v33, %v1374_v36 }
 0x172   : > { %v1386_v40 = vmul.f32 0.5, %v1385_v37 }
 0x173   : > { %v1397_v41 = vsub.f32 1.5, %v1396_v38  ;;  %v1376_v42 = vmul.f32 0.5, %v1375_v39  ;;  %v7662_v38 = vld [vmem:[%s8168_s4 + $0xb] ss:$0 sm:$0xff] }
 0x174   : > { %v1387_v43 = vsub.f32 1.5, %v1386_v40 }
 0x175   : > { %v1377_v44 = vsub.f32 1.5, %v1376_v42  ;;  %v1398_v45 = vmul.f32 %v7678_v30, %v1397_v41 }
 0x176   : > { %v1388_v47 = vmul.f32 %v7680_v31, %v1387_v43 }
 0x177   : > { %v1378_v52 = vmul.f32 %v7682_v33, %v1377_v44  ;;  %v1402_v59 = vsel %vm1401_vm13, %v7678_v30, %v1398_v45  ;;  %v7661_v30 = vld [vmem:[%s8168_s4 + $0x9] ss:$0 sm:$0xff] }
 0x178   : > { %v1392_v55 = vsel %vm1391_vm11, %v7680_v31, %v1388_v47  ;;  %v1405_v62 = vmul.f32 %v1402_v59, %v1369_v61  ;;  %v7663_v61 = vld [vmem:[%s8168_s4 + $0xc] ss:$0 sm:$0xff]  ;;  %vm2680_vm11 = vcmask 523264  }
 0x179   : > { %v1404_v57 = vmul.f32 %v1392_v55, %v1368_v48  ;;  %v1382_v58 = vsel %vm1381_vm10, %v7682_v33, %v1378_v52 }
 0x17a   : > { %v1403_v60 = vmul.f32 %v1382_v58, %v1367_v54  ;;  %v1409_v23 = vmul.f32 %v7656_v51, %v1405_v62 }
 0x17b   : > { %v1408_v24 = vmul.f32 %v7656_v51, %v1404_v57 }
 0x17c   : > { %v1407_v53 = vmul.f32 %v7656_v51, %v1403_v60  ;;  %v8310_v5 = vadd.f32 %v7657_v56, %v1409_v23 }
 0x17d   : > { %v8296_v63 = vadd.f32 %v7657_v56, %v1408_v24 }
 0x17e   : > { %v8298_v0 = vadd.f32 %v7657_v56, %v1407_v53 }
 0x17f   : > { %6608 = vmatmul.msk.f32.vlgmr.msra.gmra.mxu2 %vm1323_vm3, %v8296_v63  ;;  %6615 = vmatmul.msk.f32.vlgmr.msra.gmra.mxu3 %vm1323_vm3, %v8296_v63 }
 0x180   : > { %6607 = vmatmul.msk.f32.vlgmr.msra.gmra.mxu0 %vm1323_vm3, %v8298_v0  ;;  %6614 = vmatmul.msk.f32.vlgmr.msra.gmra.mxu1 %vm1323_vm3, %v8298_v0 }
 0x181   : > { %1717 = vmatpush.msra.mxu2 %v7213_v50 }
 0x183   : > { %1718 = vmatpush.msra.mxu2 %v7212_v2 }
 0x185   : > { %1719 = vmatpush.msra.mxu2 %v7209_v49 }
 0x187   : > { %6609 = vmatmul.msk.f32.gmra.mxu2 %vm1323_vm3, %v8310_v5  ;;  %6616 = vmatmul.msk.f32.gmra.mxu3 %vm1323_vm3, %v8310_v5 }
 0x188   : > { %6637 = vmatmul.msk.f32.vlgmr.msrb.gmra.mxu1 %vm1323_vm3, %v8298_v0  ;;  %1720 = vmatpush.msra.mxu2 %v7208_v4 }
 0x18f   : > { %6621 = vmatmul.msk.f32.vlgmr.msrb.gmra.mxu2 %vm1323_vm3, %v8298_v0 }
 0x190   : > { %6638 = vmatmul.msk.f32.gmra.mxu1 %vm1323_vm3, %v8296_v63 }
 0x197   : > { %6622 = vmatmul.msk.f32.gmra.mxu2 %vm1323_vm3, %v8296_v63 }
 0x198   : > { %6639 = vmatmul.msk.f32.gmra.mxu1 %vm1323_vm3, %v8310_v5 }
 0x19f   : > { %6623 = vmatmul.msk.f32.gmra.mxu2 %vm1323_vm3, %v8310_v5 }
 0x1a7   : > { %6644 = vmatmul.msk.f32.vlgmr.msra.gmra.mxu2 %vm1323_vm3, %v8298_v0 }
 0x1af   : > { %6645 = vmatmul.msk.f32.gmra.mxu2 %vm1323_vm3, %v8296_v63 }
 0x1b7   : > { %6646 = vmatmul.msk.f32.gmra.mxu2 %vm1323_vm3, %v8310_v5 }
 0x1fd   : > { %v1487_v14 = vpop.f32.mrf.mxu1  ;;  %v1450_v18 = vpop.f32.mrf.mxu0 }
 0x1fe   : > { %v1488_v19 = vadd.f32 %v7659_v8, %v1487_v14  ;;  %v1451_v22 = vadd.f32 %v7658_v15, %v1450_v18 }
 0x202   : > { %v1453_v6 = vpop.f32.mrf.mxu2  ;;  %v1490_v7 = vpop.f32.mrf.mxu3 }
 0x203   : > { %v1491_v12 = vadd.f32 %v7659_v8, %v1490_v7  ;;  %v1454_v29 = vadd.f32 %v7658_v15, %v1453_v6 }
 0x20a   : > { %v1456_v9 = vpop.f32.mrf.mxu2  ;;  %v1493_v10 = vpop.f32.mrf.mxu3 }
 0x20b   : > { %v1494_v11 = vadd.f32 %v7659_v8, %v1493_v10  ;;  %v1457_v34 = vadd.f32 %v7658_v15, %v1456_v9 }
 0x20d   : > { %6624 = vmatpush.xpose.msk.msrb.mxu3 %vm1533_vm14, %v1494_v11 }
 0x211   : > { %6625 = vmatpush.xpose.msk.msrb.mxu3 %vm1533_vm14, %v1491_v12 }
 0x212   : > { %v1524_v16 = vpop.f32.mrf.mxu2 }
 0x213   : > { %v1525_v35 = vadd.f32 %v7661_v30, %v1524_v16 }
 0x215   : > { %6626 = vmatpush.xpose.msk.msrb.mxu3 %vm1533_vm14, %v1488_v19 }
 0x218   : > { %6627 = vmatmul.msk.f32.vlgmr.msrb.gmra.mxu3 %vm1533_vm14, %v1451_v22  ;;  %v7524_v22 = vld [vmem:[%s8158_s19 + $0x28] sm:$0xff]  }
 0x219   : > { %1754 = vmatpush.msra.mxu3 %v7221_v17 }
 0x21a   : > { %v1527_v28 = vpop.f32.mrf.mxu2 }
 0x21b   : > { %1755 = vmatpush.msra.mxu3 %v7220_v21  ;;  %v1528_v33 = vadd.f32 %v7661_v30, %v1527_v28  ;;  %v7523_v28 = vld [vmem:[%s8158_s19 + $0x20] sm:$0xff]  }
 0x21d   : > { %1756 = vmatpush.msra.mxu3 %v7217_v26  ;;  %v7229_v26 = vunpack.c.h.bf16 %v7524_v22 }
 0x21f   : > { %1757 = vmatpush.msra.mxu3 %v7216_v27  ;;  %v7228_v27 = vunpack.c.l.bf16 %v7524_v22 }
 0x220   : > { %6628 = vmatmul.msk.f32.gmra.mxu3 %vm1533_vm14, %v1454_v29  ;;  %v7225_v29 = vunpack.c.h.bf16 %v7523_v28 }
 0x222   : > { %v1530_v31 = vpop.f32.mrf.mxu2 }
 0x223   : > { %v1531_v32 = vadd.f32 %v7661_v30, %v1530_v31  ;;  %v7224_v31 = vunpack.c.l.bf16 %v7523_v28 }
 0x225   : > { %1642 = vmatpush.msrb.mxu0 %v1531_v32 }
 0x227   : > { %1643 = vmatpush.msrb.mxu0 %v1528_v33  ;;  %v1685_v33 = vpop.f32.mrf.mxu1 }
 0x228   : > { %6629 = vmatmul.msk.f32.gmra.mxu3 %vm1533_vm14, %v1457_v34  ;;  %v7660_v34 = vld [vmem:[%s8168_s4 + $0xa] ss:$0 sm:$0xff] }
 0x229   : > { %1644 = vmatpush.msrb.mxu0 %v1525_v35  ;;  %v1686_v35 = vadd.f32 %v7660_v34, %v1685_v33 }
 0x22a   : > { %v1722_v36 = vpop.f32.mrf.mxu2 }
 0x22b   : > { %v1723_v42 = vadd.f32 %v7662_v38, %v1722_v36 }
 0x22f   : > { %v1688_v36 = vpop.f32.mrf.mxu1 }
 0x230   : > { %6651 = vmatmul.msk.f32.vlgmr.msra.gmra.mxu3 %vm1323_vm3, %v8298_v0 }
 0x232   : > { %v1725_v37 = vpop.f32.mrf.mxu2 }
 0x233   : > { %v1726_v41 = vadd.f32 %v7662_v38, %v1725_v37  ;;  %v1689_v37 = vadd.f32 %v7660_v34, %v1688_v36 }
 0x238   : > { %6652 = vmatmul.msk.f32.gmra.mxu3 %vm1323_vm3, %v8296_v63 }
 0x23a   : > { %v1728_v39 = vpop.f32.mrf.mxu2 }
 0x23b   : > { %v1729_v40 = vadd.f32 %v7662_v38, %v1728_v39  ;;  %v1691_v38 = vpop.f32.mrf.mxu1 }
 0x23c   : > { %v1692_v39 = vadd.f32 %v7660_v34, %v1691_v38 }
 0x23d   : > { %6654 = vmatpush.xpose.msk.msra.mxu0 %vm1533_vm14, %v1729_v40  ;;  %v8384_v40 = vld [vmem:[%s8148_s25] sm:$0xff]  }
 0x23e   : > { %v1888_v28 = vunpack.c.h.bf16 %v8384_v40 }
 0x240   : > { %6653 = vmatmul.msk.f32.gmra.mxu3 %vm1323_vm3, %v8310_v5  ;;  %1913 = vmatpush.msrb.mxu2 %v1888_v28 }
 0x241   : > { %6655 = vmatpush.xpose.msk.msra.mxu0 %vm1533_vm14, %v1726_v41  ;;  %v1656_v41 = vunpack.c.l.bf16 %v8384_v40  ;;  %v7529_v40 = vld [vmem:[%s8158_s19 + $0x30] sm:$0xff]  }
 0x243   : > { %1948 = vmatpush.msrb.mxu3 %v1656_v41  ;;  %v7249_v41 = vunpack.c.h.bf16 %v7529_v40 }
 0x245   : > { %6656 = vmatpush.xpose.msk.msra.mxu0 %vm1533_vm14, %v1723_v42 }
 0x29b   : > { %v1569_v43 = vpop.f32.mrf.mxu3 }
 0x29c   : > { %v1578_v44 = vmul.f32 0.35355338, %v1569_v43 }
 0x29e   : > { %v1583_v45 = vsel %vm1251_vm0, %v1578_v44, -1e+30 }
 0x29f   : > { %v1587_v47 = vsel %vm1586_vm15, %v1583_v45, -inf }
 0x2a0   : > { %1588 = vmax.xlane.f32.xlu0 %v1587_v47 }
 0x2a3   : > { %v1572_v48 = vpop.f32.mrf.mxu3 }
 0x2a4   : > { %v1579_v51 = vmul.f32 0.35355338, %v1572_v48 }
 0x2a6   : > { %v1584_v52 = vsel %vm1251_vm0, %v1579_v51, -1e+30 }
 0x2a7   : > { %v1590_v54 = vsel %vm1586_vm15, %v1584_v52, -inf }
 0x2a8   : > { %1591 = vmax.xlane.f32.xlu1 %v1590_v54 }
 0x2ab   : > { %v1575_v55 = vpop.f32.mrf.mxu3 }
 0x2ac   : > { %v1580_v56 = vmul.f32 0.35355338, %v1575_v55 }
 0x2ae   : > { %v1585_v57 = vsel %vm1251_vm0, %v1580_v56, -1e+30 }
 0x2af   : > { %v1593_v58 = vsel %vm1586_vm15, %v1585_v57, -inf }
 0x2b0   : > { %1594 = vmax.xlane.f32.xlu2 %v1593_v58 }
 0x2b3   : > { %v1759_v59 = vpop.f32.mrf.mxu3 }
 0x2b4   : > { %v1760_v25 = vadd.f32 %v7663_v61, %v1759_v59 }
 0x2bb   : > { %v1762_v60 = vpop.f32.mrf.mxu3 }
 0x2bc   : > { %v1763_v62 = vadd.f32 %v7663_v61, %v1762_v60 }
 0x2c3   : > { %v1765_v24 = vpop.f32.mrf.mxu3 }
 0x2c4   : > { %v1766_v53 = vadd.f32 %v7663_v61, %v1765_v24 }
 0x2c6   : > { %1873 = vmatpush.msra.mxu1 %v1766_v53 }
 0x2c8   : > { %1874 = vmatpush.msra.mxu1 %v1763_v62 }
 0x2ca   : > { %1875 = vmatpush.msra.mxu1 %v1760_v25 }
 0x313   : > { %v1589_v50 = vpop.xlane.xlu0 %1588 }
 0x314   : > { %v1596_v2 = vsub.f32 %v1583_v45, %v1589_v50 }
 0x316   : > { %v1599_v3 = vmul.f32 1.442695, %v1596_v2 }
 0x318   : > { %7683 = vpow2.f32 %v1599_v3 }
 0x31b   : > { %v1592_v23 = vpop.xlane.xlu1 %1591 }
 0x31c   : > { %v1597_v49 = vsub.f32 %v1584_v52, %v1592_v23 }
 0x31e   : > { %v7684_v4 = vpop.eup %7683  ;;  %v1601_v6 = vmul.f32 1.442695, %v1597_v49 }
 0x31f   : > { %v1605_v7 = vsel %vm1586_vm15, %v7684_v4, 0.0 }
 0x320   : > { %7685 = vpow2.f32 %v1601_v6  ;;  %1606 = vadd.xlane.f32.xlu0 %v1605_v7 }
 0x323   : > { %v1595_v8 = vpop.xlane.xlu2 %1594 }
 0x324   : > { %v1598_v9 = vsub.f32 %v1585_v57, %v1595_v8 }
 0x326   : > { %v7686_v10 = vpop.eup %7685  ;;  %v1603_v11 = vmul.f32 1.442695, %v1598_v9 }
 0x327   : > { %v1608_v12 = vsel %vm1586_vm15, %v7686_v10, 0.0 }
 0x328   : > { %7687 = vpow2.f32 %v1603_v11  ;;  %1609 = vadd.xlane.f32.xlu1 %v1608_v12 }
 0x32e   : > { %v7688_v13 = vpop.eup %7687 }
 0x32f   : > { %v1611_v14 = vsel %vm1586_vm15, %v7688_v13, 0.0 }
 0x330   : > { %1612 = vadd.xlane.f32.xlu2 %v1611_v14 }
 0x393   : > { %v1607_v15 = vpop.xlane.xlu0 %1606 }
 0x394   : > { %7689 = vrcp.f32 %v1607_v15 }
 0x39a   : > { %v7690_v16 = vpop.eup %7689 }
 0x39b   : > { %v1610_v17 = vpop.xlane.xlu1 %1609  ;;  %v1617_v18 = vmul.f32 %v7690_v16, %v7684_v4 }
 0x39c   : > { %7691 = vrcp.f32 %v1610_v17 }
 0x39d   : > { %6630 = vmatmul.msk.f32.vlgmr.msrb.gmra.mxu0 %vm1586_vm15, %v1617_v18 }
 0x39e   : > { %1982 = vmatpush.msrb.mxu0 %v7229_v26 }
 0x3a0   : > { %1983 = vmatpush.msrb.mxu0 %v7228_v27 }
 0x3a2   : > { %v7692_v19 = vpop.eup %7691  ;;  %1984 = vmatpush.msrb.mxu0 %v7225_v29  ;;  %v7528_v29 = vld [vmem:[%s8158_s19 + $0xa8] sm:$0xff]  }
 0x3a3   : > { %v1613_v20 = vpop.xlane.xlu2 %1612  ;;  %v1618_v21 = vmul.f32 %v7692_v19, %v7686_v10  ;;  %v7526_v10 = vld [vmem:[%s8158_s19 + $0x68] sm:$0xff]  }
 0x3a4   : > { %7693 = vrcp.f32 %v1613_v20  ;;  %1985 = vmatpush.msrb.mxu0 %v7224_v31  ;;  %v7237_v11 = vunpack.c.h.bf16 %v7526_v10  ;;  %v7236_v12 = vunpack.c.l.bf16 %v7526_v10  ;;  %v7244_v31 = vunpack.c.l.bf16 %v7528_v29 }
 0x3a5   : > { %6631 = vmatmul.msk.f32.gmra.mxu0 %vm1586_vm15, %v1618_v21 }
 0x3a6   : > { %2019 = vmatpush.msrb.mxu1 %v7237_v11  ;;  %v7666_v11 = vld [vmem:[%s8168_s4 + $0xf] ss:$0 sm:$0xff] }
 0x3a8   : > { %2020 = vmatpush.msrb.mxu1 %v7236_v12 }
 0x3aa   : > { %v7694_v30 = vpop.eup %7693 }
 0x3ab   : > { %v1619_v32 = vmul.f32 %v7694_v30, %v7688_v13  ;;  %v7525_v13 = vld [vmem:[%s8158_s19 + $0x60] sm:$0xff]   ;;  %v7245_v30 = vunpack.c.h.bf16 %v7528_v29 }
 0x3ac   : > { %v7233_v14 = vunpack.c.h.bf16 %v7525_v13  ;;  %v7232_v15 = vunpack.c.l.bf16 %v7525_v13 }
 0x3ad   : > { %6632 = vmatmul.msk.f32.gmra.mxu0 %vm1586_vm15, %v1619_v32  ;;  %v7527_v32 = vld [vmem:[%s8158_s19 + $0xa0] sm:$0xff]   ;;  %2056 = vmatpush.msra.mxu2 %v7245_v30 }
 0x3ae   : > { %2021 = vmatpush.msrb.mxu1 %v7233_v14  ;;  %v7241_v33 = vunpack.c.h.bf16 %v7527_v32  ;;  %v7240_v34 = vunpack.c.l.bf16 %v7527_v32 }
 0x3af   : > { %2057 = vmatpush.msra.mxu2 %v7244_v31 }
 0x3b0   : > { %2022 = vmatpush.msrb.mxu1 %v7232_v15 }
 0x3b1   : > { %2058 = vmatpush.msra.mxu2 %v7241_v33 }
 0x3b3   : > { %2059 = vmatpush.msra.mxu2 %v7240_v34 }
 0x3b5   : > { %6657 = vmatmul.msk.f32.vlgmr.msra.gmra.mxu0 %vm1533_vm14, %v1686_v35 }
 0x3bd   : > { %6658 = vmatmul.msk.f32.gmra.mxu0 %vm1533_vm14, %v1689_v37  ;;  %v7530_v37 = vld [vmem:[%s8158_s19 + $0x38] sm:$0xff]  }
 0x3be   : > { %v7253_v38 = vunpack.c.h.bf16 %v7530_v37 }
 0x3c5   : > { %6659 = vmatmul.msk.f32.gmra.mxu0 %vm1533_vm14, %v1692_v39  ;;  %v7252_v39 = vunpack.c.l.bf16 %v7530_v37 }
 0x3cd   : > { %6674 = vmatmul.msk.f32.vlgmr.msrb.gmra.mxu0 %vm1323_vm3, %v8298_v0 }
 0x3d5   : > { %6675 = vmatmul.msk.f32.gmra.mxu0 %vm1323_vm3, %v8296_v63 }
 0x3dd   : > { %6676 = vmatmul.msk.f32.gmra.mxu0 %vm1323_vm3, %v8310_v5 }
 0x41a   : > { %v1646_v42 = vpop.f32.mrf.mxu0 }
 0x41b   : > { %6667 = vmatmul.msk.f32.vlgmr.msrb.gmra.mxu3 %vm1533_vm14, %v1646_v42  ;;  %v7248_v42 = vunpack.c.l.bf16 %v7529_v40 }
 0x422   : > { %v1649_v43 = vpop.f32.mrf.mxu0 }
 0x423   : > { %6668 = vmatmul.msk.f32.gmra.mxu3 %vm1533_vm14, %v1649_v43 }
 0x42a   : > { %v1652_v44 = vpop.f32.mrf.mxu0 }
 0x42b   : > { %6669 = vmatmul.msk.f32.gmra.mxu3 %vm1533_vm14, %v1652_v44 }
 0x432   : > { %v1803_v45 = vpop.f32.mrf.mxu0 }
 0x433   : > { %v1812_v47 = vmul.f32 0.35355338, %v1803_v45 }
 0x435   : > { %v1815_v48 = vsel %vm1251_vm0, %v1812_v47, -1e+30  ;;  %v7665_v47 = vld [vmem:[%s8168_s4 + $0xe] ss:$0 sm:$0xff] }
 0x436   : > { %v1818_v51 = vsel %vm1586_vm15, %v1815_v48, -inf }
 0x437   : > { %1819 = vmax.xlane.f32.xlu0 %v1818_v51 }
 0x43a   : > { %v1806_v52 = vpop.f32.mrf.mxu0 }
 0x43b   : > { %v1813_v54 = vmul.f32 0.35355338, %v1806_v52 }
 0x43d   : > { %v1816_v55 = vsel %vm1251_vm0, %v1813_v54, -1e+30 }
 0x43e   : > { %v1821_v56 = vsel %vm1586_vm15, %v1816_v55, -inf }
 0x43f   : > { %1822 = vmax.xlane.f32.xlu1 %v1821_v56  ;;  %v7664_v56 = vld [vmem:[%s8168_s4 + $0xd] ss:$0 sm:$0xff] }
 0x442   : > { %v1809_v57 = vpop.f32.mrf.mxu0 }
 0x443   : > { %v1814_v58 = vmul.f32 0.35355338, %v1809_v57 }
 0x445   : > { %v1817_v59 = vsel %vm1251_vm0, %v1814_v58, -1e+30 }
 0x446   : > { %v1824_v60 = vsel %vm1586_vm15, %v1817_v59, -inf }
 0x447   : > { %1825 = vmax.xlane.f32.xlu2 %v1824_v60 }
 0x44a   : > { %v1987_v52 = vpop.f32.mrf.mxu0 }
 0x4aa   : > { %v1820_v61 = vpop.xlane.xlu0 %1819 }
 0x4ab   : > { %v1827_v24 = vsub.f32 %v1815_v48, %v1820_v61  ;;  %v1988_v61 = vadd.f32 %v7664_v56, %v1987_v52 }
 0x4ad   : > { %v1830_v53 = vmul.f32 1.442695, %v1827_v24 }
 0x4af   : > { %7695 = vpow2.f32 %v1830_v53  ;;  %v1990_v53 = vpop.f32.mrf.mxu0 }
 0x4b2   : > { %v1823_v62 = vpop.xlane.xlu1 %1822 }
 0x4b3   : > { %v1828_v25 = vsub.f32 %v1816_v55, %v1823_v62  ;;  %v7532_v55 = vld [vmem:[%s8158_s19 + $0x78] sm:$0xff]  }
 0x4b4   : > { %v7261_v57 = vunpack.c.h.bf16 %v7532_v55  ;;  %v7260_v60 = vunpack.c.l.bf16 %v7532_v55 }
 0x4b5   : > { %v7696_v50 = vpop.eup %7695  ;;  %v1832_v2 = vmul.f32 1.442695, %v1828_v25  ;;  %v1991_v25 = vadd.f32 %v7664_v56, %v1990_v53 }
 0x4b6   : > { %v1836_v3 = vsel %vm1586_vm15, %v7696_v50, 0.0 }
 0x4b7   : > { %7697 = vpow2.f32 %v1832_v2  ;;  %1837 = vadd.xlane.f32.xlu0 %v1836_v3  ;;  %v8449_v3 = vpop.f32.mrf.mxu3 }
 0x4ba   : > { %v1826_v23 = vpop.xlane.xlu2 %1825 }
 0x4bb   : > { %v1829_v49 = vsub.f32 %v1817_v59, %v1826_v23  ;;  %v7531_v59 = vld [vmem:[%s8158_s19 + $0x70] sm:$0xff]  }
 0x4bc   : > { %v7257_v24 = vunpack.c.h.bf16 %v7531_v59  ;;  %v7256_v62 = vunpack.c.l.bf16 %v7531_v59  ;;  %v7534_v59 = vld [vmem:[%s8158_s19 + $0xb8] sm:$0xff]  }
 0x4bd   : > { %v7698_v4 = vpop.eup %7697  ;;  %v1834_v6 = vmul.f32 1.442695, %v1829_v49 }
 0x4be   : > { %v1839_v7 = vsel %vm1586_vm15, %v7698_v4, 0.0 }
 0x4bf   : > { %7699 = vpow2.f32 %v1834_v6  ;;  %1840 = vadd.xlane.f32.xlu1 %v1839_v7  ;;  %v8453_v49 = vpop.f32.mrf.mxu3 }
 0x4c5   : > { %v7700_v8 = vpop.eup %7699 }
 0x4c6   : > { %v1842_v9 = vsel %vm1586_vm15, %v7700_v8, 0.0 }
 0x4c7   : > { %1843 = vadd.xlane.f32.xlu2 %v1842_v9  ;;  %v1956_v6 = vpop.f32.mrf.mxu3 }
 0x52a   : > { %v1838_v16 = vpop.xlane.xlu0 %1837 }
 0x52b   : > { %7701 = vrcp.f32 %v1838_v16 }
 0x531   : > { %v7702_v17 = vpop.eup %7701 }
 0x532   : > { %v1848_v18 = vmul.f32 %v7702_v17, %v7696_v50  ;;  %v1841_v19 = vpop.xlane.xlu1 %1840  ;;  %v1993_v50 = vpop.f32.mrf.mxu0 }
 0x533   : > { %7703 = vrcp.f32 %v1841_v19  ;;  %v1994_v2 = vadd.f32 %v7664_v56, %v1993_v50 }
 0x534   : > { %6660 = vmatmul.msk.f32.vlgmr.msra.gmra.mxu1 %vm1586_vm15, %v1848_v18 }
 0x539   : > { %v7704_v20 = vpop.eup %7703 }
 0x53a   : > { %v1844_v21 = vpop.xlane.xlu2 %1843  ;;  %v1849_v22 = vmul.f32 %v7704_v20, %v7698_v4 }
 0x53b   : > { %7705 = vrcp.f32 %v1844_v21  ;;  %v8464_v21 = vld [vmem:[%s8148_s25 + $0x8] sm:$0xff]  }
 0x53c   : > { %6661 = vmatmul.msk.f32.gmra.mxu1 %vm1586_vm15, %v1849_v22 }
 0x541   : > { %v7706_v26 = vpop.eup %7705 }
 0x542   : > { %v1850_v27 = vmul.f32 %v7706_v26, %v7700_v8  ;;  %v2190_v26 = vunpack.c.l.bf16 %v8464_v21 }
 0x544   : > { %6662 = vmatmul.msk.f32.gmra.mxu1 %vm1586_vm15, %v1850_v27 }
 0x545   : > { %2215 = vmatpush.msra.mxu1 %v2190_v26  ;;  %v7669_v26 = vld [vmem:[%s8168_s4 + $0x12] ss:$0 sm:$0xff] }
 0x54c   : > { %6681 = vmatmul.msk.f32.vlgmr.msrb.gmra.mxu1 %vm1323_vm3, %v8298_v0 }
 0x554   : > { %6682 = vmatmul.msk.f32.gmra.mxu1 %vm1323_vm3, %v8296_v63 }
 0x55c   : > { %6683 = vmatmul.msk.f32.gmra.mxu1 %vm1323_vm3, %v8310_v5 }
 0x5b1   : > { %v1877_v35 = vpop.f32.mrf.mxu1 }
 0x5b2   : > { %6664 = vmatmul.msk.f32.vlgmr.msrb.gmra.mxu2 %vm1533_vm14, %v1877_v35  ;;  %v7668_v35 = vld [vmem:[%s8168_s4 + $0x11] ss:$0 sm:$0xff] }
 0x5b3   : > { %2252 = vmatpush.msrb.mxu2 %v7253_v38 }
 0x5b5   : > { %2253 = vmatpush.msrb.mxu2 %v7252_v39 }
 0x5b7   : > { %2254 = vmatpush.msrb.mxu2 %v7249_v41 }
 0x5b9   : > { %v1880_v36 = vpop.f32.mrf.mxu1  ;;  %2255 = vmatpush.msrb.mxu2 %v7248_v42 }
 0x5ba   : > { %6665 = vmatmul.msk.f32.gmra.mxu2 %vm1533_vm14, %v1880_v36 }
 0x5c1   : > { %v1883_v43 = vpop.f32.mrf.mxu1 }
 0x5c2   : > { %6666 = vmatmul.msk.f32.gmra.mxu2 %vm1533_vm14, %v1883_v43 }
 0x5c9   : > { %v2024_v44 = vpop.f32.mrf.mxu1 }
 0x5ca   : > { %6688 = vmatmul.msk.f32.vlgmr.msra.gmra.mxu2 %vm1323_vm3, %v8298_v0  ;;  %v2025_v58 = vadd.f32 %v7665_v47, %v2024_v44 }
 0x5d1   : > { %v2027_v45 = vpop.f32.mrf.mxu1 }
 0x5d2   : > { %6689 = vmatmul.msk.f32.gmra.mxu2 %vm1323_vm3, %v8296_v63  ;;  %v2028_v54 = vadd.f32 %v7665_v47, %v2027_v45 }
 0x5d9   : > { %v2030_v48 = vpop.f32.mrf.mxu1 }
 0x5da   : > { %v2031_v51 = vadd.f32 %v7665_v47, %v2030_v48  ;;  %6690 = vmatmul.msk.f32.gmra.mxu2 %vm1323_vm3, %v8310_v5 }
 0x5dc   : > { %6691 = vmatpush.xpose.msk.msra.mxu3 %vm1533_vm14, %v2031_v51 }
 0x5e0   : > { %6692 = vmatpush.xpose.msk.msra.mxu3 %vm1533_vm14, %v2028_v54 }
 0x5e2   : > { %6708 = vmatmul.msk.f32.vlgmr.msrb.gmra.mxu2 %vm1323_vm3, %v8298_v0 }
 0x5e4   : > { %6693 = vmatpush.xpose.msk.msra.mxu3 %vm1533_vm14, %v2025_v58 }
 0x5e7   : > { %6694 = vmatmul.msk.f32.vlgmr.msra.gmra.mxu3 %vm1533_vm14, %v1988_v61  ;;  %v7268_v61 = vunpack.c.l.bf16 %v7534_v59 }
 0x5e8   : > { %2289 = vmatpush.msrb.mxu3 %v7261_v57 }
 0x5ea   : > { %2290 = vmatpush.msrb.mxu3 %v7260_v60  ;;  %6709 = vmatmul.msk.f32.gmra.mxu2 %vm1323_vm3, %v8296_v63  ;;  %v7269_v60 = vunpack.c.h.bf16 %v7534_v59 }
 0x5ec   : > { %2291 = vmatpush.msrb.mxu3 %v7257_v24  ;;  %v7533_v24 = vld [vmem:[%s8158_s19 + $0xb0] sm:$0xff]  }
 0x5ed   : > { %v7265_v53 = vunpack.c.h.bf16 %v7533_v24 }
 0x5ee   : > { %2292 = vmatpush.msrb.mxu3 %v7256_v62  ;;  %v7264_v62 = vunpack.c.l.bf16 %v7533_v24 }
 0x5ef   : > { %6695 = vmatmul.msk.f32.gmra.mxu3 %vm1533_vm14, %v1991_v25 }
 0x5f2   : > { %6710 = vmatmul.msk.f32.gmra.mxu2 %vm1323_vm3, %v8310_v5 }
 0x5f7   : > { %6696 = vmatmul.msk.f32.gmra.mxu3 %vm1533_vm14, %v1994_v2 }
 0x5ff   : > { %6715 = vmatmul.msk.f32.vlgmr.msrb.gmra.mxu3 %vm1323_vm3, %v8298_v0 }
 0x607   : > { %6716 = vmatmul.msk.f32.gmra.mxu3 %vm1323_vm3, %v8296_v63 }
 0x60f   : > { %6717 = vmatmul.msk.f32.gmra.mxu3 %vm1323_vm3, %v8310_v5 }
 0x635   : > { %v8451_v23 = vpop.f32.mrf.mxu2 }
 0x63d   : > { %v8455_v4 = vpop.f32.mrf.mxu2 }
 0x645   : > { %v1921_v7 = vpop.f32.mrf.mxu2 }
 0x646   : > { %v8457_v8 = vadd.f32 %v1956_v6, %v1921_v7 }
 0x64d   : > { %v2061_v9 = vpop.f32.mrf.mxu2 }
 0x64e   : > { %v2062_v15 = vadd.f32 %v7666_v11, %v2061_v9 }
 0x655   : > { %v2064_v10 = vpop.f32.mrf.mxu2 }
 0x656   : > { %v2065_v14 = vadd.f32 %v7666_v11, %v2064_v10 }
 0x65d   : > { %v2067_v12 = vpop.f32.mrf.mxu2 }
 0x65e   : > { %v2068_v13 = vadd.f32 %v7666_v11, %v2067_v12 }
 0x660   : > { %2175 = vmatpush.msra.mxu0 %v2068_v13 }
 0x662   : > { %2176 = vmatpush.msra.mxu0 %v2065_v14 }
 0x664   : > { %2177 = vmatpush.msra.mxu0 %v2062_v15 }
 0x665   : > { %v2257_v15 = vpop.f32.mrf.mxu2 }
 0x666   : > { %2326 = vmatpush.msrb.mxu0 %v7269_v60 }
 0x668   : > { %2327 = vmatpush.msrb.mxu0 %v7268_v61 }
 0x66a   : > { %v2105_v16 = vpop.f32.mrf.mxu3  ;;  %2328 = vmatpush.msrb.mxu0 %v7265_v53 }
 0x66b   : > { %v2114_v17 = vmul.f32 0.35355338, %v2105_v16 }
 0x66c   : > { %2329 = vmatpush.msrb.mxu0 %v7264_v62 }
 0x66d   : > { %v2117_v18 = vsel %vm1251_vm0, %v2114_v17, -1e+30  ;;  %v7667_v17 = vld [vmem:[%s8168_s4 + $0x10] ss:$0 sm:$0xff] }
 0x66e   : > { %v2120_v19 = vsel %vm1586_vm15, %v2117_v18, -inf }
 0x66f   : > { %2121 = vmax.xlane.f32.xlu0 %v2120_v19 }
 0x672   : > { %v2108_v20 = vpop.f32.mrf.mxu3 }
 0x673   : > { %v2115_v22 = vmul.f32 0.35355338, %v2108_v20 }
 0x675   : > { %v2118_v27 = vsel %vm1251_vm0, %v2115_v22, -1e+30 }
 0x676   : > { %v2123_v28 = vsel %vm1586_vm15, %v2118_v27, -inf }
 0x677   : > { %2124 = vmax.xlane.f32.xlu1 %v2123_v28 }
 0x67a   : > { %v2111_v29 = vpop.f32.mrf.mxu3 }
 0x67b   : > { %v2116_v30 = vmul.f32 0.35355338, %v2111_v29 }
 0x67d   : > { %v2119_v31 = vsel %vm1251_vm0, %v2116_v30, -1e+30 }
 0x67e   : > { %v2126_v32 = vsel %vm1586_vm15, %v2119_v31, -inf }
 0x67f   : > { %2127 = vmax.xlane.f32.xlu2 %v2126_v32 }
 0x682   : > { %v2294_v33 = vpop.f32.mrf.mxu3 }
 0x683   : > { %v2295_v39 = vadd.f32 %v7668_v35, %v2294_v33 }
 0x68a   : > { %v2297_v34 = vpop.f32.mrf.mxu3 }
 0x68b   : > { %v2298_v38 = vadd.f32 %v7668_v35, %v2297_v34  ;;  %v1954_v34 = vadd.f32 %v8453_v49, %v8455_v4 }
 0x692   : > { %v2300_v36 = vpop.f32.mrf.mxu3 }
 0x693   : > { %v2301_v37 = vadd.f32 %v7668_v35, %v2300_v36 }
 0x695   : > { %6725 = vmatpush.xpose.msk.msrb.mxu1 %vm1533_vm14, %v2301_v37 }
 0x699   : > { %6726 = vmatpush.xpose.msk.msrb.mxu1 %vm1533_vm14, %v2298_v38 }
 0x69d   : > { %6727 = vmatpush.xpose.msk.msrb.mxu1 %vm1533_vm14, %v2295_v39 }
 0x6e2   : > { %v2122_v40 = vpop.xlane.xlu0 %2121 }
 0x6e3   : > { %v2129_v41 = vsub.f32 %v2117_v18, %v2122_v40  ;;  %v2258_v18 = vadd.f32 %v7667_v17, %v2257_v15 }
 0x6e5   : > { %v2132_v42 = vmul.f32 1.442695, %v2129_v41 }
 0x6e7   : > { %7707 = vpow2.f32 %v2132_v42 }
 0x6ea   : > { %v2125_v43 = vpop.xlane.xlu1 %2124 }
 0x6eb   : > { %v2130_v44 = vsub.f32 %v2118_v27, %v2125_v43 }
 0x6ed   : > { %v7708_v45 = vpop.eup %7707  ;;  %v2134_v47 = vmul.f32 1.442695, %v2130_v44 }
 0x6ee   : > { %v2138_v48 = vsel %vm1586_vm15, %v7708_v45, 0.0 }
 0x6ef   : > { %7709 = vpow2.f32 %v2134_v47  ;;  %2139 = vadd.xlane.f32.xlu0 %v2138_v48 }
 0x6f2   : > { %v2128_v51 = vpop.xlane.xlu2 %2127 }
 0x6f3   : > { %v2131_v52 = vsub.f32 %v2119_v31, %v2128_v51  ;;  %v1951_v31 = vadd.f32 %v8449_v3, %v8451_v23 }
 0x6f5   : > { %v7710_v54 = vpop.eup %7709  ;;  %v2136_v55 = vmul.f32 1.442695, %v2131_v52 }
 0x6f6   : > { %v2141_v56 = vsel %vm1586_vm15, %v7710_v54, 0.0 }
 0x6f7   : > { %7711 = vpow2.f32 %v2136_v55  ;;  %2142 = vadd.xlane.f32.xlu1 %v2141_v56 }
 0x6fd   : > { %v7712_v57 = vpop.eup %7711 }
 0x6fe   : > { %v2144_v58 = vsel %vm1586_vm15, %v7712_v57, 0.0 }
 0x6ff   : > { %2145 = vadd.xlane.f32.xlu2 %v2144_v58 }
 0x762   : > { %v2140_v25 = vpop.xlane.xlu0 %2139 }
 0x763   : > { %7713 = vrcp.f32 %v2140_v25  ;;  %v2460_v25 = vunpack.c.h.bf16 %v8464_v21 }
 0x765   : > { %2485 = vmatpush.msra.mxu3 %v2460_v25 }
 0x769   : > { %v7714_v50 = vpop.eup %7713 }
 0x76a   : > { %v2150_v2 = vmul.f32 %v7714_v50, %v7708_v45  ;;  %v2143_v6 = vpop.xlane.xlu1 %2142 }
 0x76b   : > { %7715 = vrcp.f32 %v2143_v6 }
 0x76c   : > { %6697 = vmatmul.msk.f32.vlgmr.msra.gmra.mxu0 %vm1586_vm15, %v2150_v2 }
 0x771   : > { %v7716_v7 = vpop.eup %7715 }
 0x772   : > { %v2146_v9 = vpop.xlane.xlu2 %2145  ;;  %v2151_v10 = vmul.f32 %v7716_v7, %v7710_v54 }
 0x773   : > { %7717 = vrcp.f32 %v2146_v9 }
 0x774   : > { %6698 = vmatmul.msk.f32.gmra.mxu0 %vm1586_vm15, %v2151_v10 }
 0x779   : > { %v7718_v11 = vpop.eup %7717 }
 0x77a   : > { %v2152_v12 = vmul.f32 %v7718_v11, %v7712_v57 }
 0x77c   : > { %6699 = vmatmul.msk.f32.gmra.mxu0 %vm1586_vm15, %v2152_v12 }
 0x784   : > { %6722 = vmatmul.msk.f32.vlgmr.msrb.gmra.mxu0 %vm1323_vm3, %v8298_v0 }
 0x78c   : > { %6723 = vmatmul.msk.f32.gmra.mxu0 %vm1323_vm3, %v8296_v63  ;;  %v2260_v63 = vpop.f32.mrf.mxu2 }
 0x78d   : > { %v2261_v19 = vadd.f32 %v7667_v17, %v2260_v63 }
 0x794   : > { %6724 = vmatmul.msk.f32.gmra.mxu0 %vm1323_vm3, %v8310_v5  ;;  %v2263_v5 = vpop.f32.mrf.mxu2 }
 0x795   : > { %v2264_v22 = vadd.f32 %v7667_v17, %v2263_v5 }
 0x7e9   : > { %v2179_v13 = vpop.f32.mrf.mxu0 }
 0x7ea   : > { %6701 = vmatmul.msk.f32.vlgmr.msra.gmra.mxu1 %vm1533_vm14, %v2179_v13 }
 0x7f1   : > { %v2182_v14 = vpop.f32.mrf.mxu0 }
 0x7f2   : > { %6702 = vmatmul.msk.f32.gmra.mxu1 %vm1533_vm14, %v2182_v14 }
 0x7f9   : > { %v2185_v16 = vpop.f32.mrf.mxu0 }
 0x7fa   : > { %6703 = vmatmul.msk.f32.gmra.mxu1 %vm1533_vm14, %v2185_v16 }
 0x801   : > { %v2331_v0 = vpop.f32.mrf.mxu0 }
 0x802   : > { %6728 = vmatmul.msk.f32.vlgmr.msrb.gmra.mxu1 %vm1533_vm14, %v2258_v18  ;;  %v2332_v30 = vadd.f32 %v7669_v26, %v2331_v0  ;;  %v7670_v18 = vld [vmem:[%s8168_s4 + $0x2] ss:$0 sm:$0xff] }
 0x803   : > { %v7743_v0 = vld [vmem:[#allocation2] sm:$0xff] }
 0x809   : > { %v2334_v20 = vpop.f32.mrf.mxu0 }
 0x80a   : > { %6729 = vmatmul.msk.f32.gmra.mxu1 %vm1533_vm14, %v2261_v19  ;;  %v2335_v29 = vadd.f32 %v7669_v26, %v2334_v20 }
 0x811   : > { %v2337_v27 = vpop.f32.mrf.mxu0 }
 0x812   : > { %v2338_v28 = vadd.f32 %v7669_v26, %v2337_v27  ;;  %6730 = vmatmul.msk.f32.gmra.mxu1 %vm1533_vm14, %v2264_v22 }
 0x814   : > { %2445 = vmatpush.msra.mxu2 %v2338_v28  ;;  %v7744_v28 = vld [vmem:[#allocation2 + $0x8] sm:$0xff] }
 0x816   : > { %2446 = vmatpush.msra.mxu2 %v2335_v29 }
 0x818   : > { %2447 = vmatpush.msra.mxu2 %v2332_v30 }
 0x867   : > { %v2217_v32 = vpop.f32.mrf.mxu1 }
 0x868   : > { %v8501_v33 = vadd.f32 %v2217_v32, %v1951_v31 }
 0x86f   : > { %v2220_v35 = vpop.f32.mrf.mxu1 }
 0x870   : > { %v8505_v36 = vadd.f32 %v2220_v35, %v1954_v34 }
 0x877   : > { %v2223_v37 = vpop.f32.mrf.mxu1 }
 0x878   : > { %v8508_v38 = vadd.f32 %v2223_v37, %v8457_v8 }
 0x87f   : > { %v2375_v39 = vpop.f32.mrf.mxu1 }
 0x880   : > { %v2384_v40 = vmul.f32 0.35355338, %v2375_v39 }
 0x882   : > { %v2387_v41 = vsel %vm1251_vm0, %v2384_v40, -1e+30 }
 0x883   : > { %v2390_v3 = vsel %vm1586_vm15, %v2387_v41, -inf }
 0x884   : > { %2391 = vmax.xlane.f32.xlu0 %v2390_v3 }
 0x887   : > { %v2378_v23 = vpop.f32.mrf.mxu1 }
 0x888   : > { %v2385_v42 = vmul.f32 0.35355338, %v2378_v23  ;;  %v7535_v23 = vld [vmem:[%s8153_s27 + $0x8] sm:$0xff]  }
 0x88a   : > { %v2388_v49 = vsel %vm1251_vm0, %v2385_v42, -1e+30  ;;  %v7277_v42 = vunpack.c.h.bf16 %v7535_v23 }
 0x88b   : > { %v2393_v4 = vsel %vm1586_vm15, %v2388_v49, -inf }
 0x88c   : > { %2394 = vmax.xlane.f32.xlu1 %v2393_v4  ;;  %2623 = vmatpush.msra.mxu0 %v7277_v42 }
 0x88f   : > { %v2381_v43 = vpop.f32.mrf.mxu1 }
 0x890   : > { %v2386_v44 = vmul.f32 0.35355338, %v2381_v43 }
 0x892   : > { %v2389_v8 = vsel %vm1251_vm0, %v2386_v44, -1e+30 }
 0x893   : > { %v2396_v45 = vsel %vm1586_vm15, %v2389_v8, -inf }
 0x894   : > { %2397 = vmax.xlane.f32.xlu2 %v2396_v45 }
 0x8f7   : > { %v2392_v47 = vpop.xlane.xlu0 %2391 }
 0x8f8   : > { %v2399_v48 = vsub.f32 %v2387_v41, %v2392_v47 }
 0x8fa   : > { %v2402_v51 = vmul.f32 1.442695, %v2399_v48 }
 0x8fc   : > { %7719 = vpow2.f32 %v2402_v51 }
 0x8ff   : > { %v2395_v52 = vpop.xlane.xlu1 %2394 }
 0x900   : > { %v2400_v54 = vsub.f32 %v2388_v49, %v2395_v52  ;;  %v7271_v49 = vld [vmem:[%s8153_s27] sm:$0xff]  }
 0x901   : > { %v7273_v4 = vunpack.c.h.bf16 %v7271_v49 }
 0x902   : > { %v7720_v55 = vpop.eup %7719  ;;  %v2404_v56 = vmul.f32 1.442695, %v2400_v54 }
 0x903   : > { %v2408_v57 = vsel %vm1586_vm15, %v7720_v55, 0.0 }
 0x904   : > { %7721 = vpow2.f32 %v2404_v56  ;;  %2409 = vadd.xlane.f32.xlu0 %v2408_v57 }
 0x907   : > { %v2398_v58 = vpop.xlane.xlu2 %2397 }
 0x908   : > { %v2401_v59 = vsub.f32 %v2389_v8, %v2398_v58  ;;  %v7272_v8 = vunpack.c.l.bf16 %v7271_v49 }
 0x90a   : > { %v7722_v60 = vpop.eup %7721  ;;  %v2406_v61 = vmul.f32 1.442695, %v2401_v59 }
 0x90b   : > { %v2411_v24 = vsel %vm1586_vm15, %v7722_v60, 0.0 }
 0x90c   : > { %7723 = vpow2.f32 %v2406_v61  ;;  %2412 = vadd.xlane.f32.xlu1 %v2411_v24 }
 0x912   : > { %v7724_v53 = vpop.eup %7723 }
 0x913   : > { %v2414_v62 = vsel %vm1586_vm15, %v7724_v53, 0.0 }
 0x914   : > { %2415 = vadd.xlane.f32.xlu2 %v2414_v62 }
 0x977   : > { %v2410_v50 = vpop.xlane.xlu0 %2409 }
 0x978   : > { %7725 = vrcp.f32 %v2410_v50 }
 0x97e   : > { %v7726_v2 = vpop.eup %7725 }
 0x97f   : > { %v2420_v6 = vmul.f32 %v7726_v2, %v7720_v55  ;;  %v2413_v7 = vpop.xlane.xlu1 %2412 }
 0x980   : > { %7727 = vrcp.f32 %v2413_v7 }
 0x981   : > { %6731 = vmatmul.msk.f32.vlgmr.msra.gmra.mxu2 %vm1586_vm15, %v2420_v6 }
 0x986   : > { %v7728_v9 = vpop.eup %7727 }
 0x987   : > { %v2416_v10 = vpop.xlane.xlu2 %2415  ;;  %v2421_v11 = vmul.f32 %v7728_v9, %v7722_v60 }
 0x988   : > { %7729 = vrcp.f32 %v2416_v10 }
 0x989   : > { %6732 = vmatmul.msk.f32.gmra.mxu2 %vm1586_vm15, %v2421_v11 }
 0x98e   : > { %v7730_v12 = vpop.eup %7729 }
 0x98f   : > { %v2422_v13 = vmul.f32 %v7730_v12, %v7724_v53 }
 0x991   : > { %6733 = vmatmul.msk.f32.gmra.mxu2 %vm1586_vm15, %v2422_v13 }
 0xa04   : > { %v2449_v21 = vpop.f32.mrf.mxu2 }
 0xa05   : > { %6735 = vmatmul.msk.f32.vlgmr.msra.gmra.mxu3 %vm1533_vm14, %v2449_v21 }
 0xa0c   : > { %v2452_v14 = vpop.f32.mrf.mxu2 }
 0xa0d   : > { %6736 = vmatmul.msk.f32.gmra.mxu3 %vm1533_vm14, %v2452_v14 }
 0xa14   : > { %v2455_v15 = vpop.f32.mrf.mxu2 }
 0xa15   : > { %6737 = vmatmul.msk.f32.gmra.mxu3 %vm1533_vm14, %v2455_v15 }
 0xa88   : > { %v2487_v16 = vpop.f32.mrf.mxu3 }
 0xa89   : > { %v2496_v17 = vadd.f32 %v2487_v16, %v8501_v33 }
 0xa8b   : > { %v2499_v63 = vadd.f32 %v7743_v0, %v2496_v17 }
 0xa8d   : > { %v8531_v19 = vadd.f32 %v7670_v18, %v2499_v63 }
 0xa8f   : > { %v2509_v20 = vsel %vm1323_vm3, %v8531_v19, 0.0  ;;  %v2521_v5 = vmul.f32 %v8531_v19, %v8531_v19 }
 0xa90   : > { %2510 = vadd.xlane.f32.xlu0 %v2509_v20  ;;  %v2490_v22 = vpop.f32.mrf.mxu3  ;;  %v7672_v20 = vld [vmem:[%s8168_s4 + $0x4] ss:$0 sm:$0xff] }
 0xa91   : > { %v2497_v26 = vadd.f32 %v2490_v22, %v8505_v36  ;;  %v2524_v27 = vsel %vm1323_vm3, %v2521_v5, 0.0  ;;  %v7745_v36 = vld [vmem:[#allocation2 + $0x10] sm:$0xff] }
 0xa92   : > { %2525 = vadd.xlane.f32.xlu1 %v2524_v27 }
 0xa93   : > { %v2500_v29 = vadd.f32 %v7744_v28, %v2497_v26 }
 0xa95   : > { %v8539_v30 = vadd.f32 %v7670_v18, %v2500_v29 }
 0xa97   : > { %v2512_v31 = vsel %vm1323_vm3, %v8539_v30, 0.0  ;;  %v2522_v32 = vmul.f32 %v8539_v30, %v8539_v30 }
 0xa98   : > { %2513 = vadd.xlane.f32.xlu2 %v2512_v31  ;;  %v2493_v33 = vpop.f32.mrf.mxu3 }
 0xa99   : > { %v2498_v34 = vadd.f32 %v2493_v33, %v8508_v38  ;;  %v2527_v35 = vsel %vm1323_vm3, %v2522_v32, 0.0  ;;  %v7276_v38 = vunpack.c.l.bf16 %v7535_v23 }
 0xa9a   : > { %2528 = vadd.xlane.f32.xlu0 %v2527_v35 }
 0xa9b   : > { %v2501_v37 = vadd.f32 %v7745_v36, %v2498_v34  ;;  %2624 = vmatpush.msra.mxu0 %v7276_v38 }
 0xa9d   : > { %v8547_v39 = vadd.f32 %v7670_v18, %v2501_v37  ;;  %2625 = vmatpush.msra.mxu0 %v7273_v4  ;;  %v7671_v18 = vld [vmem:[%s8168_s4 + $0x3] ss:$0 sm:$0xff] }
 0xa9f   : > { %v2515_v40 = vsel %vm1323_vm3, %v8547_v39, 0.0  ;;  %v2523_v41 = vmul.f32 %v8547_v39, %v8547_v39  ;;  %2626 = vmatpush.msra.mxu0 %v7272_v8 }
 0xaa0   : > { %2516 = vadd.xlane.f32.xlu1 %v2515_v40 }
 0xaa1   : > { %v2530_v3 = vsel %vm1323_vm3, %v2523_v41, 0.0 }
 0xaa2   : > { %2531 = vadd.xlane.f32.xlu2 %v2530_v3 }
 0xb03   : > { %v2511_v43 = vpop.xlane.xlu0 %2510 }
 0xb04   : > { %v2518_v44 = vmul.f32 %v2511_v43, %v8262_v46  ;;  %v7538_v43 = vld [vmem:[%s8163_s8 + $0x18] sm:$0xff]  }
 0xb05   : > { %v2526_v45 = vpop.xlane.xlu1 %2525  ;;  %v7292_v8 = vunpack.c.l.bf16 %v7538_v43 }
 0xb06   : > { %v2536_v47 = vmul.f32 %v2518_v44, %v2518_v44  ;;  %v2533_v48 = vmul.f32 %v2526_v45, %v8262_v46  ;;  %v2545_v16 = vsub.f32 %v8531_v19, %v2518_v44  ;;  %v7293_v44 = vunpack.c.h.bf16 %v7538_v43  ;;  %v7537_v45 = vld [vmem:[%s8163_s8 + $0x10] sm:$0xff]  }
 0xb08   : > { %v2539_v51 = vsub.f32 %v2533_v48, %v2536_v47  ;;  %2698 = vmatpush.msra.mxu1 %v7293_v44  ;;  %v7289_v47 = vunpack.c.h.bf16 %v7537_v45  ;;  %v7288_v48 = vunpack.c.l.bf16 %v7537_v45 }
 0xb0a   : > { %v2542_v52 = vmax.f32 %v2539_v51, 0.0  ;;  %2699 = vmatpush.msra.mxu1 %v7292_v8  ;;  %v7536_v51 = vld [vmem:[%s8163_s8 + $0x8] sm:$0xff]  }
 0xb0b   : > { %v2514_v54 = vpop.xlane.xlu2 %2513 }
 0xb0c   : > { %v2548_v55 = vadd.f32 1e-12, %v2542_v52  ;;  %v2519_v56 = vmul.f32 %v2514_v54, %v8262_v46  ;;  %2700 = vmatpush.msra.mxu1 %v7289_v47  ;;  %v7285_v52 = vunpack.c.h.bf16 %v7536_v51  ;;  %v7284_v54 = vunpack.c.l.bf16 %v7536_v51 }
 0xb0d   : > { %v2529_v57 = vpop.xlane.xlu0 %2528 }
 0xb0e   : > { %7731 = vrsqrt.f32 %v2548_v55  ;;  %v2537_v58 = vmul.f32 %v2519_v56, %v2519_v56  ;;  %v2534_v59 = vmul.f32 %v2529_v57, %v8262_v46  ;;  %vm2557_vm2 = vweird.f32 %v2548_v55  ;;  %2701 = vmatpush.msra.mxu1 %v7288_v48 }
 0xb0f   : > { %v2546_v32 = vsub.f32 %v8539_v30, %v2519_v56 }
 0xb10   : > { %v2540_v60 = vsub.f32 %v2534_v59, %v2537_v58  ;;  %2702 = vmatpush.msra.mxu1 %v7285_v52  ;;  %v7673_v58 = vld [vmem:[%s8168_s4 + $0x5] ss:$0 sm:$0xff] }
 0xb12   : > { %v2543_v61 = vmax.f32 %v2540_v60, 0.0  ;;  %2703 = vmatpush.msra.mxu1 %v7284_v54 }
 0xb13   : > { %v2517_v24 = vpop.xlane.xlu1 %2516 }
 0xb14   : > { %v7732_v53 = vpop.eup %7731  ;;  %v2520_v62 = vmul.f32 %v2517_v24, %v8262_v46  ;;  %v2549_v50 = vadd.f32 1e-12, %v2543_v61 }
 0xb15   : > { %v2552_v25 = vmul.f32 %v7732_v53, %v2548_v55  ;;  %v2532_v2 = vpop.xlane.xlu2 %2531  ;;  %vm2558_vm1 = vweird.f32 %v7732_v53  ;;  %v7279_v55 = vld [vmem:[%s8163_s8] sm:$0xff]  }
 0xb16   : > { %v2538_v6 = vmul.f32 %v2520_v62, %v2520_v62  ;;  %v2535_v7 = vmul.f32 %v2532_v2, %v8262_v46  ;;  %7733 = vrsqrt.f32 %v2549_v50  ;;  %vm2559_vm4 = vmor %vm2557_vm2, %vm2558_vm1  ;;  %vm2567_vm6 = vweird.f32 %v2549_v50 }
 0xb17   : > { %v2553_v9 = vmul.f32 %v7732_v53, %v2552_v25  ;;  %v2547_v23 = vsub.f32 %v8547_v39, %v2520_v62  ;;  %v7281_v56 = vunpack.c.h.bf16 %v7279_v55  ;;  %v7280_v57 = vunpack.c.l.bf16 %v7279_v55 }
 0xb18   : > { %v2541_v10 = vsub.f32 %v2535_v7, %v2538_v6 }
 0xb19   : > { %v2554_v11 = vmul.f32 0.5, %v2553_v9  ;;  %2704 = vmatpush.msra.mxu1 %v7281_v56 }
 0xb1a   : > { %v2544_v12 = vmax.f32 %v2541_v10, 0.0 }
 0xb1b   : > { %v2555_v13 = vsub.f32 1.5, %v2554_v11  ;;  %2705 = vmatpush.msra.mxu1 %v7280_v57 }
 0xb1c   : > { %v2550_v21 = vadd.f32 1e-12, %v2544_v12  ;;  %v7734_v14 = vpop.eup %7733 }
 0xb1d   : > { %v2556_v15 = vmul.f32 %v7732_v53, %v2555_v13  ;;  %v2562_v17 = vmul.f32 %v7734_v14, %v2549_v50  ;;  %vm2568_vm5 = vweird.f32 %v7734_v14 }
 0xb1e   : > { %7735 = vrsqrt.f32 %v2550_v21  ;;  %vm2569_vm7 = vmor %vm2567_vm6, %vm2568_vm5  ;;  %vm2577_vm9 = vweird.f32 %v2550_v21 }
 0xb1f   : > { %v2560_v46 = vsel %vm2559_vm4, %v7732_v53, %v2556_v15  ;;  %v2563_v63 = vmul.f32 %v7734_v14, %v2562_v17 }
 0xb20   : > { %v2581_v0 = vmul.f32 %v2560_v46, %v2545_v16 }
 0xb21   : > { %v2564_v5 = vmul.f32 0.5, %v2563_v63 }
 0xb22   : > { %v2585_v22 = vmul.f32 %v7671_v18, %v2581_v0 }
 0xb23   : > { %v2565_v27 = vsub.f32 1.5, %v2564_v5 }
 0xb24   : > { %v7736_v26 = vpop.eup %7735  ;;  %v2589_v28 = vadd.f32 %v7672_v20, %v2585_v22 }
 0xb25   : > { %v2572_v29 = vmul.f32 %v7736_v26, %v2550_v21  ;;  %v2566_v31 = vmul.f32 %v7734_v14, %v2565_v27  ;;  %vm2578_vm8 = vweird.f32 %v7736_v26 }
 0xb26   : > { %6738 = vmatmul.msk.f32.vlgmr.msra.gmra.mxu0 %vm1323_vm3, %v2589_v28  ;;  %vm2579_vm10 = vmor %vm2577_vm9, %vm2578_vm8 }
 0xb27   : > { %v2573_v33 = vmul.f32 %v7736_v26, %v2572_v29  ;;  %v2570_v34 = vsel %vm2569_vm7, %v7734_v14, %v2566_v31 }
 0xb28   : > { %v2582_v36 = vmul.f32 %v2570_v34, %v2546_v32  ;;  %v7674_v32 = vld [vmem:[%s8168_s4 + $0x6] ss:$0 sm:$0xff] }
 0xb29   : > { %v2574_v35 = vmul.f32 0.5, %v2573_v33 }
 0xb2a   : > { %v2586_v40 = vmul.f32 %v7671_v18, %v2582_v36 }
 0xb2b   : > { %v2575_v37 = vsub.f32 1.5, %v2574_v35 }
 0xb2c   : > { %v2590_v3 = vadd.f32 %v7672_v20, %v2586_v40 }
 0xb2d   : > { %v2576_v41 = vmul.f32 %v7736_v26, %v2575_v37 }
 0xb2e   : > { %6739 = vmatmul.msk.f32.gmra.mxu0 %vm1323_vm3, %v2590_v3 }
 0xb2f   : > { %v2580_v42 = vsel %vm2579_vm10, %v7736_v26, %v2576_v41 }
 0xb30   : > { %v2583_v38 = vmul.f32 %v2580_v42, %v2547_v23 }
 0xb32   : > { %v2587_v49 = vmul.f32 %v7671_v18, %v2583_v38 }
 0xb34   : > { %v2591_v4 = vadd.f32 %v7672_v20, %v2587_v49 }
 0xb36   : > { %6740 = vmatmul.msk.f32.gmra.mxu0 %vm1323_vm3, %v2591_v4 }
 0xba3   : > { %v2628_v59 = vpop.f32.mrf.mxu0 }
 0xba4   : > { %v2629_v60 = vadd.f32 %v7673_v58, %v2628_v59 }
 0xba6   : > { %v2637_v61 = vmul.f32 %v2629_v60, %v2629_v60 }
 0xba8   : > { %v2640_v24 = vmul.f32 %v2637_v61, %v2629_v60 }
 0xbaa   : > { %v2643_v53 = vmul.f32 0.044715, %v2640_v24 }
 0xbab   : > { %v2631_v25 = vpop.f32.mrf.mxu0 }
 0xbac   : > { %v2646_v62 = vadd.f32 %v2643_v53, %v2629_v60  ;;  %v2632_v50 = vadd.f32 %v7673_v58, %v2631_v25 }
 0xbae   : > { %v2649_v2 = vmul.f32 0.7978846, %v2646_v62  ;;  %v2638_v6 = vmul.f32 %v2632_v50, %v2632_v50 }
 0xbb0   : > { %7737 = vtanh.f32 %v2649_v2  ;;  %v2641_v7 = vmul.f32 %v2638_v6, %v2632_v50 }
 0xbb2   : > { %v2644_v9 = vmul.f32 0.044715, %v2641_v7 }
 0xbb3   : > { %v2634_v10 = vpop.f32.mrf.mxu0 }
 0xbb4   : > { %v2647_v11 = vadd.f32 %v2644_v9, %v2632_v50  ;;  %v2635_v12 = vadd.f32 %v7673_v58, %v2634_v10 }
 0xbb6   : > { %v7738_v13 = vpop.eup %7737  ;;  %v2639_v14 = vmul.f32 %v2635_v12, %v2635_v12  ;;  %v2650_v15 = vmul.f32 0.7978846, %v2647_v11 }
 0xbb7   : > { %v2655_v21 = vadd.f32 1.0, %v7738_v13 }
 0xbb8   : > { %v2642_v17 = vmul.f32 %v2639_v14, %v2635_v12  ;;  %7739 = vtanh.f32 %v2650_v15 }
 0xbb9   : > { %v2658_v16 = vmul.f32 0.5, %v2655_v21 }
 0xbba   : > { %v2645_v46 = vmul.f32 0.044715, %v2642_v17 }
 0xbbb   : > { %v2661_v18 = vmul.f32 %v2658_v16, %v2629_v60 }
 0xbbc   : > { %v2648_v0 = vadd.f32 %v2645_v46, %v2635_v12 }
 0xbbd   : > { %6741 = vmatmul.msk.f32.vlgmr.msra.gmra.mxu1 %vm2680_vm11, %v2661_v18 }
 0xbbe   : > { %v7740_v63 = vpop.eup %7739  ;;  %v2651_v20 = vmul.f32 0.7978846, %v2648_v0 }
 0xbbf   : > { %v2656_v5 = vadd.f32 1.0, %v7740_v63 }
 0xbc0   : > { %7741 = vtanh.f32 %v2651_v20 }
 0xbc1   : > { %v2659_v22 = vmul.f32 0.5, %v2656_v5 }
 0xbc3   : > { %v2662_v26 = vmul.f32 %v2659_v22, %v2632_v50 }
 0xbc5   : > { %6742 = vmatmul.msk.f32.gmra.mxu1 %vm2680_vm11, %v2662_v26 }
 0xbc6   : > { %v7742_v27 = vpop.eup %7741 }
 0xbc7   : > { %v2657_v28 = vadd.f32 1.0, %v7742_v27 }
 0xbc9   : > { %v2660_v29 = vmul.f32 0.5, %v2657_v28 }
 0xbcb   : > { %v2663_v31 = vmul.f32 %v2660_v29, %v2635_v12 }
 0xbcd   : > { %6743 = vmatmul.msk.f32.gmra.mxu1 %vm2680_vm11, %v2663_v31 }
 0xc3a   : > { %v2707_v33 = vpop.f32.mrf.mxu1 }
 0xc3b   : > { %v2716_v34 = vadd.f32 %v2707_v33, %v8531_v19 }
 0xc3d   : > { %v2721_v35 = vadd.f32 %v7674_v32, %v2716_v34 }
 0xc3f   : > { %2724 = vst.msk [vmem:[#allocation2] sm:$0xff] %vm1323_vm3, %v2721_v35 }
 0xc42   : > { %v2710_v36 = vpop.f32.mrf.mxu1 }
 0xc43   : > { %v2717_v37 = vadd.f32 %v2710_v36, %v8539_v30 }
 0xc45   : > { %v2722_v40 = vadd.f32 %v7674_v32, %v2717_v37 }
 0xc47   : > { %2725 = vst.msk [vmem:[#allocation2 + $0x8] sm:$0xff] %vm1323_vm3, %v2722_v40 }
 0xc4a   : > { %v2713_v41 = vpop.f32.mrf.mxu1 }
 0xc4b   : > { %v2718_v3 = vadd.f32 %v2713_v41, %v8547_v39 }
 0xc4d   : > { %v2723_v23 = vadd.f32 %v7674_v32, %v2718_v3 }
 0xc4f   : > { %2726 = vst.msk [vmem:[#allocation2 + $0x10] sm:$0xff] %vm1323_vm3, %v2723_v23 }
 0xc50 PF: > { %s9665_s4 = sld [smem:[#allocation9_spill]] }
 0xc56   : > { %p6744_p11 = scmp.ne.s32.totalorder %s9665_s4, 2 }
 0xc57   : > { %s9666_s25 = sld [smem:[#allocation19_spill]] (!%p6744_p11) }
 0xc58   : > { %2730 = sbr.rel (%p6744_p11) target bundleno = 3349 (0xd15), region = 108  ;;  %s9667_s18 = sld [smem:[#allocation24_spill]] (!%p6744_p11) }
 0xc5d   : > { %vm2736_vm12 = vcmask 261120   ;;  %v8589_v19 = vld [vmem:[%s9666_s25 + $0x8] sm:$0xff]  ;;  %v8591_v30 = vld [vmem:[#allocation2 + $0x10] sm:$0xff]  ;;  %v8593_v42 = vld [vmem:[#allocation2] sm:$0xff]  ;;  %v8018_v2 = vmov 32.0  }
 0xc5e   : > { %v2837_v39 = vsel %vm2736_vm12, %v8589_v19, 0.0  ;;  %v2743_v38 = vsel %vm2736_vm12, %v8591_v30, 0.0  ;;  %v2737_v49 = vsel %vm2736_vm12, %v8593_v42, 0.0  ;;  %v8604_v4 = vld [vmem:[%s9666_s25 + $0x10] sm:$0xff]  ;;  %v8609_v43 = vld [vmem:[%s9666_s25] sm:$0xff]  ;;  %v8611_v44 = vld [vmem:[#allocation2 + $0x8] sm:$0xff]  ;;  %v2756_v51 = vmul.f32 %v8593_v42, %v8593_v42 }
 0xc5f   : > { %2838 = vadd.xlane.f32.xlu2 %v2837_v39  ;;  %2744 = vadd.xlane.f32.xlu1 %v2743_v38  ;;  %v2840_v8 = vsel %vm2736_vm12, %v8604_v4, 0.0  ;;  %v2834_v45 = vsel %vm2736_vm12, %v8609_v43, 0.0  ;;  %v2740_v47 = vsel %vm2736_vm12, %v8611_v44, 0.0  ;;  %v2757_v48 = vmul.f32 %v8611_v44, %v8611_v44  ;;  %v8626_v52 = vld [vmem:[%s9666_s25 + $0x18] sm:$0xff] }
 0xc60   : > { %2738 = vadd.xlane.f32.xlu0 %v2737_v49  ;;  %v2759_v55 = vsel %vm2736_vm12, %v2756_v51, 0.0  ;;  %v2843_v56 = vsel %vm2736_vm12, %v8626_v52, 0.0  ;;  %v2851_v57 = vmul.f32 %v8589_v19, %v8589_v19  ;;  %v2850_v58 = vmul.f32 %v8609_v43, %v8609_v43 }
 0xc61   : > { %v2762_v54 = vsel %vm2736_vm12, %v2757_v48, 0.0  ;;  %v2758_v59 = vmul.f32 %v8591_v30, %v8591_v30  ;;  %v2853_v53 = vmul.f32 %v8626_v52, %v8626_v52  ;;  %v2852_v62 = vmul.f32 %v8604_v4, %v8604_v4 }
 0xc62   : > { %v2857_v60 = vsel %vm2736_vm12, %v2851_v57, 0.0  ;;  %v2854_v61 = vsel %vm2736_vm12, %v2850_v58, 0.0  ;;  %7746 = vrcp.f32 %v8018_v2 }
 0xc63   : > { %v2765_v24 = vsel %vm2736_vm12, %v2758_v59, 0.0  ;;  %v2863_v25 = vsel %vm2736_vm12, %v2853_v53, 0.0  ;;  %v2860_v50 = vsel %vm2736_vm12, %v2852_v62, 0.0 }
 0xc67   : > { %2841 = vadd.xlane.f32.xlu2 %v2840_v8  ;;  %2835 = vadd.xlane.f32.xlu1 %v2834_v45 }
 0xc68   : > { %2741 = vadd.xlane.f32.xlu0 %v2740_v47  ;;  %v7747_v6 = vpop.eup %7746 }
 0xc69   : > { %v2747_v7 = vmul.f32 32.0, %v7747_v6  ;;  %vm2751_vm3 = vweird.f32 %v7747_v6 }
 0xc6b   : > { %v2748_v9 = vsub.f32 1.0, %v2747_v7 }
 0xc6d   : > { %v2749_v13 = vmul.f32 %v7747_v6, %v2748_v9 }
 0xc6f   : > { %2763 = vadd.xlane.f32.xlu2 %v2762_v54  ;;  %2760 = vadd.xlane.f32.xlu1 %v2759_v55  ;;  %v2750_v21 = vadd.f32 %v7747_v6, %v2749_v13 }
 0xc70   : > { %2844 = vadd.xlane.f32.xlu0 %v2843_v56 }
 0xc71   : > { %v2752_v17 = vsel %vm2751_vm3, %v7747_v6, %v2750_v21 }
 0xc77   : > { %2858 = vadd.xlane.f32.xlu2 %v2857_v60  ;;  %2855 = vadd.xlane.f32.xlu1 %v2854_v61 }
 0xc78   : > { %2766 = vadd.xlane.f32.xlu0 %v2765_v24 }
 0xc7f   : > { %2864 = vadd.xlane.f32.xlu1 %v2863_v25 }
 0xc80   : > { %2861 = vadd.xlane.f32.xlu0 %v2860_v50 }
 0xcd2   : > { %v2839_v10 = vpop.xlane.xlu2 %2838  ;;  %v2745_v11 = vpop.xlane.xlu1 %2744 }
 0xcd3   : > { %v2739_v12 = vpop.xlane.xlu0 %2738  ;;  %v8655_v31 = vmul.f32 %v2839_v10, %v2752_v17  ;;  %v8657_v32 = vmul.f32 %v2752_v17, %v2745_v11 }
 0xcd4   : > { %v8647_v18 = vmul.f32 %v2752_v17, %v2739_v12 }
 0xcd5   : > { %v2871_v3 = vmul.f32 %v8655_v31, %v8655_v31  ;;  %v2773_v23 = vmul.f32 %v8657_v32, %v8657_v32 }
 0xcd6   : > { %v2771_v20 = vmul.f32 %v8647_v18, %v8647_v18 }
 0xcda   : > { %v2842_v14 = vpop.xlane.xlu2 %2841  ;;  %v2836_v15 = vpop.xlane.xlu1 %2835 }
 0xcdb   : > { %v2742_v16 = vpop.xlane.xlu0 %2741  ;;  %v8659_v35 = vmul.f32 %v2836_v15, %v2752_v17  ;;  %v8670_v55 = vmul.f32 %v2842_v14, %v2752_v17 }
 0xcdc   : > { %v8649_v46 = vmul.f32 %v2752_v17, %v2742_v16 }
 0xcdd   : > { %v2870_v49 = vmul.f32 %v8659_v35, %v8659_v35  ;;  %v2872_v6 = vmul.f32 %v8670_v55, %v8670_v55 }
 0xcde   : > { %v2772_v5 = vmul.f32 %v8649_v46, %v8649_v46 }
 0xce2   : > { %v2764_v0 = vpop.xlane.xlu2 %2763  ;;  %v2761_v63 = vpop.xlane.xlu1 %2760 }
 0xce3   : > { %v2769_v22 = vmul.f32 %v2764_v0, %v2752_v17  ;;  %v2768_v26 = vmul.f32 %v2761_v63, %v2752_v17  ;;  %v2845_v27 = vpop.xlane.xlu0 %2844  ;;  %v2781_v63 = vsub.f32 %v8611_v44, %v8649_v46  ;;  %v2780_v44 = vsub.f32 %v8593_v42, %v8647_v18  ;;  %v2734_v46 = vld [vmem:[%s9667_s18] ss:$0 sm:$0xff] }
 0xce4   : > { %v8672_v56 = vmul.f32 %v2845_v27, %v2752_v17 }
 0xce5   : > { %v2775_v28 = vsub.f32 %v2769_v22, %v2772_v5  ;;  %v2774_v29 = vsub.f32 %v2768_v26, %v2771_v20 }
 0xce6   : > { %v2873_v9 = vmul.f32 %v8672_v56, %v8672_v56 }
 0xce7   : > { %v2778_v33 = vmax.f32 %v2775_v28, 0.0  ;;  %v2777_v34 = vmax.f32 %v2774_v29, 0.0 }
 0xce9   : > { %v2784_v36 = vadd.f32 1e-12, %v2778_v33  ;;  %v8661_v37 = vadd.f32 1e-12, %v2777_v34 }
 0xcea   : > { %v2859_v40 = vpop.xlane.xlu2 %2858  ;;  %v2856_v41 = vpop.xlane.xlu1 %2855 }
 0xceb   : > { %7748 = vrsqrt.f32 %v2784_v36  ;;  %v2867_v39 = vmul.f32 %v2859_v40, %v2752_v17  ;;  %v2767_v38 = vpop.xlane.xlu0 %2766  ;;  %v2866_v8 = vmul.f32 %v2856_v41, %v2752_v17  ;;  %vm2802_vm15 = vweird.f32 %v2784_v36 }
 0xcec   : > { %7750 = vrsqrt.f32 %v8661_v37  ;;  %v2770_v45 = vmul.f32 %v2767_v38, %v2752_v17  ;;  %vm2792_vm1 = vweird.f32 %v8661_v37 }
 0xced   : > { %v2875_v47 = vsub.f32 %v2867_v39, %v2871_v3  ;;  %v2874_v48 = vsub.f32 %v2866_v8, %v2870_v49  ;;  %v2735_v39 = vld [vmem:[%s9667_s18 + $0x1] ss:$0 sm:$0xff] }
 0xcee   : > { %v2776_v51 = vsub.f32 %v2770_v45, %v2773_v23 }
 0xcef   : > { %v2879_v54 = vmax.f32 %v2875_v47, 0.0  ;;  %v2878_v57 = vmax.f32 %v2874_v48, 0.0 }
 0xcf0   : > { %v2779_v58 = vmax.f32 %v2776_v51, 0.0 }
 0xcf1   : > { %v7749_v59 = vpop.eup %7748  ;;  %v8674_v60 = vadd.f32 1e-12, %v2879_v54  ;;  %v8676_v53 = vadd.f32 1e-12, %v2878_v57 }
 0xcf2   : > { %v7751_v61 = vpop.eup %7750  ;;  %v2797_v24 = vmul.f32 %v7749_v59, %v2784_v36  ;;  %v8678_v62 = vadd.f32 1e-12, %v2779_v58  ;;  %v2865_v25 = vpop.xlane.xlu1 %2864  ;;  %vm2803_vm13 = vweird.f32 %v7749_v59 }
 0xcf3   : > { %v2787_v50 = vmul.f32 %v7751_v61, %v8661_v37  ;;  %7752 = vrsqrt.f32 %v8674_v60  ;;  %v2862_v2 = vpop.xlane.xlu0 %2861  ;;  %v2869_v11 = vmul.f32 %v2865_v25, %v2752_v17  ;;  %vm2793_vm14 = vweird.f32 %v7751_v61  ;;  %vm2804_vm2 = vmor %vm2802_vm15, %vm2803_vm13 }
 0xcf4   : > { %v2798_v7 = vmul.f32 %v7749_v59, %v2797_v24  ;;  %7754 = vrsqrt.f32 %v8676_v53  ;;  %v2868_v12 = vmul.f32 %v2862_v2, %v2752_v17  ;;  %vm2794_vm4 = vmor %vm2792_vm1, %vm2793_vm14  ;;  %vm2906_vm5 = vweird.f32 %v8674_v60 }
 0xcf5   : > { %v2788_v10 = vmul.f32 %v7751_v61, %v2787_v50  ;;  %7756 = vrsqrt.f32 %v8678_v62  ;;  %v2877_v14 = vsub.f32 %v2869_v11, %v2873_v9  ;;  %v2883_v25 = vsub.f32 %v8589_v19, %v8655_v31 }
 0xcf6   : > { %v2799_v13 = vmul.f32 0.5, %v2798_v7  ;;  %v2876_v15 = vsub.f32 %v2868_v12, %v2872_v6  ;;  %v2882_v50 = vsub.f32 %v8609_v43, %v8659_v35  ;;  %vm2896_vm10 = vweird.f32 %v8676_v53  ;;  %v2832_v6 = vld [vmem:[%s9667_s18 + $0x2] ss:$0 sm:$0xff] }
 0xcf7   : > { %v2789_v21 = vmul.f32 0.5, %v2788_v10  ;;  %v2881_v5 = vmax.f32 %v2877_v14, 0.0  ;;  %vm2812_vm3 = vweird.f32 %v8678_v62  ;;  %v2782_v31 = vsub.f32 %v8591_v30, %v8657_v32 }
 0xcf8   : > { %v2800_v16 = vsub.f32 1.5, %v2799_v13  ;;  %v2880_v34 = vmax.f32 %v2876_v15, 0.0 }
 0xcf9   : > { %v7753_v0 = vpop.eup %7752  ;;  %v2790_v20 = vsub.f32 1.5, %v2789_v21  ;;  %v8693_v33 = vadd.f32 1e-12, %v2881_v5 }
 0xcfa   : > { %v7755_v22 = vpop.eup %7754  ;;  %v2801_v26 = vmul.f32 %v7749_v59, %v2800_v16  ;;  %v2901_v17 = vmul.f32 %v7753_v0, %v8674_v60  ;;  %v8707_v45 = vadd.f32 1e-12, %v2880_v34  ;;  %vm2907_vm6 = vweird.f32 %v7753_v0 }
 0xcfb   : > { %v7757_v27 = vpop.eup %7756  ;;  %v2791_v28 = vmul.f32 %v7751_v61, %v2790_v20  ;;  %v2891_v29 = vmul.f32 %v7755_v22, %v8676_v53  ;;  %7758 = vrsqrt.f32 %v8693_v33  ;;  %vm2897_vm7 = vweird.f32 %v7755_v22  ;;  %vm2908_vm9 = vmor %vm2906_vm5, %vm2907_vm6  ;;  %v2833_v53 = vld [vmem:[%s9667_s18 + $0x3] ss:$0 sm:$0xff] }
 0xcfc   : > { %v2805_v36 = vsel %vm2804_vm2, %v7749_v59, %v2801_v26  ;;  %v2902_v37 = vmul.f32 %v7753_v0, %v2901_v17  ;;  %v2807_v40 = vmul.f32 %v7757_v27, %v8678_v62  ;;  %7760 = vrsqrt.f32 %v8707_v45  ;;  %vm2898_vm11 = vmor %vm2896_vm10, %vm2897_vm7 }
 0xcfd   : > { %v2817_v41 = vmul.f32 %v2805_v36, %v2781_v63  ;;  %v2795_v3 = vsel %vm2794_vm4, %v7751_v61, %v2791_v28  ;;  %v2892_v23 = vmul.f32 %v7755_v22, %v2891_v29  ;;  %vm2813_vm8 = vweird.f32 %v7757_v27 }
 0xcfe   : > { %v2816_v42 = vmul.f32 %v2795_v3, %v2780_v44  ;;  %v2903_v18 = vmul.f32 0.5, %v2902_v37  ;;  %v2808_v38 = vmul.f32 %v7757_v27, %v2807_v40  ;;  %vm2814_vm13 = vmor %vm2812_vm3, %vm2813_vm8  ;;  %vm2926_vm15 = vweird.f32 %v8693_v33 }
 0xcff   : > { %v2820_v49 = vmul.f32 %v2817_v41, %v2734_v46  ;;  %v2893_v8 = vmul.f32 0.5, %v2892_v23  ;;  %v2885_v26 = vsub.f32 %v8626_v52, %v8672_v56  ;;  %vm2916_vm4 = vweird.f32 %v8707_v45 }
 0xd00   : > { %v2819_v47 = vmul.f32 %v2816_v42, %v2734_v46  ;;  %v2904_v48 = vsub.f32 1.5, %v2903_v18  ;;  %v2809_v51 = vmul.f32 0.5, %v2808_v38  ;;  %v2884_v34 = vsub.f32 %v8604_v4, %v8670_v55 }
 0xd01   : > { %v2823_v54 = vadd.f32 %v2820_v49, %v2735_v39  ;;  %v2894_v57 = vsub.f32 1.5, %v2893_v8  ;;  %v7759_v24 = vpop.eup %7758 }
 0xd02   : > { %v2822_v58 = vadd.f32 %v2819_v47, %v2735_v39  ;;  %v2905_v59 = vmul.f32 %v7753_v0, %v2904_v48  ;;  %v2810_v61 = vsub.f32 1.5, %v2809_v51  ;;  %v2921_v43 = vmul.f32 %v7759_v24, %v8693_v33  ;;  %v7761_v12 = vpop.eup %7760 }
 0xd03   : > { %2826 = vst.msk [vmem:[#allocation3 + $0x8] sm:$0xff] %vm2736_vm12, %v2823_v54  ;;  %v2895_v2 = vmul.f32 %v7755_v22, %v2894_v57  ;;  %v2911_v15 = vmul.f32 %v7761_v12, %v8707_v45  ;;  %vm2927_vm14 = vweird.f32 %v7759_v24  ;;  %vm2917_vm2 = vweird.f32 %v7761_v12 }
 0xd04   : > { %2825 = vst.msk [vmem:[#allocation3] sm:$0xff] %vm2736_vm12, %v2822_v58  ;;  %v2909_v7 = vsel %vm2908_vm9, %v7753_v0, %v2905_v59  ;;  %v2811_v19 = vmul.f32 %v7757_v27, %v2810_v61  ;;  %v2922_v11 = vmul.f32 %v7759_v24, %v2921_v43  ;;  %vm2928_vm1 = vmor %vm2926_vm15, %vm2927_vm14 }
 0xd05   : > { %v2931_v35 = vmul.f32 %v2909_v7, %v2883_v25  ;;  %v2899_v60 = vsel %vm2898_vm11, %v7755_v22, %v2895_v2  ;;  %v2912_v63 = vmul.f32 %v7761_v12, %v2911_v15  ;;  %vm2918_vm5 = vmor %vm2916_vm4, %vm2917_vm2 }
 0xd06   : > { %v2930_v9 = vmul.f32 %v2899_v60, %v2882_v50  ;;  %v2815_v10 = vsel %vm2814_vm13, %v7757_v27, %v2811_v19  ;;  %v2923_v14 = vmul.f32 0.5, %v2922_v11 }
 0xd07   : > { %v2935_v13 = vmul.f32 %v2931_v35, %v2832_v6  ;;  %v2818_v21 = vmul.f32 %v2815_v10, %v2782_v31  ;;  %v2913_v22 = vmul.f32 0.5, %v2912_v63 }
 0xd08   : > { %v2934_v62 = vmul.f32 %v2930_v9, %v2832_v6  ;;  %v2924_v0 = vsub.f32 1.5, %v2923_v14 }
 0xd09   : > { %v2939_v16 = vadd.f32 %v2935_v13, %v2833_v53  ;;  %v2821_v30 = vmul.f32 %v2818_v21, %v2734_v46  ;;  %v2914_v27 = vsub.f32 1.5, %v2913_v22 }
 0xd0a   : > { %v2938_v32 = vadd.f32 %v2934_v62, %v2833_v53  ;;  %v2925_v5 = vmul.f32 %v7759_v24, %v2924_v0 }
 0xd0b   : > { %2943 = vst.msk [vmem:[#allocation4 + $0x8] sm:$0xff] %vm2736_vm12, %v2939_v16  ;;  %v2824_v20 = vadd.f32 %v2821_v30, %v2735_v39  ;;  %v2915_v29 = vmul.f32 %v7761_v12, %v2914_v27 }
 0xd0c   : > { %2942 = vst.msk [vmem:[#allocation4] sm:$0xff] %vm2736_vm12, %v2938_v32  ;;  %v2929_v17 = vsel %vm2928_vm1, %v7759_v24, %v2925_v5 }
 0xd0d   : > { %2827 = vst.msk [vmem:[#allocation3 + $0x10] sm:$0xff] %vm2736_vm12, %v2824_v20  ;;  %v2933_v28 = vmul.f32 %v2929_v17, %v2885_v26  ;;  %v2919_v33 = vsel %vm2918_vm5, %v7761_v12, %v2915_v29 }
 0xd0e   : > { %v2932_v36 = vmul.f32 %v2919_v33, %v2884_v34 }
 0xd0f   : > { %v2937_v44 = vmul.f32 %v2933_v28, %v2832_v6 }
 0xd10   : > { %v2936_v52 = vmul.f32 %v2932_v36, %v2832_v6 }
 0xd11   : > { %v2941_v46 = vadd.f32 %v2937_v44, %v2833_v53 }
 0xd12   : > { %v2940_v56 = vadd.f32 %v2936_v52, %v2833_v53 }
 0xd13   : > { %2945 = vst.msk [vmem:[#allocation4 + $0x18] sm:$0xff] %vm2736_vm12, %v2941_v46 }
 0xd14   : > { %2944 = vst.msk [vmem:[#allocation4 + $0x10] sm:$0xff] %vm2736_vm12, %v2940_v56 }
 0xd15 PF: > { %s9668_s24 = sld [smem:[#allocation9_spill]] }
 0xd1b   : > { %p6745_p12 = scmp.lt.s32.totalorder %s9668_s24, 2 }
 0xd1d   : > { %2949 = sbr.rel (%p6745_p12) target bundleno = 9074 (0x2372), region = 112 }
 0xd22   : > { %v7541_v4 = vld [vmem:[%s8178_s17 + $0x48] sm:$0xff]   ;;  %v7540_v55 = vld [vmem:[%s8178_s17 + $0x40] sm:$0xff]   ;;  %vm2965_vm6 = vcmask 261120   ;;  %v8748_v38 = vld [vmem:[#allocation4] sm:$0xff]  ;;  %vm3087_vm12 = vcmask 64512  }
 0xd23   : > { %v7309_v37 = vunpack.c.h.bf16 %v7541_v4  ;;  %v7308_v40 = vunpack.c.l.bf16 %v7541_v4  ;;  %v7539_v41 = vld [vmem:[%s8178_s17 + $0x8] sm:$0xff]   ;;  %v7295_v3 = vld [vmem:[%s8178_s17] sm:$0xff]   ;;  %v7305_v23 = vunpack.c.h.bf16 %v7540_v55  ;;  %v7304_v18 = vunpack.c.l.bf16 %v7540_v55  ;;  %v8754_v45 = vld [vmem:[#allocation4 + $0x8] sm:$0xff] }
 0xd24   : > { %v7301_v39 = vunpack.c.h.bf16 %v7539_v41  ;;  %v7300_v42 = vunpack.c.l.bf16 %v7539_v41  ;;  %v7297_v49 = vunpack.c.h.bf16 %v7295_v3  ;;  %v7296_v8 = vunpack.c.l.bf16 %v7295_v3  ;;  %v8760_v47 = vld [vmem:[#allocation4 + $0x10] sm:$0xff]  ;;  %v8766_v48 = vld [vmem:[#allocation4 + $0x18] sm:$0xff]  ;;  %v7547_v62 = vld [vmem:[%s8178_s17 + $0x58] sm:$0xff]  }
 0xd25   : > { %3030 = vmatpush.msra.mxu1 %v7309_v37  ;;  %v7762_v58 = vld [vmem:[%s8208_s11 + $0xb] ss:$0 sm:$0xff]  ;;  %v7763_v2 = vld [vmem:[%s8208_s11 + $0xa] ss:$0 sm:$0xff]  ;;  %v7542_v10 = vld [vmem:[%s8178_s17 + $0x80] sm:$0xff]   ;;  %v7333_v30 = vunpack.c.h.bf16 %v7547_v62  ;;  %v7332_v0 = vunpack.c.l.bf16 %v7547_v62 }
 0xd26   : > { %2990 = vmatpush.msra.mxu0 %v7301_v39  ;;  %v7543_v9 = vld [vmem:[%s8178_s17 + $0x88] sm:$0xff]   ;;  %v7313_v13 = vunpack.c.h.bf16 %v7542_v10  ;;  %v7312_v15 = vunpack.c.l.bf16 %v7542_v10  ;;  %v7546_v32 = vld [vmem:[%s8178_s17 + $0x50] sm:$0xff]   ;;  %v7545_v33 = vld [vmem:[%s8178_s17 + $0x18] sm:$0xff]  }
 0xd27   : > { %3031 = vmatpush.msra.mxu1 %v7308_v40  ;;  %v7317_v11 = vunpack.c.h.bf16 %v7543_v9  ;;  %v7316_v12 = vunpack.c.l.bf16 %v7543_v9  ;;  %v7329_v63 = vunpack.c.h.bf16 %v7546_v32  ;;  %v7328_v22 = vunpack.c.l.bf16 %v7546_v32  ;;  %v7544_v55 = vld [vmem:[%s8178_s17 + $0x10] sm:$0xff]  }
 0xd28   : > { %2991 = vmatpush.msra.mxu0 %v7300_v42  ;;  %v7325_v46 = vunpack.c.h.bf16 %v7545_v33  ;;  %v7324_v36 = vunpack.c.l.bf16 %v7545_v33  ;;  %v7321_v37 = vunpack.c.h.bf16 %v7544_v55  ;;  %v7320_v40 = vunpack.c.l.bf16 %v7544_v55  ;;  %v7548_v33 = vld [vmem:[%s8178_s17 + $0x90] sm:$0xff]  }
 0xd29   : > { %3032 = vmatpush.msra.mxu1 %v7305_v23  ;;  %3070 = vmatpush.msra.mxu2 %v7317_v11  ;;  %v7336_v55 = vunpack.c.l.bf16 %v7548_v33 }
 0xd2a   : > { %2992 = vmatpush.msra.mxu0 %v7297_v49 }
 0xd2b   : > { %3033 = vmatpush.msra.mxu1 %v7304_v18  ;;  %3071 = vmatpush.msra.mxu2 %v7316_v12  ;;  %v7765_v12 = vld [vmem:[%s8208_s11 + $0xe] ss:$0 sm:$0xff] }
 0xd2c   : > { %6755 = vmatmul.msk.f32.vlgmr.msra.gmra.mxu1 %vm2965_vm6, %v8748_v38  ;;  %2993 = vmatpush.msra.mxu0 %v7296_v8 }
 0xd2d   : > { %6747 = vmatmul.msk.f32.vlgmr.msra.gmra.mxu0 %vm2965_vm6, %v8748_v38  ;;  %3072 = vmatpush.msra.mxu2 %v7313_v13 }
 0xd2e   : > { %3255 = vmatpush.msrb.mxu1 %v7325_v46 }
 0xd2f   : > { %3073 = vmatpush.msra.mxu2 %v7312_v15 }
 0xd30   : > { %6763 = vmatmul.msk.f32.vlgmr.msra.gmra.mxu2 %vm2965_vm6, %v8748_v38  ;;  %3256 = vmatpush.msrb.mxu1 %v7324_v36 }
 0xd31   : > { %3295 = vmatpush.msrb.mxu2 %v7333_v30 }
 0xd32   : > { %3257 = vmatpush.msrb.mxu1 %v7321_v37 }
 0xd33   : > { %3296 = vmatpush.msrb.mxu2 %v7332_v0 }
 0xd34   : > { %6756 = vmatmul.msk.f32.gmra.mxu1 %vm2965_vm6, %v8754_v45 }
 0xd35   : > { %6748 = vmatmul.msk.f32.gmra.mxu0 %vm2965_vm6, %v8754_v45  ;;  %3297 = vmatpush.msrb.mxu2 %v7329_v63 }
 0xd36   : > { %3258 = vmatpush.msrb.mxu1 %v7320_v40 }
 0xd37   : > { %3298 = vmatpush.msrb.mxu2 %v7328_v22 }
 0xd38   : > { %6764 = vmatmul.msk.f32.gmra.mxu2 %vm2965_vm6, %v8754_v45 }
 0xd3c   : > { %6757 = vmatmul.msk.f32.gmra.mxu1 %vm2965_vm6, %v8760_v47 }
 0xd3d   : > { %6749 = vmatmul.msk.f32.gmra.mxu0 %vm2965_vm6, %v8760_v47 }
 0xd40   : > { %6765 = vmatmul.msk.f32.gmra.mxu2 %vm2965_vm6, %v8760_v47 }
 0xd44   : > { %6758 = vmatmul.msk.f32.gmra.mxu1 %vm2965_vm6, %v8766_v48 }
 0xd45   : > { %6750 = vmatmul.msk.f32.gmra.mxu0 %vm2965_vm6, %v8766_v48 }
 0xd48   : > { %6766 = vmatmul.msk.f32.gmra.mxu2 %vm2965_vm6, %v8766_v48 }
 0xd4c   : > { %6783 = vmatmul.msk.f32.vlgmr.msrb.gmra.mxu1 %vm2965_vm6, %v8748_v38 }
 0xd50   : > { %6791 = vmatmul.msk.f32.vlgmr.msrb.gmra.mxu2 %vm2965_vm6, %v8748_v38 }
 0xd54   : > { %6784 = vmatmul.msk.f32.gmra.mxu1 %vm2965_vm6, %v8754_v45 }
 0xd58   : > { %6792 = vmatmul.msk.f32.gmra.mxu2 %vm2965_vm6, %v8754_v45 }
 0xd5c   : > { %6785 = vmatmul.msk.f32.gmra.mxu1 %vm2965_vm6, %v8760_v47 }
 0xd60   : > { %6793 = vmatmul.msk.f32.gmra.mxu2 %vm2965_vm6, %v8760_v47 }
 0xd64   : > { %6786 = vmatmul.msk.f32.gmra.mxu1 %vm2965_vm6, %v8766_v48 }
 0xd68   : > { %6794 = vmatmul.msk.f32.gmra.mxu2 %vm2965_vm6, %v8766_v48 }
 0xda9   : > { %v3035_v51 = vpop.f32.mrf.mxu1 }
 0xdaa   : > { %v2995_v25 = vpop.f32.mrf.mxu0  ;;  %v3036_v6 = vadd.f32 %v7762_v58, %v3035_v51 }
 0xdab   : > { %v2996_v7 = vadd.f32 %v7763_v2, %v2995_v25 }
 0xdb1   : > { %v3038_v54 = vpop.f32.mrf.mxu1 }
 0xdb2   : > { %v3039_v50 = vadd.f32 %v7762_v58, %v3038_v54  ;;  %v2998_v19 = vpop.f32.mrf.mxu0 }
 0xdb3   : > { %v2999_v43 = vadd.f32 %v7763_v2, %v2998_v19  ;;  %v3075_v8 = vpop.f32.mrf.mxu2  ;;  %v7764_v19 = vld [vmem:[%s8208_s11 + $0xc] ss:$0 sm:$0xff] }
 0xdb9   : > { %v3041_v57 = vpop.f32.mrf.mxu1 }
 0xdba   : > { %v3042_v24 = vadd.f32 %v7762_v58, %v3041_v57  ;;  %v3001_v31 = vpop.f32.mrf.mxu0 }
 0xdbb   : > { %v3002_v35 = vadd.f32 %v7763_v2, %v3001_v31 }
 0xdc1   : > { %v3044_v59 = vpop.f32.mrf.mxu1 }
 0xdc2   : > { %v3045_v61 = vadd.f32 %v7762_v58, %v3044_v59  ;;  %v3004_v60 = vpop.f32.mrf.mxu0 }
 0xdc3   : > { %v3005_v53 = vadd.f32 %v7763_v2, %v3004_v60 }
 0xdc4   : > { %6767 = vmatpush.xpose.msk.msra.mxu3 %vm3087_vm12, %v3045_v61  ;;  %v3078_v61 = vpop.f32.mrf.mxu2 }
 0xdc5   : > { %v3079_v60 = vadd.f32 %v7764_v19, %v3078_v61 }
 0xdc8   : > { %6768 = vmatpush.xpose.msk.msra.mxu3 %vm3087_vm12, %v3042_v24 }
 0xdcc   : > { %6769 = vmatpush.xpose.msk.msra.mxu3 %vm3087_vm12, %v3039_v50  ;;  %v3081_v2 = vpop.f32.mrf.mxu2 }
 0xdcd   : > { %v3082_v31 = vadd.f32 %v7764_v19, %v3081_v2 }
 0xdd0   : > { %6770 = vmatpush.xpose.msk.msra.mxu3 %vm3087_vm12, %v3036_v6 }
 0xdd3   : > { %6771 = vmatmul.msk.f32.vlgmr.msra.gmra.mxu3 %vm3087_vm12, %v2996_v7 }
 0xddb   : > { %6772 = vmatmul.msk.f32.gmra.mxu3 %vm3087_vm12, %v2999_v43  ;;  %v3084_v43 = vpop.f32.mrf.mxu2 }
 0xde3   : > { %6773 = vmatmul.msk.f32.gmra.mxu3 %vm3087_vm12, %v3002_v35  ;;  %v3085_v35 = vadd.f32 %v7764_v19, %v3084_v43  ;;  %v3300_v9 = vpop.f32.mrf.mxu2 }
 0xde4   : > { %v3301_v15 = vadd.f32 %v7765_v12, %v3300_v9 }
 0xde5   : > { %3213 = vmatpush.msrb.mxu0 %v3085_v35 }
 0xde7   : > { %3214 = vmatpush.msrb.mxu0 %v3082_v31 }
 0xde9   : > { %3215 = vmatpush.msrb.mxu0 %v3079_v60  ;;  %v7767_v60 = vld [vmem:[%s8208_s11 + $0xf] ss:$0 sm:$0xff] }
 0xdeb   : > { %6774 = vmatmul.msk.f32.gmra.mxu3 %vm3087_vm12, %v3005_v53  ;;  %v3076_v53 = vadd.f32 %v7764_v19, %v3075_v8  ;;  %v3303_v10 = vpop.f32.mrf.mxu2 }
 0xded   : > { %3216 = vmatpush.msrb.mxu0 %v3076_v53 }
 0xdf3   : > { %v3306_v11 = vpop.f32.mrf.mxu2 }
 0xdf4   : > { %v3307_v62 = vadd.f32 %v7765_v12, %v3306_v11 }
 0xdfb   : > { %v3309_v13 = vpop.f32.mrf.mxu2 }
 0xe56   : > { %v3129_v21 = vpop.f32.mrf.mxu3 }
 0xe57   : > { %v3141_v14 = vmul.f32 0.35355338, %v3129_v21  ;;  %v3310_v21 = vadd.f32 %v7765_v12, %v3309_v13 }
 0xe59   : > { %v3145_v16 = vsel %vm2965_vm6, %v3141_v14, -inf  ;;  %6803 = vmatpush.xpose.msk.msra.mxu0 %vm3087_vm12, %v3310_v21 }
 0xe5a   : > { %3146 = vmax.xlane.f32.xlu0 %v3145_v16 }
 0xe5d   : > { %6804 = vmatpush.xpose.msk.msra.mxu0 %vm3087_vm12, %v3307_v62 }
 0xe5e   : > { %v3132_v20 = vpop.f32.mrf.mxu3 }
 0xe5f   : > { %v3142_v5 = vmul.f32 0.35355338, %v3132_v20 }
 0xe61   : > { %v3148_v26 = vsel %vm2965_vm6, %v3142_v5, -inf }
 0xe62   : > { %3149 = vmax.xlane.f32.xlu0 %v3148_v26 }
 0xe66   : > { %v3135_v17 = vpop.f32.mrf.mxu3 }
 0xe67   : > { %v3143_v27 = vmul.f32 0.35355338, %v3135_v17 }
 0xe69   : > { %v3151_v28 = vsel %vm2965_vm6, %v3143_v27, -inf }
 0xe6a   : > { %3152 = vmax.xlane.f32.xlu1 %v3151_v28 }
 0xe6e   : > { %v3138_v29 = vpop.f32.mrf.mxu3 }
 0xe6f   : > { %v3144_v34 = vmul.f32 0.35355338, %v3138_v29 }
 0xe71   : > { %v3154_v44 = vsel %vm2965_vm6, %v3144_v34, -inf }
 0xe72   : > { %3155 = vmax.xlane.f32.xlu1 %v3154_v44  ;;  %v7549_v44 = vld [vmem:[%s8178_s17 + $0x98] sm:$0xff]  }
 0xe73   : > { %v7341_v46 = vunpack.c.h.bf16 %v7549_v44  ;;  %v7340_v36 = vunpack.c.l.bf16 %v7549_v44 }
 0xe75   : > { %3335 = vmatpush.msrb.mxu3 %v7341_v46 }
 0xe77   : > { %3336 = vmatpush.msrb.mxu3 %v7340_v36 }
 0xecd   : > { %v3147_v52 = vpop.xlane.xlu0 %3146 }
 0xece   : > { %v3157_v56 = vsub.f32 %v3141_v14, %v3147_v52  ;;  %v3304_v14 = vadd.f32 %v7765_v12, %v3303_v10  ;;  %v7337_v52 = vunpack.c.h.bf16 %v7548_v33  ;;  %v7553_v33 = vld [vmem:[%s8178_s17 + $0x68] sm:$0xff]  }
 0xecf   : > { %v7357_v46 = vunpack.c.h.bf16 %v7553_v33 }
 0xed0   : > { %v3161_v4 = vmul.f32 1.442695, %v3157_v56  ;;  %6805 = vmatpush.xpose.msk.msra.mxu0 %vm3087_vm12, %v3304_v14  ;;  %3337 = vmatpush.msrb.mxu3 %v7337_v52  ;;  %v7356_v52 = vunpack.c.l.bf16 %v7553_v33 }
 0xed2   : > { %7777 = vpow2.f32 %v3161_v4  ;;  %3338 = vmatpush.msrb.mxu3 %v7336_v55 }
 0xed3   : > { %6799 = vmatmul.msk.f32.vlgmr.msrb.gmra.mxu3 %vm2965_vm6, %v8748_v38 }
 0xed4   : > { %6806 = vmatpush.xpose.msk.msra.mxu0 %vm3087_vm12, %v3301_v15 }
 0xed5   : > { %v3150_v41 = vpop.xlane.xlu0 %3149 }
 0xed6   : > { %v3158_v3 = vsub.f32 %v3142_v5, %v3150_v41 }
 0xed8   : > { %v7778_v23 = vpop.eup %7777  ;;  %v3163_v39 = vmul.f32 1.442695, %v3158_v3 }
 0xed9   : > { %v3169_v42 = vsel %vm2965_vm6, %v7778_v23, 0.0 }
 0xeda   : > { %7779 = vpow2.f32 %v3163_v39  ;;  %3170 = vadd.xlane.f32.xlu2 %v3169_v42  ;;  %v8846_v39 = vld [vmem:[%s8173_s0] sm:$0xff]  }
 0xedb   : > { %6800 = vmatmul.msk.f32.gmra.mxu3 %vm2965_vm6, %v8754_v45  ;;  %v3231_v42 = vunpack.c.l.bf16 %v8846_v39 }
 0xedd   : > { %v3153_v18 = vpop.xlane.xlu1 %3152  ;;  %3565 = vmatpush.msra.mxu3 %v3231_v42 }
 0xede   : > { %v3159_v49 = vsub.f32 %v3143_v27, %v3153_v18  ;;  %v3260_v27 = vpop.f32.mrf.mxu1 }
 0xee0   : > { %v7780_v51 = vpop.eup %7779  ;;  %v3165_v54 = vmul.f32 1.442695, %v3159_v49 }
 0xee1   : > { %v3172_v57 = vsel %vm2965_vm6, %v7780_v51, 0.0 }
 0xee2   : > { %7781 = vpow2.f32 %v3165_v54  ;;  %3173 = vadd.xlane.f32.xlu2 %v3172_v57 }
 0xee3   : > { %6801 = vmatmul.msk.f32.gmra.mxu3 %vm2965_vm6, %v8760_v47 }
 0xee5   : > { %v3156_v58 = vpop.xlane.xlu1 %3155 }
 0xee6   : > { %v3160_v59 = vsub.f32 %v3144_v34, %v3156_v58  ;;  %v7766_v34 = vld [vmem:[%s8208_s11 + $0xd] ss:$0 sm:$0xff]  ;;  %v3263_v4 = vpop.f32.mrf.mxu1 }
 0xee7   : > { %v3261_v56 = vadd.f32 %v7766_v34, %v3260_v27  ;;  %v3264_v37 = vadd.f32 %v7766_v34, %v3263_v4 }
 0xee8   : > { %v7782_v24 = vpop.eup %7781  ;;  %v3167_v25 = vmul.f32 1.442695, %v3160_v59 }
 0xee9   : > { %v3175_v50 = vsel %vm2965_vm6, %v7782_v24, 0.0 }
 0xeea   : > { %7783 = vpow2.f32 %v3167_v25  ;;  %3176 = vadd.xlane.f32.xlu0 %v3175_v50 }
 0xeeb   : > { %6802 = vmatmul.msk.f32.gmra.mxu3 %vm2965_vm6, %v8766_v48 }
 0xeee   : > { %v3266_v40 = vpop.f32.mrf.mxu1 }
 0xeef   : > { %v3267_v41 = vadd.f32 %v7766_v34, %v3266_v40 }
 0xef0   : > { %v7784_v6 = vpop.eup %7783 }
 0xef1   : > { %v3178_v7 = vsel %vm2965_vm6, %v7784_v6, 0.0 }
 0xef2   : > { %3179 = vadd.xlane.f32.xlu1 %v3178_v7 }
 0xef6   : > { %v3269_v3 = vpop.f32.mrf.mxu1 }
 0xf4d   : > { %v3171_v16 = vpop.xlane.xlu2 %3170 }
 0xf4e   : > { %7785 = vrcp.f32 %v3171_v16 }
 0xf54   : > { %v7786_v30 = vpop.eup %7785 }
 0xf55   : > { %v3174_v32 = vpop.xlane.xlu2 %3173  ;;  %v3185_v0 = vmul.f32 %v7786_v30, %v7778_v23  ;;  %v3270_v23 = vadd.f32 %v7766_v34, %v3269_v3 }
 0xf56   : > { %7787 = vrcp.f32 %v3174_v32  ;;  %v3340_v61 = vpop.f32.mrf.mxu3 }
 0xf57   : > { %6775 = vmatmul.msk.f32.vlgmr.msrb.gmra.mxu0 %vm2965_vm6, %v3185_v0  ;;  %v3341_v12 = vadd.f32 %v7767_v60, %v3340_v61  ;;  %v7550_v61 = vld [vmem:[%s8178_s17 + $0x20] sm:$0xff]  }
 0xf5c   : > { %v7788_v63 = vpop.eup %7787 }
 0xf5d   : > { %v3177_v20 = vpop.xlane.xlu0 %3176  ;;  %v3186_v5 = vmul.f32 %v7788_v63, %v7780_v51 }
 0xf5e   : > { %7789 = vrcp.f32 %v3177_v20  ;;  %v3343_v2 = vpop.f32.mrf.mxu3 }
 0xf5f   : > { %6776 = vmatmul.msk.f32.gmra.mxu0 %vm2965_vm6, %v3186_v5  ;;  %v3344_v11 = vadd.f32 %v7767_v60, %v3343_v2 }
 0xf64   : > { %v7790_v22 = vpop.eup %7789 }
 0xf65   : > { %v3180_v26 = vpop.xlane.xlu1 %3179  ;;  %v3187_v17 = vmul.f32 %v7790_v22, %v7782_v24 }
 0xf66   : > { %7791 = vrcp.f32 %v3180_v26  ;;  %v3346_v43 = vpop.f32.mrf.mxu3 }
 0xf67   : > { %6777 = vmatmul.msk.f32.gmra.mxu0 %vm2965_vm6, %v3187_v17  ;;  %v3347_v9 = vadd.f32 %v7767_v60, %v3346_v43 }
 0xf6c   : > { %v7792_v28 = vpop.eup %7791 }
 0xf6d   : > { %v3188_v29 = vmul.f32 %v7792_v28, %v7784_v6 }
 0xf6e   : > { %v3349_v53 = vpop.f32.mrf.mxu3 }
 0xf6f   : > { %6778 = vmatmul.msk.f32.gmra.mxu0 %vm2965_vm6, %v3188_v29  ;;  %v3350_v10 = vadd.f32 %v7767_v60, %v3349_v53  ;;  %v7768_v60 = vld [vmem:[%s8208_s11 + $0x11] ss:$0 sm:$0xff] }
 0xf71   : > { %3477 = vmatpush.msra.mxu1 %v3350_v10 }
 0xf73   : > { %3478 = vmatpush.msra.mxu1 %v3347_v9 }
 0xf75   : > { %3479 = vmatpush.msra.mxu1 %v3344_v11 }
 0xf77   : > { %6807 = vmatmul.msk.f32.vlgmr.msra.gmra.mxu0 %vm3087_vm12, %v3261_v56  ;;  %3480 = vmatpush.msra.mxu1 %v3341_v12  ;;  %v7552_v56 = vld [vmem:[%s8178_s17 + $0x60] sm:$0xff]   ;;  %v7769_v12 = vld [vmem:[%s8208_s11 + $0x10] ss:$0 sm:$0xff] }
 0xf78   : > { %v7353_v4 = vunpack.c.h.bf16 %v7552_v56  ;;  %v7352_v55 = vunpack.c.l.bf16 %v7552_v56 }
 0xf79   : > { %3642 = vmatpush.msrb.mxu1 %v7357_v46 }
 0xf7b   : > { %3643 = vmatpush.msrb.mxu1 %v7356_v52 }
 0xf7d   : > { %3644 = vmatpush.msrb.mxu1 %v7353_v4 }
 0xf7f   : > { %6808 = vmatmul.msk.f32.gmra.mxu0 %vm3087_vm12, %v3264_v37  ;;  %3645 = vmatpush.msrb.mxu1 %v7352_v55 }
 0xf87   : > { %6809 = vmatmul.msk.f32.gmra.mxu0 %vm3087_vm12, %v3267_v41 }
 0xf8f   : > { %6810 = vmatmul.msk.f32.gmra.mxu0 %vm3087_vm12, %v3270_v23 }
 0xfd4   : > { %v3218_v18 = vpop.f32.mrf.mxu0 }
 0xfd5   : > { %6820 = vmatmul.msk.f32.vlgmr.msra.gmra.mxu3 %vm3087_vm12, %v3218_v18 }
 0xfdc   : > { %v3221_v49 = vpop.f32.mrf.mxu0 }
 0xfdd   : > { %6821 = vmatmul.msk.f32.gmra.mxu3 %vm3087_vm12, %v3221_v49 }
 0xfe4   : > { %v3224_v8 = vpop.f32.mrf.mxu0 }
 0xfe5   : > { %6822 = vmatmul.msk.f32.gmra.mxu3 %vm3087_vm12, %v3224_v8 }
 0xfec   : > { %v3227_v51 = vpop.f32.mrf.mxu0 }
 0xfed   : > { %6823 = vmatmul.msk.f32.gmra.mxu3 %vm3087_vm12, %v3227_v51  ;;  %v7551_v51 = vld [vmem:[%s8178_s17 + $0x28] sm:$0xff]  }
 0xff4   : > { %v3393_v54 = vpop.f32.mrf.mxu0 }
 0xff5   : > { %v3405_v57 = vmul.f32 0.35355338, %v3393_v54  ;;  %v7349_v54 = vunpack.c.h.bf16 %v7551_v51 }
 0xff7   : > { %v3409_v58 = vsel %vm2965_vm6, %v3405_v57, -inf  ;;  %3602 = vmatpush.msrb.mxu0 %v7349_v54  ;;  %v7558_v54 = vld [vmem:[%s8178_s17 + $0x70] sm:$0xff]  }
 0xff8   : > { %3410 = vmax.xlane.f32.xlu2 %v3409_v58 }
 0xffc   : > { %v3396_v59 = vpop.f32.mrf.mxu0 }
 0xffd   : > { %v3406_v24 = vmul.f32 0.35355338, %v3396_v59  ;;  %v7348_v59 = vunpack.c.l.bf16 %v7551_v51  ;;  %v7559_v51 = vld [vmem:[%s8178_s17 + $0x78] sm:$0xff]  }
 0xfff   : > { %v3412_v25 = vsel %vm2965_vm6, %v3406_v24, -inf  ;;  %3603 = vmatpush.msrb.mxu0 %v7348_v59 }
0x1000   : > { %3413 = vmax.xlane.f32.xlu0 %v3412_v25  ;;  %v7344_v25 = vunpack.c.l.bf16 %v7550_v61 }
0x1004   : > { %v3399_v50 = vpop.f32.mrf.mxu0 }
0x1005   : > { %v3407_v6 = vmul.f32 0.35355338, %v3399_v50  ;;  %v3496_v50 = vunpack.c.h.bf16 %v8846_v39 }
0x1007   : > { %v3415_v7 = vsel %vm2965_vm6, %v3407_v6, -inf  ;;  %3524 = vmatpush.msra.mxu2 %v3496_v50  ;;  %v7376_v50 = vunpack.c.l.bf16 %v7558_v54 }
0x1008   : > { %3416 = vmax.xlane.f32.xlu1 %v3415_v7 }
0x100c   : > { %v3402_v19 = vpop.f32.mrf.mxu0 }
0x100d   : > { %v3408_v31 = vmul.f32 0.35355338, %v3402_v19 }
0x100f   : > { %v3418_v35 = vsel %vm2965_vm6, %v3408_v31, -inf }
0x1010   : > { %3419 = vmax.xlane.f32.xlu2 %v3418_v35 }
0x106b   : > { %v3411_v13 = vpop.xlane.xlu2 %3410 }
0x106c   : > { %v3421_v21 = vsub.f32 %v3405_v57, %v3411_v13 }
0x106e   : > { %v3425_v62 = vmul.f32 1.442695, %v3421_v21 }
0x1070   : > { %7793 = vpow2.f32 %v3425_v62 }
0x1073   : > { %v3414_v14 = vpop.xlane.xlu0 %3413 }
0x1074   : > { %v3422_v15 = vsub.f32 %v3406_v24, %v3414_v14  ;;  %v7345_v24 = vunpack.c.h.bf16 %v7550_v61  ;;  %v7377_v61 = vunpack.c.h.bf16 %v7558_v54 }
0x1076   : > { %v7794_v16 = vpop.eup %7793  ;;  %v3427_v30 = vmul.f32 1.442695, %v3422_v15  ;;  %3604 = vmatpush.msrb.mxu0 %v7345_v24 }
0x1077   : > { %v3433_v32 = vsel %vm2965_vm6, %v7794_v16, 0.0 }
0x1078   : > { %7795 = vpow2.f32 %v3427_v30  ;;  %3434 = vadd.xlane.f32.xlu0 %v3433_v32  ;;  %3605 = vmatpush.msrb.mxu0 %v7344_v25 }
0x1079   : > { %6828 = vmatmul.msk.f32.vlgmr.msrb.gmra.mxu0 %vm2965_vm6, %v8748_v38 }
0x107b   : > { %v3417_v0 = vpop.xlane.xlu1 %3416 }
0x107c   : > { %v3423_v63 = vsub.f32 %v3407_v6, %v3417_v0  ;;  %v8901_v0 = vpop.f32.mrf.mxu3 }
0x107e   : > { %v7796_v20 = vpop.eup %7795  ;;  %v3429_v5 = vmul.f32 1.442695, %v3423_v63 }
0x107f   : > { %v3436_v22 = vsel %vm2965_vm6, %v7796_v20, 0.0 }
0x1080   : > { %7797 = vpow2.f32 %v3429_v5  ;;  %3437 = vadd.xlane.f32.xlu1 %v3436_v22  ;;  %v7555_v22 = vld [vmem:[%s8178_s17 + $0xa8] sm:$0xff]  }
0x1081   : > { %6829 = vmatmul.msk.f32.gmra.mxu0 %vm2965_vm6, %v8754_v45 }
0x1083   : > { %v3420_v26 = vpop.xlane.xlu2 %3419 }
0x1084   : > { %v3424_v17 = vsub.f32 %v3408_v31, %v3420_v26  ;;  %v8903_v63 = vpop.f32.mrf.mxu3  ;;  %v7554_v26 = vld [vmem:[%s8178_s17 + $0xa0] sm:$0xff]  }
0x1086   : > { %v7798_v27 = vpop.eup %7797  ;;  %v3431_v28 = vmul.f32 1.442695, %v3424_v17  ;;  %v7365_v17 = vunpack.c.h.bf16 %v7555_v22 }
0x1087   : > { %v3439_v29 = vsel %vm2965_vm6, %v7798_v27, 0.0 }
0x1088   : > { %7799 = vpow2.f32 %v3431_v28  ;;  %3440 = vadd.xlane.f32.xlu2 %v3439_v29  ;;  %3682 = vmatpush.msrb.mxu2 %v7365_v17  ;;  %v7361_v28 = vunpack.c.h.bf16 %v7554_v26  ;;  %v7557_v17 = vld [vmem:[%s8178_s17 + $0x38] sm:$0xff]  }
0x1089   : > { %6830 = vmatmul.msk.f32.gmra.mxu0 %vm2965_vm6, %v8760_v47 }
0x108e   : > { %v7800_v34 = vpop.eup %7799 }
0x108f   : > { %v3442_v44 = vsel %vm2965_vm6, %v7800_v34, 0.0 }
0x1090   : > { %3443 = vadd.xlane.f32.xlu0 %v3442_v44  ;;  %v7360_v44 = vunpack.c.l.bf16 %v7554_v26 }
0x1091   : > { %6831 = vmatmul.msk.f32.gmra.mxu0 %vm2965_vm6, %v8766_v48 }
0x10eb   : > { %v3435_v36 = vpop.xlane.xlu0 %3434 }
0x10ec   : > { %7801 = vrcp.f32 %v3435_v36 }
0x10f2   : > { %v7802_v37 = vpop.eup %7801 }
0x10f3   : > { %v3449_v40 = vmul.f32 %v7802_v37, %v7794_v16  ;;  %v3438_v41 = vpop.xlane.xlu1 %3437 }
0x10f4   : > { %7803 = vrcp.f32 %v3438_v41 }
0x10f5   : > { %6811 = vmatmul.msk.f32.vlgmr.msra.gmra.mxu1 %vm2965_vm6, %v3449_v40 }
0x10f6   : > { %v3607_v10 = vpop.f32.mrf.mxu0 }
0x10f7   : > { %v3608_v21 = vadd.f32 %v7769_v12, %v3607_v10 }
0x10fa   : > { %v7804_v3 = vpop.eup %7803 }
0x10fb   : > { %v3441_v23 = vpop.xlane.xlu2 %3440  ;;  %v3450_v42 = vmul.f32 %v7804_v3, %v7796_v20  ;;  %v8905_v20 = vpop.f32.mrf.mxu3 }
0x10fc   : > { %7805 = vrcp.f32 %v3441_v23 }
0x10fd   : > { %6812 = vmatmul.msk.f32.gmra.mxu1 %vm2965_vm6, %v3450_v42 }
0x10fe   : > { %v3610_v62 = vpop.f32.mrf.mxu0 }
0x10ff   : > { %v3611_v14 = vadd.f32 %v7769_v12, %v3610_v62 }
0x1102   : > { %v7806_v18 = vpop.eup %7805 }
0x1103   : > { %v3444_v49 = vpop.xlane.xlu0 %3443  ;;  %v3451_v8 = vmul.f32 %v7806_v18, %v7798_v27  ;;  %v8907_v5 = vpop.f32.mrf.mxu3  ;;  %v7364_v27 = vunpack.c.l.bf16 %v7555_v22 }
0x1104   : > { %7807 = vrcp.f32 %v3444_v49 }
0x1105   : > { %6813 = vmatmul.msk.f32.gmra.mxu1 %vm2965_vm6, %v3451_v8  ;;  %3683 = vmatpush.msrb.mxu2 %v7364_v27  ;;  %v7373_v27 = vunpack.c.h.bf16 %v7557_v17 }
0x1106   : > { %v3613_v15 = vpop.f32.mrf.mxu0 }
0x1107   : > { %v3614_v16 = vadd.f32 %v7769_v12, %v3613_v15  ;;  %3684 = vmatpush.msrb.mxu2 %v7361_v28  ;;  %v7770_v15 = vld [vmem:[%s8208_s11 + $0x12] ss:$0 sm:$0xff]  ;;  %v7372_v28 = vunpack.c.l.bf16 %v7557_v17 }
0x1109   : > { %3685 = vmatpush.msrb.mxu2 %v7360_v44 }
0x110a   : > { %v7808_v57 = vpop.eup %7807 }
0x110b   : > { %v3452_v58 = vmul.f32 %v7808_v57, %v7800_v34  ;;  %v7381_v57 = vunpack.c.h.bf16 %v7559_v51 }
0x110d   : > { %6814 = vmatmul.msk.f32.gmra.mxu1 %vm2965_vm6, %v3452_v58  ;;  %v7380_v58 = vunpack.c.l.bf16 %v7559_v51 }
0x110e   : > { %v3616_v30 = vpop.f32.mrf.mxu0 }
0x110f   : > { %v3617_v32 = vadd.f32 %v7769_v12, %v3616_v30 }
0x1115   : > { %6836 = vmatmul.msk.f32.vlgmr.msrb.gmra.mxu1 %vm2965_vm6, %v8748_v38 }
0x111d   : > { %6837 = vmatmul.msk.f32.gmra.mxu1 %vm2965_vm6, %v8754_v45 }
0x1125   : > { %6838 = vmatmul.msk.f32.gmra.mxu1 %vm2965_vm6, %v8760_v47 }
0x112d   : > { %6839 = vmatmul.msk.f32.gmra.mxu1 %vm2965_vm6, %v8766_v48 }
0x1172   : > { %v3482_v2 = vpop.f32.mrf.mxu1 }
0x1173   : > { %6816 = vmatmul.msk.f32.vlgmr.msra.gmra.mxu2 %vm3087_vm12, %v3482_v2 }
0x1174   : > { %3912 = vmatpush.msra.mxu2 %v7373_v27 }
0x1176   : > { %3913 = vmatpush.msra.mxu2 %v7372_v28 }
0x117a   : > { %v3485_v6 = vpop.f32.mrf.mxu1 }
0x117b   : > { %6817 = vmatmul.msk.f32.gmra.mxu2 %vm3087_vm12, %v3485_v6 }
0x1182   : > { %v3488_v7 = vpop.f32.mrf.mxu1 }
0x1183   : > { %6818 = vmatmul.msk.f32.gmra.mxu2 %vm3087_vm12, %v3488_v7 }
0x118a   : > { %v3491_v19 = vpop.f32.mrf.mxu1 }
0x118b   : > { %6819 = vmatmul.msk.f32.gmra.mxu2 %vm3087_vm12, %v3491_v19 }
0x1192   : > { %v3647_v43 = vpop.f32.mrf.mxu1 }
0x1193   : > { %v3648_v13 = vadd.f32 %v7768_v60, %v3647_v43  ;;  %6844 = vmatmul.msk.f32.vlgmr.msrb.gmra.mxu2 %vm2965_vm6, %v8748_v38 }
0x119a   : > { %v3650_v31 = vpop.f32.mrf.mxu1 }
0x119b   : > { %v3651_v11 = vadd.f32 %v7768_v60, %v3650_v31  ;;  %6845 = vmatmul.msk.f32.gmra.mxu2 %vm2965_vm6, %v8754_v45 }
0x11a2   : > { %v3653_v35 = vpop.f32.mrf.mxu1 }
0x11a3   : > { %v3654_v9 = vadd.f32 %v7768_v60, %v3653_v35  ;;  %6846 = vmatmul.msk.f32.gmra.mxu2 %vm2965_vm6, %v8760_v47 }
0x11aa   : > { %v3656_v53 = vpop.f32.mrf.mxu1 }
0x11ab   : > { %v3657_v39 = vadd.f32 %v7768_v60, %v3656_v53  ;;  %6847 = vmatmul.msk.f32.gmra.mxu2 %vm2965_vm6, %v8766_v48 }
0x11ad   : > { %6848 = vmatpush.xpose.msk.msrb.mxu3 %vm3087_vm12, %v3657_v39 }
0x11b1   : > { %6849 = vmatpush.xpose.msk.msrb.mxu3 %vm3087_vm12, %v3654_v9 }
0x11b5   : > { %6850 = vmatpush.xpose.msk.msrb.mxu3 %vm3087_vm12, %v3651_v11 }
0x11b9   : > { %6851 = vmatpush.xpose.msk.msrb.mxu3 %vm3087_vm12, %v3648_v13 }
0x11bc   : > { %6852 = vmatmul.msk.f32.vlgmr.msrb.gmra.mxu3 %vm3087_vm12, %v3608_v21 }
0x11bd   : > { %3952 = vmatpush.msra.mxu3 %v7381_v57  ;;  %v7771_v57 = vld [vmem:[%s8208_s11 + $0x14] ss:$0 sm:$0xff] }
0x11bf   : > { %3953 = vmatpush.msra.mxu3 %v7380_v58 }
0x11c1   : > { %3954 = vmatpush.msra.mxu3 %v7377_v61 }
0x11c3   : > { %3955 = vmatpush.msra.mxu3 %v7376_v50 }
0x11c4   : > { %6853 = vmatmul.msk.f32.gmra.mxu3 %vm3087_vm12, %v3611_v14 }
0x11cc   : > { %6854 = vmatmul.msk.f32.gmra.mxu3 %vm3087_vm12, %v3614_v16 }
0x11d4   : > { %6855 = vmatmul.msk.f32.gmra.mxu3 %vm3087_vm12, %v3617_v32 }
0x11dc   : > { %6877 = vmatmul.msk.f32.vlgmr.msra.gmra.mxu3 %vm2965_vm6, %v8748_v38 }
0x11e4   : > { %6878 = vmatmul.msk.f32.gmra.mxu3 %vm2965_vm6, %v8754_v45 }
0x11ec   : > { %6879 = vmatmul.msk.f32.gmra.mxu3 %vm2965_vm6, %v8760_v47 }
0x11f4   : > { %6880 = vmatmul.msk.f32.gmra.mxu3 %vm2965_vm6, %v8766_v48 }
0x11f6   : > { %v8923_v3 = vpop.f32.mrf.mxu2 }
0x11fe   : > { %v8925_v23 = vpop.f32.mrf.mxu2 }
0x1206   : > { %v8927_v42 = vpop.f32.mrf.mxu2 }
0x120e   : > { %v8931_v25 = vpop.f32.mrf.mxu2 }
0x1216   : > { %v3687_v31 = vpop.f32.mrf.mxu2 }
0x1217   : > { %v3688_v26 = vadd.f32 %v7770_v15, %v3687_v31 }
0x121e   : > { %v3690_v10 = vpop.f32.mrf.mxu2 }
0x121f   : > { %v3691_v22 = vadd.f32 %v7770_v15, %v3690_v10  ;;  %v3568_v10 = vadd.f32 %v8901_v0, %v8923_v3  ;;  %v7561_v3 = vld [vmem:[%s8178_s17 + $0xb8] sm:$0xff]  }
0x1220   : > { %v7388_v17 = vunpack.c.l.bf16 %v7561_v3 }
0x1226   : > { %v3693_v21 = vpop.f32.mrf.mxu2 }
0x1227   : > { %v3694_v30 = vadd.f32 %v7770_v15, %v3693_v21 }
0x122e   : > { %v3696_v16 = vpop.f32.mrf.mxu2 }
0x122f   : > { %v3697_v32 = vadd.f32 %v7770_v15, %v3696_v16 }
0x1231   : > { %3824 = vmatpush.msra.mxu0 %v3697_v32 }
0x1233   : > { %3825 = vmatpush.msra.mxu0 %v3694_v30  ;;  %v3577_v30 = vadd.f32 %v8907_v5, %v8931_v25 }
0x1235   : > { %3826 = vmatpush.msra.mxu0 %v3691_v22  ;;  %v7560_v22 = vld [vmem:[%s8178_s17 + $0xb0] sm:$0xff]  }
0x1236   : > { %v7384_v28 = vunpack.c.l.bf16 %v7560_v22 }
0x1237   : > { %3827 = vmatpush.msra.mxu0 %v3688_v26  ;;  %v7389_v26 = vunpack.c.h.bf16 %v7561_v3 }
0x1239   : > { %3992 = vmatpush.msrb.mxu0 %v7389_v26 }
0x123b   : > { %3993 = vmatpush.msrb.mxu0 %v7388_v17 }
0x123f   : > { %v3740_v29 = vpop.f32.mrf.mxu3 }
0x1240   : > { %v3752_v34 = vmul.f32 0.35355338, %v3740_v29  ;;  %v7556_v29 = vld [vmem:[%s8178_s17 + $0x30] sm:$0xff]  }
0x1241   : > { %v7368_v44 = vunpack.c.l.bf16 %v7556_v29 }
0x1242   : > { %v3756_v33 = vsel %vm2965_vm6, %v3752_v34, -inf }
0x1243   : > { %3757 = vmax.xlane.f32.xlu1 %v3756_v33 }
0x1247   : > { %v3743_v46 = vpop.f32.mrf.mxu3 }
0x1248   : > { %v3753_v36 = vmul.f32 0.35355338, %v3743_v46 }
0x124a   : > { %v3759_v52 = vsel %vm2965_vm6, %v3753_v36, -inf }
0x124b   : > { %3760 = vmax.xlane.f32.xlu2 %v3759_v52 }
0x124f   : > { %v3746_v56 = vpop.f32.mrf.mxu3 }
0x1250   : > { %v3754_v4 = vmul.f32 0.35355338, %v3746_v56  ;;  %v8954_v56 = vld [vmem:[%s8173_s0 + $0x8] sm:$0xff]   ;;  %s9669_s0 = sld [smem:[#allocation10_spill]] }
0x1252   : > { %v3762_v55 = vsel %vm2965_vm6, %v3754_v4, -inf }
0x1253   : > { %3763 = vmax.xlane.f32.xlu0 %v3762_v55 }
0x1256   : > { %s4333_s17 = ssub.s32 0, %s9669_s0  ;;  %p4332_p13 = scmp.lt.s32.totalorder %s9669_s0, 0 }
0x1257   : > { %v3749_v37 = vpop.f32.mrf.mxu3  ;;  %s6906_s5 = smin.u32 %s9669_s0, %s4333_s17 }
0x1258   : > { %v3755_v40 = vmul.f32 0.35355338, %v3749_v37  ;;  %s4335_s30 = sand.u32 1, %s6906_s5  }
0x1259   : > { %s4336_s26 = ssub.s32 0, %s4335_s30 }
0x125a   : > { %v3765_v41 = vsel %vm2965_vm6, %v3755_v40, -inf  ;;  %s9685_s26 = smov (!%p4332_p13, %s4336_s26), %s4335_s30 }
0x125b   : > { %3766 = vmax.xlane.f32.xlu1 %v3765_v41  ;;  %p6908_p0 = scmp.lt.s32.totalorder %s9685_s26, 0  ;;  %s4342_s3 = sadd.s32 2, %s9685_s26 }
0x125d   : > { %s9687_s3 = smov (!%p6908_p0, %s4342_s3), %s9685_s26 }
0x125e   : > { %p6909_p1 = scmp.ne.s32.totalorder %s9687_s3, 0 }
0x12b6   : > { %v3758_v18 = vpop.xlane.xlu1 %3757 }
0x12b7   : > { %v3768_v49 = vsub.f32 %v3752_v34, %v3758_v18  ;;  %v7369_v34 = vunpack.c.h.bf16 %v7556_v29 }
0x12b9   : > { %v3772_v8 = vmul.f32 1.442695, %v3768_v49  ;;  %3914 = vmatpush.msra.mxu2 %v7369_v34  ;;  %v9002_v34 = vld [vmem:[#allocation4 + $0x8] sm:$0xff] }
0x12bb   : > { %7809 = vpow2.f32 %v3772_v8  ;;  %3915 = vmatpush.msra.mxu2 %v7368_v44 }
0x12bc   : > { %6869 = vmatmul.msk.f32.vlgmr.msra.gmra.mxu2 %vm2965_vm6, %v8748_v38  ;;  %v3957_v38 = vpop.f32.mrf.mxu3 }
0x12be   : > { %v3761_v59 = vpop.xlane.xlu2 %3760 }
0x12bf   : > { %v3769_v24 = vsub.f32 %v3753_v36, %v3761_v59 }
0x12c1   : > { %v7810_v2 = vpop.eup %7809  ;;  %v3774_v6 = vmul.f32 1.442695, %v3769_v24  ;;  %v3958_v24 = vadd.f32 %v7771_v57, %v3957_v38 }
0x12c2   : > { %v3780_v7 = vsel %vm2965_vm6, %v7810_v2, 0.0 }
0x12c3   : > { %7811 = vpow2.f32 %v3774_v6  ;;  %3781 = vadd.xlane.f32.xlu2 %v3780_v7 }
0x12c4   : > { %6870 = vmatmul.msk.f32.gmra.mxu2 %vm2965_vm6, %v8754_v45  ;;  %v3960_v49 = vpop.f32.mrf.mxu3 }
0x12c5   : > { %v3961_v61 = vadd.f32 %v7771_v57, %v3960_v49 }
0x12c6   : > { %v3764_v19 = vpop.xlane.xlu0 %3763 }
0x12c7   : > { %v3770_v43 = vsub.f32 %v3754_v4, %v3764_v19  ;;  %v3843_v4 = vunpack.c.l.bf16 %v8954_v56  ;;  %v7772_v19 = vld [vmem:[%s8208_s11 + $0x13] ss:$0 sm:$0xff] }
0x12c9   : > { %v7812_v35 = vpop.eup %7811  ;;  %v3776_v60 = vmul.f32 1.442695, %v3770_v43  ;;  %3871 = vmatpush.msra.mxu1 %v3843_v4 }
0x12ca   : > { %v3783_v53 = vsel %vm2965_vm6, %v7812_v35, 0.0 }
0x12cb   : > { %7813 = vpow2.f32 %v3776_v60  ;;  %3784 = vadd.xlane.f32.xlu0 %v3783_v53 }
0x12cc   : > { %6871 = vmatmul.msk.f32.gmra.mxu2 %vm2965_vm6, %v8760_v47  ;;  %v3963_v54 = vpop.f32.mrf.mxu3 }
0x12cd   : > { %v3964_v59 = vadd.f32 %v7771_v57, %v3963_v54 }
0x12ce   : > { %v3767_v39 = vpop.xlane.xlu1 %3766 }
0x12cf   : > { %v3771_v9 = vsub.f32 %v3755_v40, %v3767_v39 }
0x12d1   : > { %v7814_v11 = vpop.eup %7813  ;;  %v3778_v12 = vmul.f32 1.442695, %v3771_v9 }
0x12d2   : > { %v3786_v13 = vsel %vm2965_vm6, %v7814_v11, 0.0 }
0x12d3   : > { %7815 = vpow2.f32 %v3778_v12  ;;  %3787 = vadd.xlane.f32.xlu1 %v3786_v13  ;;  %v3571_v13 = vadd.f32 %v8903_v63, %v8925_v23  ;;  %v7385_v63 = vunpack.c.h.bf16 %v7560_v22 }
0x12d4   : > { %6872 = vmatmul.msk.f32.gmra.mxu2 %vm2965_vm6, %v8766_v48  ;;  %v3966_v47 = vpop.f32.mrf.mxu3 }
0x12d5   : > { %v3967_v58 = vadd.f32 %v7771_v57, %v3966_v47  ;;  %3994 = vmatpush.msrb.mxu0 %v7385_v63 }
0x12d7   : > { %6889 = vmatpush.xpose.msk.msrb.mxu1 %vm3087_vm12, %v3967_v58  ;;  %3995 = vmatpush.msrb.mxu0 %v7384_v28 }
0x12d9   : > { %v7816_v62 = vpop.eup %7815 }
0x12da   : > { %v3789_v14 = vsel %vm2965_vm6, %v7816_v62, 0.0 }
0x12db   : > { %3790 = vadd.xlane.f32.xlu2 %v3789_v14  ;;  %6890 = vmatpush.xpose.msk.msrb.mxu1 %vm3087_vm12, %v3964_v59  ;;  %v3574_v14 = vadd.f32 %v8905_v20, %v8927_v42  ;;  %v8997_v42 = vld [vmem:[#allocation4] sm:$0xff] }
0x12df   : > { %6891 = vmatpush.xpose.msk.msrb.mxu1 %vm3087_vm12, %v3961_v61 }
0x12e3   : > { %6892 = vmatpush.xpose.msk.msrb.mxu1 %vm3087_vm12, %v3958_v24 }
0x1336   : > { %v3782_v33 = vpop.xlane.xlu2 %3781 }
0x1337   : > { %7817 = vrcp.f32 %v3782_v33 }
0x133d   : > { %v7818_v46 = vpop.eup %7817 }
0x133e   : > { %v3796_v36 = vmul.f32 %v7818_v46, %v7810_v2  ;;  %v3785_v52 = vpop.xlane.xlu0 %3784 }
0x133f   : > { %7819 = vrcp.f32 %v3785_v52  ;;  %v3917_v6 = vpop.f32.mrf.mxu2 }
0x1340   : > { %6856 = vmatmul.msk.f32.vlgmr.msra.gmra.mxu0 %vm2965_vm6, %v3796_v36  ;;  %v3918_v43 = vadd.f32 %v7772_v19, %v3917_v6  ;;  %v9007_v36 = vld [vmem:[#allocation4 + $0x10] sm:$0xff] }
0x1345   : > { %v7820_v55 = vpop.eup %7819 }
0x1346   : > { %v3788_v37 = vpop.xlane.xlu1 %3787  ;;  %v3797_v40 = vmul.f32 %v7820_v55, %v7812_v35 }
0x1347   : > { %7821 = vrcp.f32 %v3788_v37  ;;  %v3920_v31 = vpop.f32.mrf.mxu2  ;;  %v9012_v37 = vld [vmem:[#allocation4 + $0x18] sm:$0xff] }
0x1348   : > { %6857 = vmatmul.msk.f32.gmra.mxu0 %vm2965_vm6, %v3797_v40  ;;  %v3921_v35 = vadd.f32 %v7772_v19, %v3920_v31 }
0x134d   : > { %v7822_v41 = vpop.eup %7821 }
0x134e   : > { %v3791_v45 = vpop.xlane.xlu2 %3790  ;;  %v3798_v18 = vmul.f32 %v7822_v41, %v7814_v11 }
0x134f   : > { %7823 = vrcp.f32 %v3791_v45  ;;  %v3923_v60 = vpop.f32.mrf.mxu2 }
0x1350   : > { %6858 = vmatmul.msk.f32.gmra.mxu0 %vm2965_vm6, %v3798_v18  ;;  %v3924_v53 = vadd.f32 %v7772_v19, %v3923_v60 }
0x1355   : > { %v7824_v8 = vpop.eup %7823 }
0x1356   : > { %v3799_v51 = vmul.f32 %v7824_v8, %v7816_v62 }
0x1357   : > { %v3926_v39 = vpop.f32.mrf.mxu2 }
0x1358   : > { %6859 = vmatmul.msk.f32.gmra.mxu0 %vm2965_vm6, %v3799_v51  ;;  %v3927_v9 = vadd.f32 %v7772_v19, %v3926_v39 }
0x1360   : > { %6885 = vmatmul.msk.f32.vlgmr.msrb.gmra.mxu0 %vm2965_vm6, %v8997_v42 }
0x1368   : > { %6886 = vmatmul.msk.f32.gmra.mxu0 %vm2965_vm6, %v9002_v34 }
0x1370   : > { %6887 = vmatmul.msk.f32.gmra.mxu0 %vm2965_vm6, %v9007_v36 }
0x1378   : > { %6888 = vmatmul.msk.f32.gmra.mxu0 %vm2965_vm6, %v9012_v37 }
0x13bd   : > { %v3829_v48 = vpop.f32.mrf.mxu0 }
0x13be   : > { %6861 = vmatmul.msk.f32.vlgmr.msra.gmra.mxu1 %vm3087_vm12, %v3829_v48 }
0x13c5   : > { %v3832_v50 = vpop.f32.mrf.mxu0 }
0x13c6   : > { %6862 = vmatmul.msk.f32.gmra.mxu1 %vm3087_vm12, %v3832_v50 }
0x13cd   : > { %v3835_v2 = vpop.f32.mrf.mxu0 }
0x13ce   : > { %6863 = vmatmul.msk.f32.gmra.mxu1 %vm3087_vm12, %v3835_v2 }
0x13d5   : > { %v3838_v7 = vpop.f32.mrf.mxu0 }
0x13d6   : > { %6864 = vmatmul.msk.f32.gmra.mxu1 %vm3087_vm12, %v3838_v7 }
0x13dd   : > { %v3997_v54 = vpop.f32.mrf.mxu0 }
0x13de   : > { %6893 = vmatmul.msk.f32.vlgmr.msrb.gmra.mxu1 %vm3087_vm12, %v3918_v43  ;;  %v7773_v43 = vld [vmem:[%s8208_s11 + $0x15] ss:$0 sm:$0xff] }
0x13e5   : > { %v4000_v24 = vpop.f32.mrf.mxu0 }
0x13e6   : > { %6894 = vmatmul.msk.f32.gmra.mxu1 %vm3087_vm12, %v3921_v35 }
0x13ed   : > { %v4003_v19 = vpop.f32.mrf.mxu0 }
0x13ee   : > { %6895 = vmatmul.msk.f32.gmra.mxu1 %vm3087_vm12, %v3924_v53  ;;  %v4004_v53 = vadd.f32 %v7773_v43, %v4003_v19 }
0x13f5   : > { %v4006_v60 = vpop.f32.mrf.mxu0 }
0x13f6   : > { %6896 = vmatmul.msk.f32.gmra.mxu1 %vm3087_vm12, %v3927_v9  ;;  %v4007_v39 = vadd.f32 %v7773_v43, %v4006_v60  ;;  %v4001_v9 = vadd.f32 %v7773_v43, %v4000_v24 }
0x13f8   : > { %4134 = vmatpush.msrb.mxu2 %v4007_v39 }
0x13fa   : > { %4135 = vmatpush.msrb.mxu2 %v4004_v53 }
0x13fc   : > { %4136 = vmatpush.msrb.mxu2 %v4001_v9 }
0x143b   : > { %v3873_v11 = vpop.f32.mrf.mxu1 }
0x143c   : > { %v8980_v12 = vadd.f32 %v3873_v11, %v3568_v10  ;;  %v3998_v10 = vadd.f32 %v7773_v43, %v3997_v54 }
0x143e   : > { %4137 = vmatpush.msrb.mxu2 %v3998_v10 }
0x1443   : > { %v3876_v21 = vpop.f32.mrf.mxu1 }
0x1444   : > { %v8984_v62 = vadd.f32 %v3876_v21, %v3571_v13  ;;  %v4153_v13 = vunpack.c.h.bf16 %v8954_v56 }
0x1446   : > { %4181 = vmatpush.msrb.mxu3 %v4153_v13 }
0x144b   : > { %v3879_v15 = vpop.f32.mrf.mxu1 }
0x144c   : > { %v8988_v16 = vadd.f32 %v3879_v15, %v3574_v14 }
0x1453   : > { %v3882_v32 = vpop.f32.mrf.mxu1 }
0x1454   : > { %v8992_v0 = vadd.f32 %v3882_v32, %v3577_v30 }
0x145b   : > { %v4050_v23 = vpop.f32.mrf.mxu1 }
0x145c   : > { %v4062_v27 = vmul.f32 0.35355338, %v4050_v23 }
0x145e   : > { %v4066_v20 = vsel %vm2965_vm6, %v4062_v27, -inf }
0x145f   : > { %4067 = vmax.xlane.f32.xlu0 %v4066_v20 }
0x1463   : > { %v4053_v5 = vpop.f32.mrf.mxu1 }
0x1464   : > { %v4063_v25 = vmul.f32 0.35355338, %v4053_v5  ;;  %v7774_v5 = vld [vmem:[%s8208_s11 + $0x2] ss:$0 sm:$0xff] }
0x1466   : > { %v4069_v29 = vsel %vm2965_vm6, %v4063_v25, -inf }
0x1467   : > { %4070 = vmax.xlane.f32.xlu1 %v4069_v29 }
0x146b   : > { %v4056_v44 = vpop.f32.mrf.mxu1 }
0x146c   : > { %v4064_v33 = vmul.f32 0.35355338, %v4056_v44 }
0x146e   : > { %v4072_v46 = vsel %vm2965_vm6, %v4064_v33, -inf }
0x146f   : > { %4073 = vmax.xlane.f32.xlu2 %v4072_v46 }
0x1473   : > { %v4059_v52 = vpop.f32.mrf.mxu1 }
0x1474   : > { %v4065_v4 = vmul.f32 0.35355338, %v4059_v52 }
0x1476   : > { %v4075_v55 = vsel %vm2965_vm6, %v4065_v4, -inf }
0x1477   : > { %4076 = vmax.xlane.f32.xlu0 %v4075_v55 }
0x14d2   : > { %v4068_v40 = vpop.xlane.xlu0 %4067 }
0x14d3   : > { %v4078_v38 = vsub.f32 %v4062_v27, %v4068_v40 }
0x14d5   : > { %v4082_v41 = vmul.f32 1.442695, %v4078_v38 }
0x14d7   : > { %7825 = vpow2.f32 %v4082_v41 }
0x14da   : > { %v4071_v45 = vpop.xlane.xlu1 %4070 }
0x14db   : > { %v4079_v18 = vsub.f32 %v4063_v25, %v4071_v45 }
0x14dd   : > { %v7826_v49 = vpop.eup %7825  ;;  %v4084_v8 = vmul.f32 1.442695, %v4079_v18 }
0x14de   : > { %v4090_v51 = vsel %vm2965_vm6, %v7826_v49, 0.0 }
0x14df   : > { %7827 = vpow2.f32 %v4084_v8  ;;  %4091 = vadd.xlane.f32.xlu1 %v4090_v51 }
0x14e2   : > { %v4074_v57 = vpop.xlane.xlu2 %4073 }
0x14e3   : > { %v4080_v47 = vsub.f32 %v4064_v33, %v4074_v57 }
0x14e5   : > { %v7828_v58 = vpop.eup %7827  ;;  %v4086_v59 = vmul.f32 1.442695, %v4080_v47 }
0x14e6   : > { %v4093_v61 = vsel %vm2965_vm6, %v7828_v58, 0.0 }
0x14e7   : > { %7829 = vpow2.f32 %v4086_v59  ;;  %4094 = vadd.xlane.f32.xlu2 %v4093_v61 }
0x14ea   : > { %v4077_v48 = vpop.xlane.xlu0 %4076 }
0x14eb   : > { %v4081_v50 = vsub.f32 %v4065_v4, %v4077_v48 }
0x14ed   : > { %v7830_v2 = vpop.eup %7829  ;;  %v4088_v6 = vmul.f32 1.442695, %v4081_v50 }
0x14ee   : > { %v4096_v7 = vsel %vm2965_vm6, %v7830_v2, 0.0 }
0x14ef   : > { %7831 = vpow2.f32 %v4088_v6  ;;  %4097 = vadd.xlane.f32.xlu0 %v4096_v7 }
0x14f5   : > { %v7832_v31 = vpop.eup %7831 }
0x14f6   : > { %v4099_v35 = vsel %vm2965_vm6, %v7832_v31, 0.0 }
0x14f7   : > { %4100 = vadd.xlane.f32.xlu1 %v4099_v35 }
0x1552   : > { %v4092_v11 = vpop.xlane.xlu1 %4091 }
0x1553   : > { %7833 = vrcp.f32 %v4092_v11 }
0x1559   : > { %v7834_v21 = vpop.eup %7833 }
0x155a   : > { %v4106_v14 = vmul.f32 %v7834_v21, %v7826_v49  ;;  %v4095_v15 = vpop.xlane.xlu2 %4094 }
0x155b   : > { %7835 = vrcp.f32 %v4095_v15 }
0x155c   : > { %6897 = vmatmul.msk.f32.vlgmr.msrb.gmra.mxu2 %vm2965_vm6, %v4106_v14 }
0x1561   : > { %v7836_v30 = vpop.eup %7835 }
0x1562   : > { %v4098_v32 = vpop.xlane.xlu0 %4097  ;;  %v4107_v3 = vmul.f32 %v7836_v30, %v7828_v58 }
0x1563   : > { %7837 = vrcp.f32 %v4098_v32 }
0x1564   : > { %6898 = vmatmul.msk.f32.gmra.mxu2 %vm2965_vm6, %v4107_v3 }
0x1569   : > { %v7838_v22 = vpop.eup %7837 }
0x156a   : > { %v4101_v26 = vpop.xlane.xlu1 %4100  ;;  %v4108_v17 = vmul.f32 %v7838_v22, %v7830_v2 }
0x156b   : > { %7839 = vrcp.f32 %v4101_v26 }
0x156c   : > { %6899 = vmatmul.msk.f32.gmra.mxu2 %vm2965_vm6, %v4108_v17 }
0x1571   : > { %v7840_v56 = vpop.eup %7839 }
0x1572   : > { %v4109_v63 = vmul.f32 %v7840_v56, %v7832_v31 }
0x1574   : > { %6900 = vmatmul.msk.f32.gmra.mxu2 %vm2965_vm6, %v4109_v63 }
0x15df   : > { %v4139_v23 = vpop.f32.mrf.mxu2 }
0x15e0   : > { %6902 = vmatmul.msk.f32.vlgmr.msrb.gmra.mxu3 %vm3087_vm12, %v4139_v23 }
0x15e7   : > { %v4142_v27 = vpop.f32.mrf.mxu2 }
0x15e8   : > { %6903 = vmatmul.msk.f32.gmra.mxu3 %vm3087_vm12, %v4142_v27  ;;  %v9081_v27 = vld [vmem:[%s8208_s11] ss:$0 sm:$0xff] }
0x15ef   : > { %v4145_v28 = vpop.f32.mrf.mxu2 }
0x15f0   : > { %6904 = vmatmul.msk.f32.gmra.mxu3 %vm3087_vm12, %v4145_v28 }
0x15f7   : > { %v4148_v20 = vpop.f32.mrf.mxu2 }
0x15f8   : > { %6905 = vmatmul.msk.f32.gmra.mxu3 %vm3087_vm12, %v4148_v20 }
0x1663   : > { %v4183_v25 = vpop.f32.mrf.mxu3 }
0x1664   : > { %v4195_v29 = vadd.f32 %v4183_v25, %v8980_v12 }
0x1666   : > { %v4201_v44 = vadd.f32 %v7774_v5, %v4195_v29  ;;  %v9085_v29 = vld [vmem:[%s8208_s11 + $0x1] ss:$0 sm:$0xff] }
0x1668   : > { %v9033_v33 = vadd.f32 %v8997_v42, %v4201_v44 }
0x166a   : > { %v4211_v46 = vsel %vm2965_vm6, %v9033_v33, 0.0  ;;  %v4234_v52 = vmul.f32 %v9033_v33, %v9033_v33 }
0x166b   : > { %4212 = vadd.xlane.f32.xlu2 %v4211_v46  ;;  %v4186_v4 = vpop.f32.mrf.mxu3 }
0x166c   : > { %v4196_v55 = vadd.f32 %v4186_v4, %v8984_v62  ;;  %v4238_v40 = vsel %vm2965_vm6, %v4234_v52, 0.0 }
0x166d   : > { %4239 = vadd.xlane.f32.xlu0 %v4238_v40 }
0x166e   : > { %v4202_v38 = vadd.f32 %v7774_v5, %v4196_v55 }
0x1670   : > { %v9042_v12 = vadd.f32 %v9002_v34, %v4202_v38 }
0x1672   : > { %v4214_v45 = vsel %vm2965_vm6, %v9042_v12, 0.0 }
0x1673   : > { %v4189_v41 = vpop.f32.mrf.mxu3 }
0x1674   : > { %v4197_v42 = vadd.f32 %v4189_v41, %v8988_v16  ;;  %v4235_v16 = vmul.f32 %v9042_v12, %v9042_v12 }
0x1675   : > { %4215 = vadd.xlane.f32.xlu0 %v4214_v45 }
0x1676   : > { %v4203_v18 = vadd.f32 %v7774_v5, %v4197_v42 }
0x1678   : > { %v9048_v49 = vadd.f32 %v9007_v36, %v4203_v18  ;;  %v4241_v36 = vsel %vm2965_vm6, %v4235_v16, 0.0 }
0x167a   : > { %v4217_v62 = vsel %vm2965_vm6, %v9048_v49, 0.0  ;;  %v4236_v58 = vmul.f32 %v9048_v49, %v9048_v49 }
0x167b   : > { %4218 = vadd.xlane.f32.xlu1 %v4217_v62  ;;  %v4192_v8 = vpop.f32.mrf.mxu3 }
0x167c   : > { %v4198_v34 = vadd.f32 %v4192_v8, %v8992_v0  ;;  %v4244_v59 = vsel %vm2965_vm6, %v4236_v58, 0.0 }
0x167e   : > { %v4204_v51 = vadd.f32 %v7774_v5, %v4198_v34 }
0x1680   : > { %v9056_v54 = vadd.f32 %v9012_v37, %v4204_v51  ;;  %v8019_v37 = vmov 32.0  }
0x1681   : > { %7841 = vrcp.f32 %v8019_v37 }
0x1682   : > { %v4220_v57 = vsel %vm2965_vm6, %v9056_v54, 0.0  ;;  %v4237_v47 = vmul.f32 %v9056_v54, %v9056_v54 }
0x1683   : > { %4242 = vadd.xlane.f32.xlu1 %v4241_v36  ;;  %4221 = vadd.xlane.f32.xlu2 %v4220_v57 }
0x1684   : > { %v4247_v0 = vsel %vm2965_vm6, %v4237_v47, 0.0 }
0x1685   : > { %4248 = vadd.xlane.f32.xlu0 %v4247_v0 }
0x1687   : > { %v7842_v61 = vpop.eup %7841 }
0x1688   : > { %v4224_v24 = vmul.f32 32.0, %v7842_v61  ;;  %vm4228_vm7 = vweird.f32 %v7842_v61 }
0x168a   : > { %v4225_v48 = vsub.f32 1.0, %v4224_v24 }
0x168b   : > { %4245 = vadd.xlane.f32.xlu2 %v4244_v59 }
0x168c   : > { %v4226_v50 = vmul.f32 %v7842_v61, %v4225_v48 }
0x168e   : > { %v4227_v2 = vadd.f32 %v7842_v61, %v4226_v50 }
0x1690   : > { %v9072_v6 = vsel %vm4228_vm7, %v7842_v61, %v4227_v2 }
0x16de   : > { %v4213_v7 = vpop.xlane.xlu2 %4212 }
0x16df   : > { %v4230_v19 = vmul.f32 %v9072_v6, %v4213_v7 }
0x16e0   : > { %v4240_v43 = vpop.xlane.xlu0 %4239 }
0x16e1   : > { %v4254_v31 = vmul.f32 %v4230_v19, %v4230_v19  ;;  %v4250_v35 = vmul.f32 %v4240_v43, %v9072_v6  ;;  %v4266_v23 = vsub.f32 %v9033_v33, %v4230_v19 }
0x16e3   : > { %v4258_v60 = vsub.f32 %v4250_v35, %v4254_v31 }
0x16e5   : > { %v4262_v53 = vmax.f32 %v4258_v60, 0.0 }
0x16e7   : > { %v4270_v39 = vadd.f32 1e-12, %v4262_v53 }
0x16e8   : > { %v4216_v13 = vpop.xlane.xlu0 %4215 }
0x16e9   : > { %7843 = vrsqrt.f32 %v4270_v39  ;;  %v4231_v14 = vmul.f32 %v9072_v6, %v4216_v13  ;;  %vm4280_vm9 = vweird.f32 %v4270_v39 }
0x16eb   : > { %v4255_v22 = vmul.f32 %v4231_v14, %v4231_v14  ;;  %v4267_v50 = vsub.f32 %v9042_v12, %v4231_v14 }
0x16ee   : > { %v4219_v9 = vpop.xlane.xlu1 %4218 }
0x16ef   : > { %v7844_v10 = vpop.eup %7843  ;;  %v4232_v4 = vmul.f32 %v9072_v6, %v4219_v9 }
0x16f0   : > { %v4275_v11 = vmul.f32 %v7844_v10, %v4270_v39  ;;  %vm4281_vm8 = vweird.f32 %v7844_v10 }
0x16f1   : > { %vm4282_vm10 = vmor %vm4280_vm9, %vm4281_vm8  ;;  %v4256_v45 = vmul.f32 %v4232_v4, %v4232_v4 }
0x16f2   : > { %v4276_v21 = vmul.f32 %v7844_v10, %v4275_v11 }
0x16f4   : > { %v4277_v15 = vmul.f32 0.5, %v4276_v21 }
0x16f6   : > { %v4278_v30 = vsub.f32 1.5, %v4277_v15  ;;  %v4243_v32 = vpop.xlane.xlu1 %4242  ;;  %v4222_v3 = vpop.xlane.xlu2 %4221 }
0x16f7   : > { %v4251_v26 = vmul.f32 %v4243_v32, %v9072_v6  ;;  %v4233_v17 = vmul.f32 %v9072_v6, %v4222_v3 }
0x16f8   : > { %v4279_v56 = vmul.f32 %v7844_v10, %v4278_v30  ;;  %v4249_v63 = vpop.xlane.xlu0 %4248 }
0x16f9   : > { %v4259_v28 = vsub.f32 %v4251_v26, %v4255_v22  ;;  %v4257_v20 = vmul.f32 %v4233_v17, %v4233_v17  ;;  %v4253_v5 = vmul.f32 %v4249_v63, %v9072_v6  ;;  %v4269_v31 = vsub.f32 %v9056_v54, %v4233_v17 }
0x16fa   : > { %v4283_v25 = vsel %vm4282_vm10, %v7844_v10, %v4279_v56  ;;  %v4268_v54 = vsub.f32 %v9048_v49, %v4232_v4 }
0x16fb   : > { %v4314_v44 = vmul.f32 %v4283_v25, %v4266_v23  ;;  %v4263_v46 = vmax.f32 %v4259_v28, 0.0  ;;  %v4261_v52 = vsub.f32 %v4253_v5, %v4257_v20 }
0x16fd   : > { %v4319_v55 = vmul.f32 %v9081_v27, %v4314_v44  ;;  %v4271_v40 = vadd.f32 1e-12, %v4263_v46  ;;  %v4265_v38 = vmax.f32 %v4261_v52, 0.0 }
0x16fe   : > { %v4246_v33 = vpop.xlane.xlu2 %4245 }
0x16ff   : > { %v4324_v41 = vadd.f32 %v9085_v29, %v4319_v55  ;;  %7845 = vrsqrt.f32 %v4271_v40  ;;  %v4273_v42 = vadd.f32 1e-12, %v4265_v38  ;;  %v4252_v18 = vmul.f32 %v4246_v33, %v9072_v6 }
0x1700   : > { %vm4290_vm3 = vweird.f32 %v4271_v40 }
0x1701   : > { %4328 = vst.msk [vmem:[#allocation4] sm:$0xff] %vm2965_vm6, %v4324_v41  ;;  %7847 = vrsqrt.f32 %v4273_v42  ;;  %v4260_v62 = vsub.f32 %v4252_v18, %v4256_v45  ;;  %vm4310_vm15 = vweird.f32 %v4273_v42 }
0x1703   : > { %v4264_v8 = vmax.f32 %v4260_v62, 0.0 }
0x1705   : > { %v7846_v34 = vpop.eup %7845  ;;  %v4272_v16 = vadd.f32 1e-12, %v4264_v8 }
0x1706   : > { %v4285_v51 = vmul.f32 %v7846_v34, %v4271_v40  ;;  %vm4291_vm11 = vweird.f32 %v7846_v34 }
0x1707   : > { %v7848_v36 = vpop.eup %7847  ;;  %7849 = vrsqrt.f32 %v4272_v16  ;;  %vm4292_vm14 = vmor %vm4290_vm3, %vm4291_vm11  ;;  %vm4300_vm4 = vweird.f32 %v4272_v16 }
0x1708   : > { %v4286_v57 = vmul.f32 %v7846_v34, %v4285_v51  ;;  %v4305_v47 = vmul.f32 %v7848_v36, %v4273_v42  ;;  %vm4311_vm13 = vweird.f32 %v7848_v36 }
0x1709   : > { %vm4312_vm1 = vmor %vm4310_vm15, %vm4311_vm13 }
0x170a   : > { %v4287_v0 = vmul.f32 0.5, %v4286_v57  ;;  %v4306_v58 = vmul.f32 %v7848_v36, %v4305_v47 }
0x170c   : > { %v4288_v59 = vsub.f32 1.5, %v4287_v0  ;;  %v4307_v37 = vmul.f32 0.5, %v4306_v58 }
0x170d   : > { %v7850_v61 = vpop.eup %7849 }
0x170e   : > { %v4289_v24 = vmul.f32 %v7846_v34, %v4288_v59  ;;  %v4308_v48 = vsub.f32 1.5, %v4307_v37  ;;  %v4295_v2 = vmul.f32 %v7850_v61, %v4272_v16  ;;  %vm4301_vm2 = vweird.f32 %v7850_v61 }
0x170f   : > { %vm4302_vm5 = vmor %vm4300_vm4, %vm4301_vm2 }
0x1710   : > { %v4293_v7 = vsel %vm4292_vm14, %v7846_v34, %v4289_v24  ;;  %v4309_v19 = vmul.f32 %v7848_v36, %v4308_v48  ;;  %v4296_v35 = vmul.f32 %v7850_v61, %v4295_v2 }
0x1711   : > { %v4315_v43 = vmul.f32 %v4293_v7, %v4267_v50 }
0x1712   : > { %v4313_v60 = vsel %vm4312_vm1, %v7848_v36, %v4309_v19  ;;  %v4297_v9 = vmul.f32 0.5, %v4296_v35 }
0x1713   : > { %v4320_v53 = vmul.f32 %v9081_v27, %v4315_v43  ;;  %v4317_v39 = vmul.f32 %v4313_v60, %v4269_v31 }
0x1714   : > { %v4298_v12 = vsub.f32 1.5, %v4297_v9 }
0x1715   : > { %v4325_v10 = vadd.f32 %v9085_v29, %v4320_v53  ;;  %v4322_v11 = vmul.f32 %v9081_v27, %v4317_v39 }
0x1716   : > { %v4299_v21 = vmul.f32 %v7850_v61, %v4298_v12 }
0x1717   : > { %4329 = vst.msk [vmem:[#allocation4 + $0x8] sm:$0xff] %vm2965_vm6, %v4325_v10  ;;  %v4327_v13 = vadd.f32 %v9085_v29, %v4322_v11 }
0x1718   : > { %v4303_v14 = vsel %vm4302_vm5, %v7850_v61, %v4299_v21 }
0x1719   : > { %4331 = vst.msk [vmem:[#allocation4 + $0x18] sm:$0xff] %vm2965_vm6, %v4327_v13  ;;  %v4316_v15 = vmul.f32 %v4303_v14, %v4268_v54 }
0x171b   : > { %v4321_v30 = vmul.f32 %v9081_v27, %v4316_v15  ;;  %4347 = sbr.rel (%p6909_p1) target bundleno = 8597 (0x2195), region = 116 }
0x171d   : > { %v4326_v32 = vadd.f32 %v9085_v29, %v4321_v30 }
0x171f   : > { %4330 = vst.msk [vmem:[#allocation4 + $0x10] sm:$0xff] %vm2965_vm6, %v4326_v32 }
0x1720   : > { %v7563_v3 = vld [vmem:[%s8193_s7 + $0x8] sm:$0xff]   ;;  %v7399_v49 = vld [vmem:[%s8193_s7] sm:$0xff]   ;;  %v9109_v5 = vld [vmem:[#allocation3] sm:$0xff]  ;;  %vm4548_vm7 = vcmask 195584  }
0x1721   : > { %v7405_v22 = vunpack.c.h.bf16 %v7563_v3  ;;  %v7404_v26 = vunpack.c.l.bf16 %v7563_v3  ;;  %v7562_v17 = vld [vmem:[%s8183_s21 + $0x8] sm:$0xff]   ;;  %v7391_v23 = vld [vmem:[%s8183_s21] sm:$0xff]   ;;  %v7401_v27 = vunpack.c.h.bf16 %v7399_v49  ;;  %v7400_v20 = vunpack.c.l.bf16 %v7399_v49  ;;  %v9111_v29 = vld [vmem:[#allocation4] sm:$0xff] }
0x1722   : > { %v7397_v56 = vunpack.c.h.bf16 %v7562_v17  ;;  %v7396_v63 = vunpack.c.l.bf16 %v7562_v17  ;;  %v7393_v28 = vunpack.c.h.bf16 %v7391_v23  ;;  %v7392_v25 = vunpack.c.l.bf16 %v7391_v23  ;;  %v9117_v44 = vld [vmem:[#allocation3 + $0x8] sm:$0xff]  ;;  %v9119_v46 = vld [vmem:[#allocation4 + $0x8] sm:$0xff]  ;;  %v9125_v52 = vld [vmem:[#allocation3 + $0x10] sm:$0xff] }
0x1723   : > { %4437 = vmatpush.msra.mxu1 %v7405_v22  ;;  %v9133_v55 = vld [vmem:[#allocation4 + $0x18] sm:$0xff]  ;;  %v7855_v33 = vld [vmem:[%s8208_s11 + $0x17] ss:$0 sm:$0xff]  ;;  %v7856_v62 = vld [vmem:[%s8208_s11 + $0x16] ss:$0 sm:$0xff] }
0x1724   : > { %4389 = vmatpush.msra.mxu0 %v7397_v56  ;;  %v7565_v58 = vld [vmem:[%s8193_s7 + $0x48] sm:$0xff]   ;;  %v7564_v59 = vld [vmem:[%s8193_s7 + $0x40] sm:$0xff]  }
0x1725   : > { %4438 = vmatpush.msra.mxu1 %v7404_v26  ;;  %v7413_v37 = vunpack.c.h.bf16 %v7565_v58  ;;  %v7412_v61 = vunpack.c.l.bf16 %v7565_v58  ;;  %v7409_v48 = vunpack.c.h.bf16 %v7564_v59  ;;  %v7408_v2 = vunpack.c.l.bf16 %v7564_v59  ;;  %v7567_v59 = vld [vmem:[%s8183_s21 + $0x18] sm:$0xff]  }
0x1726   : > { %4390 = vmatpush.msra.mxu0 %v7396_v63  ;;  %v9127_v4 = vld [vmem:[#allocation4 + $0x10] sm:$0xff] }
0x1727   : > { %4439 = vmatpush.msra.mxu1 %v7401_v27  ;;  %4474 = vmatpush.msra.mxu2 %v7413_v37  ;;  %v7421_v37 = vunpack.c.h.bf16 %v7567_v59 }
0x1728   : > { %4391 = vmatpush.msra.mxu0 %v7393_v28 }
0x1729   : > { %4440 = vmatpush.msra.mxu1 %v7400_v20  ;;  %4475 = vmatpush.msra.mxu2 %v7412_v61  ;;  %v7420_v61 = vunpack.c.l.bf16 %v7567_v59 }
0x172a   : > { %6914 = vmatmul.msk.f32.vlgmr.msra.gmra.mxu1 %vm2965_vm6, %v9109_v5  ;;  %4392 = vmatpush.msra.mxu0 %v7392_v25 }
0x172b   : > { %6910 = vmatmul.msk.f32.vlgmr.msra.gmra.mxu0 %vm2965_vm6, %v9111_v29  ;;  %4476 = vmatpush.msra.mxu2 %v7409_v48 }
0x172d   : > { %4477 = vmatpush.msra.mxu2 %v7408_v2  ;;  %v7566_v2 = vld [vmem:[%s8183_s21 + $0x10] sm:$0xff]  }
0x172e   : > { %6921 = vmatmul.msk.f32.vlgmr.msra.gmra.mxu2 %vm2965_vm6, %v9109_v5 }
0x172f   : > { %4659 = vmatpush.msrb.mxu2 %v7421_v37 }
0x1731   : > { %4660 = vmatpush.msrb.mxu2 %v7420_v61 }
0x1732   : > { %6915 = vmatmul.msk.f32.gmra.mxu1 %vm2965_vm6, %v9117_v44 }
0x1733   : > { %6911 = vmatmul.msk.f32.gmra.mxu0 %vm2965_vm6, %v9119_v46 }
0x1736   : > { %6922 = vmatmul.msk.f32.gmra.mxu2 %vm2965_vm6, %v9117_v44 }
0x173a   : > { %6916 = vmatmul.msk.f32.gmra.mxu1 %vm2965_vm6, %v9125_v52 }
0x173b   : > { %6912 = vmatmul.msk.f32.gmra.mxu0 %vm2965_vm6, %v9127_v4 }
0x173e   : > { %6923 = vmatmul.msk.f32.gmra.mxu2 %vm2965_vm6, %v9125_v52 }
0x1743   : > { %6913 = vmatmul.msk.f32.gmra.mxu0 %vm2965_vm6, %v9133_v55 }
0x17a7   : > { %v4442_v40 = vpop.f32.mrf.mxu1 }
0x17a8   : > { %v4394_v45 = vpop.f32.mrf.mxu0  ;;  %v4443_v8 = vadd.f32 %v7855_v33, %v4442_v40 }
0x17a9   : > { %v4395_v34 = vadd.f32 %v7856_v62, %v4394_v45 }
0x17af   : > { %v4445_v38 = vpop.f32.mrf.mxu1 }
0x17b0   : > { %v4446_v18 = vadd.f32 %v7855_v33, %v4445_v38  ;;  %v4397_v51 = vpop.f32.mrf.mxu0 }
0x17b1   : > { %v4398_v16 = vadd.f32 %v7856_v62, %v4397_v51  ;;  %v4479_v56 = vpop.f32.mrf.mxu2  ;;  %v7569_v51 = vld [vmem:[%s8193_s7 + $0x18] sm:$0xff]  }
0x17b7   : > { %v4448_v41 = vpop.f32.mrf.mxu1 }
0x17b8   : > { %v4449_v42 = vadd.f32 %v7855_v33, %v4448_v41  ;;  %v4400_v36 = vpop.f32.mrf.mxu0  ;;  %v7857_v41 = vld [vmem:[%s8208_s11 + $0x18] ss:$0 sm:$0xff] }
0x17b9   : > { %v4401_v57 = vadd.f32 %v7856_v62, %v4400_v36  ;;  %v4482_v25 = vpop.f32.mrf.mxu2  ;;  %v7428_v36 = vunpack.c.l.bf16 %v7569_v51 }
0x17ba   : > { %6924 = vmatpush.xpose.msk.msra.mxu3 %vm3087_vm12, %v4449_v42 }
0x17be   : > { %6925 = vmatpush.xpose.msk.msra.mxu3 %vm3087_vm12, %v4446_v18  ;;  %v4483_v18 = vadd.f32 %v7857_v41, %v4482_v25 }
0x17c0   : > { %v4403_v47 = vpop.f32.mrf.mxu0 }
0x17c1   : > { %v4404_v0 = vadd.f32 %v7856_v62, %v4403_v47  ;;  %v4485_v42 = vpop.f32.mrf.mxu2  ;;  %v7568_v47 = vld [vmem:[%s8193_s7 + $0x10] sm:$0xff]  }
0x17c2   : > { %6926 = vmatpush.xpose.msk.msra.mxu3 %vm3087_vm12, %v4443_v8  ;;  %v4486_v62 = vadd.f32 %v7857_v41, %v4485_v42  ;;  %v7424_v58 = vunpack.c.l.bf16 %v7568_v47 }
0x17c4   : > { %4618 = vmatpush.msrb.mxu1 %v4486_v62 }
0x17c5   : > { %6927 = vmatmul.msk.f32.vlgmr.msra.gmra.mxu3 %vm3087_vm12, %v4395_v34  ;;  %v4480_v34 = vadd.f32 %v7857_v41, %v4479_v56 }
0x17c6   : > { %4619 = vmatpush.msrb.mxu1 %v4483_v18 }
0x17c8   : > { %4620 = vmatpush.msrb.mxu1 %v4480_v34 }
0x17cd   : > { %6928 = vmatmul.msk.f32.gmra.mxu3 %vm3087_vm12, %v4398_v16  ;;  %v7429_v16 = vunpack.c.h.bf16 %v7569_v51 }
0x17cf   : > { %4699 = vmatpush.msrb.mxu0 %v7429_v16  ;;  %7608 = vmatpush.msra.mxu1 %v7429_v16 }
0x17d1   : > { %4700 = vmatpush.msrb.mxu0 %v7428_v36  ;;  %7609 = vmatpush.msra.mxu1 %v7428_v36 }
0x17d5   : > { %6929 = vmatmul.msk.f32.gmra.mxu3 %vm3087_vm12, %v4401_v57 }
0x17dd   : > { %6930 = vmatmul.msk.f32.gmra.mxu3 %vm3087_vm12, %v4404_v0  ;;  %v7425_v0 = vunpack.c.h.bf16 %v7568_v47 }
0x17df   : > { %4701 = vmatpush.msrb.mxu0 %v7425_v0  ;;  %7610 = vmatpush.msra.mxu1 %v7425_v0 }
0x17e1   : > { %4702 = vmatpush.msrb.mxu0 %v7424_v58  ;;  %7611 = vmatpush.msra.mxu1 %v7424_v58 }
0x17e2   : > { %6947 = vmatmul.msk.f32.vlgmr.msrb.gmra.mxu0 %vm2965_vm6, %v9109_v5 }
0x17ea   : > { %6948 = vmatmul.msk.f32.gmra.mxu0 %vm2965_vm6, %v9117_v44 }
0x1848   : > { %v4526_v24 = vpop.f32.mrf.mxu3 }
0x1849   : > { %v4538_v50 = vmul.f32 0.35355338, %v4526_v24 }
0x184b   : > { %v4544_v7 = vsel %vm1251_vm0, %v4538_v50, -1e+30 }
0x184c   : > { %v4549_v19 = vsel %vm4548_vm7, %v4544_v7, -inf }
0x184d   : > { %4550 = vmax.xlane.f32.xlu0 %v4549_v19  ;;  %v7416_v19 = vunpack.c.l.bf16 %v7566_v2 }
0x1850   : > { %v4529_v43 = vpop.f32.mrf.mxu3 }
0x1851   : > { %v4539_v31 = vmul.f32 0.35355338, %v4529_v43  ;;  %v7571_v43 = vld [vmem:[%s8193_s7 + $0x58] sm:$0xff]  }
0x1853   : > { %v4545_v35 = vsel %vm1251_vm0, %v4539_v31, -1e+30  ;;  %v7570_v31 = vld [vmem:[%s8193_s7 + $0x50] sm:$0xff]  }
0x1854   : > { %v4552_v60 = vsel %vm4548_vm7, %v4545_v35, -inf }
0x1855   : > { %4553 = vmax.xlane.f32.xlu0 %v4552_v60  ;;  %v7436_v60 = vunpack.c.l.bf16 %v7571_v43 }
0x1858   : > { %v4532_v53 = vpop.f32.mrf.mxu3 }
0x1859   : > { %v4540_v39 = vmul.f32 0.35355338, %v4532_v53  ;;  %v7433_v53 = vunpack.c.h.bf16 %v7570_v31 }
0x185b   : > { %v4546_v9 = vsel %vm1251_vm0, %v4540_v39, -1e+30 }
0x185c   : > { %v4555_v10 = vsel %vm4548_vm7, %v4546_v9, -inf }
0x185d   : > { %4556 = vmax.xlane.f32.xlu1 %v4555_v10 }
0x1860   : > { %v4535_v11 = vpop.f32.mrf.mxu3 }
0x1861   : > { %v4541_v12 = vmul.f32 0.35355338, %v4535_v11 }
0x1863   : > { %v4547_v13 = vsel %vm1251_vm0, %v4541_v12, -1e+30 }
0x1864   : > { %v4558_v21 = vsel %vm4548_vm7, %v4547_v13, -inf }
0x1865   : > { %4559 = vmax.xlane.f32.xlu1 %v4558_v21 }
0x18c0   : > { %v4551_v54 = vpop.xlane.xlu0 %4550 }
0x18c1   : > { %v4561_v14 = vsub.f32 %v4544_v7, %v4551_v54  ;;  %v7417_v7 = vunpack.c.h.bf16 %v7566_v2 }
0x18c3   : > { %v4565_v15 = vmul.f32 1.442695, %v4561_v14  ;;  %4661 = vmatpush.msrb.mxu2 %v7417_v7 }
0x18c5   : > { %7870 = vpow2.f32 %v4565_v15  ;;  %4662 = vmatpush.msrb.mxu2 %v7416_v19  ;;  %v9214_v15 = vld [vmem:[%s8188_s6] sm:$0xff]  }
0x18c6   : > { %6939 = vmatmul.msk.f32.vlgmr.msrb.gmra.mxu2 %vm2965_vm6, %v9111_v29 }
0x18c8   : > { %v4554_v30 = vpop.xlane.xlu0 %4553 }
0x18c9   : > { %v4562_v32 = vsub.f32 %v4545_v35, %v4554_v30  ;;  %v7437_v35 = vunpack.c.h.bf16 %v7571_v43  ;;  %v4635_v30 = vunpack.c.l.bf16 %v9214_v15 }
0x18cb   : > { %v7871_v3 = vpop.eup %7870  ;;  %v4567_v49 = vmul.f32 1.442695, %v4562_v32  ;;  %4736 = vmatpush.msrb.mxu3 %v7437_v35 }
0x18cc   : > { %v4573_v22 = vsel %vm4548_vm7, %v7871_v3, 0.0 }
0x18cd   : > { %7872 = vpow2.f32 %v4567_v49  ;;  %4574 = vadd.xlane.f32.xlu2 %v4573_v22  ;;  %4737 = vmatpush.msrb.mxu3 %v7436_v60  ;;  %v4704_v22 = vpop.f32.mrf.mxu0 }
0x18ce   : > { %6940 = vmatmul.msk.f32.gmra.mxu2 %vm2965_vm6, %v9119_v46 }
0x18cf   : > { %4738 = vmatpush.msrb.mxu3 %v7433_v53 }
0x18d0   : > { %v4557_v26 = vpop.xlane.xlu1 %4556 }
0x18d1   : > { %v4563_v17 = vsub.f32 %v4546_v9, %v4557_v26  ;;  %v7432_v9 = vunpack.c.l.bf16 %v7570_v31 }
0x18d3   : > { %v9167_v63 = vpop.eup %7872  ;;  %v4569_v23 = vmul.f32 1.442695, %v4563_v17  ;;  %4739 = vmatpush.msrb.mxu3 %v7432_v9  ;;  %v7858_v17 = vld [vmem:[%s8208_s11 + $0x1a] ss:$0 sm:$0xff] }
0x18d4   : > { %v4576_v27 = vsel %vm4548_vm7, %v9167_v63, 0.0  ;;  %6954 = vmatmul.msk.f32.vlgmr.msrb.gmra.mxu3 %vm2965_vm6, %v9109_v5 }
0x18d5   : > { %7874 = vpow2.f32 %v4569_v23  ;;  %4577 = vadd.xlane.f32.xlu2 %v4576_v27  ;;  %4964 = vmatpush.msra.mxu3 %v4635_v30 }
0x18d6   : > { %6941 = vmatmul.msk.f32.gmra.mxu2 %vm2965_vm6, %v9127_v4 }
0x18d8   : > { %v4560_v28 = vpop.xlane.xlu1 %4559 }
0x18d9   : > { %v4564_v20 = vsub.f32 %v4547_v13, %v4560_v28 }
0x18db   : > { %v9171_v40 = vpop.eup %7874  ;;  %v4571_v38 = vmul.f32 1.442695, %v4564_v20  ;;  %v7859_v20 = vld [vmem:[%s8208_s11 + $0x19] ss:$0 sm:$0xff] }
0x18dc   : > { %v4579_v33 = vsel %vm4548_vm7, %v9171_v40, 0.0  ;;  %6955 = vmatmul.msk.f32.gmra.mxu3 %vm2965_vm6, %v9117_v44 }
0x18dd   : > { %7876 = vpow2.f32 %v4571_v38  ;;  %4580 = vadd.xlane.f32.xlu0 %v4579_v33 }
0x18de   : > { %6942 = vmatmul.msk.f32.gmra.mxu2 %vm2965_vm6, %v9133_v55 }
0x18e3   : > { %v9176_v45 = vpop.eup %7876 }
0x18e4   : > { %v4582_v8 = vsel %vm4548_vm7, %v9176_v45, 0.0  ;;  %6956 = vmatmul.msk.f32.gmra.mxu3 %vm2965_vm6, %v9125_v52 }
0x18e5   : > { %4583 = vadd.xlane.f32.xlu1 %v4582_v8 }
0x1940   : > { %v4575_v57 = vpop.xlane.xlu2 %4574 }
0x1941   : > { %7878 = vrcp.f32 %v4575_v57 }
0x1947   : > { %v7879_v24 = vpop.eup %7878 }
0x1948   : > { %v4578_v48 = vpop.xlane.xlu2 %4577  ;;  %v4589_v50 = vmul.f32 %v7879_v24, %v7871_v3 }
0x1949   : > { %7880 = vrcp.f32 %v4578_v48  ;;  %v4664_v27 = vpop.f32.mrf.mxu2 }
0x194a   : > { %6931 = vmatmul.msk.f32.vlgmr.msrb.gmra.mxu1 %vm4548_vm7, %v4589_v50  ;;  %v4665_v38 = vadd.f32 %v7859_v20, %v4664_v27  ;;  %v7575_v27 = vld [vmem:[%s8193_s7 + $0x28] sm:$0xff]  }
0x194f   : > { %v7881_v39 = vpop.eup %7880 }
0x1950   : > { %v4581_v10 = vpop.xlane.xlu0 %4580  ;;  %v4590_v11 = vmul.f32 %v7881_v39, %v9167_v63  ;;  %v4707_v63 = vpop.f32.mrf.mxu0 }
0x1951   : > { %7882 = vrcp.f32 %v4581_v10  ;;  %v4708_v28 = vadd.f32 %v7858_v17, %v4707_v63  ;;  %v4667_v33 = vpop.f32.mrf.mxu2 }
0x1952   : > { %6932 = vmatmul.msk.f32.gmra.mxu1 %vm4548_vm7, %v4590_v11  ;;  %v4668_v42 = vadd.f32 %v7859_v20, %v4667_v33 }
0x1957   : > { %v7883_v12 = vpop.eup %7882  ;;  %v4741_v25 = vpop.f32.mrf.mxu3 }
0x1958   : > { %v4584_v13 = vpop.xlane.xlu1 %4583  ;;  %v4591_v21 = vmul.f32 %v7883_v12, %v9171_v40  ;;  %v4705_v40 = vadd.f32 %v7858_v17, %v4704_v22 }
0x1959   : > { %7884 = vrcp.f32 %v4584_v13  ;;  %v4670_v18 = vpop.f32.mrf.mxu2 }
0x195a   : > { %6933 = vmatmul.msk.f32.gmra.mxu1 %vm4548_vm7, %v4591_v21  ;;  %v4671_v16 = vadd.f32 %v7859_v20, %v4670_v18 }
0x195f   : > { %v7885_v54 = vpop.eup %7884  ;;  %v4744_v41 = vpop.f32.mrf.mxu3 }
0x1960   : > { %v4592_v14 = vmul.f32 %v7885_v54, %v9176_v45  ;;  %v7860_v45 = vld [vmem:[%s8208_s11 + $0x1b] ss:$0 sm:$0xff] }
0x1961   : > { %v4745_v8 = vadd.f32 %v7860_v45, %v4744_v41  ;;  %v4742_v51 = vadd.f32 %v7860_v45, %v4741_v25  ;;  %v4673_v36 = vpop.f32.mrf.mxu2  ;;  %v7452_v25 = vunpack.c.l.bf16 %v7575_v27 }
0x1962   : > { %6934 = vmatmul.msk.f32.gmra.mxu1 %vm4548_vm7, %v4592_v14  ;;  %v4674_v57 = vadd.f32 %v7859_v20, %v4673_v36 }
0x1967   : > { %v4747_v62 = vpop.f32.mrf.mxu3 }
0x1968   : > { %v4748_v34 = vadd.f32 %v7860_v45, %v4747_v62 }
0x196a   : > { %6949 = vmatmul.msk.f32.vlgmr.msra.gmra.mxu1 %vm2965_vm6, %v9125_v52 }
0x196b   : > { %4877 = vmatpush.msrb.mxu1 %v4748_v34  ;;  %v7573_v34 = vld [vmem:[%s8183_s21 + $0x28] sm:$0xff]  }
0x196d   : > { %4878 = vmatpush.msrb.mxu1 %v4745_v8 }
0x196f   : > { %4879 = vmatpush.msrb.mxu1 %v4742_v51  ;;  %v7445_v51 = vunpack.c.h.bf16 %v7573_v34 }
0x19c7   : > { %v4622_v32 = vpop.f32.mrf.mxu1 }
0x19c8   : > { %6973 = vmatmul.msk.f32.vlgmr.msra.gmra.mxu3 %vm3087_vm12, %v4622_v32 }
0x19cf   : > { %v4625_v3 = vpop.f32.mrf.mxu1 }
0x19d0   : > { %6974 = vmatmul.msk.f32.gmra.mxu3 %vm3087_vm12, %v4625_v3 }
0x19d7   : > { %v4628_v49 = vpop.f32.mrf.mxu1 }
0x19d8   : > { %6975 = vmatmul.msk.f32.gmra.mxu3 %vm3087_vm12, %v4628_v49 }
0x19df   : > { %v4631_v26 = vpop.f32.mrf.mxu1 }
0x19e0   : > { %6976 = vmatmul.msk.f32.gmra.mxu3 %vm3087_vm12, %v4631_v26 }
0x19e7   : > { %v4710_v56 = vpop.f32.mrf.mxu1 }
0x19e8   : > { %v4711_v23 = vadd.f32 %v7858_v17, %v4710_v56 }
0x19ea   : > { %6957 = vmatpush.xpose.msk.msra.mxu0 %vm3087_vm12, %v4711_v23 }
0x19ee   : > { %6958 = vmatpush.xpose.msk.msra.mxu0 %vm3087_vm12, %v4708_v28  ;;  %v7453_v28 = vunpack.c.h.bf16 %v7575_v27 }
0x19f0   : > { %5041 = vmatpush.msra.mxu1 %v7453_v28 }
0x19f2   : > { %6959 = vmatpush.xpose.msk.msra.mxu0 %vm3087_vm12, %v4705_v40  ;;  %v7574_v40 = vld [vmem:[%s8193_s7 + $0x20] sm:$0xff]   ;;  %5042 = vmatpush.msra.mxu1 %v7452_v25 }
0x19f3   : > { %v7448_v33 = vunpack.c.l.bf16 %v7574_v40 }
0x19f5   : > { %6960 = vmatmul.msk.f32.vlgmr.msra.gmra.mxu0 %vm3087_vm12, %v4665_v38  ;;  %v7449_v38 = vunpack.c.h.bf16 %v7574_v40 }
0x19f6   : > { %5001 = vmatpush.msrb.mxu0 %v7445_v51 }
0x19f7   : > { %5043 = vmatpush.msra.mxu1 %v7449_v38 }
0x19f9   : > { %5044 = vmatpush.msra.mxu1 %v7448_v33 }
0x19fd   : > { %6961 = vmatmul.msk.f32.gmra.mxu0 %vm3087_vm12, %v4668_v42 }
0x1a05   : > { %6962 = vmatmul.msk.f32.gmra.mxu0 %vm3087_vm12, %v4671_v16 }
0x1a0d   : > { %6963 = vmatmul.msk.f32.gmra.mxu0 %vm3087_vm12, %v4674_v57 }
0x1a72   : > { %v4788_v47 = vpop.f32.mrf.mxu0 }
0x1a73   : > { %v4800_v0 = vmul.f32 0.35355338, %v4788_v47  ;;  %v7444_v47 = vunpack.c.l.bf16 %v7573_v34 }
0x1a75   : > { %v4804_v58 = vsel %vm1251_vm0, %v4800_v0, -1e+30  ;;  %v7572_v0 = vld [vmem:[%s8183_s21 + $0x20] sm:$0xff]   ;;  %5002 = vmatpush.msrb.mxu0 %v7444_v47 }
0x1a76   : > { %v4808_v59 = vsel %vm4548_vm7, %v4804_v58, -inf }
0x1a77   : > { %4809 = vmax.xlane.f32.xlu2 %v4808_v59  ;;  %v7440_v59 = vunpack.c.l.bf16 %v7572_v0 }
0x1a7a   : > { %v4791_v37 = vpop.f32.mrf.mxu0 }
0x1a7b   : > { %v4801_v61 = vmul.f32 0.35355338, %v4791_v37 }
0x1a7d   : > { %v4805_v24 = vsel %vm1251_vm0, %v4801_v61, -1e+30 }
0x1a7e   : > { %v4811_v48 = vsel %vm4548_vm7, %v4805_v24, -inf }
0x1a7f   : > { %4812 = vmax.xlane.f32.xlu0 %v4811_v48 }
0x1a82   : > { %v4794_v50 = vpop.f32.mrf.mxu0 }
0x1a83   : > { %v4802_v2 = vmul.f32 0.35355338, %v4794_v50 }
0x1a85   : > { %v4806_v7 = vsel %vm1251_vm0, %v4802_v2, -1e+30 }
0x1a86   : > { %v4814_v19 = vsel %vm4548_vm7, %v4806_v7, -inf }
0x1a87   : > { %4815 = vmax.xlane.f32.xlu1 %v4814_v19 }
0x1a8a   : > { %v4797_v43 = vpop.f32.mrf.mxu0 }
0x1a8b   : > { %v4803_v31 = vmul.f32 0.35355338, %v4797_v43 }
0x1a8d   : > { %v4807_v35 = vsel %vm1251_vm0, %v4803_v31, -1e+30  ;;  %v7861_v31 = vld [vmem:[%s8208_s11 + $0x1d] ss:$0 sm:$0xff] }
0x1a8e   : > { %v4817_v60 = vsel %vm4548_vm7, %v4807_v35, -inf }
0x1a8f   : > { %4818 = vmax.xlane.f32.xlu2 %v4817_v60 }
0x1aea   : > { %v4810_v53 = vpop.xlane.xlu2 %4809 }
0x1aeb   : > { %v4820_v39 = vsub.f32 %v4804_v58, %v4810_v53  ;;  %v7441_v58 = vunpack.c.h.bf16 %v7572_v0 }
0x1aed   : > { %v4824_v9 = vmul.f32 1.442695, %v4820_v39  ;;  %5003 = vmatpush.msrb.mxu0 %v7441_v58  ;;  %v7862_v39 = vld [vmem:[%s8208_s11 + $0x1c] ss:$0 sm:$0xff] }
0x1aef   : > { %7886 = vpow2.f32 %v4824_v9  ;;  %5004 = vmatpush.msrb.mxu0 %v7440_v59 }
0x1af0   : > { %6981 = vmatmul.msk.f32.vlgmr.msrb.gmra.mxu0 %vm2965_vm6, %v9111_v29 }
0x1af2   : > { %v4813_v10 = vpop.xlane.xlu0 %4812 }
0x1af3   : > { %v4821_v11 = vsub.f32 %v4805_v24, %v4813_v10  ;;  %v4895_v24 = vunpack.c.h.bf16 %v9214_v15 }
0x1af5   : > { %v7887_v12 = vpop.eup %7886  ;;  %v4826_v13 = vmul.f32 1.442695, %v4821_v11  ;;  %4923 = vmatpush.msra.mxu2 %v4895_v24 }
0x1af6   : > { %v4832_v21 = vsel %vm4548_vm7, %v7887_v12, 0.0 }
0x1af7   : > { %7888 = vpow2.f32 %v4826_v13  ;;  %4833 = vadd.xlane.f32.xlu0 %v4832_v21 }
0x1af8   : > { %6982 = vmatmul.msk.f32.gmra.mxu0 %vm2965_vm6, %v9119_v46 }
0x1afa   : > { %v4816_v54 = vpop.xlane.xlu1 %4815 }
0x1afb   : > { %v4822_v14 = vsub.f32 %v4806_v7, %v4816_v54 }
0x1afd   : > { %v7889_v30 = vpop.eup %7888  ;;  %v4828_v32 = vmul.f32 1.442695, %v4822_v14 }
0x1afe   : > { %v4835_v3 = vsel %vm4548_vm7, %v7889_v30, 0.0 }
0x1aff   : > { %7890 = vpow2.f32 %v4828_v32  ;;  %4836 = vadd.xlane.f32.xlu1 %v4835_v3 }
0x1b00   : > { %6983 = vmatmul.msk.f32.gmra.mxu0 %vm2965_vm6, %v9127_v4 }
0x1b02   : > { %v4819_v49 = vpop.xlane.xlu2 %4818 }
0x1b03   : > { %v4823_v22 = vsub.f32 %v4807_v35, %v4819_v49 }
0x1b05   : > { %v7891_v26 = vpop.eup %7890  ;;  %v4830_v17 = vmul.f32 1.442695, %v4823_v22  ;;  %v7577_v22 = vld [vmem:[%s8193_s7 + $0x68] sm:$0xff]  }
0x1b06   : > { %v4838_v56 = vsel %vm4548_vm7, %v7891_v26, 0.0 }
0x1b07   : > { %7892 = vpow2.f32 %v4830_v17  ;;  %4839 = vadd.xlane.f32.xlu2 %v4838_v56  ;;  %v7461_v17 = vunpack.c.h.bf16 %v7577_v22  ;;  %v7460_v56 = vunpack.c.l.bf16 %v7577_v22  ;;  %v7863_v22 = vld [vmem:[%s8208_s11 + $0x1e] ss:$0 sm:$0xff] }
0x1b08   : > { %6984 = vmatmul.msk.f32.gmra.mxu0 %vm2965_vm6, %v9133_v55 }
0x1b09   : > { %5078 = vmatpush.msrb.mxu2 %v7461_v17 }
0x1b0b   : > { %5079 = vmatpush.msrb.mxu2 %v7460_v56 }
0x1b0d   : > { %v7893_v63 = vpop.eup %7892 }
0x1b0e   : > { %v4841_v23 = vsel %vm4548_vm7, %v7893_v63, 0.0 }
0x1b0f   : > { %4842 = vadd.xlane.f32.xlu0 %v4841_v23 }
0x1b6a   : > { %v4834_v20 = vpop.xlane.xlu0 %4833 }
0x1b6b   : > { %7894 = vrcp.f32 %v4834_v20 }
0x1b6d   : > { %v5006_v15 = vpop.f32.mrf.mxu0 }
0x1b6e   : > { %v5007_v10 = vadd.f32 %v7862_v39, %v5006_v15 }
0x1b71   : > { %v7895_v41 = vpop.eup %7894 }
0x1b72   : > { %v4848_v42 = vmul.f32 %v7895_v41, %v7887_v12  ;;  %v4837_v45 = vpop.xlane.xlu1 %4836 }
0x1b73   : > { %7896 = vrcp.f32 %v4837_v45 }
0x1b74   : > { %6964 = vmatmul.msk.f32.vlgmr.msrb.gmra.mxu1 %vm4548_vm7, %v4848_v42 }
0x1b75   : > { %v5009_v11 = vpop.f32.mrf.mxu0 }
0x1b76   : > { %v5010_v12 = vadd.f32 %v7862_v39, %v5009_v11 }
0x1b79   : > { %v7897_v18 = vpop.eup %7896 }
0x1b7a   : > { %v4840_v62 = vpop.xlane.xlu2 %4839  ;;  %v4849_v8 = vmul.f32 %v7897_v18, %v7889_v30  ;;  %v9283_v30 = vpop.f32.mrf.mxu3 }
0x1b7b   : > { %7898 = vrcp.f32 %v4840_v62 }
0x1b7c   : > { %6965 = vmatmul.msk.f32.gmra.mxu1 %vm4548_vm7, %v4849_v8 }
0x1b7d   : > { %v5012_v13 = vpop.f32.mrf.mxu0 }
0x1b7e   : > { %v5013_v21 = vadd.f32 %v7862_v39, %v5012_v13 }
0x1b81   : > { %v7899_v16 = vpop.eup %7898 }
0x1b82   : > { %v4843_v36 = vpop.xlane.xlu0 %4842  ;;  %v4850_v57 = vmul.f32 %v7899_v16, %v7891_v26  ;;  %v9285_v32 = vpop.f32.mrf.mxu3  ;;  %v7576_v26 = vld [vmem:[%s8193_s7 + $0x60] sm:$0xff]  }
0x1b83   : > { %7900 = vrcp.f32 %v4843_v36  ;;  %v7457_v23 = vunpack.c.h.bf16 %v7576_v26  ;;  %v7456_v28 = vunpack.c.l.bf16 %v7576_v26 }
0x1b84   : > { %6966 = vmatmul.msk.f32.gmra.mxu1 %vm4548_vm7, %v4850_v57 }
0x1b85   : > { %v5015_v54 = vpop.f32.mrf.mxu0  ;;  %5080 = vmatpush.msrb.mxu2 %v7457_v23 }
0x1b86   : > { %v5016_v14 = vadd.f32 %v7862_v39, %v5015_v54 }
0x1b87   : > { %5081 = vmatpush.msrb.mxu2 %v7456_v28 }
0x1b89   : > { %v7901_v37 = vpop.eup %7900 }
0x1b8a   : > { %v4851_v61 = vmul.f32 %v7901_v37, %v7893_v63  ;;  %v9287_v3 = vpop.f32.mrf.mxu3  ;;  %v7581_v37 = vld [vmem:[%s8193_s7 + $0x38] sm:$0xff]  }
0x1b8b   : > { %v7477_v24 = vunpack.c.h.bf16 %v7581_v37 }
0x1b8c   : > { %6967 = vmatmul.msk.f32.gmra.mxu1 %vm4548_vm7, %v4851_v61  ;;  %v7580_v61 = vld [vmem:[%s8193_s7 + $0x30] sm:$0xff]  }
0x1b92   : > { %v9289_v49 = vpop.f32.mrf.mxu3 }
0x1b94   : > { %6989 = vmatmul.msk.f32.vlgmr.msra.gmra.mxu1 %vm2965_vm6, %v9109_v5 }
0x1b9c   : > { %6990 = vmatmul.msk.f32.gmra.mxu1 %vm2965_vm6, %v9117_v44 }
0x1ba4   : > { %6991 = vmatmul.msk.f32.gmra.mxu1 %vm2965_vm6, %v9125_v52 }
0x1bf1   : > { %v4881_v48 = vpop.f32.mrf.mxu1 }
0x1bf2   : > { %6969 = vmatmul.msk.f32.vlgmr.msra.gmra.mxu2 %vm3087_vm12, %v4881_v48  ;;  %v7476_v48 = vunpack.c.l.bf16 %v7581_v37  ;;  %v7864_v37 = vld [vmem:[%s8208_s11 + $0x20] ss:$0 sm:$0xff] }
0x1bf9   : > { %v4884_v50 = vpop.f32.mrf.mxu1 }
0x1bfa   : > { %6970 = vmatmul.msk.f32.gmra.mxu2 %vm3087_vm12, %v4884_v50 }
0x1c01   : > { %v4887_v2 = vpop.f32.mrf.mxu1 }
0x1c02   : > { %6971 = vmatmul.msk.f32.gmra.mxu2 %vm3087_vm12, %v4887_v2  ;;  %v7473_v2 = vunpack.c.h.bf16 %v7580_v61 }
0x1c09   : > { %v4890_v7 = vpop.f32.mrf.mxu1 }
0x1c0a   : > { %6972 = vmatmul.msk.f32.gmra.mxu2 %vm3087_vm12, %v4890_v7 }
0x1c11   : > { %v5046_v19 = vpop.f32.mrf.mxu1 }
0x1c12   : > { %v5047_v9 = vadd.f32 %v7861_v31, %v5046_v19  ;;  %6996 = vmatmul.msk.f32.vlgmr.msrb.gmra.mxu2 %vm2965_vm6, %v9109_v5 }
0x1c19   : > { %v5049_v43 = vpop.f32.mrf.mxu1 }
0x1c1a   : > { %v5050_v53 = vadd.f32 %v7861_v31, %v5049_v43  ;;  %6997 = vmatmul.msk.f32.gmra.mxu2 %vm2965_vm6, %v9117_v44  ;;  %v7472_v43 = vunpack.c.l.bf16 %v7580_v61 }
0x1c21   : > { %v5052_v35 = vpop.f32.mrf.mxu1 }
0x1c22   : > { %v5053_v60 = vadd.f32 %v7861_v31, %v5052_v35  ;;  %6998 = vmatmul.msk.f32.gmra.mxu2 %vm2965_vm6, %v9125_v52 }
0x1c24   : > { %6999 = vmatpush.xpose.msk.msrb.mxu3 %vm3087_vm12, %v5053_v60 }
0x1c28   : > { %7000 = vmatpush.xpose.msk.msrb.mxu3 %vm3087_vm12, %v5050_v53 }
0x1c2c   : > { %7001 = vmatpush.xpose.msk.msrb.mxu3 %vm3087_vm12, %v5047_v9 }
0x1c2f   : > { %7002 = vmatmul.msk.f32.vlgmr.msrb.gmra.mxu3 %vm3087_vm12, %v5007_v10 }
0x1c30   : > { %5346 = vmatpush.msra.mxu3 %v7477_v24 }
0x1c32   : > { %5347 = vmatpush.msra.mxu3 %v7476_v48 }
0x1c34   : > { %5348 = vmatpush.msra.mxu3 %v7473_v2 }
0x1c36   : > { %5349 = vmatpush.msra.mxu3 %v7472_v43 }
0x1c37   : > { %7003 = vmatmul.msk.f32.gmra.mxu3 %vm3087_vm12, %v5010_v12 }
0x1c3f   : > { %7004 = vmatmul.msk.f32.gmra.mxu3 %vm3087_vm12, %v5013_v21 }
0x1c47   : > { %7005 = vmatmul.msk.f32.gmra.mxu3 %vm3087_vm12, %v5016_v14 }
0x1c4f   : > { %7027 = vmatmul.msk.f32.vlgmr.msra.gmra.mxu3 %vm2965_vm6, %v9109_v5 }
0x1c57   : > { %7028 = vmatmul.msk.f32.gmra.mxu3 %vm2965_vm6, %v9117_v44 }
0x1c5f   : > { %7029 = vmatmul.msk.f32.gmra.mxu3 %vm2965_vm6, %v9125_v52  ;;  %v7578_v52 = vld [vmem:[%s8183_s21 + $0x30] sm:$0xff]  }
0x1c75   : > { %v9311_v36 = vpop.f32.mrf.mxu2 }
0x1c7d   : > { %v9313_v57 = vpop.f32.mrf.mxu2 }
0x1c85   : > { %v9315_v47 = vpop.f32.mrf.mxu2 }
0x1c8d   : > { %v9319_v19 = vpop.f32.mrf.mxu2 }
0x1c95   : > { %v5083_v39 = vpop.f32.mrf.mxu2 }
0x1c96   : > { %v5084_v23 = vadd.f32 %v7863_v22, %v5083_v39 }
0x1c9d   : > { %v5086_v21 = vpop.f32.mrf.mxu2 }
0x1c9e   : > { %v5087_v56 = vadd.f32 %v7863_v22, %v5086_v21  ;;  %v4970_v21 = vadd.f32 %v9285_v32, %v9313_v57 }
0x1ca5   : > { %v5089_v26 = vpop.f32.mrf.mxu2 }
0x1cb2   : > { %v5130_v63 = vpop.f32.mrf.mxu3 }
0x1cb3   : > { %v5142_v27 = vmul.f32 0.35355338, %v5130_v63  ;;  %v5090_v63 = vadd.f32 %v7863_v22, %v5089_v26 }
0x1cb5   : > { %v5146_v20 = vsel %vm1251_vm0, %v5142_v27, -1e+30  ;;  %5219 = vmatpush.msrb.mxu1 %v5090_v63  ;;  %v7579_v27 = vld [vmem:[%s8183_s21 + $0x38] sm:$0xff]   ;;  %v7582_v63 = vld [vmem:[%s8193_s7 + $0x70] sm:$0xff]  }
0x1cb6   : > { %v5150_v25 = vsel %vm4548_vm7, %v5146_v20, -inf  ;;  %v7469_v28 = vunpack.c.h.bf16 %v7579_v27  ;;  %v7481_v57 = vunpack.c.h.bf16 %v7582_v63 }
0x1cb7   : > { %5151 = vmax.xlane.f32.xlu1 %v5150_v25  ;;  %5220 = vmatpush.msrb.mxu1 %v5087_v56  ;;  %v7468_v25 = vunpack.c.l.bf16 %v7579_v27 }
0x1cb8   : > { %5306 = vmatpush.msra.mxu0 %v7469_v28  ;;  %v7480_v28 = vunpack.c.l.bf16 %v7582_v63 }
0x1cb9   : > { %5221 = vmatpush.msrb.mxu1 %v5084_v23 }
0x1cba   : > { %v5133_v40 = vpop.f32.mrf.mxu3  ;;  %5307 = vmatpush.msra.mxu0 %v7468_v25 }
0x1cbb   : > { %v5143_v38 = vmul.f32 0.35355338, %v5133_v40  ;;  %v7465_v40 = vunpack.c.h.bf16 %v7578_v52 }
0x1cbd   : > { %v5147_v33 = vsel %vm1251_vm0, %v5143_v38, -1e+30  ;;  %v7464_v38 = vunpack.c.l.bf16 %v7578_v52  ;;  %5308 = vmatpush.msra.mxu0 %v7465_v40  ;;  %v7943_v40 = vld [vmem:[#allocation3 + $0x8] sm:$0xff] }
0x1cbe   : > { %v5153_v41 = vsel %vm4548_vm7, %v5147_v33, -inf }
0x1cbf   : > { %5154 = vmax.xlane.f32.xlu2 %v5153_v41  ;;  %5309 = vmatpush.msra.mxu0 %v7464_v38 }
0x1cc0   : > { %7019 = vmatmul.msk.f32.vlgmr.msra.gmra.mxu0 %vm2965_vm6, %v9111_v29 }
0x1cc2   : > { %v5136_v42 = vpop.f32.mrf.mxu3 }
0x1cc3   : > { %v5144_v45 = vmul.f32 0.35355338, %v5136_v42 }
0x1cc5   : > { %v5148_v18 = vsel %vm1251_vm0, %v5144_v45, -1e+30 }
0x1cc6   : > { %v5156_v62 = vsel %vm4548_vm7, %v5148_v18, -inf }
0x1cc7   : > { %5157 = vmax.xlane.f32.xlu0 %v5156_v62 }
0x1cc8   : > { %7020 = vmatmul.msk.f32.gmra.mxu0 %vm2965_vm6, %v9119_v46 }
0x1cca   : > { %v5139_v8 = vpop.f32.mrf.mxu3 }
0x1ccb   : > { %v5145_v34 = vmul.f32 0.35355338, %v5139_v8 }
0x1ccd   : > { %v5149_v51 = vsel %vm1251_vm0, %v5145_v34, -1e+30 }
0x1cce   : > { %v5159_v16 = vsel %vm4548_vm7, %v5149_v51, -inf }
0x1ccf   : > { %5160 = vmax.xlane.f32.xlu1 %v5159_v16 }
0x1cd0   : > { %7021 = vmatmul.msk.f32.gmra.mxu0 %vm2965_vm6, %v9127_v4 }
0x1cd8   : > { %7022 = vmatmul.msk.f32.gmra.mxu0 %vm2965_vm6, %v9133_v55 }
0x1d2a   : > { %v5152_v0 = vpop.xlane.xlu1 %5151 }
0x1d2b   : > { %v5162_v58 = vsub.f32 %v5146_v20, %v5152_v0 }
0x1d2d   : > { %v5166_v59 = vmul.f32 1.442695, %v5162_v58 }
0x1d2f   : > { %7902 = vpow2.f32 %v5166_v59 }
0x1d32   : > { %v5155_v50 = vpop.xlane.xlu2 %5154 }
0x1d33   : > { %v5163_v7 = vsub.f32 %v5147_v33, %v5155_v50  ;;  %v9335_v33 = vld [vmem:[%s8188_s6 + $0x8] sm:$0xff]  }
0x1d34   : > { %v5237_v41 = vunpack.c.l.bf16 %v9335_v33 }
0x1d35   : > { %v7903_v31 = vpop.eup %7902  ;;  %v5168_v35 = vmul.f32 1.442695, %v5163_v7 }
0x1d36   : > { %v5174_v60 = vsel %vm4548_vm7, %v7903_v31, 0.0  ;;  %5265 = vmatpush.msra.mxu2 %v5237_v41 }
0x1d37   : > { %7904 = vpow2.f32 %v5168_v35  ;;  %5175 = vadd.xlane.f32.xlu2 %v5174_v60 }
0x1d3a   : > { %v5158_v15 = vpop.xlane.xlu0 %5157 }
0x1d3b   : > { %v5164_v53 = vsub.f32 %v5148_v18, %v5158_v15 }
0x1d3d   : > { %v7905_v9 = vpop.eup %7904  ;;  %v5170_v10 = vmul.f32 1.442695, %v5164_v53  ;;  %v5311_v7 = vpop.f32.mrf.mxu0 }
0x1d3e   : > { %v5177_v11 = vsel %vm4548_vm7, %v7905_v9, 0.0 }
0x1d3f   : > { %7906 = vpow2.f32 %v5170_v10  ;;  %5178 = vadd.xlane.f32.xlu0 %v5177_v11  ;;  %v4967_v11 = vadd.f32 %v9283_v30, %v9311_v36  ;;  %v7583_v36 = vld [vmem:[%s8193_s7 + $0x78] sm:$0xff]  }
0x1d40   : > { %v7484_v23 = vunpack.c.l.bf16 %v7583_v36 }
0x1d42   : > { %v5161_v12 = vpop.xlane.xlu1 %5160 }
0x1d43   : > { %v5165_v13 = vsub.f32 %v5149_v51, %v5161_v12  ;;  %v5351_v51 = vpop.f32.mrf.mxu3 }
0x1d44   : > { %v5352_v50 = vadd.f32 %v7864_v37, %v5351_v51 }
0x1d45   : > { %v7907_v54 = vpop.eup %7906  ;;  %v5172_v14 = vmul.f32 1.442695, %v5165_v13  ;;  %v5314_v60 = vpop.f32.mrf.mxu0 }
0x1d46   : > { %v5180_v5 = vsel %vm4548_vm7, %v7907_v54, 0.0 }
0x1d47   : > { %7908 = vpow2.f32 %v5172_v14  ;;  %5181 = vadd.xlane.f32.xlu1 %v5180_v5  ;;  %v4973_v5 = vadd.f32 %v9287_v3, %v9315_v47 }
0x1d4b   : > { %v5354_v29 = vpop.f32.mrf.mxu3 }
0x1d4c   : > { %v5355_v48 = vadd.f32 %v7864_v37, %v5354_v29 }
0x1d4d   : > { %v7909_v17 = vpop.eup %7908  ;;  %v5317_v53 = vpop.f32.mrf.mxu0 }
0x1d4e   : > { %v5183_v44 = vsel %vm4548_vm7, %v7909_v17, 0.0 }
0x1d4f   : > { %5184 = vadd.xlane.f32.xlu2 %v5183_v44  ;;  %v7485_v44 = vunpack.c.h.bf16 %v7583_v36 }
0x1d51   : > { %5383 = vmatpush.msra.mxu1 %v7485_v44 }
0x1d53   : > { %v5357_v46 = vpop.f32.mrf.mxu3  ;;  %5384 = vmatpush.msra.mxu1 %v7484_v23 }
0x1d54   : > { %v5358_v24 = vadd.f32 %v7864_v37, %v5357_v46 }
0x1d55   : > { %5385 = vmatpush.msra.mxu1 %v7481_v57 }
0x1d56   : > { %7037 = vmatpush.xpose.msk.msrb.mxu2 %vm3087_vm12, %v5358_v24 }
0x1d57   : > { %5386 = vmatpush.msra.mxu1 %v7480_v28 }
0x1d5a   : > { %7038 = vmatpush.xpose.msk.msrb.mxu2 %vm3087_vm12, %v5355_v48 }
0x1d5e   : > { %7039 = vmatpush.xpose.msk.msrb.mxu2 %vm3087_vm12, %v5352_v50 }
0x1daa   : > { %v5176_v20 = vpop.xlane.xlu2 %5175 }
0x1dab   : > { %7910 = vrcp.f32 %v5176_v20 }
0x1db1   : > { %v7911_v42 = vpop.eup %7910 }
0x1db2   : > { %v5190_v45 = vmul.f32 %v7911_v42, %v7903_v31  ;;  %v5179_v18 = vpop.xlane.xlu0 %5178  ;;  %v7865_v31 = vld [vmem:[%s8208_s11 + $0x1f] ss:$0 sm:$0xff] }
0x1db3   : > { %7912 = vrcp.f32 %v5179_v18  ;;  %v5312_v35 = vadd.f32 %v7865_v31, %v5311_v7  ;;  %v5315_v15 = vadd.f32 %v7865_v31, %v5314_v60  ;;  %v5318_v39 = vadd.f32 %v7865_v31, %v5317_v53  ;;  %v7944_v18 = vld [vmem:[#allocation3 + $0x10] sm:$0xff] }
0x1db4   : > { %7006 = vmatmul.msk.f32.vlgmr.msrb.gmra.mxu1 %vm4548_vm7, %v5190_v45 }
0x1db9   : > { %v7913_v62 = vpop.eup %7912 }
0x1dba   : > { %v5182_v8 = vpop.xlane.xlu1 %5181  ;;  %v5191_v34 = vmul.f32 %v7913_v62, %v7905_v9  ;;  %v5320_v9 = vpop.f32.mrf.mxu0 }
0x1dbb   : > { %7914 = vrcp.f32 %v5182_v8  ;;  %v5321_v10 = vadd.f32 %v7865_v31, %v5320_v9  ;;  %v7866_v31 = vld [vmem:[%s8208_s11 + $0x21] ss:$0 sm:$0xff] }
0x1dbc   : > { %7007 = vmatmul.msk.f32.gmra.mxu1 %vm4548_vm7, %v5191_v34 }
0x1dc1   : > { %v7915_v16 = vpop.eup %7914 }
0x1dc2   : > { %v5185_v0 = vpop.xlane.xlu2 %5184  ;;  %v5192_v58 = vmul.f32 %v7915_v16, %v7907_v54 }
0x1dc3   : > { %7916 = vrcp.f32 %v5185_v0 }
0x1dc4   : > { %7008 = vmatmul.msk.f32.gmra.mxu1 %vm4548_vm7, %v5192_v58 }
0x1dc9   : > { %v7917_v59 = vpop.eup %7916 }
0x1dca   : > { %v5193_v61 = vmul.f32 %v7917_v59, %v7909_v17  ;;  %v4976_v17 = vadd.f32 %v9289_v49, %v9319_v19  ;;  %v7942_v49 = vld [vmem:[#allocation3] sm:$0xff] }
0x1dcc   : > { %7009 = vmatmul.msk.f32.gmra.mxu1 %vm4548_vm7, %v5193_v61 }
0x1dd4   : > { %7034 = vmatmul.msk.f32.vlgmr.msra.gmra.mxu1 %vm2965_vm6, %v7942_v49  ;;  %v7867_v49 = vld [vmem:[%s8208_s11 + $0x5] ss:$0 sm:$0xff] }
0x1ddc   : > { %7035 = vmatmul.msk.f32.gmra.mxu1 %vm2965_vm6, %v7943_v40 }
0x1de4   : > { %7036 = vmatmul.msk.f32.gmra.mxu1 %vm2965_vm6, %v7944_v18 }
0x1e31   : > { %v5223_v4 = vpop.f32.mrf.mxu1 }
0x1e32   : > { %7011 = vmatmul.msk.f32.vlgmr.msra.gmra.mxu2 %vm3087_vm12, %v5223_v4 }
0x1e39   : > { %v5226_v2 = vpop.f32.mrf.mxu1 }
0x1e3a   : > { %7012 = vmatmul.msk.f32.gmra.mxu2 %vm3087_vm12, %v5226_v2 }
0x1e41   : > { %v5229_v55 = vpop.f32.mrf.mxu1 }
0x1e42   : > { %7013 = vmatmul.msk.f32.gmra.mxu2 %vm3087_vm12, %v5229_v55 }
0x1e49   : > { %v5232_v43 = vpop.f32.mrf.mxu1 }
0x1e4a   : > { %7014 = vmatmul.msk.f32.gmra.mxu2 %vm3087_vm12, %v5232_v43 }
0x1e51   : > { %v5388_v24 = vpop.f32.mrf.mxu1 }
0x1e52   : > { %7040 = vmatmul.msk.f32.vlgmr.msrb.gmra.mxu2 %vm3087_vm12, %v5312_v35 }
0x1e59   : > { %v5391_v55 = vpop.f32.mrf.mxu1 }
0x1e5a   : > { %7041 = vmatmul.msk.f32.gmra.mxu2 %vm3087_vm12, %v5315_v15 }
0x1e61   : > { %v5394_v53 = vpop.f32.mrf.mxu1 }
0x1e62   : > { %7042 = vmatmul.msk.f32.gmra.mxu2 %vm3087_vm12, %v5318_v39  ;;  %v5392_v39 = vadd.f32 %v7866_v31, %v5391_v55  ;;  %v5395_v9 = vadd.f32 %v7866_v31, %v5394_v53 }
0x1e64   : > { %5524 = vmatpush.msrb.mxu3 %v5395_v9 }
0x1e66   : > { %5525 = vmatpush.msrb.mxu3 %v5392_v39 }
0x1e6a   : > { %7043 = vmatmul.msk.f32.gmra.mxu2 %vm3087_vm12, %v5321_v10  ;;  %v5389_v10 = vadd.f32 %v7866_v31, %v5388_v24 }
0x1e6c   : > { %5526 = vmatpush.msrb.mxu3 %v5389_v10 }
0x1eb5   : > { %v5267_v12 = vpop.f32.mrf.mxu2 }
0x1eb6   : > { %v9365_v13 = vadd.f32 %v5267_v12, %v4967_v11 }
0x1ebd   : > { %v5270_v54 = vpop.f32.mrf.mxu2 }
0x1ebe   : > { %v9369_v14 = vadd.f32 %v5270_v54, %v4970_v21  ;;  %v5542_v54 = vunpack.c.h.bf16 %v9335_v33 }
0x1ec0   : > { %5570 = vmatpush.msrb.mxu0 %v5542_v54 }
0x1ec5   : > { %v5273_v22 = vpop.f32.mrf.mxu2 }
0x1ec6   : > { %v9373_v26 = vadd.f32 %v5273_v22, %v4973_v5 }
0x1ecd   : > { %v5276_v56 = vpop.f32.mrf.mxu2 }
0x1ece   : > { %v9377_v30 = vadd.f32 %v5276_v56, %v4976_v17 }
0x1ed5   : > { %v5435_v32 = vpop.f32.mrf.mxu2 }
0x1ed6   : > { %v5447_v27 = vmul.f32 0.35355338, %v5435_v32 }
0x1ed8   : > { %v5451_v3 = vsel %vm1251_vm0, %v5447_v27, -1e+30 }
0x1ed9   : > { %v5455_v47 = vsel %vm4548_vm7, %v5451_v3, -inf }
0x1eda   : > { %5456 = vmax.xlane.f32.xlu0 %v5455_v47 }
0x1edd   : > { %v5438_v19 = vpop.f32.mrf.mxu2 }
0x1ede   : > { %v5448_v20 = vmul.f32 0.35355338, %v5438_v19 }
0x1ee0   : > { %v5452_v25 = vsel %vm1251_vm0, %v5448_v20, -1e+30 }
0x1ee1   : > { %v5458_v52 = vsel %vm4548_vm7, %v5452_v25, -inf }
0x1ee2   : > { %5459 = vmax.xlane.f32.xlu1 %v5458_v52  ;;  %v7945_v52 = vld [vmem:[#allocation4] sm:$0xff] }
0x1ee5   : > { %v5441_v38 = vpop.f32.mrf.mxu2 }
0x1ee6   : > { %v5449_v41 = vmul.f32 0.35355338, %v5441_v38 }
0x1ee8   : > { %v5453_v42 = vsel %vm1251_vm0, %v5449_v41, -1e+30 }
0x1ee9   : > { %v5461_v45 = vsel %vm4548_vm7, %v5453_v42, -inf }
0x1eea   : > { %5462 = vmax.xlane.f32.xlu2 %v5461_v45 }
0x1eed   : > { %v5444_v62 = vpop.f32.mrf.mxu2 }
0x1eee   : > { %v5450_v8 = vmul.f32 0.35355338, %v5444_v62 }
0x1ef0   : > { %v5454_v34 = vsel %vm1251_vm0, %v5450_v8, -1e+30  ;;  %v7946_v8 = vld [vmem:[#allocation4 + $0x8] sm:$0xff] }
0x1ef1   : > { %v5464_v51 = vsel %vm4548_vm7, %v5454_v34, -inf }
0x1ef2   : > { %5465 = vmax.xlane.f32.xlu0 %v5464_v51 }
0x1f4d   : > { %v5457_v16 = vpop.xlane.xlu0 %5456 }
0x1f4e   : > { %v5467_v0 = vsub.f32 %v5451_v3, %v5457_v16 }
0x1f50   : > { %v5471_v58 = vmul.f32 1.442695, %v5467_v0 }
0x1f52   : > { %7918 = vpow2.f32 %v5471_v58  ;;  %v7947_v58 = vld [vmem:[#allocation4 + $0x10] sm:$0xff] }
0x1f55   : > { %v5460_v29 = vpop.xlane.xlu1 %5459 }
0x1f56   : > { %v5468_v59 = vsub.f32 %v5452_v25, %v5460_v29 }
0x1f58   : > { %v7919_v37 = vpop.eup %7918  ;;  %v5473_v61 = vmul.f32 1.442695, %v5468_v59 }
0x1f59   : > { %v5479_v46 = vsel %vm4548_vm7, %v7919_v37, 0.0 }
0x1f5a   : > { %7920 = vpow2.f32 %v5473_v61  ;;  %5480 = vadd.xlane.f32.xlu1 %v5479_v46 }
0x1f5d   : > { %v5463_v48 = vpop.xlane.xlu2 %5462 }
0x1f5e   : > { %v5469_v1 = vsub.f32 %v5453_v42, %v5463_v48 }
0x1f60   : > { %v7921_v50 = vpop.eup %7920  ;;  %v5475_v4 = vmul.f32 1.442695, %v5469_v1 }
0x1f61   : > { %v5482_v2 = vsel %vm4548_vm7, %v7921_v50, 0.0 }
0x1f62   : > { %7922 = vpow2.f32 %v5475_v4  ;;  %5483 = vadd.xlane.f32.xlu2 %v5482_v2 }
0x1f65   : > { %v5466_v7 = vpop.xlane.xlu0 %5465 }
0x1f66   : > { %v5470_v43 = vsub.f32 %v5454_v34, %v5466_v7 }
0x1f68   : > { %v7923_v35 = vpop.eup %7922  ;;  %v5477_v60 = vmul.f32 1.442695, %v5470_v43 }
0x1f69   : > { %v5485_v15 = vsel %vm4548_vm7, %v7923_v35, 0.0 }
0x1f6a   : > { %7924 = vpow2.f32 %v5477_v60  ;;  %5486 = vadd.xlane.f32.xlu0 %v5485_v15 }
0x1f70   : > { %v7925_v11 = vpop.eup %7924 }
0x1f71   : > { %v5488_v12 = vsel %vm4548_vm7, %v7925_v11, 0.0 }
0x1f72   : > { %5489 = vadd.xlane.f32.xlu1 %v5488_v12 }
0x1fcd   : > { %v5481_v21 = vpop.xlane.xlu1 %5480 }
0x1fce   : > { %7926 = vrcp.f32 %v5481_v21 }
0x1fd4   : > { %v7927_v5 = vpop.eup %7926 }
0x1fd5   : > { %v5495_v22 = vmul.f32 %v7927_v5, %v7919_v37  ;;  %v5484_v17 = vpop.xlane.xlu2 %5483 }
0x1fd6   : > { %7928 = vrcp.f32 %v5484_v17 }
0x1fd7   : > { %7044 = vmatmul.msk.f32.vlgmr.msrb.gmra.mxu3 %vm4548_vm7, %v5495_v22 }
0x1fdc   : > { %v7929_v56 = vpop.eup %7928 }
0x1fdd   : > { %v5487_v36 = vpop.xlane.xlu0 %5486  ;;  %v5496_v63 = vmul.f32 %v7929_v56, %v7921_v50 }
0x1fde   : > { %7930 = vrcp.f32 %v5487_v36 }
0x1fdf   : > { %7045 = vmatmul.msk.f32.gmra.mxu3 %vm4548_vm7, %v5496_v63 }
0x1fe4   : > { %v7931_v44 = vpop.eup %7930 }
0x1fe5   : > { %v5490_v23 = vpop.xlane.xlu1 %5489  ;;  %v5497_v32 = vmul.f32 %v7931_v44, %v7923_v35 }
0x1fe6   : > { %7932 = vrcp.f32 %v5490_v23 }
0x1fe7   : > { %7046 = vmatmul.msk.f32.gmra.mxu3 %vm4548_vm7, %v5497_v32 }
0x1fec   : > { %v7933_v33 = vpop.eup %7932 }
0x1fed   : > { %v5498_v57 = vmul.f32 %v7933_v33, %v7925_v11  ;;  %v9450_v33 = vld [vmem:[%s8208_s11 + $0x3] ss:$0 sm:$0xff] }
0x1fef   : > { %7047 = vmatmul.msk.f32.gmra.mxu3 %vm4548_vm7, %v5498_v57 }
0x205a   : > { %v5528_v27 = vpop.f32.mrf.mxu3 }
0x205b   : > { %7049 = vmatmul.msk.f32.vlgmr.msrb.gmra.mxu0 %vm3087_vm12, %v5528_v27 }
0x2062   : > { %v5531_v28 = vpop.f32.mrf.mxu3 }
0x2063   : > { %7050 = vmatmul.msk.f32.gmra.mxu0 %vm3087_vm12, %v5531_v28 }
0x206a   : > { %v5534_v3 = vpop.f32.mrf.mxu3 }
0x206b   : > { %7051 = vmatmul.msk.f32.gmra.mxu0 %vm3087_vm12, %v5534_v3 }
0x2072   : > { %v5537_v47 = vpop.f32.mrf.mxu3 }
0x2073   : > { %7052 = vmatmul.msk.f32.gmra.mxu0 %vm3087_vm12, %v5537_v47  ;;  %v9454_v47 = vld [vmem:[%s8208_s11 + $0x4] ss:$0 sm:$0xff] }
0x20d8   : > { %v5572_v19 = vpop.f32.mrf.mxu0 }
0x20d9   : > { %v5584_v20 = vadd.f32 %v5572_v19, %v9365_v13 }
0x20db   : > { %v5590_v25 = vadd.f32 %v7867_v49, %v5584_v20 }
0x20dd   : > { %v9412_v40 = vadd.f32 %v7945_v52, %v5590_v25 }
0x20df   : > { %v5600_v38 = vsel %vm2965_vm6, %v9412_v40, 0.0  ;;  %v5616_v41 = vmul.f32 %v9412_v40, %v9412_v40 }
0x20e0   : > { %5601 = vadd.xlane.f32.xlu2 %v5600_v38  ;;  %v5575_v42 = vpop.f32.mrf.mxu0 }
0x20e1   : > { %v5585_v45 = vadd.f32 %v5575_v42, %v9369_v14  ;;  %v5620_v18 = vsel %vm2965_vm6, %v5616_v41, 0.0 }
0x20e2   : > { %5621 = vadd.xlane.f32.xlu0 %v5620_v18 }
0x20e3   : > { %v5591_v62 = vadd.f32 %v7867_v49, %v5585_v45 }
0x20e5   : > { %v9420_v13 = vadd.f32 %v7946_v8, %v5591_v62 }
0x20e7   : > { %v5603_v16 = vsel %vm2965_vm6, %v9420_v13, 0.0  ;;  %v5617_v46 = vmul.f32 %v9420_v13, %v9420_v13 }
0x20e8   : > { %v5578_v34 = vpop.f32.mrf.mxu0 }
0x20e9   : > { %v5586_v51 = vadd.f32 %v5578_v34, %v9373_v26  ;;  %v7948_v26 = vld [vmem:[#allocation4 + $0x18] sm:$0xff]  ;;  %v5623_v48 = vsel %vm2965_vm6, %v5617_v46, 0.0 }
0x20ea   : > { %5604 = vadd.xlane.f32.xlu0 %v5603_v16 }
0x20eb   : > { %v5592_v0 = vadd.f32 %v7867_v49, %v5586_v51 }
0x20ed   : > { %v9425_v29 = vadd.f32 %v7947_v58, %v5592_v0 }
0x20ef   : > { %v5606_v14 = vsel %vm2965_vm6, %v9425_v29, 0.0 }
0x20f0   : > { %5607 = vadd.xlane.f32.xlu1 %v5606_v14  ;;  %v5581_v59 = vpop.f32.mrf.mxu0 }
0x20f1   : > { %v5587_v37 = vadd.f32 %v5581_v59, %v9377_v30  ;;  %v5618_v30 = vmul.f32 %v9425_v29, %v9425_v29 }
0x20f3   : > { %v5593_v61 = vadd.f32 %v7867_v49, %v5587_v37  ;;  %v5626_v2 = vsel %vm2965_vm6, %v5618_v30, 0.0 }
0x20f5   : > { %v9432_v24 = vadd.f32 %v7948_v26, %v5593_v61 }
0x20f7   : > { %v5609_v1 = vsel %vm2965_vm6, %v9432_v24, 0.0  ;;  %v5619_v50 = vmul.f32 %v9432_v24, %v9432_v24 }
0x20f8   : > { %5624 = vadd.xlane.f32.xlu1 %v5623_v48  ;;  %5610 = vadd.xlane.f32.xlu2 %v5609_v1 }
0x20f9   : > { %v5629_v4 = vsel %vm2965_vm6, %v5619_v50, 0.0 }
0x20fa   : > { %5630 = vadd.xlane.f32.xlu0 %v5629_v4 }
0x2100   : > { %5627 = vadd.xlane.f32.xlu2 %v5626_v2 }
0x2153   : > { %v5602_v55 = vpop.xlane.xlu2 %5601 }
0x2154   : > { %v5612_v7 = vmul.f32 %v5602_v55, %v9072_v6 }
0x2155   : > { %v5622_v43 = vpop.xlane.xlu0 %5621 }
0x2156   : > { %v5636_v31 = vmul.f32 %v5612_v7, %v5612_v7  ;;  %v5632_v35 = vmul.f32 %v5622_v43, %v9072_v6  ;;  %v5648_v32 = vsub.f32 %v9412_v40, %v5612_v7 }
0x2158   : > { %v5640_v60 = vsub.f32 %v5632_v35, %v5636_v31 }
0x215a   : > { %v5644_v15 = vmax.f32 %v5640_v60, 0.0 }
0x215c   : > { %v5652_v53 = vadd.f32 1e-12, %v5644_v15 }
0x215d   : > { %v5605_v11 = vpop.xlane.xlu0 %5604 }
0x215e   : > { %7934 = vrsqrt.f32 %v5652_v53  ;;  %v5613_v21 = vmul.f32 %v5605_v11, %v9072_v6  ;;  %vm5662_vm12 = vweird.f32 %v5652_v53 }
0x2160   : > { %v5637_v56 = vmul.f32 %v5613_v21, %v5613_v21  ;;  %v5649_v4 = vsub.f32 %v9420_v13, %v5613_v21 }
0x2163   : > { %v5608_v39 = vpop.xlane.xlu1 %5607 }
0x2164   : > { %v7935_v9 = vpop.eup %7934  ;;  %v5614_v25 = vmul.f32 %v5608_v39, %v9072_v6 }
0x2165   : > { %v5657_v10 = vmul.f32 %v7935_v9, %v5652_v53  ;;  %vm5663_vm0 = vweird.f32 %v7935_v9 }
0x2166   : > { %vm5664_vm8 = vmor %vm5662_vm12, %vm5663_vm0  ;;  %v5638_v18 = vmul.f32 %v5614_v25, %v5614_v25 }
0x2167   : > { %v5658_v12 = vmul.f32 %v7935_v9, %v5657_v10 }
0x2169   : > { %v5659_v54 = vmul.f32 0.5, %v5658_v12 }
0x216b   : > { %v5660_v5 = vsub.f32 1.5, %v5659_v54  ;;  %v5625_v22 = vpop.xlane.xlu1 %5624  ;;  %v5611_v17 = vpop.xlane.xlu2 %5610 }
0x216c   : > { %v5633_v36 = vmul.f32 %v5625_v22, %v9072_v6  ;;  %v5615_v63 = vmul.f32 %v5611_v17, %v9072_v6 }
0x216d   : > { %v5661_v44 = vmul.f32 %v7935_v9, %v5660_v5  ;;  %v5631_v23 = vpop.xlane.xlu0 %5630 }
0x216e   : > { %v5641_v57 = vsub.f32 %v5633_v36, %v5637_v56  ;;  %v5639_v27 = vmul.f32 %v5615_v63, %v5615_v63  ;;  %v5635_v28 = vmul.f32 %v5631_v23, %v9072_v6  ;;  %v5651_v43 = vsub.f32 %v9432_v24, %v5615_v63 }
0x216f   : > { %v5665_v3 = vsel %vm5664_vm8, %v7935_v9, %v5661_v44  ;;  %v5650_v24 = vsub.f32 %v9425_v29, %v5614_v25 }
0x2170   : > { %v5696_v49 = vmul.f32 %v5665_v3, %v5648_v32  ;;  %v5645_v19 = vmax.f32 %v5641_v57, 0.0  ;;  %v5643_v20 = vsub.f32 %v5635_v28, %v5639_v27 }
0x2172   : > { %v5701_v52 = vmul.f32 %v9450_v33, %v5696_v49  ;;  %v5653_v38 = vadd.f32 1e-12, %v5645_v19  ;;  %v5647_v41 = vmax.f32 %v5643_v20, 0.0 }
0x2173   : > { %v5628_v40 = vpop.xlane.xlu2 %5627 }
0x2174   : > { %v5706_v42 = vadd.f32 %v9454_v47, %v5701_v52  ;;  %7936 = vrsqrt.f32 %v5653_v38  ;;  %v5655_v45 = vadd.f32 1e-12, %v5647_v41  ;;  %v5634_v62 = vmul.f32 %v5628_v40, %v9072_v6 }
0x2175   : > { %vm5672_vm10 = vweird.f32 %v5653_v38 }
0x2176   : > { %5710 = vst.msk [vmem:[#allocation4] sm:$0xff] %vm2965_vm6, %v5706_v42  ;;  %7938 = vrsqrt.f32 %v5655_v45  ;;  %v5642_v8 = vsub.f32 %v5634_v62, %v5638_v18  ;;  %vm5692_vm13 = vweird.f32 %v5655_v45 }
0x2178   : > { %v5646_v34 = vmax.f32 %v5642_v8, 0.0 }
0x217a   : > { %v7937_v51 = vpop.eup %7936  ;;  %v5654_v0 = vadd.f32 1e-12, %v5646_v34 }
0x217b   : > { %v5667_v16 = vmul.f32 %v7937_v51, %v5653_v38  ;;  %vm5673_vm9 = vweird.f32 %v7937_v51 }
0x217c   : > { %v7939_v58 = vpop.eup %7938  ;;  %7940 = vrsqrt.f32 %v5654_v0  ;;  %vm5674_vm3 = vmor %vm5672_vm10, %vm5673_vm9  ;;  %vm5682_vm1 = vweird.f32 %v5654_v0 }
0x217d   : > { %v5668_v14 = vmul.f32 %v7937_v51, %v5667_v16  ;;  %v5687_v59 = vmul.f32 %v7939_v58, %v5655_v45  ;;  %vm5693_vm11 = vweird.f32 %v7939_v58 }
0x217e   : > { %vm5694_vm14 = vmor %vm5692_vm13, %vm5693_vm11 }
0x217f   : > { %v5669_v37 = vmul.f32 0.5, %v5668_v14  ;;  %v5688_v61 = vmul.f32 %v7939_v58, %v5687_v59 }
0x2181   : > { %v5670_v46 = vsub.f32 1.5, %v5669_v37  ;;  %v5689_v26 = vmul.f32 0.5, %v5688_v61 }
0x2182   : > { %v7941_v48 = vpop.eup %7940 }
0x2183   : > { %v5671_v1 = vmul.f32 %v7937_v51, %v5670_v46  ;;  %v5690_v50 = vsub.f32 1.5, %v5689_v26  ;;  %v5677_v30 = vmul.f32 %v7941_v48, %v5654_v0  ;;  %vm5683_vm15 = vweird.f32 %v7941_v48 }
0x2184   : > { %vm5684_vm2 = vmor %vm5682_vm1, %vm5683_vm15 }
0x2185   : > { %v5675_v2 = vsel %vm5674_vm3, %v7937_v51, %v5671_v1  ;;  %v5691_v55 = vmul.f32 %v7939_v58, %v5690_v50  ;;  %v5678_v31 = vmul.f32 %v7941_v48, %v5677_v30 }
0x2186   : > { %v5697_v7 = vmul.f32 %v5675_v2, %v5649_v4 }
0x2187   : > { %v5695_v35 = vsel %vm5694_vm14, %v7939_v58, %v5691_v55  ;;  %v5679_v53 = vmul.f32 0.5, %v5678_v31 }
0x2188   : > { %v5702_v60 = vmul.f32 %v9450_v33, %v5697_v7  ;;  %v5699_v15 = vmul.f32 %v5695_v35, %v5651_v43 }
0x2189   : > { %v5680_v13 = vsub.f32 1.5, %v5679_v53 }
0x218a   : > { %v5707_v39 = vadd.f32 %v9454_v47, %v5702_v60  ;;  %v5704_v9 = vmul.f32 %v9450_v33, %v5699_v15 }
0x218b   : > { %v5681_v11 = vmul.f32 %v7941_v48, %v5680_v13 }
0x218c   : > { %5711 = vst.msk [vmem:[#allocation4 + $0x8] sm:$0xff] %vm2965_vm6, %v5707_v39  ;;  %v5709_v10 = vadd.f32 %v9454_v47, %v5704_v9 }
0x218d   : > { %v5685_v12 = vsel %vm5684_vm2, %v7941_v48, %v5681_v11 }
0x218e   : > { %5713 = vst.msk [vmem:[#allocation4 + $0x18] sm:$0xff] %vm2965_vm6, %v5709_v10  ;;  %v5698_v21 = vmul.f32 %v5685_v12, %v5650_v24 }
0x2190   : > { %v5703_v54 = vmul.f32 %v9450_v33, %v5698_v21 }
0x2192   : > { %v5708_v5 = vadd.f32 %v9454_v47, %v5703_v54 }
0x2194   : > { %5712 = vst.msk [vmem:[#allocation4 + $0x10] sm:$0xff] %vm2965_vm6, %v5708_v5 }
0x2195 PF: > { %v7584_v22 = vld [vmem:[%s8198_s2 + $0x8] sm:$0xff]   ;;  %v7487_v17 = vld [vmem:[%s8198_s2] sm:$0xff]   ;;  %v9475_v44 = vld [vmem:[#allocation4] sm:$0xff]  ;;  %vm5823_vm4 = vcmask 523264  }
0x2196   : > { %v7493_v56 = vunpack.c.h.bf16 %v7584_v22  ;;  %v7492_v36 = vunpack.c.l.bf16 %v7584_v22  ;;  %v7489_v29 = vunpack.c.h.bf16 %v7487_v17  ;;  %v7488_v63 = vunpack.c.l.bf16 %v7487_v17  ;;  %v9477_v23 = vld [vmem:[#allocation4 + $0x8] sm:$0xff]  ;;  %v9487_v33 = vld [vmem:[#allocation4 + $0x18] sm:$0xff]  ;;  %v7586_v3 = vld [vmem:[%s8203_s9 + $0x10] sm:$0xff]  }
0x2197   : > { %v7587_v57 = vld [vmem:[%s8203_s9 + $0x18] sm:$0xff]   ;;  %v7505_v47 = vunpack.c.h.bf16 %v7586_v3  ;;  %v7504_v49 = vunpack.c.l.bf16 %v7586_v3  ;;  %v7585_v19 = vld [vmem:[%s8203_s9 + $0x8] sm:$0xff]   ;;  %v7495_v52 = vld [vmem:[%s8203_s9] sm:$0xff]  }
0x2198   : > { %5752 = vmatpush.msra.mxu0 %v7493_v56  ;;  %7612 = vmatpush.msra.mxu3 %v7493_v56  ;;  %v7509_v27 = vunpack.c.h.bf16 %v7587_v57  ;;  %v7508_v28 = vunpack.c.l.bf16 %v7587_v57  ;;  %v7501_v20 = vunpack.c.h.bf16 %v7585_v19  ;;  %v7500_v25 = vunpack.c.l.bf16 %v7585_v19  ;;  %v7949_v40 = vld [vmem:[%s8208_s11 + $0x8] ss:$0 sm:$0xff] }
0x2199   : > { %v7497_v38 = vunpack.c.h.bf16 %v7495_v52  ;;  %v7496_v41 = vunpack.c.l.bf16 %v7495_v52 }
0x219a   : > { %5753 = vmatpush.msra.mxu0 %v7492_v36  ;;  %7613 = vmatpush.msra.mxu3 %v7492_v36 }
0x219b   : > { %v9483_v32 = vld [vmem:[#allocation4 + $0x10] sm:$0xff]  ;;  %5844 = vmatpush.msra.mxu1 %v7509_v27  ;;  %7616 = vmatpush.msra.mxu2 %v7509_v27 }
0x219c   : > { %5754 = vmatpush.msra.mxu0 %v7489_v29  ;;  %7614 = vmatpush.msra.mxu3 %v7489_v29  ;;  %v7950_v29 = vld [vmem:[%s8208_s11 + $0x9] ss:$0 sm:$0xff] }
0x219d   : > { %5845 = vmatpush.msra.mxu1 %v7508_v28  ;;  %7617 = vmatpush.msra.mxu2 %v7508_v28 }
0x219e   : > { %5755 = vmatpush.msra.mxu0 %v7488_v63  ;;  %7615 = vmatpush.msra.mxu3 %v7488_v63 }
0x219f   : > { %7053 = vmatmul.msk.f32.vlgmr.msra.gmra.mxu0 %vm2965_vm6, %v9475_v44  ;;  %7054 = vmatmul.msk.f32.vlgmr.msra.gmra.mxu3 %vm2965_vm6, %v9477_v23 }
0x21a0   : > { %5846 = vmatpush.msra.mxu1 %v7505_v47  ;;  %7618 = vmatpush.msra.mxu2 %v7505_v47 }
0x21a2   : > { %5847 = vmatpush.msra.mxu1 %v7504_v49  ;;  %7619 = vmatpush.msra.mxu2 %v7504_v49 }
0x21a4   : > { %5848 = vmatpush.msra.mxu1 %v7501_v20  ;;  %7620 = vmatpush.msra.mxu2 %v7501_v20 }
0x21a6   : > { %5849 = vmatpush.msra.mxu1 %v7500_v25  ;;  %7621 = vmatpush.msra.mxu2 %v7500_v25 }
0x21a7   : > { %7055 = vmatmul.msk.f32.gmra.mxu3 %vm2965_vm6, %v9483_v32 }
0x21a8   : > { %5850 = vmatpush.msra.mxu1 %v7497_v38  ;;  %7622 = vmatpush.msra.mxu2 %v7497_v38 }
0x21aa   : > { %5851 = vmatpush.msra.mxu1 %v7496_v41  ;;  %7623 = vmatpush.msra.mxu2 %v7496_v41 }
0x21af   : > { %7056 = vmatmul.msk.f32.gmra.mxu3 %vm2965_vm6, %v9487_v33 }
0x221c   : > { %v5757_v42 = vpop.f32.mrf.mxu0 }
0x221d   : > { %v5758_v45 = vadd.f32 %v7949_v40, %v5757_v42 }
0x221f   : > { %v5769_v18 = vmul.f32 %v5758_v45, %v5758_v45 }
0x2221   : > { %v5773_v62 = vmul.f32 %v5769_v18, %v5758_v45 }
0x2222   : > { %v5760_v8 = vpop.f32.mrf.mxu3 }
0x2223   : > { %v5777_v34 = vmul.f32 0.044715, %v5773_v62  ;;  %v5761_v51 = vadd.f32 %v7949_v40, %v5760_v8 }
0x2225   : > { %v5781_v16 = vadd.f32 %v5777_v34, %v5758_v45  ;;  %v5770_v0 = vmul.f32 %v5761_v51, %v5761_v51 }
0x2227   : > { %v5774_v58 = vmul.f32 %v5770_v0, %v5761_v51  ;;  %v5785_v14 = vmul.f32 0.7978846, %v5781_v16 }
0x2229   : > { %v5778_v59 = vmul.f32 0.044715, %v5774_v58  ;;  %7953 = vtanh.f32 %v5785_v14 }
0x222a   : > { %v5763_v37 = vpop.f32.mrf.mxu3 }
0x222b   : > { %v5782_v61 = vadd.f32 %v5778_v59, %v5761_v51  ;;  %v5764_v46 = vadd.f32 %v7949_v40, %v5763_v37 }
0x222d   : > { %v5771_v26 = vmul.f32 %v5764_v46, %v5764_v46  ;;  %v5786_v48 = vmul.f32 0.7978846, %v5782_v61 }
0x222f   : > { %v7954_v1 = vpop.eup %7953  ;;  %v5775_v50 = vmul.f32 %v5771_v26, %v5764_v46  ;;  %7955 = vtanh.f32 %v5786_v48 }
0x2230   : > { %v5793_v4 = vadd.f32 1.0, %v7954_v1 }
0x2231   : > { %v5779_v30 = vmul.f32 0.044715, %v5775_v50 }
0x2232   : > { %v5766_v2 = vpop.f32.mrf.mxu3  ;;  %v5797_v55 = vmul.f32 0.5, %v5793_v4 }
0x2233   : > { %v5783_v7 = vadd.f32 %v5779_v30, %v5764_v46  ;;  %v5767_v43 = vadd.f32 %v7949_v40, %v5766_v2 }
0x2234   : > { %v5801_v31 = vmul.f32 %v5797_v55, %v5758_v45 }
0x2235   : > { %v7956_v35 = vpop.eup %7955  ;;  %v5772_v60 = vmul.f32 %v5767_v43, %v5767_v43  ;;  %v5787_v15 = vmul.f32 0.7978846, %v5783_v7 }
0x2236   : > { %7057 = vmatmul.msk.f32.vlgmr.msra.gmra.mxu1 %vm5823_vm4, %v5801_v31  ;;  %v5794_v53 = vadd.f32 1.0, %v7956_v35 }
0x2237   : > { %v5776_v39 = vmul.f32 %v5772_v60, %v5767_v43  ;;  %7957 = vtanh.f32 %v5787_v15 }
0x2238   : > { %v5798_v9 = vmul.f32 0.5, %v5794_v53 }
0x2239   : > { %v5780_v13 = vmul.f32 0.044715, %v5776_v39 }
0x223a   : > { %v5802_v11 = vmul.f32 %v5798_v9, %v5761_v51 }
0x223b   : > { %v5784_v10 = vadd.f32 %v5780_v13, %v5767_v43 }
0x223d   : > { %v7958_v24 = vpop.eup %7957  ;;  %v5788_v12 = vmul.f32 0.7978846, %v5784_v10 }
0x223e   : > { %7058 = vmatmul.msk.f32.gmra.mxu1 %vm5823_vm4, %v5802_v11  ;;  %v5795_v21 = vadd.f32 1.0, %v7958_v24 }
0x223f   : > { %7959 = vtanh.f32 %v5788_v12  ;;  %v7951_v12 = vld [vmem:[%s8208_s11 + $0x6] ss:$0 sm:$0xff] }
0x2240   : > { %v5799_v54 = vmul.f32 0.5, %v5795_v21 }
0x2242   : > { %v5803_v5 = vmul.f32 %v5799_v54, %v5764_v46 }
0x2244   : > { %7059 = vmatmul.msk.f32.vlgmr.msra.gmra.mxu2 %vm5823_vm4, %v5803_v5 }
0x2245   : > { %v7960_v22 = vpop.eup %7959 }
0x2246   : > { %v5796_v17 = vadd.f32 1.0, %v7960_v22 }
0x2248   : > { %v5800_v56 = vmul.f32 0.5, %v5796_v17  ;;  %v7952_v17 = vld [vmem:[%s8208_s11 + $0x7] ss:$0 sm:$0xff] }
0x224a   : > { %v5804_v36 = vmul.f32 %v5800_v56, %v5767_v43 }
0x224c   : > { %7060 = vmatmul.msk.f32.gmra.mxu2 %vm5823_vm4, %v5804_v36 }
0x22b3   : > { %v5853_v63 = vpop.f32.mrf.mxu1 }
0x22b4   : > { %v5854_v57 = vadd.f32 %v7950_v29, %v5853_v63 }
0x22b6   : > { %v9502_v27 = vadd.f32 %v5854_v57, %v9475_v44 }
0x22b8   : > { %v5871_v28 = vsel %vm2965_vm6, %v9502_v27, 0.0  ;;  %v5887_v3 = vmul.f32 %v9502_v27, %v9502_v27 }
0x22b9   : > { %5872 = vadd.xlane.f32.xlu0 %v5871_v28 }
0x22ba   : > { %v5891_v47 = vsel %vm2965_vm6, %v5887_v3, 0.0 }
0x22bb   : > { %v5856_v49 = vpop.f32.mrf.mxu1  ;;  %5892 = vadd.xlane.f32.xlu2 %v5891_v47 }
0x22bc   : > { %v5857_v19 = vadd.f32 %v7950_v29, %v5856_v49 }
0x22be   : > { %v9510_v20 = vadd.f32 %v5857_v19, %v9477_v23 }
0x22c0   : > { %v5874_v25 = vsel %vm2965_vm6, %v9510_v20, 0.0  ;;  %v5888_v44 = vmul.f32 %v9510_v20, %v9510_v20 }
0x22c1   : > { %5875 = vadd.xlane.f32.xlu0 %v5874_v25 }
0x22c2   : > { %v5894_v52 = vsel %vm2965_vm6, %v5888_v44, 0.0 }
0x22c3   : > { %5895 = vadd.xlane.f32.xlu2 %v5894_v52 }
0x22c7   : > { %v5859_v38 = vpop.f32.mrf.mxu2 }
0x22c8   : > { %v5860_v41 = vadd.f32 %v7950_v29, %v5859_v38 }
0x22ca   : > { %v9518_v40 = vadd.f32 %v5860_v41, %v9483_v32 }
0x22cc   : > { %v5877_v42 = vsel %vm2965_vm6, %v9518_v40, 0.0  ;;  %v5889_v23 = vmul.f32 %v9518_v40, %v9518_v40 }
0x22cd   : > { %5878 = vadd.xlane.f32.xlu1 %v5877_v42 }
0x22ce   : > { %v5897_v45 = vsel %vm2965_vm6, %v5889_v23, 0.0 }
0x22cf   : > { %v5862_v18 = vpop.f32.mrf.mxu2  ;;  %5898 = vadd.xlane.f32.xlu0 %v5897_v45 }
0x22d0   : > { %v5863_v62 = vadd.f32 %v7950_v29, %v5862_v18 }
0x22d2   : > { %v9526_v8 = vadd.f32 %v5863_v62, %v9487_v33 }
0x22d4   : > { %v5880_v34 = vsel %vm2965_vm6, %v9526_v8, 0.0  ;;  %v5890_v32 = vmul.f32 %v9526_v8, %v9526_v8 }
0x22d5   : > { %5881 = vadd.xlane.f32.xlu1 %v5880_v34 }
0x22d6   : > { %v5900_v51 = vsel %vm2965_vm6, %v5890_v32, 0.0 }
0x22dd   : > { %5901 = vadd.xlane.f32.xlu1 %v5900_v51 }
0x232c   : > { %v5873_v16 = vpop.xlane.xlu0 %5872 }
0x232d   : > { %v5883_v0 = vmul.f32 %v5873_v16, %v9072_v6 }
0x232e   : > { %v5893_v58 = vpop.xlane.xlu2 %5892 }
0x232f   : > { %v5907_v14 = vmul.f32 %v5883_v0, %v5883_v0  ;;  %v5903_v59 = vmul.f32 %v5893_v58, %v9072_v6  ;;  %v5919_v24 = vsub.f32 %v9502_v27, %v5883_v0 }
0x2331   : > { %v5911_v37 = vsub.f32 %v5903_v59, %v5907_v14 }
0x2333   : > { %v5915_v33 = vmax.f32 %v5911_v37, 0.0 }
0x2334   : > { %v5876_v61 = vpop.xlane.xlu0 %5875 }
0x2335   : > { %v5923_v46 = vadd.f32 1e-12, %v5915_v33  ;;  %v5884_v26 = vmul.f32 %v5876_v61, %v9072_v6 }
0x2336   : > { %v5896_v48 = vpop.xlane.xlu2 %5895 }
0x2337   : > { %7961 = vrsqrt.f32 %v5923_v46  ;;  %v5908_v1 = vmul.f32 %v5884_v26, %v5884_v26  ;;  %v5904_v50 = vmul.f32 %v5896_v48, %v9072_v6  ;;  %vm5933_vm7 = vweird.f32 %v5923_v46 }
0x2338   : > { %v5920_v49 = vsub.f32 %v9510_v20, %v5884_v26 }
0x2339   : > { %v5912_v4 = vsub.f32 %v5904_v50, %v5908_v1 }
0x233b   : > { %v5916_v30 = vmax.f32 %v5912_v4, 0.0 }
0x233d   : > { %v7962_v2 = vpop.eup %7961  ;;  %v5924_v7 = vadd.f32 1e-12, %v5916_v30 }
0x233e   : > { %v5928_v55 = vmul.f32 %v7962_v2, %v5923_v46  ;;  %vm5934_vm5 = vweird.f32 %v7962_v2 }
0x233f   : > { %7963 = vrsqrt.f32 %v5924_v7  ;;  %vm5935_vm0 = vmor %vm5933_vm7, %vm5934_vm5  ;;  %vm5943_vm8 = vweird.f32 %v5924_v7 }
0x2340   : > { %v5929_v43 = vmul.f32 %v7962_v2, %v5928_v55  ;;  %v5879_v31 = vpop.xlane.xlu1 %5878 }
0x2341   : > { %v5885_v35 = vmul.f32 %v5879_v31, %v9072_v6 }
0x2342   : > { %v5930_v60 = vmul.f32 0.5, %v5929_v43  ;;  %v5899_v15 = vpop.xlane.xlu0 %5898 }
0x2343   : > { %v5909_v53 = vmul.f32 %v5885_v35, %v5885_v35  ;;  %v5905_v39 = vmul.f32 %v5899_v15, %v9072_v6  ;;  %v5921_v0 = vsub.f32 %v9518_v40, %v5885_v35 }
0x2344   : > { %v5931_v9 = vsub.f32 1.5, %v5930_v60 }
0x2345   : > { %v5913_v13 = vsub.f32 %v5905_v39, %v5909_v53  ;;  %v7964_v10 = vpop.eup %7963 }
0x2346   : > { %v5932_v11 = vmul.f32 %v7962_v2, %v5931_v9  ;;  %v5938_v21 = vmul.f32 %v7964_v10, %v5924_v7  ;;  %vm5944_vm12 = vweird.f32 %v7964_v10 }
0x2347   : > { %v5917_v54 = vmax.f32 %v5913_v13, 0.0  ;;  %vm5945_vm9 = vmor %vm5943_vm8, %vm5944_vm12 }
0x2348   : > { %v5936_v5 = vsel %vm5935_vm0, %v7962_v2, %v5932_v11  ;;  %v5882_v22 = vpop.xlane.xlu1 %5881  ;;  %v5939_v36 = vmul.f32 %v7964_v10, %v5938_v21 }
0x2349   : > { %v5967_v56 = vmul.f32 %v5936_v5, %v5919_v24  ;;  %v5925_v29 = vadd.f32 1e-12, %v5917_v54  ;;  %v5886_v47 = vmul.f32 %v5882_v22, %v9072_v6 }
0x234a   : > { %v5940_v57 = vmul.f32 0.5, %v5939_v36 }
0x234b   : > { %v5972_v63 = vmul.f32 %v7951_v12, %v5967_v56  ;;  %7965 = vrsqrt.f32 %v5925_v29  ;;  %v5910_v52 = vmul.f32 %v5886_v47, %v5886_v47  ;;  %vm5953_vm11 = vweird.f32 %v5925_v29 }
0x234c   : > { %v5941_v3 = vsub.f32 1.5, %v5940_v57  ;;  %v5922_v1 = vsub.f32 %v9526_v8, %v5886_v47 }
0x234d   : > { %v5977_v28 = vadd.f32 %v7952_v17, %v5972_v63 }
0x234e   : > { %v5942_v27 = vmul.f32 %v7964_v10, %v5941_v3 }
0x234f   : > { %5981 = vst.msk [vmem:[#allocation4] sm:$0xff] %vm2965_vm6, %v5977_v28 }
0x2350   : > { %v5902_v19 = vpop.xlane.xlu1 %5901  ;;  %v5946_v44 = vsel %vm5945_vm9, %v7964_v10, %v5942_v27 }
0x2351   : > { %v7966_v25 = vpop.eup %7965  ;;  %v5906_v38 = vmul.f32 %v5902_v19, %v9072_v6  ;;  %v5968_v41 = vmul.f32 %v5946_v44, %v5920_v49 }
0x2352   : > { %v5948_v42 = vmul.f32 %v7966_v25, %v5925_v29  ;;  %vm5954_vm10 = vweird.f32 %v7966_v25 }
0x2353   : > { %v5914_v23 = vsub.f32 %v5906_v38, %v5910_v52  ;;  %v5973_v45 = vmul.f32 %v7951_v12, %v5968_v41  ;;  %vm5955_vm3 = vmor %vm5953_vm11, %vm5954_vm10 }
0x2354   : > { %v5949_v18 = vmul.f32 %v7966_v25, %v5948_v42 }
0x2355   : > { %v5918_v62 = vmax.f32 %v5914_v23, 0.0  ;;  %v5978_v34 = vadd.f32 %v7952_v17, %v5973_v45 }
0x2356   : > { %v5950_v32 = vmul.f32 0.5, %v5949_v18 }
0x2357   : > { %v5926_v51 = vadd.f32 1e-12, %v5918_v62  ;;  %5982 = vst.msk [vmem:[#allocation4 + $0x8] sm:$0xff] %vm2965_vm6, %v5978_v34 }
0x2358   : > { %v5951_v16 = vsub.f32 1.5, %v5950_v32 }
0x2359   : > { %7967 = vrsqrt.f32 %v5926_v51  ;;  %vm5963_vm14 = vweird.f32 %v5926_v51 }
0x235a   : > { %v5952_v20 = vmul.f32 %v7966_v25, %v5951_v16 }
0x235c   : > { %v5956_v6 = vsel %vm5955_vm3, %v7966_v25, %v5952_v20 }
0x235d   : > { %v5969_v58 = vmul.f32 %v5956_v6, %v5921_v0 }
0x235f   : > { %v7968_v14 = vpop.eup %7967  ;;  %v5974_v59 = vmul.f32 %v7951_v12, %v5969_v58 }
0x2360   : > { %v5958_v37 = vmul.f32 %v7968_v14, %v5926_v51  ;;  %vm5964_vm13 = vweird.f32 %v7968_v14 }
0x2361   : > { %v5979_v33 = vadd.f32 %v7952_v17, %v5974_v59  ;;  %vm5965_vm15 = vmor %vm5963_vm14, %vm5964_vm13 }
0x2362   : > { %v5959_v61 = vmul.f32 %v7968_v14, %v5958_v37 }
0x2363   : > { %5983 = vst.msk [vmem:[#allocation4 + $0x10] sm:$0xff] %vm2965_vm6, %v5979_v33 }
0x2364   : > { %v5960_v46 = vmul.f32 0.5, %v5959_v61 }
0x2366   : > { %v5961_v26 = vsub.f32 1.5, %v5960_v46 }
0x2368   : > { %v5962_v48 = vmul.f32 %v7968_v14, %v5961_v26 }
0x236a   : > { %v5966_v50 = vsel %vm5965_vm15, %v7968_v14, %v5962_v48 }
0x236b   : > { %v5970_v40 = vmul.f32 %v5966_v50, %v5922_v1 }
0x236d   : > { %v5975_v4 = vmul.f32 %v7951_v12, %v5970_v40 }
0x236f   : > { %v5980_v30 = vadd.f32 %v7952_v17, %v5975_v4 }
0x2371   : > { %5984 = vst.msk [vmem:[#allocation4 + $0x18] sm:$0xff] %vm2965_vm6, %v5980_v30 }
0x2372 PF: > { %s9670_s6 = sld [smem:[#allocation9_spill]] }
0x2378   : > { %p7061_p2 = scmp.ne.s32.totalorder %s9670_s6, 3 }
0x2379   : > { %s9671_s11 = sld [smem:[#allocation23_spill]] (!%p7061_p2) }
0x237a   : > { %5988 = sbr.rel (%p7061_p2) target bundleno = 9385 (0x24a9), region = 120  ;;  %s9672_s8 = sld [smem:[#allocation24_spill]] (!%p7061_p2) }
0x237f   : > { %v5996_v2 = vld [vmem:[%s9671_s11 + $0x18] sm:$0xff]  ;;  %v5995_v55 = vld [vmem:[%s9671_s11 + $0x10] sm:$0xff]  ;;  %v5994_v8 = vld [vmem:[%s9671_s11 + $0x8] sm:$0xff]  ;;  %vm6012_vm6 = vcmask 261120  }
0x2380   : > { %v6003_v7 = vunpack.c.l.bf16 %v5996_v2  ;;  %v6004_v43 = vunpack.c.h.bf16 %v5996_v2  ;;  %v6001_v31 = vunpack.c.l.bf16 %v5995_v55  ;;  %v6002_v35 = vunpack.c.h.bf16 %v5995_v55  ;;  %v5993_v60 = vld [vmem:[%s9671_s11] sm:$0xff]  ;;  %v5989_v13 = vld [vmem:[#allocation4] sm:$0xff]  ;;  %v5990_v11 = vld [vmem:[#allocation4 + $0x8] sm:$0xff] }
0x2381   : > { %v5999_v15 = vunpack.c.l.bf16 %v5994_v8  ;;  %v6000_v53 = vunpack.c.h.bf16 %v5994_v8  ;;  %v5997_v39 = vunpack.c.l.bf16 %v5993_v60  ;;  %v5998_v9 = vunpack.c.h.bf16 %v5993_v60  ;;  %v5991_v10 = vld [vmem:[#allocation4 + $0x10] sm:$0xff]  ;;  %v5992_v24 = vld [vmem:[#allocation4 + $0x18] sm:$0xff] }
0x2382   : > { %6037 = vmatpush.msra.mxu0 %v6003_v7  ;;  %7624 = vmatpush.msra.mxu2 %v6003_v7  ;;  %v7062_v12 = vld [vmem:[%s9672_s8 + $0x4] ss:$8 sm:$0x3] }
0x2383   : > { %6066 = vmatpush.msra.mxu1 %v6004_v43  ;;  %7628 = vmatpush.msra.mxu3 %v6004_v43  ;;  %v6008_v21 = vperm.slane %v7062_v12, 0  ;;  %v6009_v54 = vperm.slane %v7062_v12, 1 }
0x2384   : > { %6038 = vmatpush.msra.mxu0 %v6001_v31  ;;  %7625 = vmatpush.msra.mxu2 %v6001_v31 }
0x2385   : > { %6067 = vmatpush.msra.mxu1 %v6002_v35  ;;  %7629 = vmatpush.msra.mxu3 %v6002_v35 }
0x2386   : > { %6039 = vmatpush.msra.mxu0 %v5999_v15  ;;  %7626 = vmatpush.msra.mxu2 %v5999_v15 }
0x2387   : > { %6068 = vmatpush.msra.mxu1 %v6000_v53  ;;  %7630 = vmatpush.msra.mxu3 %v6000_v53 }
0x2388   : > { %6040 = vmatpush.msra.mxu0 %v5997_v39  ;;  %7627 = vmatpush.msra.mxu2 %v5997_v39 }
0x2389   : > { %6069 = vmatpush.msra.mxu1 %v5998_v9  ;;  %7631 = vmatpush.msra.mxu3 %v5998_v9 }
0x238a   : > { %7063 = vmatmul.msk.f32.vlgmr.msra.gmra.mxu0 %vm6012_vm6, %v5989_v13  ;;  %7065 = vmatmul.msk.f32.vlgmr.msra.gmra.mxu2 %vm6012_vm6, %v5991_v10 }
0x238b   : > { %7067 = vmatmul.msk.f32.vlgmr.msra.gmra.mxu1 %vm6012_vm6, %v5989_v13  ;;  %7069 = vmatmul.msk.f32.vlgmr.msra.gmra.mxu3 %vm6012_vm6, %v5991_v10 }
0x2392   : > { %7064 = vmatmul.msk.f32.gmra.mxu0 %vm6012_vm6, %v5990_v11  ;;  %7066 = vmatmul.msk.f32.gmra.mxu2 %vm6012_vm6, %v5992_v24 }
0x2393   : > { %7068 = vmatmul.msk.f32.gmra.mxu1 %vm6012_vm6, %v5990_v11  ;;  %7070 = vmatmul.msk.f32.gmra.mxu3 %vm6012_vm6, %v5992_v24 }
0x2407   : > { %v6042_v5 = vpop.f32.mrf.mxu0 }
0x2408   : > { %v6043_v22 = vadd.f32 %v6042_v5, %v6008_v21  ;;  %v6071_v17 = vpop.f32.mrf.mxu1 }
0x2409   : > { %v6072_v56 = vadd.f32 %v6071_v17, %v6009_v54 }
0x240a   : > { %v6083_v36 = vmul.f32 %v6043_v22, %v6043_v22 }
0x240b   : > { %v6084_v29 = vmul.f32 %v6072_v56, %v6072_v56 }
0x240d   : > { %v6048_v63 = vpop.f32.mrf.mxu2  ;;  %v6091_v57 = vadd.f32 %v6084_v29, %v6083_v36 }
0x240e   : > { %v9567_v28 = vadd.f32 %v6048_v63, %v6008_v21  ;;  %v6077_v3 = vpop.f32.mrf.mxu3 }
0x240f   : > { %v9569_v47 = vadd.f32 %v6077_v3, %v6009_v54  ;;  %6092 = vadd.xlane.f32.xlu0 %v6091_v57  ;;  %v6045_v27 = vpop.f32.mrf.mxu0 }
0x2410   : > { %v9571_v49 = vadd.f32 %v6045_v27, %v6008_v21  ;;  %v6074_v19 = vpop.f32.mrf.mxu1  ;;  %v6087_v25 = vmul.f32 %v9567_v28, %v9567_v28 }
0x2411   : > { %v9575_v44 = vadd.f32 %v6074_v19, %v6009_v54  ;;  %v6088_v52 = vmul.f32 %v9569_v47, %v9569_v47 }
0x2412   : > { %v6085_v38 = vmul.f32 %v9571_v49, %v9571_v49 }
0x2413   : > { %v6086_v41 = vmul.f32 %v9575_v44, %v9575_v44  ;;  %v6097_v42 = vadd.f32 %v6088_v52, %v6087_v25 }
0x2415   : > { %6098 = vadd.xlane.f32.xlu1 %v6097_v42  ;;  %v6051_v23 = vpop.f32.mrf.mxu2  ;;  %v6094_v45 = vadd.f32 %v6086_v41, %v6085_v38 }
0x2416   : > { %v9583_v18 = vadd.f32 %v6051_v23, %v6008_v21  ;;  %v6080_v62 = vpop.f32.mrf.mxu3 }
0x2417   : > { %v9585_v34 = vadd.f32 %v6080_v62, %v6009_v54  ;;  %6095 = vadd.xlane.f32.xlu0 %v6094_v45 }
0x2418   : > { %v6089_v32 = vmul.f32 %v9583_v18, %v9583_v18 }
0x2419   : > { %v6090_v51 = vmul.f32 %v9585_v34, %v9585_v34 }
0x241b   : > { %v6100_v16 = vadd.f32 %v6090_v51, %v6089_v32 }
0x241d   : > { %6101 = vadd.xlane.f32.xlu1 %v6100_v16 }
0x2482   : > { %v6093_v20 = vpop.xlane.xlu0 %6092 }
0x2483   : > { %v6103_v0 = vmax.f32 %v6093_v20, 1e-24 }
0x2485   : > { %7969 = vrsqrt.f32 %v6103_v0  ;;  %vm6113_vm1 = vweird.f32 %v6103_v0 }
0x2488   : > { %v6099_v6 = vpop.xlane.xlu1 %6098 }
0x2489   : > { %v6105_v58 = vmax.f32 %v6099_v6, 1e-24 }
0x248a   : > { %v6096_v14 = vpop.xlane.xlu0 %6095 }
0x248b   : > { %v7970_v59 = vpop.eup %7969  ;;  %7971 = vrsqrt.f32 %v6105_v58  ;;  %v6104_v37 = vmax.f32 %v6096_v14, 1e-24  ;;  %vm6133_vm7 = vweird.f32 %v6105_v58 }
0x248c   : > { %v6108_v33 = vmul.f32 %v7970_v59, %v6103_v0  ;;  %vm6114_vm2 = vweird.f32 %v7970_v59 }
0x248d   : > { %7973 = vrsqrt.f32 %v6104_v37  ;;  %vm6115_vm4 = vmor %vm6113_vm1, %vm6114_vm2  ;;  %vm6123_vm0 = vweird.f32 %v6104_v37 }
0x248e   : > { %v6109_v61 = vmul.f32 %v7970_v59, %v6108_v33 }
0x2490   : > { %v6110_v46 = vmul.f32 0.5, %v6109_v61  ;;  %v6102_v26 = vpop.xlane.xlu1 %6101 }
0x2491   : > { %v7972_v48 = vpop.eup %7971  ;;  %v6106_v1 = vmax.f32 %v6102_v26, 1e-24 }
0x2492   : > { %v6111_v50 = vsub.f32 1.5, %v6110_v46  ;;  %v6128_v40 = vmul.f32 %v7972_v48, %v6105_v58  ;;  %vm6134_vm5 = vweird.f32 %v7972_v48 }
0x2493   : > { %v7974_v4 = vpop.eup %7973  ;;  %7975 = vrsqrt.f32 %v6106_v1  ;;  %vm6135_vm8 = vmor %vm6133_vm7, %vm6134_vm5  ;;  %vm6143_vm11 = vweird.f32 %v6106_v1 }
0x2494   : > { %v6112_v30 = vmul.f32 %v7970_v59, %v6111_v50  ;;  %v6129_v2 = vmul.f32 %v7972_v48, %v6128_v40  ;;  %v6118_v55 = vmul.f32 %v7974_v4, %v6104_v37  ;;  %vm6124_vm12 = vweird.f32 %v7974_v4 }
0x2495   : > { %vm6125_vm9 = vmor %vm6123_vm0, %vm6124_vm12 }
0x2496   : > { %v6116_v8 = vsel %vm6115_vm4, %v7970_v59, %v6112_v30  ;;  %v6130_v7 = vmul.f32 0.5, %v6129_v2  ;;  %v6119_v43 = vmul.f32 %v7974_v4, %v6118_v55 }
0x2497   : > { %v6147_v31 = vmul.f32 %v6116_v8, %v6043_v22  ;;  %v6148_v35 = vmul.f32 %v6116_v8, %v6072_v56 }
0x2498   : > { %v6131_v60 = vsub.f32 1.5, %v6130_v7  ;;  %v6120_v15 = vmul.f32 0.5, %v6119_v43 }
0x2499   : > { %v7976_v53 = vpop.eup %7975  ;;  %6155 = vst [vmem:[#allocation5] sm:$0xff] %v6147_v31 }
0x249a   : > { %6156 = vst [vmem:[#allocation5 + $0x8] sm:$0xff] %v6148_v35  ;;  %v6132_v39 = vmul.f32 %v7972_v48, %v6131_v60  ;;  %v6121_v9 = vsub.f32 1.5, %v6120_v15  ;;  %v6138_v13 = vmul.f32 %v7976_v53, %v6106_v1  ;;  %vm6144_vm10 = vweird.f32 %v7976_v53 }
0x249b   : > { %vm6145_vm3 = vmor %vm6143_vm11, %vm6144_vm10 }
0x249c   : > { %v6136_v10 = vsel %vm6135_vm8, %v7972_v48, %v6132_v39  ;;  %v6122_v11 = vmul.f32 %v7974_v4, %v6121_v9  ;;  %v6139_v24 = vmul.f32 %v7976_v53, %v6138_v13 }
0x249d   : > { %v6151_v12 = vmul.f32 %v6136_v10, %v9567_v28  ;;  %v6152_v21 = vmul.f32 %v6136_v10, %v9569_v47 }
0x249e   : > { %v6126_v54 = vsel %vm6125_vm9, %v7974_v4, %v6122_v11  ;;  %v6140_v5 = vmul.f32 0.5, %v6139_v24 }
0x249f   : > { %6159 = vst [vmem:[#allocation5 + $0x20] sm:$0xff] %v6151_v12  ;;  %v6149_v22 = vmul.f32 %v6126_v54, %v9571_v49  ;;  %v6150_v17 = vmul.f32 %v6126_v54, %v9575_v44 }
0x24a0   : > { %6160 = vst [vmem:[#allocation5 + $0x28] sm:$0xff] %v6152_v21  ;;  %v6141_v56 = vsub.f32 1.5, %v6140_v5 }
0x24a1   : > { %6157 = vst [vmem:[#allocation5 + $0x10] sm:$0xff] %v6149_v22 }
0x24a2   : > { %6158 = vst [vmem:[#allocation5 + $0x18] sm:$0xff] %v6150_v17  ;;  %v6142_v36 = vmul.f32 %v7976_v53, %v6141_v56 }
0x24a4   : > { %v6146_v29 = vsel %vm6145_vm3, %v7976_v53, %v6142_v36 }
0x24a5   : > { %v6153_v63 = vmul.f32 %v6146_v29, %v9583_v18  ;;  %v6154_v57 = vmul.f32 %v6146_v29, %v9585_v34 }
0x24a7   : > { %6161 = vst [vmem:[#allocation5 + $0x30] sm:$0xff] %v6153_v63 }
0x24a8   : > { %6162 = vst [vmem:[#allocation5 + $0x38] sm:$0xff] %v6154_v57 }
0x24a9 PF: > { %s9673_s19 = sld [smem:[#allocation9_spill]]  ;;  %s8020_s27 = smov [#allocation5]  }
0x24aa   : > { %s6168_s24 = sshll.u32 %s8020_s27, 4  ;;  %s9674_s5 = sld [smem:[#allocation25_spill]]  ;;  %s6169_s24 = int_to_ptr.vmem [resolvable:$true] %s6168_s24 }
0x24ab   : > { %s8021_s26 = smov 256   ;;  %s8022_s3 = smov 16  }
0x24af   : > { %p7640_p3 = scmp.eq.s32.totalorder %s9673_s19, 3 }
0x24b0   : > { %s6170_s30 = sshll.u32 %s9674_s5, 4  ;;  %s6171_s30 = int_to_ptr.hbm [resolvable:$true] %s6170_s30 }
0x24b1   : > { %7637 = dma.vmem_to_hbm [thread:$0]  (%p7640_p3), %s6169_s24, 1024, %s6171_s30, [#allocation6], %s8021_s26, %s8021_s26, %s8022_s3  }
0x24b2   : > { %8010 = dma.done.wait (%p7640_p3), [#allocation6], 1024  }
0x24b3   : > { %8012 = vsyncadd (%p7640_p3), [#allocation6], 4294966272 }
0x24b4 PF: > { %s9675_s6 = sld [smem:[#allocation8_spill]] }
0x24ba   : > { %s30_s0 = sadd.s32 1, %s9675_s6  }
0x24bb   : > { %p27_p4 = scmp.ge.s32.totalorder %s30_s0, 6  }
0x24bd   :  { %29 = sbr.rel (!%p27_p4) target bundleno = 17 (0x11), region = 225 }
0x24c2   :  { %6187 = vsyncpa [#allocation6], 1 }
0x24c3   :  { %6189 = vsyncpa [#allocation6 + $0x1], 1 }

</bundles_post_ra>
